<compile_context>
chip_gen: v7x
topology: tpu7x:2x2x1
jax: 0.10.0
libtpu: 0.0.40
codegen_flags: <defaults>
</compile_context>

<pallas_src>
import functools

import jax
import jax.numpy as jnp
from jax.experimental import pallas as pl
from jax.experimental.pallas import tpu as pltpu


# ------------------------------ fused ConvGroup kernel ------------------------------


def _conv_group_kernel(*refs, nb, hh, has_skip, num_rest, eps):
    (x_ref, eadd_ref, p_in_ref, p_out_ref,
     w0_gb_ref, w0_rows_ref, w0_cw1_ref, w0_cw2_ref) = refs[:8]
    k = 8
    w0_skw_ref = None
    if has_skip:
        w0_skw_ref = refs[k]
        k += 1
    if num_rest:
        wr_rows_ref, wr_cw1_ref, wr_cw2_ref = refs[k], refs[k + 1], refs[k + 2]
        k += 3
    o_ref = refs[k]

    f32 = jnp.float32
    bf16 = jnp.bfloat16

    x = x_ref[...].astype(f32)               # (M, W*Cin), M = nb*hh (nb samples stacked)
    m = x.shape[0]
    eadd = eadd_ref[...].astype(f32)          # (nb, num_blocks, W*Cout)

    def row_sum(v):
        # (M, WC) -> (NB, WC): per-sample sum over the H rows (XLU sublane reduce).
        return jnp.sum(v.reshape(nb, hh, v.shape[1]), axis=1)

    def per_row(v):
        # (NB, WC) -> (M, WC): broadcast each sample's row to its H rows.
        return jnp.broadcast_to(v[:, None, :], (nb, hh, v.shape[1])).reshape(m, v.shape[1])

    def gn_silu(h, p_ref, gamma, beta):
        # GroupNorm (per sample, per channel group in the W*C lane layout) + SiLU.
        # p_ref folds the one-hot group reduce, broadcast-back and 1/count; stats in f32.
        mean = per_row(jnp.dot(row_sum(h), p_ref[...], preferred_element_type=f32))
        d = h - mean
        var = per_row(jnp.dot(row_sum(d * d), p_ref[...], preferred_element_type=f32))
        y = d * jax.lax.rsqrt(var + eps) * gamma + beta
        return y * jax.nn.sigmoid(y)

    def conv3x3(h, cw, cb):
        # 3x3 SAME conv as ONE stacked-K bf16 matmul:
        #   [h(y-1) | h(y) | h(y+1)] @ banded W (3*WC_in, WC_out);  x-padding is folded
        # into the band edges, y-padding comes from the per-sample zero rows below.
        wc = h.shape[1]
        h3 = h.reshape(nb, hh, wc)
        z = jnp.zeros((nb, 1, wc), f32)
        dn = jnp.concatenate([z, h3[:, :hh - 1, :]], axis=1).reshape(m, wc)   # h[y-1]
        up = jnp.concatenate([h3[:, 1:, :], z], axis=1).reshape(m, wc)        # h[y+1]
        hs = jnp.concatenate([dn, h, up], axis=1).astype(bf16)                # (M, 3*WC)
        return jnp.dot(hs, cw, preferred_element_type=f32) + cb

    def emb_add(b):
        # emb projection was computed outside the kernel; just broadcast to rows.
        return per_row(eadd[:, b, :])

    # -------------------- block 0: Cin -> Cout, optional 1x1-conv skip --------------------
    w0_gb = w0_gb_ref[...]
    w0_rows = w0_rows_ref[...]
    g1, b1 = w0_gb[0:1, :], w0_gb[1:2, :]
    cb1, g2, b2, cb2 = (w0_rows[0:1, :], w0_rows[1:2, :],
                        w0_rows[2:3, :], w0_rows[3:4, :])

    h = conv3x3(gn_silu(x, p_in_ref, g1, b1), w0_cw1_ref[...], cb1) + emb_add(0)
    # TODO(synk): dropout (p=0.02) treated as identity (eval-mode semantics); the
    #             use_scale_shift_norm=True and in-block attention variants of the
    #             (unprovided) ConvBlock are not implemented.
    h = conv3x3(gn_silu(h, p_out_ref, g2, b2), w0_cw2_ref[...], cb2)
    if has_skip:
        skip = jnp.dot(x.astype(bf16), w0_skw_ref[...],
                       preferred_element_type=f32) + w0_rows[4:5, :]
    else:
        skip = x
    h = skip + h

    # -------------- blocks 1..B-1: Cout -> Cout, identity skip (static unroll) --------------
    for j in range(num_rest):
        rows = wr_rows_ref[j]                                    # (6, W*Cout)
        rg1, rb1, rcb1 = rows[0:1, :], rows[1:2, :], rows[2:3, :]
        rg2, rb2, rcb2 = rows[3:4, :], rows[4:5, :], rows[5:6, :]
        t = conv3x3(gn_silu(h, p_out_ref, rg1, rb1), wr_cw1_ref[j], rcb1) + emb_add(j + 1)
        t = conv3x3(gn_silu(t, p_out_ref, rg2, rb2), wr_cw2_ref[j], rcb2)
        h = h + t

    o_ref[...] = h.astype(o_ref.dtype)


# ------------------------- weight packing (runs ONCE at init) -------------------------


def _banded_conv_weights(w9, w, cin, cout):
    # (9, cin, cout) taps -> (3*W*Cin, W*Cout); B[dy*W*Cin + (x+dx-1)*cin+ci, x*cout+co]
    # = w[dy,dx,ci,co], zero x-padding folded into the band edges.
    mats = []
    for dy in range(3):
        b = jnp.zeros((w * cin, w * cout), jnp.float32)
        for dx in range(3):
            shift = jnp.eye(w, w, k=1 - dx, dtype=jnp.float32)
            b = b + jnp.kron(shift, w9[dy * 3 + dx].astype(jnp.float32))
        mats.append(b)
    return jnp.concatenate(mats, axis=0)


def _group_projector(w, c, g, h):
    # (W*C, W*C) f32: one-hot group reduce + broadcast-back + 1/count for GN stats.
    grp = (jnp.arange(w * c) % c) // (c // g)
    same = (grp[:, None] == grp[None, :]).astype(jnp.float32)
    return same / float(h * w * (c // g))


def _tile_lanes(v, w):
    return jnp.tile(v.astype(jnp.float32), w).reshape(1, w * v.shape[0])


def pack_conv_group(blocks, hh, ww):
    """Pack per-block weights into kernel-layout arrays. Call once; reuse every forward."""
    p0 = blocks[0]
    cin, cout = p0["in_conv_w"].shape[1], p0["in_conv_w"].shape[2]
    g = p0["groups"]
    bf16 = jnp.bfloat16
    has_skip = p0["skip_w"] is not None

    skb = (_tile_lanes(p0["skip_b"], ww) if has_skip
           else jnp.zeros((1, ww * cout), jnp.float32))
    weights = {
        "p_in": _group_projector(ww, cin, g, hh),
        "p_out": _group_projector(ww, cout, g, hh),
        "w0_gb_in": jnp.concatenate([_tile_lanes(p0["in_norm_g"], ww),
                                     _tile_lanes(p0["in_norm_b"], ww)], axis=0),
        "w0_rows_out": jnp.concatenate([_tile_lanes(p0["in_conv_b"], ww),
                                        _tile_lanes(p0["out_norm_g"], ww),
                                        _tile_lanes(p0["out_norm_b"], ww),
                                        _tile_lanes(p0["out_conv_b"], ww),
                                        skb], axis=0),
        "w0_cw1": _banded_conv_weights(p0["in_conv_w"], ww, cin, cout).astype(bf16),
        "w0_cw2": _banded_conv_weights(p0["out_conv_w"], ww, cout, cout).astype(bf16),
        "emb_w": jnp.stack([b["emb_w"].astype(jnp.float32) for b in blocks]),
        "emb_b": jnp.stack([b["emb_b"].astype(jnp.float32) for b in blocks]),
    }
    if has_skip:
        weights["w0_skw"] = jnp.kron(jnp.eye(ww, dtype=jnp.float32),
                                     p0["skip_w"].astype(jnp.float32)).astype(bf16)
    rest = blocks[1:]
    if rest:
        weights["wr_rows"] = jnp.stack(
            [jnp.concatenate([_tile_lanes(b["in_norm_g"], ww),
                              _tile_lanes(b["in_norm_b"], ww),
                              _tile_lanes(b["in_conv_b"], ww),
                              _tile_lanes(b["out_norm_g"], ww),
                              _tile_lanes(b["out_norm_b"], ww),
                              _tile_lanes(b["out_conv_b"], ww)], axis=0) for b in rest])
        weights["wr_cw1"] = jnp.stack(
            [_banded_conv_weights(b["in_conv_w"], ww, cout, cout) for b in rest]).astype(bf16)
        weights["wr_cw2"] = jnp.stack(
            [_banded_conv_weights(b["out_conv_w"], ww, cout, cout) for b in rest]).astype(bf16)
    return weights


# ------------------------------- forward (jit this) -------------------------------


def _const_spec(a):
    nd = a.ndim
    return pl.BlockSpec(a.shape, lambda i, _nd=nd: (0,) * _nd)


def conv_group_forward(weights, x_nchw, emb):
    """Fused ConvGroup forward.  x: (N, Cin, H, W) NCHW, emb: (N, E)."""
    n, cin, hh, ww = x_nchw.shape
    wcin = ww * cin
    wcout = weights["w0_rows_out"].shape[1]
    cout = wcout // ww
    num_blocks = weights["emb_w"].shape[0]
    num_rest = num_blocks - 1
    has_skip = "w0_skw" in weights

    # Batch-block so the conv matmuls see M = nb*H ~ 128 rows; for large batches the
    # grid (N/nb) stays >= 2 so megacore (v7x) can still split it.
    nb = max(1, min(n, max(1, 128 // hh)))
    while n % nb:
        nb -= 1
    m = nb * hh
    assert m % 8 == 0 and wcin % 128 == 0 and wcout % 128 == 0, (
        "lane-dense layout needs NB*H % 8 == 0 and W*C % 128 == 0")

    x2d = jnp.transpose(x_nchw, (0, 2, 3, 1)).reshape(n * hh, wcin)

    # emb_layers (SiLU + Linear) for ALL blocks as one batched matmul outside the kernel,
    # pre-tiled to the (W*Cout) lane layout.
    se = x_emb = emb.astype(jnp.float32)
    se = x_emb * jax.nn.sigmoid(x_emb)
    eadd = jnp.einsum("ne,bec->nbc", se, weights["emb_w"]) + weights["emb_b"][None]
    eadd = jnp.tile(eadd, (1, 1, ww))                                  # (N, B, W*Cout)

    inputs = [x2d, eadd, weights["p_in"], weights["p_out"],
              weights["w0_gb_in"], weights["w0_rows_out"],
              weights["w0_cw1"], weights["w0_cw2"]]
    in_specs = [pl.BlockSpec((m, wcin), lambda i: (i, 0)),
                pl.BlockSpec((nb, num_blocks, wcout), lambda i: (i, 0, 0))]
    in_specs += [_const_spec(a) for a in inputs[2:]]
    if has_skip:
        inputs.append(weights["w0_skw"])
        in_specs.append(_const_spec(weights["w0_skw"]))
    if num_rest:
        for name in ("wr_rows", "wr_cw1", "wr_cw2"):
            inputs.append(weights[name])
            in_specs.append(_const_spec(weights[name]))

    kernel = functools.partial(_conv_group_kernel, nb=nb, hh=hh,
                               has_skip=has_skip, num_rest=num_rest, eps=1e-5)
    out2d = pl.pallas_call(
        kernel,
        out_shape=jax.ShapeDtypeStruct((n * hh, wcout), x_nchw.dtype),
        grid=(n // nb,),
        in_specs=in_specs,
        out_specs=pl.BlockSpec((m, wcout), lambda i: (i, 0)),
        compiler_params=pltpu.CompilerParams(
            dimension_semantics=("parallel",),
            vmem_limit_bytes=64 * 1024 * 1024),
    )(*inputs)
    return jnp.transpose(out2d.reshape(n, hh, ww, cout), (0, 3, 1, 2))


# ------------------------------------ init ------------------------------------


def init_conv_block(key, cin, cout, emb_ch, groups):
    ks = jax.random.split(key, 8)
    return {
        "groups": groups,
        "in_norm_g": jnp.ones((cin,), jnp.float32),
        "in_norm_b": jnp.zeros((cin,), jnp.float32),
        "in_conv_w": 0.1 * jax.random.normal(ks[0], (9, cin, cout), jnp.float32),
        "in_conv_b": 0.05 * jax.random.normal(ks[1], (cout,), jnp.float32),
        "emb_w": 0.1 * jax.random.normal(ks[2], (emb_ch, cout), jnp.float32),
        "emb_b": 0.05 * jax.random.normal(ks[3], (cout,), jnp.float32),
        "out_norm_g": jnp.ones((cout,), jnp.float32),
        "out_norm_b": jnp.zeros((cout,), jnp.float32),
        "out_conv_w": 0.1 * jax.random.normal(ks[4], (9, cout, cout), jnp.float32),
        "out_conv_b": 0.05 * jax.random.normal(ks[5], (cout,), jnp.float32),
        "skip_w": (0.1 * jax.random.normal(ks[6], (cin, cout), jnp.float32)) if cin != cout else None,
        "skip_b": (0.05 * jax.random.normal(ks[7], (cout,), jnp.float32)) if cin != cout else None,
    }


def init_conv_group(key, in_ch, out_ch, emb_ch, num_res_blocks=3, groupnorm=32):
    keys = jax.random.split(key, num_res_blocks)
    blocks = [init_conv_block(keys[0], in_ch, out_ch, emb_ch, groupnorm)]
    for i in range(1, num_res_blocks):
        blocks.append(init_conv_block(keys[i], out_ch, out_ch, emb_ch, groupnorm))
    return blocks


# ------------------------------- pure-JAX reference -------------------------------


def _silu(x):
    return x * jax.nn.sigmoid(x)


def _gn_ref(x, gamma, beta, groups, eps=1e-5):
    n, h, w, c = x.shape
    xg = x.reshape(n, h, w, groups, c // groups)
    mean = xg.mean(axis=(1, 2, 4), keepdims=True)
    var = xg.var(axis=(1, 2, 4), keepdims=True)
    xn = ((xg - mean) / jnp.sqrt(var + eps)).reshape(n, h, w, c)
    return xn * gamma + beta


def _conv3x3_ref(x, w9, b):
    cin, cout = w9.shape[1], w9.shape[2]
    wk = w9.reshape(3, 3, cin, cout)
    y = jax.lax.conv_general_dilated(
        x, wk, (1, 1), "SAME", dimension_numbers=("NHWC", "HWIO", "NHWC"),
        precision=jax.lax.Precision.HIGHEST)
    return y + b


def _block_ref(p, x, emb):
    h = _conv3x3_ref(_silu(_gn_ref(x, p["in_norm_g"], p["in_norm_b"], p["groups"])),
                     p["in_conv_w"], p["in_conv_b"])
    e = _silu(emb) @ p["emb_w"] + p["emb_b"]
    h = h + e[:, None, None, :]
    h = _conv3x3_ref(_silu(_gn_ref(h, p["out_norm_g"], p["out_norm_b"], p["groups"])),
                     p["out_conv_w"], p["out_conv_b"])
    skip = x if p["skip_w"] is None else (x @ p["skip_w"] + p["skip_b"])
    return skip + h


def _group_ref(blocks, x_nchw, emb):
    x = jnp.transpose(x_nchw, (0, 2, 3, 1))
    for p in blocks:
        x = _block_ref(p, x, emb)
    return jnp.transpose(x, (0, 3, 1, 2))


# ------------------------------------- main -------------------------------------

if __name__ == "__main__":
    key = jax.random.PRNGKey(0)
    kx, ke, kp = jax.random.split(key, 3)

    N, Cin, Cout, E, H, W = 2, 8, 16, 32, 16, 16
    groups = 8  # groupnorm: must divide both Cin and Cout at these small sizes

    x = jax.random.normal(kx, (N, Cin, H, W), jnp.float32)     # NCHW like the PyTorch module
    emb = jax.random.normal(ke, (N, E), jnp.float32)

    blocks = init_conv_group(kp, Cin, Cout, E, num_res_blocks=3, groupnorm=groups)
    weights = pack_conv_group(blocks, H, W)                    # one-time pack (not per call)

    fwd = jax.jit(conv_group_forward)
    out = jax.block_until_ready(fwd(weights, x, emb))

    assert out.shape == (N, Cout, H, W), out.shape
    ref = _group_ref(blocks, x, emb)
    err = float(jnp.max(jnp.abs(out - ref)))
    scale = float(jnp.max(jnp.abs(ref)))
    # bf16 MXU operands (f32 accumulate / f32 GN stats) -> allow a small relative slack.
    assert err <= 0.05 * scale + 1e-3, f"max abs err {err} (scale {scale})"

    print("KERNEL_OK")
</pallas_src>

<mosaic_0001>
module attributes {stable_mosaic.version = 11 : i64} {
  func.func @_conv_group_kernel(%arg0: i32, %arg1: memref<32x128xf32, #tpu.memory_space<vmem>>, %arg2: memref<2x3x256xf32, #tpu.memory_space<vmem>>, %arg3: memref<128x128xf32, #tpu.memory_space<vmem>>, %arg4: memref<256x256xf32, #tpu.memory_space<vmem>>, %arg5: memref<2x128xf32, #tpu.memory_space<vmem>>, %arg6: memref<5x256xf32, #tpu.memory_space<vmem>>, %arg7: memref<384x256xbf16, #tpu.memory_space<vmem>>, %arg8: memref<768x256xbf16, #tpu.memory_space<vmem>>, %arg9: memref<128x256xbf16, #tpu.memory_space<vmem>>, %arg10: memref<2x6x256xf32, #tpu.memory_space<vmem>>, %arg11: memref<2x768x256xbf16, #tpu.memory_space<vmem>>, %arg12: memref<2x768x256xbf16, #tpu.memory_space<vmem>>, %arg13: memref<32x256xf32, #tpu.memory_space<vmem>>) attributes {dimension_semantics = [#tpu.dimension_semantics<parallel>], iteration_bounds = array<i64: 1>, scalar_prefetch = 0 : i64, scratch_operands = 0 : i64, tpu.core_type = #tpu.core_type<tc>, window_params = [{transform_indices = @transform_0, window_bounds = array<i64: 32, 128>}, {transform_indices = @transform_1, window_bounds = array<i64: 2, 3, 256>}, {pipeline_mode = #tpu.pipeline_mode<synchronous>, transform_indices = @transform_2, window_bounds = array<i64: 128, 128>}, {pipeline_mode = #tpu.pipeline_mode<synchronous>, transform_indices = @transform_3, window_bounds = array<i64: 256, 256>}, {pipeline_mode = #tpu.pipeline_mode<synchronous>, transform_indices = @transform_4, window_bounds = array<i64: 2, 128>}, {pipeline_mode = #tpu.pipeline_mode<synchronous>, transform_indices = @transform_5, window_bounds = array<i64: 5, 256>}, {pipeline_mode = #tpu.pipeline_mode<synchronous>, transform_indices = @transform_6, window_bounds = array<i64: 384, 256>}, {pipeline_mode = #tpu.pipeline_mode<synchronous>, transform_indices = @transform_7, window_bounds = array<i64: 768, 256>}, {pipeline_mode = #tpu.pipeline_mode<synchronous>, transform_indices = @transform_8, window_bounds = array<i64: 128, 256>}, {pipeline_mode = #tpu.pipeline_mode<synchronous>, transform_indices = @transform_9, window_bounds = array<i64: 2, 6, 256>}, {pipeline_mode = #tpu.pipeline_mode<synchronous>, transform_indices = @transform_10, window_bounds = array<i64: 2, 768, 256>}, {pipeline_mode = #tpu.pipeline_mode<synchronous>, transform_indices = @transform_11, window_bounds = array<i64: 2, 768, 256>}, {transform_indices = @transform_12, window_bounds = array<i64: 32, 256>}]} {
    %c0 = arith.constant 0 : index
    %c0_0 = arith.constant 0 : index
    %0 = vector.load %arg1[%c0, %c0_0] : memref<32x128xf32, #tpu.memory_space<vmem>>, vector<32x128xf32>
    %c0_1 = arith.constant 0 : index
    %c0_2 = arith.constant 0 : index
    %c0_3 = arith.constant 0 : index
    %1 = vector.load %arg2[%c0_1, %c0_2, %c0_3] : memref<2x3x256xf32, #tpu.memory_space<vmem>>, vector<2x3x256xf32>
    %c0_4 = arith.constant 0 : index
    %c0_5 = arith.constant 0 : index
    %2 = vector.load %arg5[%c0_4, %c0_5] : memref<2x128xf32, #tpu.memory_space<vmem>>, vector<2x128xf32>
    %c0_6 = arith.constant 0 : index
    %c0_7 = arith.constant 0 : index
    %3 = vector.load %arg6[%c0_6, %c0_7] : memref<5x256xf32, #tpu.memory_space<vmem>>, vector<5x256xf32>
    %4 = vector.extract_strided_slice %2 {offsets = [0, 0], sizes = [1, 128], strides = [1, 1]} : vector<2x128xf32> to vector<1x128xf32>
    %5 = vector.extract_strided_slice %2 {offsets = [1, 0], sizes = [1, 128], strides = [1, 1]} : vector<2x128xf32> to vector<1x128xf32>
    %6 = vector.extract_strided_slice %3 {offsets = [0, 0], sizes = [1, 256], strides = [1, 1]} : vector<5x256xf32> to vector<1x256xf32>
    %7 = vector.extract_strided_slice %3 {offsets = [1, 0], sizes = [1, 256], strides = [1, 1]} : vector<5x256xf32> to vector<1x256xf32>
    %8 = vector.extract_strided_slice %3 {offsets = [2, 0], sizes = [1, 256], strides = [1, 1]} : vector<5x256xf32> to vector<1x256xf32>
    %9 = vector.extract_strided_slice %3 {offsets = [3, 0], sizes = [1, 256], strides = [1, 1]} : vector<5x256xf32> to vector<1x256xf32>
    %10 = vector.shape_cast %0 : vector<32x128xf32> to vector<2x16x128xf32>
    %cst = arith.constant dense<0.000000e+00> : vector<2x128xf32>
    %11 = vector.multi_reduction <add>, %10, %cst [1] : vector<2x16x128xf32> to vector<2x128xf32>
    %c0_8 = arith.constant 0 : index
    %c0_9 = arith.constant 0 : index
    %12 = vector.load %arg3[%c0_8, %c0_9] : memref<128x128xf32, #tpu.memory_space<vmem>>, vector<128x128xf32>
    %cst_10 = arith.constant dense<0.000000e+00> : vector<2x128xf32>
    %13 = tpu.matmul %11, %12, %cst_10 {dimension_numbers = #tpu.dot_dimension_numbers<[1], [0], [0], [1], [0, 0, 1, 1], [], []>} : vector<2x128xf32>, vector<128x128xf32>, vector<2x128xf32> -> vector<2x128xf32>
    %14 = vector.shape_cast %13 : vector<2x128xf32> to vector<2x1x128xf32>
    %15 = vector.shape_cast %14 : vector<2x1x128xf32> to vector<2x1x128xf32>
    %16 = vector.broadcast %15 : vector<2x1x128xf32> to vector<2x16x128xf32>
    %17 = vector.shape_cast %16 : vector<2x16x128xf32> to vector<32x128xf32>
    %18 = arith.subf %0, %17 : vector<32x128xf32>
    %19 = arith.mulf %18, %18 : vector<32x128xf32>
    %20 = vector.shape_cast %19 : vector<32x128xf32> to vector<2x16x128xf32>
    %cst_11 = arith.constant dense<0.000000e+00> : vector<2x128xf32>
    %21 = vector.multi_reduction <add>, %20, %cst_11 [1] : vector<2x16x128xf32> to vector<2x128xf32>
    %c0_12 = arith.constant 0 : index
    %c0_13 = arith.constant 0 : index
    %22 = vector.load %arg3[%c0_12, %c0_13] : memref<128x128xf32, #tpu.memory_space<vmem>>, vector<128x128xf32>
    %cst_14 = arith.constant dense<0.000000e+00> : vector<2x128xf32>
    %23 = tpu.matmul %21, %22, %cst_14 {dimension_numbers = #tpu.dot_dimension_numbers<[1], [0], [0], [1], [0, 0, 1, 1], [], []>} : vector<2x128xf32>, vector<128x128xf32>, vector<2x128xf32> -> vector<2x128xf32>
    %24 = vector.shape_cast %23 : vector<2x128xf32> to vector<2x1x128xf32>
    %25 = vector.shape_cast %24 : vector<2x1x128xf32> to vector<2x1x128xf32>
    %26 = vector.broadcast %25 : vector<2x1x128xf32> to vector<2x16x128xf32>
    %27 = vector.shape_cast %26 : vector<2x16x128xf32> to vector<32x128xf32>
    %cst_15 = arith.constant 9.99999974E-6 : f32
    %28 = vector.broadcast %cst_15 : f32 to vector<32x128xf32>
    %29 = arith.addf %27, %28 : vector<32x128xf32>
    %30 = math.rsqrt %29 : vector<32x128xf32>
    %31 = arith.mulf %18, %30 : vector<32x128xf32>
    %32 = vector.broadcast %4 : vector<1x128xf32> to vector<32x128xf32>
    %33 = arith.mulf %31, %32 : vector<32x128xf32>
    %34 = vector.broadcast %5 : vector<1x128xf32> to vector<32x128xf32>
    %35 = arith.addf %33, %34 : vector<32x128xf32>
    %36 = arith.negf %35 : vector<32x128xf32>
    %37 = math.exp %36 : vector<32x128xf32>
    %cst_16 = arith.constant 1.000000e+00 : f32
    %38 = vector.broadcast %cst_16 : f32 to vector<32x128xf32>
    %39 = arith.addf %38, %37 : vector<32x128xf32>
    %40 = arith.divf %38, %39 : vector<32x128xf32>
    %41 = arith.mulf %35, %40 : vector<32x128xf32>
    %c0_17 = arith.constant 0 : index
    %c0_18 = arith.constant 0 : index
    %42 = vector.load %arg7[%c0_17, %c0_18] : memref<384x256xbf16, #tpu.memory_space<vmem>>, vector<384x256xbf16>
    %43 = vector.shape_cast %41 : vector<32x128xf32> to vector<2x16x128xf32>
    %cst_19 = arith.constant 0.000000e+00 : f32
    %44 = vector.broadcast %cst_19 : f32 to vector<2x1x128xf32>
    %45 = vector.extract_strided_slice %43 {offsets = [0, 0, 0], sizes = [2, 15, 128], strides = [1, 1, 1]} : vector<2x16x128xf32> to vector<2x15x128xf32>
    %46 = tpu.concatenate %44, %45 in 1 : vector<2x1x128xf32>, vector<2x15x128xf32> -> vector<2x16x128xf32>
    %47 = vector.shape_cast %46 : vector<2x16x128xf32> to vector<32x128xf32>
    %48 = vector.extract_strided_slice %43 {offsets = [0, 1, 0], sizes = [2, 15, 128], strides = [1, 1, 1]} : vector<2x16x128xf32> to vector<2x15x128xf32>
    %49 = tpu.concatenate %48, %44 in 1 : vector<2x15x128xf32>, vector<2x1x128xf32> -> vector<2x16x128xf32>
    %50 = vector.shape_cast %49 : vector<2x16x128xf32> to vector<32x128xf32>
    %51 = tpu.concatenate %47, %41, %50 in 1 : vector<32x128xf32>, vector<32x128xf32>, vector<32x128xf32> -> vector<32x384xf32>
    %52 = arith.truncf %51 : vector<32x384xf32> to vector<32x384xbf16>
    %cst_20 = arith.constant dense<0.000000e+00> : vector<32x256xf32>
    %53 = tpu.matmul %52, %42, %cst_20 {dimension_numbers = #tpu.dot_dimension_numbers<[1], [0], [0], [1], [0, 0, 1, 1], [], []>} : vector<32x384xbf16>, vector<384x256xbf16>, vector<32x256xf32> -> vector<32x256xf32>
    %54 = vector.broadcast %6 : vector<1x256xf32> to vector<32x256xf32>
    %55 = arith.addf %53, %54 : vector<32x256xf32>
    %56 = vector.extract_strided_slice %1 {offsets = [0, 0, 0], sizes = [2, 1, 256], strides = [1, 1, 1]} : vector<2x3x256xf32> to vector<2x1x256xf32>
    %57 = vector.shape_cast %56 : vector<2x1x256xf32> to vector<2x256xf32>
    %58 = vector.shape_cast %57 : vector<2x256xf32> to vector<2x1x256xf32>
    %59 = vector.shape_cast %58 : vector<2x1x256xf32> to vector<2x1x256xf32>
    %60 = vector.broadcast %59 : vector<2x1x256xf32> to vector<2x16x256xf32>
    %61 = vector.shape_cast %60 : vector<2x16x256xf32> to vector<32x256xf32>
    %62 = arith.addf %55, %61 : vector<32x256xf32>
    %63 = vector.shape_cast %62 : vector<32x256xf32> to vector<2x16x256xf32>
    %cst_21 = arith.constant dense<0.000000e+00> : vector<2x256xf32>
    %64 = vector.multi_reduction <add>, %63, %cst_21 [1] : vector<2x16x256xf32> to vector<2x256xf32>
    %c0_22 = arith.constant 0 : index
    %c0_23 = arith.constant 0 : index
    %65 = vector.load %arg4[%c0_22, %c0_23] : memref<256x256xf32, #tpu.memory_space<vmem>>, vector<256x256xf32>
    %cst_24 = arith.constant dense<0.000000e+00> : vector<2x256xf32>
    %66 = tpu.matmul %64, %65, %cst_24 {dimension_numbers = #tpu.dot_dimension_numbers<[1], [0], [0], [1], [0, 0, 1, 1], [], []>} : vector<2x256xf32>, vector<256x256xf32>, vector<2x256xf32> -> vector<2x256xf32>
    %67 = vector.shape_cast %66 : vector<2x256xf32> to vector<2x1x256xf32>
    %68 = vector.shape_cast %67 : vector<2x1x256xf32> to vector<2x1x256xf32>
    %69 = vector.broadcast %68 : vector<2x1x256xf32> to vector<2x16x256xf32>
    %70 = vector.shape_cast %69 : vector<2x16x256xf32> to vector<32x256xf32>
    %71 = arith.subf %62, %70 : vector<32x256xf32>
    %72 = arith.mulf %71, %71 : vector<32x256xf32>
    %73 = vector.shape_cast %72 : vector<32x256xf32> to vector<2x16x256xf32>
    %cst_25 = arith.constant dense<0.000000e+00> : vector<2x256xf32>
    %74 = vector.multi_reduction <add>, %73, %cst_25 [1] : vector<2x16x256xf32> to vector<2x256xf32>
    %c0_26 = arith.constant 0 : index
    %c0_27 = arith.constant 0 : index
    %75 = vector.load %arg4[%c0_26, %c0_27] : memref<256x256xf32, #tpu.memory_space<vmem>>, vector<256x256xf32>
    %cst_28 = arith.constant dense<0.000000e+00> : vector<2x256xf32>
    %76 = tpu.matmul %74, %75, %cst_28 {dimension_numbers = #tpu.dot_dimension_numbers<[1], [0], [0], [1], [0, 0, 1, 1], [], []>} : vector<2x256xf32>, vector<256x256xf32>, vector<2x256xf32> -> vector<2x256xf32>
    %77 = vector.shape_cast %76 : vector<2x256xf32> to vector<2x1x256xf32>
    %78 = vector.shape_cast %77 : vector<2x1x256xf32> to vector<2x1x256xf32>
    %79 = vector.broadcast %78 : vector<2x1x256xf32> to vector<2x16x256xf32>
    %80 = vector.shape_cast %79 : vector<2x16x256xf32> to vector<32x256xf32>
    %cst_29 = arith.constant 9.99999974E-6 : f32
    %81 = vector.broadcast %cst_29 : f32 to vector<32x256xf32>
    %82 = arith.addf %80, %81 : vector<32x256xf32>
    %83 = math.rsqrt %82 : vector<32x256xf32>
    %84 = arith.mulf %71, %83 : vector<32x256xf32>
    %85 = vector.broadcast %7 : vector<1x256xf32> to vector<32x256xf32>
    %86 = arith.mulf %84, %85 : vector<32x256xf32>
    %87 = vector.broadcast %8 : vector<1x256xf32> to vector<32x256xf32>
    %88 = arith.addf %86, %87 : vector<32x256xf32>
    %89 = arith.negf %88 : vector<32x256xf32>
    %90 = math.exp %89 : vector<32x256xf32>
    %cst_30 = arith.constant 1.000000e+00 : f32
    %91 = vector.broadcast %cst_30 : f32 to vector<32x256xf32>
    %92 = arith.addf %91, %90 : vector<32x256xf32>
    %93 = arith.divf %91, %92 : vector<32x256xf32>
    %94 = arith.mulf %88, %93 : vector<32x256xf32>
    %c0_31 = arith.constant 0 : index
    %c0_32 = arith.constant 0 : index
    %95 = vector.load %arg8[%c0_31, %c0_32] : memref<768x256xbf16, #tpu.memory_space<vmem>>, vector<768x256xbf16>
    %96 = vector.shape_cast %94 : vector<32x256xf32> to vector<2x16x256xf32>
    %cst_33 = arith.constant 0.000000e+00 : f32
    %97 = vector.broadcast %cst_33 : f32 to vector<2x1x256xf32>
    %98 = vector.extract_strided_slice %96 {offsets = [0, 0, 0], sizes = [2, 15, 256], strides = [1, 1, 1]} : vector<2x16x256xf32> to vector<2x15x256xf32>
    %99 = tpu.concatenate %97, %98 in 1 : vector<2x1x256xf32>, vector<2x15x256xf32> -> vector<2x16x256xf32>
    %100 = vector.shape_cast %99 : vector<2x16x256xf32> to vector<32x256xf32>
    %101 = vector.extract_strided_slice %96 {offsets = [0, 1, 0], sizes = [2, 15, 256], strides = [1, 1, 1]} : vector<2x16x256xf32> to vector<2x15x256xf32>
    %102 = tpu.concatenate %101, %97 in 1 : vector<2x15x256xf32>, vector<2x1x256xf32> -> vector<2x16x256xf32>
    %103 = vector.shape_cast %102 : vector<2x16x256xf32> to vector<32x256xf32>
    %104 = tpu.concatenate %100, %94, %103 in 1 : vector<32x256xf32>, vector<32x256xf32>, vector<32x256xf32> -> vector<32x768xf32>
    %105 = arith.truncf %104 : vector<32x768xf32> to vector<32x768xbf16>
    %cst_34 = arith.constant dense<0.000000e+00> : vector<32x256xf32>
    %106 = tpu.matmul %105, %95, %cst_34 {dimension_numbers = #tpu.dot_dimension_numbers<[1], [0], [0], [1], [0, 0, 1, 1], [], []>} : vector<32x768xbf16>, vector<768x256xbf16>, vector<32x256xf32> -> vector<32x256xf32>
    %107 = vector.broadcast %9 : vector<1x256xf32> to vector<32x256xf32>
    %108 = arith.addf %106, %107 : vector<32x256xf32>
    %109 = arith.truncf %0 : vector<32x128xf32> to vector<32x128xbf16>
    %c0_35 = arith.constant 0 : index
    %c0_36 = arith.constant 0 : index
    %110 = vector.load %arg9[%c0_35, %c0_36] : memref<128x256xbf16, #tpu.memory_space<vmem>>, vector<128x256xbf16>
    %cst_37 = arith.constant dense<0.000000e+00> : vector<32x256xf32>
    %111 = tpu.matmul %109, %110, %cst_37 {dimension_numbers = #tpu.dot_dimension_numbers<[1], [0], [0], [1], [0, 0, 1, 1], [], []>} : vector<32x128xbf16>, vector<128x256xbf16>, vector<32x256xf32> -> vector<32x256xf32>
    %112 = vector.extract_strided_slice %3 {offsets = [4, 0], sizes = [1, 256], strides = [1, 1]} : vector<5x256xf32> to vector<1x256xf32>
    %113 = vector.broadcast %112 : vector<1x256xf32> to vector<32x256xf32>
    %114 = arith.addf %111, %113 : vector<32x256xf32>
    %115 = arith.addf %114, %108 : vector<32x256xf32>
    %c0_38 = arith.constant 0 : index
    %c0_39 = arith.constant 0 : index
    %c0_40 = arith.constant 0 : index
    %116 = vector.load %arg10[%c0_38, %c0_39, %c0_40] : memref<2x6x256xf32, #tpu.memory_space<vmem>>, vector<1x6x256xf32>
    %117 = vector.shape_cast %116 : vector<1x6x256xf32> to vector<6x256xf32>
    %118 = vector.extract_strided_slice %117 {offsets = [0, 0], sizes = [1, 256], strides = [1, 1]} : vector<6x256xf32> to vector<1x256xf32>
    %119 = vector.extract_strided_slice %117 {offsets = [1, 0], sizes = [1, 256], strides = [1, 1]} : vector<6x256xf32> to vector<1x256xf32>
    %120 = vector.extract_strided_slice %117 {offsets = [2, 0], sizes = [1, 256], strides = [1, 1]} : vector<6x256xf32> to vector<1x256xf32>
    %121 = vector.extract_strided_slice %117 {offsets = [3, 0], sizes = [1, 256], strides = [1, 1]} : vector<6x256xf32> to vector<1x256xf32>
    %122 = vector.extract_strided_slice %117 {offsets = [4, 0], sizes = [1, 256], strides = [1, 1]} : vector<6x256xf32> to vector<1x256xf32>
    %123 = vector.extract_strided_slice %117 {offsets = [5, 0], sizes = [1, 256], strides = [1, 1]} : vector<6x256xf32> to vector<1x256xf32>
    %124 = vector.shape_cast %115 : vector<32x256xf32> to vector<2x16x256xf32>
    %cst_41 = arith.constant dense<0.000000e+00> : vector<2x256xf32>
    %125 = vector.multi_reduction <add>, %124, %cst_41 [1] : vector<2x16x256xf32> to vector<2x256xf32>
    %c0_42 = arith.constant 0 : index
    %c0_43 = arith.constant 0 : index
    %126 = vector.load %arg4[%c0_42, %c0_43] : memref<256x256xf32, #tpu.memory_space<vmem>>, vector<256x256xf32>
    %cst_44 = arith.constant dense<0.000000e+00> : vector<2x256xf32>
    %127 = tpu.matmul %125, %126, %cst_44 {dimension_numbers = #tpu.dot_dimension_numbers<[1], [0], [0], [1], [0, 0, 1, 1], [], []>} : vector<2x256xf32>, vector<256x256xf32>, vector<2x256xf32> -> vector<2x256xf32>
    %128 = vector.shape_cast %127 : vector<2x256xf32> to vector<2x1x256xf32>
    %129 = vector.shape_cast %128 : vector<2x1x256xf32> to vector<2x1x256xf32>
    %130 = vector.broadcast %129 : vector<2x1x256xf32> to vector<2x16x256xf32>
    %131 = vector.shape_cast %130 : vector<2x16x256xf32> to vector<32x256xf32>
    %132 = arith.subf %115, %131 : vector<32x256xf32>
    %133 = arith.mulf %132, %132 : vector<32x256xf32>
    %134 = vector.shape_cast %133 : vector<32x256xf32> to vector<2x16x256xf32>
    %cst_45 = arith.constant dense<0.000000e+00> : vector<2x256xf32>
    %135 = vector.multi_reduction <add>, %134, %cst_45 [1] : vector<2x16x256xf32> to vector<2x256xf32>
    %c0_46 = arith.constant 0 : index
    %c0_47 = arith.constant 0 : index
    %136 = vector.load %arg4[%c0_46, %c0_47] : memref<256x256xf32, #tpu.memory_space<vmem>>, vector<256x256xf32>
    %cst_48 = arith.constant dense<0.000000e+00> : vector<2x256xf32>
    %137 = tpu.matmul %135, %136, %cst_48 {dimension_numbers = #tpu.dot_dimension_numbers<[1], [0], [0], [1], [0, 0, 1, 1], [], []>} : vector<2x256xf32>, vector<256x256xf32>, vector<2x256xf32> -> vector<2x256xf32>
    %138 = vector.shape_cast %137 : vector<2x256xf32> to vector<2x1x256xf32>
    %139 = vector.shape_cast %138 : vector<2x1x256xf32> to vector<2x1x256xf32>
    %140 = vector.broadcast %139 : vector<2x1x256xf32> to vector<2x16x256xf32>
    %141 = vector.shape_cast %140 : vector<2x16x256xf32> to vector<32x256xf32>
    %cst_49 = arith.constant 9.99999974E-6 : f32
    %142 = vector.broadcast %cst_49 : f32 to vector<32x256xf32>
    %143 = arith.addf %141, %142 : vector<32x256xf32>
    %144 = math.rsqrt %143 : vector<32x256xf32>
    %145 = arith.mulf %132, %144 : vector<32x256xf32>
    %146 = vector.broadcast %118 : vector<1x256xf32> to vector<32x256xf32>
    %147 = arith.mulf %145, %146 : vector<32x256xf32>
    %148 = vector.broadcast %119 : vector<1x256xf32> to vector<32x256xf32>
    %149 = arith.addf %147, %148 : vector<32x256xf32>
    %150 = arith.negf %149 : vector<32x256xf32>
    %151 = math.exp %150 : vector<32x256xf32>
    %cst_50 = arith.constant 1.000000e+00 : f32
    %152 = vector.broadcast %cst_50 : f32 to vector<32x256xf32>
    %153 = arith.addf %152, %151 : vector<32x256xf32>
    %154 = arith.divf %152, %153 : vector<32x256xf32>
    %155 = arith.mulf %149, %154 : vector<32x256xf32>
    %c0_51 = arith.constant 0 : index
    %c0_52 = arith.constant 0 : index
    %c0_53 = arith.constant 0 : index
    %156 = vector.load %arg11[%c0_51, %c0_52, %c0_53] : memref<2x768x256xbf16, #tpu.memory_space<vmem>>, vector<1x768x256xbf16>
    %157 = vector.shape_cast %156 : vector<1x768x256xbf16> to vector<768x256xbf16>
    %158 = vector.shape_cast %155 : vector<32x256xf32> to vector<2x16x256xf32>
    %cst_54 = arith.constant 0.000000e+00 : f32
    %159 = vector.broadcast %cst_54 : f32 to vector<2x1x256xf32>
    %160 = vector.extract_strided_slice %158 {offsets = [0, 0, 0], sizes = [2, 15, 256], strides = [1, 1, 1]} : vector<2x16x256xf32> to vector<2x15x256xf32>
    %161 = tpu.concatenate %159, %160 in 1 : vector<2x1x256xf32>, vector<2x15x256xf32> -> vector<2x16x256xf32>
    %162 = vector.shape_cast %161 : vector<2x16x256xf32> to vector<32x256xf32>
    %163 = vector.extract_strided_slice %158 {offsets = [0, 1, 0], sizes = [2, 15, 256], strides = [1, 1, 1]} : vector<2x16x256xf32> to vector<2x15x256xf32>
    %164 = tpu.concatenate %163, %159 in 1 : vector<2x15x256xf32>, vector<2x1x256xf32> -> vector<2x16x256xf32>
    %165 = vector.shape_cast %164 : vector<2x16x256xf32> to vector<32x256xf32>
    %166 = tpu.concatenate %162, %155, %165 in 1 : vector<32x256xf32>, vector<32x256xf32>, vector<32x256xf32> -> vector<32x768xf32>
    %167 = arith.truncf %166 : vector<32x768xf32> to vector<32x768xbf16>
    %cst_55 = arith.constant dense<0.000000e+00> : vector<32x256xf32>
    %168 = tpu.matmul %167, %157, %cst_55 {dimension_numbers = #tpu.dot_dimension_numbers<[1], [0], [0], [1], [0, 0, 1, 1], [], []>} : vector<32x768xbf16>, vector<768x256xbf16>, vector<32x256xf32> -> vector<32x256xf32>
    %169 = vector.broadcast %120 : vector<1x256xf32> to vector<32x256xf32>
    %170 = arith.addf %168, %169 : vector<32x256xf32>
    %171 = vector.extract_strided_slice %1 {offsets = [0, 1, 0], sizes = [2, 1, 256], strides = [1, 1, 1]} : vector<2x3x256xf32> to vector<2x1x256xf32>
    %172 = vector.shape_cast %171 : vector<2x1x256xf32> to vector<2x256xf32>
    %173 = vector.shape_cast %172 : vector<2x256xf32> to vector<2x1x256xf32>
    %174 = vector.shape_cast %173 : vector<2x1x256xf32> to vector<2x1x256xf32>
    %175 = vector.broadcast %174 : vector<2x1x256xf32> to vector<2x16x256xf32>
    %176 = vector.shape_cast %175 : vector<2x16x256xf32> to vector<32x256xf32>
    %177 = arith.addf %170, %176 : vector<32x256xf32>
    %178 = vector.shape_cast %177 : vector<32x256xf32> to vector<2x16x256xf32>
    %cst_56 = arith.constant dense<0.000000e+00> : vector<2x256xf32>
    %179 = vector.multi_reduction <add>, %178, %cst_56 [1] : vector<2x16x256xf32> to vector<2x256xf32>
    %c0_57 = arith.constant 0 : index
    %c0_58 = arith.constant 0 : index
    %180 = vector.load %arg4[%c0_57, %c0_58] : memref<256x256xf32, #tpu.memory_space<vmem>>, vector<256x256xf32>
    %cst_59 = arith.constant dense<0.000000e+00> : vector<2x256xf32>
    %181 = tpu.matmul %179, %180, %cst_59 {dimension_numbers = #tpu.dot_dimension_numbers<[1], [0], [0], [1], [0, 0, 1, 1], [], []>} : vector<2x256xf32>, vector<256x256xf32>, vector<2x256xf32> -> vector<2x256xf32>
    %182 = vector.shape_cast %181 : vector<2x256xf32> to vector<2x1x256xf32>
    %183 = vector.shape_cast %182 : vector<2x1x256xf32> to vector<2x1x256xf32>
    %184 = vector.broadcast %183 : vector<2x1x256xf32> to vector<2x16x256xf32>
    %185 = vector.shape_cast %184 : vector<2x16x256xf32> to vector<32x256xf32>
    %186 = arith.subf %177, %185 : vector<32x256xf32>
    %187 = arith.mulf %186, %186 : vector<32x256xf32>
    %188 = vector.shape_cast %187 : vector<32x256xf32> to vector<2x16x256xf32>
    %cst_60 = arith.constant dense<0.000000e+00> : vector<2x256xf32>
    %189 = vector.multi_reduction <add>, %188, %cst_60 [1] : vector<2x16x256xf32> to vector<2x256xf32>
    %c0_61 = arith.constant 0 : index
    %c0_62 = arith.constant 0 : index
    %190 = vector.load %arg4[%c0_61, %c0_62] : memref<256x256xf32, #tpu.memory_space<vmem>>, vector<256x256xf32>
    %cst_63 = arith.constant dense<0.000000e+00> : vector<2x256xf32>
    %191 = tpu.matmul %189, %190, %cst_63 {dimension_numbers = #tpu.dot_dimension_numbers<[1], [0], [0], [1], [0, 0, 1, 1], [], []>} : vector<2x256xf32>, vector<256x256xf32>, vector<2x256xf32> -> vector<2x256xf32>
    %192 = vector.shape_cast %191 : vector<2x256xf32> to vector<2x1x256xf32>
    %193 = vector.shape_cast %192 : vector<2x1x256xf32> to vector<2x1x256xf32>
    %194 = vector.broadcast %193 : vector<2x1x256xf32> to vector<2x16x256xf32>
    %195 = vector.shape_cast %194 : vector<2x16x256xf32> to vector<32x256xf32>
    %cst_64 = arith.constant 9.99999974E-6 : f32
    %196 = vector.broadcast %cst_64 : f32 to vector<32x256xf32>
    %197 = arith.addf %195, %196 : vector<32x256xf32>
    %198 = math.rsqrt %197 : vector<32x256xf32>
    %199 = arith.mulf %186, %198 : vector<32x256xf32>
    %200 = vector.broadcast %121 : vector<1x256xf32> to vector<32x256xf32>
    %201 = arith.mulf %199, %200 : vector<32x256xf32>
    %202 = vector.broadcast %122 : vector<1x256xf32> to vector<32x256xf32>
    %203 = arith.addf %201, %202 : vector<32x256xf32>
    %204 = arith.negf %203 : vector<32x256xf32>
    %205 = math.exp %204 : vector<32x256xf32>
    %cst_65 = arith.constant 1.000000e+00 : f32
    %206 = vector.broadcast %cst_65 : f32 to vector<32x256xf32>
    %207 = arith.addf %206, %205 : vector<32x256xf32>
    %208 = arith.divf %206, %207 : vector<32x256xf32>
    %209 = arith.mulf %203, %208 : vector<32x256xf32>
    %c0_66 = arith.constant 0 : index
    %c0_67 = arith.constant 0 : index
    %c0_68 = arith.constant 0 : index
    %210 = vector.load %arg12[%c0_66, %c0_67, %c0_68] : memref<2x768x256xbf16, #tpu.memory_space<vmem>>, vector<1x768x256xbf16>
    %211 = vector.shape_cast %210 : vector<1x768x256xbf16> to vector<768x256xbf16>
    %212 = vector.shape_cast %209 : vector<32x256xf32> to vector<2x16x256xf32>
    %cst_69 = arith.constant 0.000000e+00 : f32
    %213 = vector.broadcast %cst_69 : f32 to vector<2x1x256xf32>
    %214 = vector.extract_strided_slice %212 {offsets = [0, 0, 0], sizes = [2, 15, 256], strides = [1, 1, 1]} : vector<2x16x256xf32> to vector<2x15x256xf32>
    %215 = tpu.concatenate %213, %214 in 1 : vector<2x1x256xf32>, vector<2x15x256xf32> -> vector<2x16x256xf32>
    %216 = vector.shape_cast %215 : vector<2x16x256xf32> to vector<32x256xf32>
    %217 = vector.extract_strided_slice %212 {offsets = [0, 1, 0], sizes = [2, 15, 256], strides = [1, 1, 1]} : vector<2x16x256xf32> to vector<2x15x256xf32>
    %218 = tpu.concatenate %217, %213 in 1 : vector<2x15x256xf32>, vector<2x1x256xf32> -> vector<2x16x256xf32>
    %219 = vector.shape_cast %218 : vector<2x16x256xf32> to vector<32x256xf32>
    %220 = tpu.concatenate %216, %209, %219 in 1 : vector<32x256xf32>, vector<32x256xf32>, vector<32x256xf32> -> vector<32x768xf32>
    %221 = arith.truncf %220 : vector<32x768xf32> to vector<32x768xbf16>
    %cst_70 = arith.constant dense<0.000000e+00> : vector<32x256xf32>
    %222 = tpu.matmul %221, %211, %cst_70 {dimension_numbers = #tpu.dot_dimension_numbers<[1], [0], [0], [1], [0, 0, 1, 1], [], []>} : vector<32x768xbf16>, vector<768x256xbf16>, vector<32x256xf32> -> vector<32x256xf32>
    %223 = vector.broadcast %123 : vector<1x256xf32> to vector<32x256xf32>
    %224 = arith.addf %222, %223 : vector<32x256xf32>
    %225 = arith.addf %115, %224 : vector<32x256xf32>
    %c1 = arith.constant 1 : index
    %c0_71 = arith.constant 0 : index
    %c0_72 = arith.constant 0 : index
    %226 = vector.load %arg10[%c1, %c0_71, %c0_72] : memref<2x6x256xf32, #tpu.memory_space<vmem>>, vector<1x6x256xf32>
    %227 = vector.shape_cast %226 : vector<1x6x256xf32> to vector<6x256xf32>
    %228 = vector.extract_strided_slice %227 {offsets = [0, 0], sizes = [1, 256], strides = [1, 1]} : vector<6x256xf32> to vector<1x256xf32>
    %229 = vector.extract_strided_slice %227 {offsets = [1, 0], sizes = [1, 256], strides = [1, 1]} : vector<6x256xf32> to vector<1x256xf32>
    %230 = vector.extract_strided_slice %227 {offsets = [2, 0], sizes = [1, 256], strides = [1, 1]} : vector<6x256xf32> to vector<1x256xf32>
    %231 = vector.extract_strided_slice %227 {offsets = [3, 0], sizes = [1, 256], strides = [1, 1]} : vector<6x256xf32> to vector<1x256xf32>
    %232 = vector.extract_strided_slice %227 {offsets = [4, 0], sizes = [1, 256], strides = [1, 1]} : vector<6x256xf32> to vector<1x256xf32>
    %233 = vector.extract_strided_slice %227 {offsets = [5, 0], sizes = [1, 256], strides = [1, 1]} : vector<6x256xf32> to vector<1x256xf32>
    %234 = vector.shape_cast %225 : vector<32x256xf32> to vector<2x16x256xf32>
    %cst_73 = arith.constant dense<0.000000e+00> : vector<2x256xf32>
    %235 = vector.multi_reduction <add>, %234, %cst_73 [1] : vector<2x16x256xf32> to vector<2x256xf32>
    %c0_74 = arith.constant 0 : index
    %c0_75 = arith.constant 0 : index
    %236 = vector.load %arg4[%c0_74, %c0_75] : memref<256x256xf32, #tpu.memory_space<vmem>>, vector<256x256xf32>
    %cst_76 = arith.constant dense<0.000000e+00> : vector<2x256xf32>
    %237 = tpu.matmul %235, %236, %cst_76 {dimension_numbers = #tpu.dot_dimension_numbers<[1], [0], [0], [1], [0, 0, 1, 1], [], []>} : vector<2x256xf32>, vector<256x256xf32>, vector<2x256xf32> -> vector<2x256xf32>
    %238 = vector.shape_cast %237 : vector<2x256xf32> to vector<2x1x256xf32>
    %239 = vector.shape_cast %238 : vector<2x1x256xf32> to vector<2x1x256xf32>
    %240 = vector.broadcast %239 : vector<2x1x256xf32> to vector<2x16x256xf32>
    %241 = vector.shape_cast %240 : vector<2x16x256xf32> to vector<32x256xf32>
    %242 = arith.subf %225, %241 : vector<32x256xf32>
    %243 = arith.mulf %242, %242 : vector<32x256xf32>
    %244 = vector.shape_cast %243 : vector<32x256xf32> to vector<2x16x256xf32>
    %cst_77 = arith.constant dense<0.000000e+00> : vector<2x256xf32>
    %245 = vector.multi_reduction <add>, %244, %cst_77 [1] : vector<2x16x256xf32> to vector<2x256xf32>
    %c0_78 = arith.constant 0 : index
    %c0_79 = arith.constant 0 : index
    %246 = vector.load %arg4[%c0_78, %c0_79] : memref<256x256xf32, #tpu.memory_space<vmem>>, vector<256x256xf32>
    %cst_80 = arith.constant dense<0.000000e+00> : vector<2x256xf32>
    %247 = tpu.matmul %245, %246, %cst_80 {dimension_numbers = #tpu.dot_dimension_numbers<[1], [0], [0], [1], [0, 0, 1, 1], [], []>} : vector<2x256xf32>, vector<256x256xf32>, vector<2x256xf32> -> vector<2x256xf32>
    %248 = vector.shape_cast %247 : vector<2x256xf32> to vector<2x1x256xf32>
    %249 = vector.shape_cast %248 : vector<2x1x256xf32> to vector<2x1x256xf32>
    %250 = vector.broadcast %249 : vector<2x1x256xf32> to vector<2x16x256xf32>
    %251 = vector.shape_cast %250 : vector<2x16x256xf32> to vector<32x256xf32>
    %cst_81 = arith.constant 9.99999974E-6 : f32
    %252 = vector.broadcast %cst_81 : f32 to vector<32x256xf32>
    %253 = arith.addf %251, %252 : vector<32x256xf32>
    %254 = math.rsqrt %253 : vector<32x256xf32>
    %255 = arith.mulf %242, %254 : vector<32x256xf32>
    %256 = vector.broadcast %228 : vector<1x256xf32> to vector<32x256xf32>
    %257 = arith.mulf %255, %256 : vector<32x256xf32>
    %258 = vector.broadcast %229 : vector<1x256xf32> to vector<32x256xf32>
    %259 = arith.addf %257, %258 : vector<32x256xf32>
    %260 = arith.negf %259 : vector<32x256xf32>
    %261 = math.exp %260 : vector<32x256xf32>
    %cst_82 = arith.constant 1.000000e+00 : f32
    %262 = vector.broadcast %cst_82 : f32 to vector<32x256xf32>
    %263 = arith.addf %262, %261 : vector<32x256xf32>
    %264 = arith.divf %262, %263 : vector<32x256xf32>
    %265 = arith.mulf %259, %264 : vector<32x256xf32>
    %c1_83 = arith.constant 1 : index
    %c0_84 = arith.constant 0 : index
    %c0_85 = arith.constant 0 : index
    %266 = vector.load %arg11[%c1_83, %c0_84, %c0_85] : memref<2x768x256xbf16, #tpu.memory_space<vmem>>, vector<1x768x256xbf16>
    %267 = vector.shape_cast %266 : vector<1x768x256xbf16> to vector<768x256xbf16>
    %268 = vector.shape_cast %265 : vector<32x256xf32> to vector<2x16x256xf32>
    %cst_86 = arith.constant 0.000000e+00 : f32
    %269 = vector.broadcast %cst_86 : f32 to vector<2x1x256xf32>
    %270 = vector.extract_strided_slice %268 {offsets = [0, 0, 0], sizes = [2, 15, 256], strides = [1, 1, 1]} : vector<2x16x256xf32> to vector<2x15x256xf32>
    %271 = tpu.concatenate %269, %270 in 1 : vector<2x1x256xf32>, vector<2x15x256xf32> -> vector<2x16x256xf32>
    %272 = vector.shape_cast %271 : vector<2x16x256xf32> to vector<32x256xf32>
    %273 = vector.extract_strided_slice %268 {offsets = [0, 1, 0], sizes = [2, 15, 256], strides = [1, 1, 1]} : vector<2x16x256xf32> to vector<2x15x256xf32>
    %274 = tpu.concatenate %273, %269 in 1 : vector<2x15x256xf32>, vector<2x1x256xf32> -> vector<2x16x256xf32>
    %275 = vector.shape_cast %274 : vector<2x16x256xf32> to vector<32x256xf32>
    %276 = tpu.concatenate %272, %265, %275 in 1 : vector<32x256xf32>, vector<32x256xf32>, vector<32x256xf32> -> vector<32x768xf32>
    %277 = arith.truncf %276 : vector<32x768xf32> to vector<32x768xbf16>
    %cst_87 = arith.constant dense<0.000000e+00> : vector<32x256xf32>
    %278 = tpu.matmul %277, %267, %cst_87 {dimension_numbers = #tpu.dot_dimension_numbers<[1], [0], [0], [1], [0, 0, 1, 1], [], []>} : vector<32x768xbf16>, vector<768x256xbf16>, vector<32x256xf32> -> vector<32x256xf32>
    %279 = vector.broadcast %230 : vector<1x256xf32> to vector<32x256xf32>
    %280 = arith.addf %278, %279 : vector<32x256xf32>
    %281 = vector.extract_strided_slice %1 {offsets = [0, 2, 0], sizes = [2, 1, 256], strides = [1, 1, 1]} : vector<2x3x256xf32> to vector<2x1x256xf32>
    %282 = vector.shape_cast %281 : vector<2x1x256xf32> to vector<2x256xf32>
    %283 = vector.shape_cast %282 : vector<2x256xf32> to vector<2x1x256xf32>
    %284 = vector.shape_cast %283 : vector<2x1x256xf32> to vector<2x1x256xf32>
    %285 = vector.broadcast %284 : vector<2x1x256xf32> to vector<2x16x256xf32>
    %286 = vector.shape_cast %285 : vector<2x16x256xf32> to vector<32x256xf32>
    %287 = arith.addf %280, %286 : vector<32x256xf32>
    %288 = vector.shape_cast %287 : vector<32x256xf32> to vector<2x16x256xf32>
    %cst_88 = arith.constant dense<0.000000e+00> : vector<2x256xf32>
    %289 = vector.multi_reduction <add>, %288, %cst_88 [1] : vector<2x16x256xf32> to vector<2x256xf32>
    %c0_89 = arith.constant 0 : index
    %c0_90 = arith.constant 0 : index
    %290 = vector.load %arg4[%c0_89, %c0_90] : memref<256x256xf32, #tpu.memory_space<vmem>>, vector<256x256xf32>
    %cst_91 = arith.constant dense<0.000000e+00> : vector<2x256xf32>
    %291 = tpu.matmul %289, %290, %cst_91 {dimension_numbers = #tpu.dot_dimension_numbers<[1], [0], [0], [1], [0, 0, 1, 1], [], []>} : vector<2x256xf32>, vector<256x256xf32>, vector<2x256xf32> -> vector<2x256xf32>
    %292 = vector.shape_cast %291 : vector<2x256xf32> to vector<2x1x256xf32>
    %293 = vector.shape_cast %292 : vector<2x1x256xf32> to vector<2x1x256xf32>
    %294 = vector.broadcast %293 : vector<2x1x256xf32> to vector<2x16x256xf32>
    %295 = vector.shape_cast %294 : vector<2x16x256xf32> to vector<32x256xf32>
    %296 = arith.subf %287, %295 : vector<32x256xf32>
    %297 = arith.mulf %296, %296 : vector<32x256xf32>
    %298 = vector.shape_cast %297 : vector<32x256xf32> to vector<2x16x256xf32>
    %cst_92 = arith.constant dense<0.000000e+00> : vector<2x256xf32>
    %299 = vector.multi_reduction <add>, %298, %cst_92 [1] : vector<2x16x256xf32> to vector<2x256xf32>
    %c0_93 = arith.constant 0 : index
    %c0_94 = arith.constant 0 : index
    %300 = vector.load %arg4[%c0_93, %c0_94] : memref<256x256xf32, #tpu.memory_space<vmem>>, vector<256x256xf32>
    %cst_95 = arith.constant dense<0.000000e+00> : vector<2x256xf32>
    %301 = tpu.matmul %299, %300, %cst_95 {dimension_numbers = #tpu.dot_dimension_numbers<[1], [0], [0], [1], [0, 0, 1, 1], [], []>} : vector<2x256xf32>, vector<256x256xf32>, vector<2x256xf32> -> vector<2x256xf32>
    %302 = vector.shape_cast %301 : vector<2x256xf32> to vector<2x1x256xf32>
    %303 = vector.shape_cast %302 : vector<2x1x256xf32> to vector<2x1x256xf32>
    %304 = vector.broadcast %303 : vector<2x1x256xf32> to vector<2x16x256xf32>
    %305 = vector.shape_cast %304 : vector<2x16x256xf32> to vector<32x256xf32>
    %cst_96 = arith.constant 9.99999974E-6 : f32
    %306 = vector.broadcast %cst_96 : f32 to vector<32x256xf32>
    %307 = arith.addf %305, %306 : vector<32x256xf32>
    %308 = math.rsqrt %307 : vector<32x256xf32>
    %309 = arith.mulf %296, %308 : vector<32x256xf32>
    %310 = vector.broadcast %231 : vector<1x256xf32> to vector<32x256xf32>
    %311 = arith.mulf %309, %310 : vector<32x256xf32>
    %312 = vector.broadcast %232 : vector<1x256xf32> to vector<32x256xf32>
    %313 = arith.addf %311, %312 : vector<32x256xf32>
    %314 = arith.negf %313 : vector<32x256xf32>
    %315 = math.exp %314 : vector<32x256xf32>
    %cst_97 = arith.constant 1.000000e+00 : f32
    %316 = vector.broadcast %cst_97 : f32 to vector<32x256xf32>
    %317 = arith.addf %316, %315 : vector<32x256xf32>
    %318 = arith.divf %316, %317 : vector<32x256xf32>
    %319 = arith.mulf %313, %318 : vector<32x256xf32>
    %c1_98 = arith.constant 1 : index
    %c0_99 = arith.constant 0 : index
    %c0_100 = arith.constant 0 : index
    %320 = vector.load %arg12[%c1_98, %c0_99, %c0_100] : memref<2x768x256xbf16, #tpu.memory_space<vmem>>, vector<1x768x256xbf16>
    %321 = vector.shape_cast %320 : vector<1x768x256xbf16> to vector<768x256xbf16>
    %322 = vector.shape_cast %319 : vector<32x256xf32> to vector<2x16x256xf32>
    %cst_101 = arith.constant 0.000000e+00 : f32
    %323 = vector.broadcast %cst_101 : f32 to vector<2x1x256xf32>
    %324 = vector.extract_strided_slice %322 {offsets = [0, 0, 0], sizes = [2, 15, 256], strides = [1, 1, 1]} : vector<2x16x256xf32> to vector<2x15x256xf32>
    %325 = tpu.concatenate %323, %324 in 1 : vector<2x1x256xf32>, vector<2x15x256xf32> -> vector<2x16x256xf32>
    %326 = vector.shape_cast %325 : vector<2x16x256xf32> to vector<32x256xf32>
    %327 = vector.extract_strided_slice %322 {offsets = [0, 1, 0], sizes = [2, 15, 256], strides = [1, 1, 1]} : vector<2x16x256xf32> to vector<2x15x256xf32>
    %328 = tpu.concatenate %327, %323 in 1 : vector<2x15x256xf32>, vector<2x1x256xf32> -> vector<2x16x256xf32>
    %329 = vector.shape_cast %328 : vector<2x16x256xf32> to vector<32x256xf32>
    %330 = tpu.concatenate %326, %319, %329 in 1 : vector<32x256xf32>, vector<32x256xf32>, vector<32x256xf32> -> vector<32x768xf32>
    %331 = arith.truncf %330 : vector<32x768xf32> to vector<32x768xbf16>
    %cst_102 = arith.constant dense<0.000000e+00> : vector<32x256xf32>
    %332 = tpu.matmul %331, %321, %cst_102 {dimension_numbers = #tpu.dot_dimension_numbers<[1], [0], [0], [1], [0, 0, 1, 1], [], []>} : vector<32x768xbf16>, vector<768x256xbf16>, vector<32x256xf32> -> vector<32x256xf32>
    %333 = vector.broadcast %233 : vector<1x256xf32> to vector<32x256xf32>
    %334 = arith.addf %332, %333 : vector<32x256xf32>
    %335 = arith.addf %225, %334 : vector<32x256xf32>
    %c0_103 = arith.constant 0 : index
    %c0_104 = arith.constant 0 : index
    %336 = vector.load %arg13[%c0_103, %c0_104] : memref<32x256xf32, #tpu.memory_space<vmem>>, vector<32x256xf32>
    tpu.vector_store %arg13[%c0_103, %c0_104], %335 {strides = array<i32>} : memref<32x256xf32, #tpu.memory_space<vmem>>, vector<32x256xf32>,
    return
  }
  func.func @transform_0(%arg0: i32) -> (i32, i32) {
    %c0_i32 = arith.constant 0 : i32
    %c0_i32_0 = arith.constant 0 : i32
    return %arg0, %c0_i32 : i32, i32
  }
  func.func @transform_1(%arg0: i32) -> (i32, i32, i32) {
    %c0_i32 = arith.constant 0 : i32
    %c0_i32_0 = arith.constant 0 : i32
    %c0_i32_1 = arith.constant 0 : i32
    return %arg0, %c0_i32, %c0_i32_0 : i32, i32, i32
  }
  func.func @transform_2(%arg0: i32) -> (i32, i32) {
    %c0_i32 = arith.constant 0 : i32
    %c0_i32_0 = arith.constant 0 : i32
    %c0_i32_1 = arith.constant 0 : i32
    return %c0_i32, %c0_i32_0 : i32, i32
  }
  func.func @transform_3(%arg0: i32) -> (i32, i32) {
    %c0_i32 = arith.constant 0 : i32
    %c0_i32_0 = arith.constant 0 : i32
    %c0_i32_1 = arith.constant 0 : i32
    return %c0_i32, %c0_i32_0 : i32, i32
  }
  func.func @transform_4(%arg0: i32) -> (i32, i32) {
    %c0_i32 = arith.constant 0 : i32
    %c0_i32_0 = arith.constant 0 : i32
    %c0_i32_1 = arith.constant 0 : i32
    return %c0_i32, %c0_i32_0 : i32, i32
  }
  func.func @transform_5(%arg0: i32) -> (i32, i32) {
    %c0_i32 = arith.constant 0 : i32
    %c0_i32_0 = arith.constant 0 : i32
    %c0_i32_1 = arith.constant 0 : i32
    return %c0_i32, %c0_i32_0 : i32, i32
  }
  func.func @transform_6(%arg0: i32) -> (i32, i32) {
    %c0_i32 = arith.constant 0 : i32
    %c0_i32_0 = arith.constant 0 : i32
    %c0_i32_1 = arith.constant 0 : i32
    return %c0_i32, %c0_i32_0 : i32, i32
  }
  func.func @transform_7(%arg0: i32) -> (i32, i32) {
    %c0_i32 = arith.constant 0 : i32
    %c0_i32_0 = arith.constant 0 : i32
    %c0_i32_1 = arith.constant 0 : i32
    return %c0_i32, %c0_i32_0 : i32, i32
  }
  func.func @transform_8(%arg0: i32) -> (i32, i32) {
    %c0_i32 = arith.constant 0 : i32
    %c0_i32_0 = arith.constant 0 : i32
    %c0_i32_1 = arith.constant 0 : i32
    return %c0_i32, %c0_i32_0 : i32, i32
  }
  func.func @transform_9(%arg0: i32) -> (i32, i32, i32) {
    %c0_i32 = arith.constant 0 : i32
    %c0_i32_0 = arith.constant 0 : i32
    %c0_i32_1 = arith.constant 0 : i32
    %c0_i32_2 = arith.constant 0 : i32
    return %c0_i32, %c0_i32_0, %c0_i32_1 : i32, i32, i32
  }
  func.func @transform_10(%arg0: i32) -> (i32, i32, i32) {
    %c0_i32 = arith.constant 0 : i32
    %c0_i32_0 = arith.constant 0 : i32
    %c0_i32_1 = arith.constant 0 : i32
    %c0_i32_2 = arith.constant 0 : i32
    return %c0_i32, %c0_i32_0, %c0_i32_1 : i32, i32, i32
  }
  func.func @transform_11(%arg0: i32) -> (i32, i32, i32) {
    %c0_i32 = arith.constant 0 : i32
    %c0_i32_0 = arith.constant 0 : i32
    %c0_i32_1 = arith.constant 0 : i32
    %c0_i32_2 = arith.constant 0 : i32
    return %c0_i32, %c0_i32_0, %c0_i32_1 : i32, i32, i32
  }
  func.func @transform_12(%arg0: i32) -> (i32, i32) {
    %c0_i32 = arith.constant 0 : i32
    %c0_i32_0 = arith.constant 0 : i32
    return %arg0, %c0_i32 : i32, i32
  }
}

</mosaic_0001>

<bundles_post_ra>
// kernel: tile.9
= control target key start
LH: loop header
LB: loop body
LE: loop exit
PB: predicated region body
PF: predicated region fallthrough
CT: control target
= control target key end

     0   :  { %vm27_vm0 = vcmask 1043458   ;;  %s93_s6 = smov 3  ;;  %s96_s9 = smov 12  ;;  %vm32_vm1 = vcmask 1045508   ;;  %vm37_vm2 = vcmask 1047558   ;;  %vm6_vm3 = vcmask 130048   ;;  %s634_s0 = inlined_call_operand.vmem [shape: f32[2,3,16,16], index: 0, kind: input, shape index: {}]   ;;  %s635_s1 = inlined_call_operand.vmem [shape: f32[2,3,256], index: 1, kind: output, shape index: {}]  }
   0x1   :  { %v372_v0 = vld [vmem:[%s634_s0 + $0x46] ss:$16 sm:%s93_s6]   ;;  %v373_v1 = vld [vmem:[%s634_s0 + $0x2e] ss:$16 sm:%s96_s9]   ;;  %s50_s12 = smov 3  ;;  %s53_s13 = smov 12 }
   0x2   :  { %v99_v2 = vsel %vm27_vm0, %v373_v1, %v372_v0  ;;  %v366_v3 = vld [vmem:[%s634_s0 + $0x47] ss:$16 sm:%s50_s12]   ;;  %v367_v4 = vld [vmem:[%s634_s0 + $0x2f] ss:$16 sm:%s53_s13]   ;;  %s65_s18 = smov 3  ;;  %s68_s19 = smov 12 }
   0x3   :  { %s416_s20 = smov 96   ;;  %v56_v5 = vsel %vm27_vm0, %v367_v4, %v366_v3  ;;  %v368_v6 = vld [vmem:[%s634_s0 + $0x6] ss:$16 sm:%s65_s18]   ;;  %s73_s23 = smov 48  ;;  %v369_v7 = vld [vmem:[%s634_s0 - $0x12] ss:$16 sm:%s68_s19]  }
   0x4   :  { %100 = vrot.lane.b32.xlu1 %v99_v2, %s416_s20  ;;  %s78_s24 = smov 192  ;;  %s417_s25 = smov 112   ;;  %v71_v8 = vsel %vm27_vm0, %v369_v7, %v368_v6  ;;  %v370_v9 = vld [vmem:[%s634_s0 - $0x1a] ss:$16 sm:%s73_s23]   ;;  %vm4_vm4 = vcmask 1047556   ;;  %vm41_vm5 = vcmask 1048448  }
   0x5   :  { %57 = vrot.lane.b32.xlu0 %v56_v5, %s417_s25  ;;  %s22_s28 = smov 3  ;;  %s25_s29 = smov 12  ;;  %v371_v10 = vld [vmem:[%s634_s0 - $0x32] ss:$16 sm:%s78_s24]   ;;  %v76_v11 = vsel %vm32_vm1, %v370_v9, %v71_v8  ;;  %vm84_vm6 = vcmask 917248   ;;  %vm127_vm7 = vcmask 786048  }
   0x6   :  { %s30_s5 = smov 48  ;;  %s35_s6 = smov 192  ;;  %v362_v12 = vld [vmem:[%s634_s0 + $0x7] ss:$16 sm:%s22_s28]   ;;  %v363_v13 = vld [vmem:[%s634_s0 - $0x11] ss:$16 sm:%s25_s29]   ;;  %v81_v14 = vsel %vm37_vm2, %v371_v10, %v76_v11 }
   0x7   :  { %s136_s11 = smov 3  ;;  %v28_v15 = vsel %vm27_vm0, %v363_v13, %v362_v12  ;;  %v364_v16 = vld [vmem:[%s634_s0 - $0x19] ss:$16 sm:%s30_s5]   ;;  %v365_v17 = vld [vmem:[%s634_s0 - $0x31] ss:$16 sm:%s35_s6]   ;;  %s139_s16 = smov 12 }
   0x8   :  { %s108_s17 = smov 3  ;;  %82 = vrot.lane.b32.xlu1 %v81_v14, %s416_s20  ;;  %v33_v18 = vsel %vm32_vm1, %v364_v16, %v28_v15  ;;  %v378_v19 = vld [vmem:[%s634_s0 + $0x45] ss:$16 sm:%s136_s11]   ;;  %s111_s20 = smov 12  ;;  %vm170_vm8 = vcmask 654848   ;;  %vm213_vm9 = vcmask 523648  }
   0x9   :  { %s116_s21 = smov 48  ;;  %v38_v20 = vsel %vm37_vm2, %v365_v17, %v33_v18  ;;  %v379_v21 = vld [vmem:[%s634_s0 + $0x2d] ss:$16 sm:%s139_s16]   ;;  %v374_v22 = vld [vmem:[%s634_s0 + $0x5] ss:$16 sm:%s108_s17]   ;;  %s121_s27 = smov 192 }
   0xa   :  { %39 = vrot.lane.b32.xlu0 %v38_v20, %s417_s25  ;;  %v142_v23 = vsel %vm27_vm0, %v379_v21, %v378_v19  ;;  %v375_v24 = vld [vmem:[%s634_s0 - $0x13] ss:$16 sm:%s111_s20]   ;;  %s179_s29 = smov 3  ;;  %s182_s30 = smov 12  ;;  %vm256_vm10 = vcmask 392448   ;;  %vm299_vm11 = vcmask 261248  }
   0xb   :  { %v114_v25 = vsel %vm27_vm0, %v375_v24, %v374_v22  ;;  %v376_v26 = vld [vmem:[%s634_s0 - $0x1b] ss:$16 sm:%s116_s21]   ;;  %v377_v27 = vld [vmem:[%s634_s0 - $0x33] ss:$16 sm:%s121_s27]   ;;  %s151_s6 = smov 3  ;;  %s154_s7 = smov 12 }
   0xc   :  { %s418_s8 = smov 80   ;;  %v119_v28 = vsel %vm32_vm1, %v376_v26, %v114_v25  ;;  %v384_v29 = vld [vmem:[%s634_s0 + $0x44] ss:$16 sm:%s179_s29]   ;;  %s159_s11 = smov 48  ;;  %v385_v31 = vld [vmem:[%s634_s0 + $0x2c] ss:$16 sm:%s182_s30]  }
   0xd   :  { %143 = vrot.lane.b32.xlu1 %v142_v23, %s418_s8  ;;  %s164_s12 = smov 192  ;;  %v124_v30 = vsel %vm37_vm2, %v377_v27, %v119_v28  ;;  %v380_v32 = vld [vmem:[%s634_s0 + $0x4] ss:$16 sm:%s151_s6]   ;;  %s222_s17 = smov 3  ;;  %v185_v33 = vsel %vm27_vm0, %v385_v31, %v384_v29 }
   0xe   :  { %125 = vrot.lane.b32.xlu0 %v124_v30, %s418_s8  ;;  %v381_v34 = vld [vmem:[%s634_s0 - $0x14] ss:$16 sm:%s154_s7]   ;;  %s225_s20 = smov 12  ;;  %s194_s21 = smov 3 }
   0xf   :  { %v157_v35 = vsel %vm27_vm0, %v381_v34, %v380_v32  ;;  %v382_v36 = vld [vmem:[%s634_s0 - $0x1c] ss:$16 sm:%s159_s11]   ;;  %v383_v37 = vld [vmem:[%s634_s0 - $0x34] ss:$16 sm:%s164_s12]   ;;  %s197_s27 = smov 12  ;;  %s419_s25 = smov 64  }
  0x10   :  { %v162_v38 = vsel %vm32_vm1, %v382_v36, %v157_v35  ;;  %v390_v39 = vld [vmem:[%s634_s0 + $0x43] ss:$16 sm:%s222_s17]   ;;  %s202_s30 = smov 48  ;;  %s207_s2 = smov 192  ;;  %v391_v41 = vld [vmem:[%s634_s0 + $0x2b] ss:$16 sm:%s225_s20]  }
  0x11   :  { %186 = vrot.lane.b32.xlu1 %v185_v33, %s419_s25  ;;  %v167_v40 = vsel %vm37_vm2, %v383_v37, %v162_v38  ;;  %v386_v42 = vld [vmem:[%s634_s0 + $0x3] ss:$16 sm:%s194_s21]   ;;  %s265_s7 = smov 3  ;;  %v228_v43 = vsel %vm27_vm0, %v391_v41, %v390_v39  ;;  %s268_s10 = smov 12 }
  0x12   :  { %168 = vrot.lane.b32.xlu0 %v167_v40, %s419_s25  ;;  %v387_v44 = vld [vmem:[%s634_s0 - $0x15] ss:$16 sm:%s197_s27]   ;;  %s237_s11 = smov 3  ;;  %s240_s16 = smov 12 }
  0x13   :  { %v200_v45 = vsel %vm27_vm0, %v387_v44, %v386_v42  ;;  %v388_v46 = vld [vmem:[%s634_s0 - $0x1d] ss:$16 sm:%s202_s30]   ;;  %v389_v47 = vld [vmem:[%s634_s0 - $0x35] ss:$16 sm:%s207_s2]   ;;  %s420_s17 = smov 48   ;;  %s245_s20 = smov 48 }
  0x14   :  { %v205_v48 = vsel %vm32_vm1, %v388_v46, %v200_v45  ;;  %v396_v49 = vld [vmem:[%s634_s0 + $0x42] ss:$16 sm:%s265_s7]   ;;  %s250_s21 = smov 192  ;;  %v397_v51 = vld [vmem:[%s634_s0 + $0x2a] ss:$16 sm:%s268_s10]   ;;  %s308_s27 = smov 3 }
  0x15   :  { %229 = vrot.lane.b32.xlu1 %v228_v43, %s420_s17  ;;  %v210_v50 = vsel %vm37_vm2, %v389_v47, %v205_v48  ;;  %v392_v52 = vld [vmem:[%s634_s0 + $0x2] ss:$16 sm:%s237_s11]   ;;  %v271_v53 = vsel %vm27_vm0, %v397_v51, %v396_v49  ;;  %s311_s29 = smov 12  ;;  %s280_s30 = smov 3 }
  0x16   :  { %211 = vrot.lane.b32.xlu0 %v210_v50, %s420_s17  ;;  %v393_v54 = vld [vmem:[%s634_s0 - $0x16] ss:$16 sm:%s240_s16]   ;;  %s283_s6 = smov 12  ;;  %s288_s7 = smov 48 }
  0x17   :  { %v243_v55 = vsel %vm27_vm0, %v393_v54, %v392_v52  ;;  %v394_v56 = vld [vmem:[%s634_s0 - $0x1e] ss:$16 sm:%s245_s20]   ;;  %v395_v57 = vld [vmem:[%s634_s0 - $0x36] ss:$16 sm:%s250_s21]   ;;  %s421_s8 = smov 32   ;;  %s293_s11 = smov 192 }
  0x18   :  { %v248_v58 = vsel %vm32_vm1, %v394_v56, %v243_v55  ;;  %v402_v59 = vld [vmem:[%s634_s0 + $0x41] ss:$16 sm:%s308_s27]   ;;  %v361_v60 = vld [vmem:[%s634_s0 + $0x40] ss:$8 sm:$0xf]   ;;  %s422_s27 = smov 16  }
  0x19   :  { %272 = vrot.lane.b32.xlu1 %v271_v53, %s421_s8  ;;  %v253_v61 = vsel %vm37_vm2, %v395_v57, %v248_v58  ;;  %v403_v62 = vld [vmem:[%s634_s0 + $0x29] ss:$16 sm:%s311_s29]   ;;  %18 = vst.msk [vmem:[#allocation0 + $0x20] ss:$8 sm:$0x3] %vm6_vm3, %v361_v60  }
  0x1a   :  { %v398_v63 = vld [vmem:[%s634_s0 + $0x1] ss:$16 sm:%s280_s30]   ;;  %20 = vst.msk [vmem:[#allocation0 + $0x11] ss:$8 sm:$0xc] %vm6_vm3, %v361_v60   ;;  %254 = vrot.lane.b32.xlu0 %v253_v61, %s421_s8  ;;  %v314_v0 = vsel %vm27_vm0, %v403_v62, %v402_v59 }
  0x1b   :  { %v399_v1 = vld [vmem:[%s634_s0 - $0x17] ss:$16 sm:%s283_s6]   ;;  %v2_v2 = vld [vmem:[%s634_s0] ss:$8 sm:$0xf]  }
  0x1c   :  { %v286_v3 = vsel %vm27_vm0, %v399_v1, %v398_v63  ;;  %v400_v4 = vld [vmem:[%s634_s0 - $0x1f] ss:$16 sm:%s288_s7]   ;;  %v401_v5 = vld [vmem:[%s634_s0 - $0x37] ss:$16 sm:%s293_s11]  }
  0x1d   :  { %315 = vrot.lane.b32.xlu1 %v314_v0, %s422_s27  ;;  %v291_v6 = vsel %vm32_vm1, %v400_v4, %v286_v3  ;;  %v3_v7 = vld [vmem:[%s634_s0] ss:$8 sm:$0xf0]  }
  0x1e   :  { %v296_v8 = vsel %vm37_vm2, %v401_v5, %v291_v6  ;;  %v5_v9 = vsel %vm4_vm4, %v3_v7, %v2_v2 }
  0x1f   :  { %297 = vrot.lane.b32.xlu0 %v296_v8, %s422_s27  ;;  %7 = vst.msk [vmem:[#allocation0] ss:$8 sm:$0x3] %vm6_vm3, %v5_v9   ;;  %9 = vst.msk [vmem:[#allocation0 - $0xf] ss:$8 sm:$0xc] %vm6_vm3, %v5_v9  }
  0x20   :  { %11 = vst.msk [vmem:[#allocation0 - $0x10] ss:$8 sm:$0x30] %vm6_vm3, %v5_v9   ;;  %13 = vst.msk [vmem:[#allocation0 - $0x1f] ss:$8 sm:$0xc0] %vm6_vm3, %v5_v9  }
  0x76   :  { %v101_v10 = vpop.permute.xlu1 %100  }
  0x77   :  { %v58_v11 = vpop.permute.xlu0 %57  }
  0x78   :  { %61 = vst.msk [vmem:[#allocation0 + $0x20] sm:$0x3] %vm41_vm5, %v58_v11   ;;  %63 = vst.msk [vmem:[#allocation0 + $0x26] sm:$0xc] %vm41_vm5, %v58_v11  }
  0x79   :  { %104 = vst.msk [vmem:[#allocation0 + $0x20] sm:$0x3] %vm84_vm6, %v101_v10   ;;  %106 = vst.msk [vmem:[#allocation0 + $0x26] sm:$0xc] %vm84_vm6, %v101_v10  }
  0x7a   :  { %v83_v12 = vpop.permute.xlu1 %82  }
  0x7c   :  { %v40_v13 = vpop.permute.xlu0 %39  }
  0x7d   :  { %42 = vst.msk [vmem:[#allocation0] sm:$0x3] %vm41_vm5, %v40_v13   ;;  %44 = vst.msk [vmem:[#allocation0 + $0x6] sm:$0xc] %vm41_vm5, %v40_v13  }
  0x7e   :  { %46 = vst.msk [vmem:[#allocation0 + $0xc] sm:$0x30] %vm41_vm5, %v40_v13   ;;  %48 = vst.msk [vmem:[#allocation0 + $0x12] sm:$0xc0] %vm41_vm5, %v40_v13  }
  0x7f   :  { %85 = vst.msk [vmem:[#allocation0] sm:$0x3] %vm84_vm6, %v83_v12   ;;  %87 = vst.msk [vmem:[#allocation0 + $0x6] sm:$0xc] %vm84_vm6, %v83_v12   ;;  %v144_v14 = vpop.permute.xlu1 %143  }
  0x80   :  { %89 = vst.msk [vmem:[#allocation0 + $0xc] sm:$0x30] %vm84_vm6, %v83_v12   ;;  %91 = vst.msk [vmem:[#allocation0 + $0x12] sm:$0xc0] %vm84_vm6, %v83_v12   ;;  %v126_v15 = vpop.permute.xlu0 %125  }
  0x81   :  { %147 = vst.msk [vmem:[#allocation0 + $0x20] sm:$0x3] %vm127_vm7, %v144_v14   ;;  %149 = vst.msk [vmem:[#allocation0 + $0x26] sm:$0xc] %vm127_vm7, %v144_v14  }
  0x82   :  { %128 = vst.msk [vmem:[#allocation0] sm:$0x3] %vm127_vm7, %v126_v15   ;;  %130 = vst.msk [vmem:[#allocation0 + $0x6] sm:$0xc] %vm127_vm7, %v126_v15  }
  0x83   :  { %132 = vst.msk [vmem:[#allocation0 + $0xc] sm:$0x30] %vm127_vm7, %v126_v15   ;;  %134 = vst.msk [vmem:[#allocation0 + $0x12] sm:$0xc0] %vm127_vm7, %v126_v15   ;;  %v187_v16 = vpop.permute.xlu1 %186  }
  0x84   :  { %190 = vst.msk [vmem:[#allocation0 + $0x20] sm:$0x3] %vm170_vm8, %v187_v16   ;;  %192 = vst.msk [vmem:[#allocation0 + $0x26] sm:$0xc] %vm170_vm8, %v187_v16   ;;  %v169_v17 = vpop.permute.xlu0 %168  }
  0x85   :  { %171 = vst.msk [vmem:[#allocation0] sm:$0x3] %vm170_vm8, %v169_v17   ;;  %173 = vst.msk [vmem:[#allocation0 + $0x6] sm:$0xc] %vm170_vm8, %v169_v17  }
  0x86   :  { %175 = vst.msk [vmem:[#allocation0 + $0xc] sm:$0x30] %vm170_vm8, %v169_v17   ;;  %177 = vst.msk [vmem:[#allocation0 + $0x12] sm:$0xc0] %vm170_vm8, %v169_v17  }
  0x87   :  { %v230_v18 = vpop.permute.xlu1 %229  }
  0x88   :  { %233 = vst.msk [vmem:[#allocation0 + $0x20] sm:$0x3] %vm213_vm9, %v230_v18   ;;  %235 = vst.msk [vmem:[#allocation0 + $0x26] sm:$0xc] %vm213_vm9, %v230_v18   ;;  %v212_v19 = vpop.permute.xlu0 %211  }
  0x89   :  { %214 = vst.msk [vmem:[#allocation0] sm:$0x3] %vm213_vm9, %v212_v19   ;;  %216 = vst.msk [vmem:[#allocation0 + $0x6] sm:$0xc] %vm213_vm9, %v212_v19  }
  0x8a   :  { %218 = vst.msk [vmem:[#allocation0 + $0xc] sm:$0x30] %vm213_vm9, %v212_v19   ;;  %220 = vst.msk [vmem:[#allocation0 + $0x12] sm:$0xc0] %vm213_vm9, %v212_v19  }
  0x8b   :  { %v273_v20 = vpop.permute.xlu1 %272  }
  0x8c   :  { %276 = vst.msk [vmem:[#allocation0 + $0x20] sm:$0x3] %vm256_vm10, %v273_v20   ;;  %278 = vst.msk [vmem:[#allocation0 + $0x26] sm:$0xc] %vm256_vm10, %v273_v20   ;;  %v255_v21 = vpop.permute.xlu0 %254  }
  0x8d   :  { %257 = vst.msk [vmem:[#allocation0] sm:$0x3] %vm256_vm10, %v255_v21   ;;  %259 = vst.msk [vmem:[#allocation0 + $0x6] sm:$0xc] %vm256_vm10, %v255_v21  }
  0x8e   :  { %261 = vst.msk [vmem:[#allocation0 + $0xc] sm:$0x30] %vm256_vm10, %v255_v21   ;;  %263 = vst.msk [vmem:[#allocation0 + $0x12] sm:$0xc0] %vm256_vm10, %v255_v21  }
  0x8f   :  { %v316_v22 = vpop.permute.xlu1 %315  }
  0x90   :  { %319 = vst.msk [vmem:[#allocation0 + $0x20] sm:$0x3] %vm299_vm11, %v316_v22   ;;  %321 = vst.msk [vmem:[#allocation0 + $0x26] sm:$0xc] %vm299_vm11, %v316_v22  }
  0x91   :  { %v298_v23 = vpop.permute.xlu0 %297  }
  0x92   :  { %300 = vst.msk [vmem:[#allocation0] sm:$0x3] %vm299_vm11, %v298_v23   ;;  %302 = vst.msk [vmem:[#allocation0 + $0x6] sm:$0xc] %vm299_vm11, %v298_v23  }
  0x93   :  { %304 = vst.msk [vmem:[#allocation0 + $0xc] sm:$0x30] %vm299_vm11, %v298_v23   ;;  %306 = vst.msk [vmem:[#allocation0 + $0x12] sm:$0xc0] %vm299_vm11, %v298_v23  }
  0x97   :  { %v346_v24 = vld [vmem:[#allocation0 + $0x20] sm:$0x3]  ;;  %v352_v25 = vld [vmem:[#allocation0 + $0x28] sm:$0x3] }
  0x98   :  { %407 = vst [vmem:[%s635_s1 + $0x8] sm:$0x3] %v346_v24  ;;  %408 = vst [vmem:[%s635_s1 + $0xa] sm:$0x3] %v352_v25 }
  0x99   :  { %v325_v26 = vld [vmem:[#allocation0] sm:$0x3]  ;;  %v329_v27 = vld [vmem:[#allocation0 + $0x8] sm:$0x3] }
  0x9a   :  { %v334_v28 = vld [vmem:[#allocation0 + $0x10] sm:$0x3]  ;;  %327 = vst [vmem:[%s635_s1] sm:$0x3] %v325_v26  ;;  %404 = vst [vmem:[%s635_s1 + $0x2] sm:$0x3] %v329_v27 }
  0x9b   :  { %405 = vst [vmem:[%s635_s1 + $0x4] sm:$0x3] %v334_v28  ;;  %v340_v29 = vld [vmem:[#allocation0 + $0x18] sm:$0x3] }
  0x9c   :  { %406 = vst [vmem:[%s635_s1 + $0x6] sm:$0x3] %v340_v29 }

// kernel: conv_group_forward.1
= control target key start
LH: loop header
LB: loop body
LE: loop exit
PB: predicated region body
PF: predicated region fallthrough
CT: control target
= control target key end

     0   :  { %17 = vsyncpa [#allocation3], 0  ;;  %s12440_s0 = inlined_call_operand.hbm [shape: f32[32,128], index: 0, kind: input, shape index: {}]   ;;  %s12441_s1 = inlined_call_operand.hbm [shape: f32[2,3,256], index: 1, kind: input, shape index: {}]   ;;  %s12442_s2 = inlined_call_operand.hbm [shape: f32[128,128], index: 2, kind: input, shape index: {}]   ;;  %s12443_s3 = inlined_call_operand.hbm [shape: f32[256,256], index: 3, kind: input, shape index: {}]   ;;  %s12444_s4 = inlined_call_operand.hbm [shape: f32[2,128], index: 4, kind: input, shape index: {}]   ;;  %s12445_s5 = inlined_call_operand.hbm [shape: f32[5,256], index: 5, kind: input, shape index: {}]   ;;  %s12446_s6 = inlined_call_operand.hbm [shape: bf16[384,256], index: 6, kind: input, shape index: {}]   ;;  %s12447_s7 = inlined_call_operand.hbm [shape: bf16[768,256], index: 7, kind: input, shape index: {}]   ;;  %s12448_s8 = inlined_call_operand.hbm [shape: bf16[128,256], index: 8, kind: input, shape index: {}]   ;;  %s12449_s9 = inlined_call_operand.hbm [shape: f32[2,6,256], index: 9, kind: input, shape index: {}]   ;;  %s12450_s10 = inlined_call_operand.hbm [shape: bf16[2,768,256], index: 10, kind: input, shape index: {}]   ;;  %s12451_s11 = inlined_call_operand.hbm [shape: bf16[2,768,256], index: 11, kind: input, shape index: {}]   ;;  %s12452_s12 = inlined_call_operand.hbm [shape: f32[32,256], index: 12, kind: output, shape index: {}]  }
   0x1   :  { %18 = vsyncpa [#allocation6], 0 }
   0x2   :  { %19 = vsyncpa [#allocation9], 0 }
   0x3   :  { %20 = vsyncpa [#allocation12], 0 }
   0x4   :  { %21 = vsyncpa [#allocation15], 0 }
   0x5   :  { %22 = vsyncpa [#allocation18], 0 }
   0x6   :  { %23 = vsyncpa [#allocation21], 0 }
   0x7   :  { %24 = vsyncpa [#allocation4], 0  ;;  %s10627_s21 = smov [#allocation5]   ;;  %s10628_s23 = smov [#allocation8]  }
   0x8   :  { %s42_s22 = sshll.u32 %s10627_s21, 4  ;;  %s66_s24 = sshll.u32 %s10628_s23, 4  ;;  %s43_s22 = int_to_ptr.vmem [resolvable:$true] %s42_s22  ;;  %s10715_s24 = int_to_ptr.vmem [resolvable:$true] %s66_s24 }
   0x9   :  { %s10325_s27 = scalar_lea.hbm %s12441_s1, 256 }
   0xa   :  { %p10326_p0 = scmp.ne.s32.totalorder %s12441_s1, %s10325_s27  ;;  %p10329_p1 = scmp.lt.u32.totalorder %s10325_s27, %s12441_s1 }
   0xc   :  { %p10331_p2 = pnand %p10329_p1, %p10326_p0 }
   0xe   :  { %10334 = shalt.err (!%p10331_p2)
}
   0xf   :  { %s10335_s14 = scalar_lea.vmem %s43_s22, 256  ;;  %p10340_p4 = scmp.lt.s32.totalorder %s43_s22, %s43_s22 }
  0x10   :  { %p10336_p3 = scmp.ne.s32.totalorder %s43_s22, %s10335_s14  ;;  %p10341_p5 = scmp.lt.s32.totalorder %s10335_s14, %s10335_s14 }
  0x12   :  { %p10342_p6 = por %p10341_p5, %p10340_p4 }
  0x14   :  { %p10343_p7 = pnand %p10342_p6, %p10336_p3 }
  0x16   :  { %10346 = shalt.err (!%p10343_p7)
}
  0x17   :  { %s10629_s15 = smov 128   ;;  %s10630_s16 = smov 8  }
  0x18   :  { %48 = dma.hbm_to_vmem [thread:$0]  %s12441_s1, 256, %s43_s22, [#allocation6], %s10629_s15, %s10629_s15, %s10630_s16  }
  0x19   :  { %s10347_s21 = scalar_lea.hbm %s12443_s3, 8192 }
  0x1a   :  { %p10348_p8 = scmp.ne.s32.totalorder %s12443_s3, %s10347_s21  ;;  %p10351_p9 = scmp.lt.u32.totalorder %s10347_s21, %s12443_s3 }
  0x1c   :  { %p10353_p10 = pnand %p10351_p9, %p10348_p8 }
  0x1e   :  { %10356 = shalt.err (!%p10353_p10)
}
  0x1f   :  { %s10357_s28 = scalar_lea.vmem %s10715_s24, 8192  ;;  %p10362_p12 = scmp.lt.s32.totalorder %s10715_s24, %s10715_s24 }
  0x20   :  { %p10358_p11 = scmp.ne.s32.totalorder %s10715_s24, %s10357_s28  ;;  %p10363_p13 = scmp.lt.s32.totalorder %s10357_s28, %s10357_s28 }
  0x22   :  { %p10364_p0 = por %p10363_p13, %p10362_p12 }
  0x24   :  { %p10365_p1 = pnand %p10364_p0, %p10358_p11 }
  0x26   :  { %10368 = shalt.err (!%p10365_p1)
}
  0x27   :  { %s10631_s1 = smov 256   ;;  %s10632_s22 = smov 16  }
  0x28   :  { %72 = dma.hbm_to_vmem [thread:$0]  %s12443_s3, 8192, %s10715_s24, [#allocation9], %s10631_s1, %s10631_s1, %s10632_s22  }
  0x29   :  { %s10633_s13 = smov [#allocation11]   ;;  %s10634_s17 = smov [#allocation14]  }
  0x2a   :  { %s89_s14 = sshll.u32 %s10633_s13, 4  ;;  %s110_s18 = sshll.u32 %s10634_s17, 4  ;;  %s90_s14 = int_to_ptr.vmem [resolvable:$true] %s89_s14  ;;  %s10752_s18 = int_to_ptr.vmem [resolvable:$true] %s110_s18 }
  0x2b   :  { %s10369_s21 = scalar_lea.hbm %s12445_s5, 256 }
  0x2c   :  { %p10370_p2 = scmp.ne.s32.totalorder %s12445_s5, %s10369_s21  ;;  %p10373_p3 = scmp.lt.u32.totalorder %s10369_s21, %s12445_s5 }
  0x2e   :  { %p10375_p4 = pnand %p10373_p3, %p10370_p2 }
  0x30   :  { %10378 = shalt.err (!%p10375_p4)
}
  0x31   :  { %s10379_s3 = scalar_lea.vmem %s90_s14, 256  ;;  %p10384_p6 = scmp.lt.s32.totalorder %s90_s14, %s90_s14 }
  0x32   :  { %p10380_p5 = scmp.ne.s32.totalorder %s90_s14, %s10379_s3  ;;  %p10385_p7 = scmp.lt.s32.totalorder %s10379_s3, %s10379_s3 }
  0x34   :  { %p10386_p8 = por %p10385_p7, %p10384_p6 }
  0x36   :  { %p10387_p9 = pnand %p10386_p8, %p10380_p5 }
  0x38   :  { %10390 = shalt.err (!%p10387_p9)
}
  0x39   :  { %92 = dma.hbm_to_vmem [thread:$0]  %s12445_s5, 256, %s90_s14, [#allocation12]  }
  0x3a   :  { %s10391_s13 = scalar_lea.hbm %s12447_s7, 12288 }
  0x3b   :  { %p10392_p10 = scmp.ne.s32.totalorder %s12447_s7, %s10391_s13  ;;  %p10395_p11 = scmp.lt.u32.totalorder %s10391_s13, %s12447_s7 }
  0x3d   :  { %p10397_p12 = pnand %p10395_p11, %p10392_p10 }
  0x3f   :  { %10400 = shalt.err (!%p10397_p12)
}
  0x40   :  { %s10401_s23 = scalar_lea.vmem %s10752_s18, 12288  ;;  %p10406_p0 = scmp.lt.s32.totalorder %s10752_s18, %s10752_s18 }
  0x41   :  { %p10402_p13 = scmp.ne.s32.totalorder %s10752_s18, %s10401_s23  ;;  %p10407_p1 = scmp.lt.s32.totalorder %s10401_s23, %s10401_s23 }
  0x43   :  { %p10408_p2 = por %p10407_p1, %p10406_p0 }
  0x45   :  { %p10409_p3 = pnand %p10408_p2, %p10402_p13 }
  0x47   :  { %10412 = shalt.err (!%p10409_p3)
}
  0x48   :  { %116 = dma.hbm_to_vmem [thread:$0]  %s12447_s7, 12288, %s10752_s18, [#allocation15], %s10629_s15, %s10629_s15, %s10630_s16  }
  0x49   :  { %s10635_s25 = smov [#allocation17]   ;;  %s10636_s27 = smov [#allocation2]  }
  0x4a   :  { %s134_s26 = sshll.u32 %s10635_s25, 4  ;;  %s30_s3 = sshll.u32 %s10636_s27, 4  ;;  %s135_s26 = int_to_ptr.vmem [resolvable:$true] %s134_s26  ;;  %s10786_s3 = int_to_ptr.vmem [resolvable:$true] %s30_s3 }
  0x4b   :  { %s10413_s29 = scalar_lea.hbm %s12449_s9, 512 }
  0x4c   :  { %p10414_p4 = scmp.ne.s32.totalorder %s12449_s9, %s10413_s29  ;;  %p10417_p5 = scmp.lt.u32.totalorder %s10413_s29, %s12449_s9 }
  0x4e   :  { %p10419_p6 = pnand %p10417_p5, %p10414_p4 }
  0x50   :  { %10422 = shalt.err (!%p10419_p6)
}
  0x51   :  { %s10423_s7 = scalar_lea.vmem %s135_s26, 512  ;;  %p10428_p8 = scmp.lt.s32.totalorder %s135_s26, %s135_s26 }
  0x52   :  { %p10424_p7 = scmp.ne.s32.totalorder %s135_s26, %s10423_s7  ;;  %p10429_p9 = scmp.lt.s32.totalorder %s10423_s7, %s10423_s7 }
  0x54   :  { %p10430_p10 = por %p10429_p9, %p10428_p8 }
  0x56   :  { %p10431_p11 = pnand %p10430_p10, %p10424_p7 }
  0x58   :  { %10434 = shalt.err (!%p10431_p11)
}
  0x59   :  { %140 = dma.hbm_to_vmem [thread:$0]  %s12449_s9, 512, %s135_s26, [#allocation18], %s10631_s1, %s10631_s1, %s10632_s22  }
  0x5a   :  { %s10435_s5 = scalar_lea.hbm %s12440_s0, 512 }
  0x5b   :  { %p10436_p12 = scmp.ne.s32.totalorder %s12440_s0, %s10435_s5  ;;  %p10439_p13 = scmp.lt.u32.totalorder %s10435_s5, %s12440_s0 }
  0x5d   :  { %p10441_p0 = pnand %p10439_p13, %p10436_p12 }
  0x5f   :  { %10444 = shalt.err (!%p10441_p0)
}
  0x60   :  { %s10445_s28 = scalar_lea.vmem %s10786_s3, 512  ;;  %p10450_p2 = scmp.lt.s32.totalorder %s10786_s3, %s10786_s3 }
  0x61   :  { %p10446_p1 = scmp.ne.s32.totalorder %s10786_s3, %s10445_s28  ;;  %p10451_p3 = scmp.lt.s32.totalorder %s10445_s28, %s10445_s28 }
  0x63   :  { %p10452_p4 = por %p10451_p3, %p10450_p2 }
  0x65   :  { %p10453_p5 = pnand %p10452_p4, %p10446_p1 }
  0x67   :  { %10456 = shalt.err (!%p10453_p5)
}
  0x68   :  { %36 = dma.hbm_to_vmem [thread:$0]  %s12440_s0, 512, %s10786_s3, [#allocation3], %s10629_s15, %s10629_s15, %s10630_s16  }
  0x69   :  { %s10637_s29 = smov [#allocation7]   ;;  %s10638_s13 = smov [#allocation10]  }
  0x6a   :  { %s54_s30 = sshll.u32 %s10637_s29, 4  ;;  %s79_s17 = sshll.u32 %s10638_s13, 4  ;;  %s55_s30 = int_to_ptr.vmem [resolvable:$true] %s54_s30  ;;  %s80_s17 = int_to_ptr.vmem [resolvable:$true] %s79_s17 }
  0x6b   :  { %s10457_s18 = scalar_lea.hbm %s12442_s2, 2048 }
  0x6c   :  { %p10458_p6 = scmp.ne.s32.totalorder %s12442_s2, %s10457_s18  ;;  %p10461_p7 = scmp.lt.u32.totalorder %s10457_s18, %s12442_s2 }
  0x6e   :  { %p10463_p8 = pnand %p10461_p7, %p10458_p6 }
  0x70   :  { %10466 = shalt.err (!%p10463_p8)
}
  0x71   :  { %s10467_s0 = scalar_lea.vmem %s55_s30, 2048  ;;  %p10472_p10 = scmp.lt.s32.totalorder %s55_s30, %s55_s30 }
  0x72   :  { %p10468_p9 = scmp.ne.s32.totalorder %s55_s30, %s10467_s0  ;;  %p10473_p11 = scmp.lt.s32.totalorder %s10467_s0, %s10467_s0 }
  0x74   :  { %p10474_p12 = por %p10473_p11, %p10472_p10 }
  0x76   :  { %p10475_p13 = pnand %p10474_p12, %p10468_p9 }
  0x78   :  { %10478 = shalt.err (!%p10475_p13)
}
  0x79   :  { %60 = dma.hbm_to_vmem [thread:$0]  %s12442_s2, 2048, %s55_s30, [#allocation6], %s10629_s15, %s10629_s15, %s10630_s16  }
  0x7a   :  { %s10479_s24 = scalar_lea.hbm %s12444_s4, 32 }
  0x7b   :  { %p10480_p0 = scmp.ne.s32.totalorder %s12444_s4, %s10479_s24  ;;  %p10483_p1 = scmp.lt.u32.totalorder %s10479_s24, %s12444_s4 }
  0x7d   :  { %p10485_p2 = pnand %p10483_p1, %p10480_p0 }
  0x7f   :  { %10488 = shalt.err (!%p10485_p2)
}
  0x80   :  { %s10489_s13 = scalar_lea.vmem %s80_s17, 32  ;;  %p10494_p4 = scmp.lt.s32.totalorder %s80_s17, %s80_s17 }
  0x81   :  { %p10490_p3 = scmp.ne.s32.totalorder %s80_s17, %s10489_s13  ;;  %p10495_p5 = scmp.lt.s32.totalorder %s10489_s13, %s10489_s13 }
  0x83   :  { %p10496_p6 = por %p10495_p5, %p10494_p4 }
  0x85   :  { %p10497_p7 = pnand %p10496_p6, %p10490_p3 }
  0x87   :  { %10500 = shalt.err (!%p10497_p7)
}
  0x88   :  { %82 = dma.hbm_to_vmem [thread:$0]  %s12444_s4, 32, %s80_s17, [#allocation9]  }
  0x89   :  { %s10639_s19 = smov [#allocation13]   ;;  %s10640_s18 = smov [#allocation16]  }
  0x8a   :  { %s98_s7 = sshll.u32 %s10639_s19, 4  ;;  %s122_s20 = sshll.u32 %s10640_s18, 4  ;;  %s99_s7 = int_to_ptr.vmem [resolvable:$true] %s98_s7  ;;  %s10850_s20 = int_to_ptr.vmem [resolvable:$true] %s122_s20 }
  0x8b   :  { %s10501_s5 = scalar_lea.hbm %s12446_s6, 6144 }
  0x8c   :  { %p10502_p8 = scmp.ne.s32.totalorder %s12446_s6, %s10501_s5  ;;  %p10505_p9 = scmp.lt.u32.totalorder %s10501_s5, %s12446_s6 }
  0x8e   :  { %p10507_p10 = pnand %p10505_p9, %p10502_p8 }
  0x90   :  { %10510 = shalt.err (!%p10507_p10)
}
  0x91   :  { %s10511_s4 = scalar_lea.vmem %s99_s7, 6144  ;;  %p10516_p12 = scmp.lt.s32.totalorder %s99_s7, %s99_s7 }
  0x92   :  { %p10512_p11 = scmp.ne.s32.totalorder %s99_s7, %s10511_s4  ;;  %p10517_p13 = scmp.lt.s32.totalorder %s10511_s4, %s10511_s4 }
  0x94   :  { %p10518_p0 = por %p10517_p13, %p10516_p12 }
  0x96   :  { %p10519_p1 = pnand %p10518_p0, %p10512_p11 }
  0x98   :  { %10522 = shalt.err (!%p10519_p1)
}
  0x99   :  { %104 = dma.hbm_to_vmem [thread:$0]  %s12446_s6, 6144, %s99_s7, [#allocation12], %s10629_s15, %s10629_s15, %s10630_s16  }
  0x9a   :  { %s10523_s9 = scalar_lea.hbm %s12448_s8, 2048 }
  0x9b   :  { %p10524_p2 = scmp.ne.s32.totalorder %s12448_s8, %s10523_s9  ;;  %p10527_p3 = scmp.lt.u32.totalorder %s10523_s9, %s12448_s8 }
  0x9d   :  { %p10529_p4 = pnand %p10527_p3, %p10524_p2 }
  0x9f   :  { %10532 = shalt.err (!%p10529_p4)
}
  0xa0   :  { %s10533_s30 = scalar_lea.vmem %s10850_s20, 2048  ;;  %p10538_p6 = scmp.lt.s32.totalorder %s10850_s20, %s10850_s20 }
  0xa1   :  { %p10534_p5 = scmp.ne.s32.totalorder %s10850_s20, %s10533_s30  ;;  %p10539_p7 = scmp.lt.s32.totalorder %s10533_s30, %s10533_s30 }
  0xa3   :  { %p10540_p8 = por %p10539_p7, %p10538_p6 }
  0xa5   :  { %p10541_p9 = pnand %p10540_p8, %p10534_p5 }
  0xa7   :  { %10544 = shalt.err (!%p10541_p9)
}
  0xa8   :  { %128 = dma.hbm_to_vmem [thread:$0]  %s12448_s8, 2048, %s10850_s20, [#allocation15], %s10629_s15, %s10629_s15, %s10630_s16  }
  0xa9   :  { %s10641_s7 = smov [#allocation19]   ;;  %s10642_s21 = smov [#allocation20]  }
  0xaa   :  { %s146_s18 = sshll.u32 %s10641_s7, 4  ;;  %s158_s23 = sshll.u32 %s10642_s21, 4  ;;  %s147_s18 = int_to_ptr.vmem [resolvable:$true] %s146_s18  ;;  %s10887_s23 = int_to_ptr.vmem [resolvable:$true] %s158_s23 }
  0xab   :  { %s10545_s3 = scalar_lea.hbm %s12450_s10, 24576 }
  0xac   :  { %p10546_p10 = scmp.ne.s32.totalorder %s12450_s10, %s10545_s3  ;;  %p10549_p11 = scmp.lt.u32.totalorder %s10545_s3, %s12450_s10 }
  0xae   :  { %p10551_p12 = pnand %p10549_p11, %p10546_p10 }
  0xb0   :  { %10554 = shalt.err (!%p10551_p12)
}
  0xb1   :  { %s10555_s8 = scalar_lea.vmem %s147_s18, 24576  ;;  %p10560_p0 = scmp.lt.s32.totalorder %s147_s18, %s147_s18 }
  0xb2   :  { %p10556_p13 = scmp.ne.s32.totalorder %s147_s18, %s10555_s8  ;;  %p10561_p1 = scmp.lt.s32.totalorder %s10555_s8, %s10555_s8 }
  0xb4   :  { %p10562_p2 = por %p10561_p1, %p10560_p0 }
  0xb6   :  { %p10563_p3 = pnand %p10562_p2, %p10556_p13 }
  0xb8   :  { %10566 = shalt.err (!%p10563_p3)
}
  0xb9   :  { %152 = dma.hbm_to_vmem [thread:$0]  %s12450_s10, 24576, %s147_s18, [#allocation18], %s10629_s15, %s10629_s15, %s10630_s16  }
  0xba   :  { %s10567_s9 = scalar_lea.hbm %s12451_s11, 24576 }
  0xbb   :  { %p10568_p4 = scmp.ne.s32.totalorder %s12451_s11, %s10567_s9  ;;  %p10571_p5 = scmp.lt.u32.totalorder %s10567_s9, %s12451_s11 }
  0xbd   :  { %p10573_p6 = pnand %p10571_p5, %p10568_p4 }
  0xbf   :  { %10576 = shalt.err (!%p10573_p6)
}
  0xc0   :  { %s10577_s30 = scalar_lea.vmem %s10887_s23, 24576  ;;  %p10582_p8 = scmp.lt.s32.totalorder %s10887_s23, %s10887_s23 }
  0xc1   :  { %p10578_p7 = scmp.ne.s32.totalorder %s10887_s23, %s10577_s30  ;;  %p10583_p9 = scmp.lt.s32.totalorder %s10577_s30, %s10577_s30 }
  0xc3   :  { %p10584_p10 = por %p10583_p9, %p10582_p8 }
  0xc5   :  { %p10585_p11 = pnand %p10584_p10, %p10578_p7 }
  0xc7   :  { %10588 = shalt.err (!%p10585_p11)
}
  0xc8   :  { %164 = dma.hbm_to_vmem [thread:$0]  %s12451_s11, 24576, %s10887_s23, [#allocation21], %s10629_s15, %s10629_s15, %s10630_s16  }
  0xc9   :  { %10611 = dma.done.wait [#allocation3], 512  }
  0xca   :  { %10612 = vsyncadd [#allocation3], 4294966784 }
  0xcb   :  { %10613 = dma.done.wait [#allocation6], 2304  }
  0xcc   :  { %10614 = vsyncadd [#allocation6], 4294964992 }
  0xcd   :  { %10615 = dma.done.wait [#allocation9], 8224  }
  0xce   :  { %10616 = vsyncadd [#allocation9], 4294959072 }
  0xcf   :  { %10617 = dma.done.wait [#allocation12], 6400  }
  0xd0   :  { %10618 = vsyncadd [#allocation12], 4294960896 }
  0xd1   :  { %10619 = dma.done.wait [#allocation15], 14336  }
  0xd2   :  { %10620 = vsyncadd [#allocation15], 4294952960 }
  0xd3   :  { %10621 = dma.done.wait [#allocation18], 25088  }
  0xd4   :  { %10622 = vsyncadd [#allocation18], 4294942208 }
  0xd5   :  { %10623 = dma.done.wait [#allocation21], 24576  }
  0xd6   :  { %10624 = vsyncadd [#allocation21], 4294942720  ;;  %v10643_v0 = vmov 0.0|0.0   ;;  %vm10644_vm0 = vmmov 0   ;;  %v10645_v1 = vmov 0.0   ;;  %v225_v2 = vld [vmem:[#allocation7] sm:$0xff]  ;;  %v320_v48 = vlaneseq }
  0xd7   :  { %8408 = vmatprep.subr.bf16.mxu1 %v10643_v0  ;;  %8370 = vmatprep.mubr.msk.f32.mxu1 %vm10644_vm0, %v10645_v1  ;;  %v226_v3 = vld [vmem:[#allocation7 + $0x8] sm:$0xff]  ;;  %v227_v4 = vld [vmem:[#allocation7 + $0x10] sm:$0xff]  ;;  %v228_v6 = vld [vmem:[#allocation7 + $0x18] sm:$0xff]  ;;  %vm243_vm1 = vcmask 1041409   ;;  %v10646_v46 = vmov 1966171168  }
  0xd8   :  { %v8409_v5 = vpack.c.bf16 %v226_v3, %v225_v2  ;;  %v8412_v7 = vpack.c.bf16 %v228_v6, %v227_v4  ;;  %v229_v8 = vld [vmem:[#allocation7 + $0x20] sm:$0xff]  ;;  %v230_v9 = vld [vmem:[#allocation7 + $0x28] sm:$0xff]  ;;  %v202_v10 = vld [vmem:[#allocation2] sm:$0xff]  ;;  %v318_v47 = vunpack.c.l.s4 %v10646_v46  ;;  %v10945_v50 = vshrl.u32 %v320_v48, 7  ;;  %s10649_s11 = smov [#allocation22]  }
  0xd9   :  { %v203_v11 = vld [vmem:[#allocation2 + $0x8] sm:$0xff]  ;;  %v231_v12 = vld [vmem:[#allocation7 + $0x30] sm:$0xff]  ;;  %v204_v14 = vld [vmem:[#allocation2 + $0x10] sm:$0xff]  ;;  %v8415_v17 = vpack.c.bf16 %v230_v9, %v229_v8  ;;  %vm582_vm2 = vcmask 1040384   ;;  %vm595_vm4 = vcmask 1046528   ;;  %vm10648_vm5 = vmmov 1  }
  0xda   :  { %8410 = vmatpush3.bf16.msra.mxu1 %v8409_v5  ;;  %v232_v13 = vld [vmem:[#allocation7 + $0x38] sm:$0xff]  ;;  %v205_v15 = vld [vmem:[#allocation2 + $0x18] sm:$0xff]  ;;  %v211_v16 = vadd.f32 %v203_v11, %v202_v10  ;;  %v233_v21 = vld [vmem:[#allocation7 + $0x40] sm:$0xff]  ;;  %v319_v49 = vunpack.c.0.s8 %v318_v47  ;;  %12552 = vst [vmem:[#allocation31_spill] sm:$0xff] %v10945_v50  ;;  %v10952_v54 = vsub.s32 0, %v10945_v50  ;;  %s7544_s15 = sshll.u32 %s10649_s11, 4  ;;  %s7545_s15 = int_to_ptr.vmem [resolvable:$true] %s7544_s15 }
  0xdb   :  { %8411 = vmatprep.subr.bf16.mxu1 %v10643_v0  ;;  %v218_v18 = vadd.f32 %v205_v15, %v204_v14  ;;  %v234_v22 = vld [vmem:[#allocation7 + $0x48] sm:$0xff]  ;;  %v8418_v23 = vpack.c.bf16 %v232_v13, %v231_v12  ;;  %v235_v26 = vld [vmem:[#allocation7 + $0x50] sm:$0xff]  ;;  %v236_v27 = vld [vmem:[#allocation7 + $0x58] sm:$0xff]  ;;  %s10589_s16 = scalar_lea.vmem %s7545_s15, 1024  ;;  %p10594_p13 = scmp.lt.s32.totalorder %s7545_s15, %s7545_s15 }
  0xdc   :  { %v212_v19 = vrot.slane %v211_v16, 4  ;;  %v8421_v28 = vpack.c.bf16 %v234_v22, %v233_v21  ;;  %v237_v31 = vld [vmem:[#allocation7 + $0x60] sm:$0xff]  ;;  %v238_v32 = vld [vmem:[#allocation7 + $0x68] sm:$0xff]  ;;  %v8424_v33 = vpack.c.bf16 %v236_v27, %v235_v26  ;;  %v239_v36 = vld [vmem:[#allocation7 + $0x70] sm:$0xff]  ;;  %v10948_v51 = vsub.s32 %v319_v49, %v10945_v50  ;;  %12554 = vst [vmem:[#allocation33_spill] sm:$0xff] %v10952_v54  ;;  %p10590_p12 = scmp.ne.s32.totalorder %s7545_s15, %s10589_s16  ;;  %p10595_p0 = scmp.lt.s32.totalorder %s10589_s16, %s10589_s16 }
  0xdd   :  { %v219_v20 = vrot.slane %v218_v18, 4  ;;  %v240_v37 = vld [vmem:[#allocation7 + $0x78] sm:$0xff]  ;;  %v8427_v38 = vpack.c.bf16 %v238_v32, %v237_v31  ;;  %v10307_v61 = vld [vmem:[#allocation2] sm:$0xff]  ;;  %v10310_v3 = vld [vmem:[#allocation2 + $0x18] sm:$0xff] }
  0xde   :  { %8413 = vmatpush3.bf16.msra.mxu1 %v8412_v7  ;;  %v213_v24 = vadd.f32 %v212_v19, %v211_v16  ;;  %v8430_v41 = vpack.c.bf16 %v240_v37, %v239_v36  ;;  %v9273_v45 = vld [vmem:[#allocation13 + $0x4] ss:$8 sps:$4 sm:$0xff]   ;;  %12553 = vst [vmem:[#allocation32_spill] sm:$0xff] %v10948_v51  ;;  %v9274_v26 = vld [vmem:[#allocation13 + $0x10] ss:$8 sps:$4 sm:$0xff]   ;;  %vm10994_vm3 = vmneg %vm582_vm2  ;;  %p10596_p1 = por %p10595_p0, %p10594_p13 }
  0xdf   :  { %8414 = vmatprep.subr.bf16.mxu1 %v10643_v0  ;;  %v220_v25 = vadd.f32 %v219_v20, %v218_v18  ;;  %v10308_v63 = vld [vmem:[#allocation2 + $0x8] sm:$0xff]  ;;  %v9316_v46 = vld [vmem:[#allocation13 + $0x134] ss:$8 sps:$4 sm:$0xff]   ;;  %v9318_v48 = vld [vmem:[#allocation13 + $0x130] ss:$8 sps:$4 sm:$0xff]  }
  0xe0   :  { %v214_v29 = vrot.slane %v213_v24, 2  ;;  %v9279_v27 = vld [vmem:[#allocation13 + $0x24] ss:$8 sps:$4 sm:$0xff]   ;;  %v9283_v32 = vld [vmem:[#allocation13 + $0x40] ss:$8 sps:$4 sm:$0xff]   ;;  %vm11000_vm6 = vmpackc.low %vm10648_vm5, %vm10994_vm3  ;;  %p10597_p2 = pnand %p10596_p1, %p10590_p12 }
  0xe1   :  { %v221_v30 = vrot.slane %v220_v25, 2  ;;  %v9285_v31 = vld [vmem:[#allocation13 + $0x44] ss:$8 sps:$4 sm:$0xff]   ;;  %v9300_v37 = vld [vmem:[#allocation13 + $0x100] ss:$8 sps:$4 sm:$0xff]   ;;  %vm11007_vm7 = vmpackc.low %vm595_vm4, %vm10648_vm5 }
  0xe2   :  { %8416 = vmatpush3.bf16.msra.mxu1 %v8415_v17  ;;  %v215_v34 = vadd.f32 %v214_v29, %v213_v24  ;;  %v9276_v24 = vld [vmem:[#allocation13 + $0x14] ss:$8 sps:$4 sm:$0xff]   ;;  %v9298_v36 = vld [vmem:[#allocation13 + $0x104] ss:$8 sps:$4 sm:$0xff]   ;;  %v9295_v47 = vld [vmem:[#allocation13 + $0x80] ss:$8 sps:$4 sm:$0xff]  }
  0xe3   :  { %8417 = vmatprep.subr.bf16.mxu1 %v10643_v0  ;;  %v222_v35 = vadd.f32 %v221_v30, %v220_v25  ;;  %v9282_v29 = vld [vmem:[#allocation13 + $0x34] ss:$8 sps:$4 sm:$0xff]   ;;  %v9280_v30 = vld [vmem:[#allocation13 + $0x30] ss:$8 sps:$4 sm:$0xff]   ;;  %915 = vmatprep.subr.bf16.mxu0 %v9298_v36 }
  0xe4   :  { %v216_v39 = vrot.slane %v215_v34, 1  ;;  %916 = vmatpush1.bf16.msra.mxu0 %v9300_v37  ;;  %v9303_v49 = vld [vmem:[#allocation13 + $0x94] ss:$8 sps:$4 sm:$0xff]  }
  0xe5   :  { %v223_v40 = vrot.slane %v222_v35, 1 }
  0xe6   :  { %8419 = vmatpush3.bf16.msra.mxu1 %v8418_v23  ;;  %v217_v42 = vadd.f32 %v216_v39, %v215_v34  ;;  %v9286_v34 = vld [vmem:[#allocation13 + $0x50] ss:$8 sps:$4 sm:$0xff]   ;;  %v9289_v39 = vld [vmem:[#allocation13 + $0x60] ss:$8 sps:$4 sm:$0xff]  }
  0xe7   :  { %8420 = vmatprep.subr.bf16.mxu1 %v10643_v0  ;;  %v224_v43 = vadd.f32 %v223_v40, %v222_v35  ;;  %v9291_v35 = vld [vmem:[#allocation13 + $0x64] ss:$8 sps:$4 sm:$0xff]   ;;  %v9306_v40 = vld [vmem:[#allocation13 + $0x110] ss:$8 sps:$4 sm:$0xff]  }
  0xe9   :  { %v244_v44 = vsel %vm243_vm1, %v224_v43, %v217_v42  ;;  %v9310_v42 = vld [vmem:[#allocation13 + $0x124] ss:$8 sps:$4 sm:$0xff]   ;;  %v9292_v43 = vld [vmem:[#allocation13 + $0x70] ss:$8 sps:$4 sm:$0xff]  }
  0xea   :  { %8422 = vmatpush3.bf16.msra.mxu1 %v8421_v28 }
  0xeb   :  { %8423 = vmatprep.subr.bf16.mxu1 %v10643_v0 }
  0xee   :  { %8425 = vmatpush3.bf16.msra.mxu1 %v8424_v33 }
  0xef   :  { %8426 = vmatprep.subr.bf16.mxu1 %v10643_v0 }
  0xf2   :  { %8428 = vmatpush3.bf16.msra.mxu1 %v8427_v38 }
  0xf3   :  { %8429 = vmatprep.subr.bf16.mxu1 %v10643_v0 }
  0xf6   :  { %8431 = vmatpush3.bf16.msra.mxu1 %v8430_v41 }
  0xf7   :  { %8432 = vmatprep.subr.bf16.mxu1 %v10643_v0 }
  0xf9   :  { %8371 = vmatmul.mubr.f32.vlgmr.msra.gmra.mrb[0].mxu1 %v244_v44  ;;  %v9312_v44 = vld [vmem:[#allocation13 + $0x120] ss:$8 sps:$4 sm:$0xff]  }
  0xfa   :  { %8434 = vmatpush3.bf16.msra.mxu1 %v8409_v5  ;;  %8405 = vmatprep.mubr.msk.f32.mxu1 %vm10644_vm0, %v10645_v1  ;;  %v10309_v1 = vld [vmem:[#allocation2 + $0x10] sm:$0xff] }
  0xfb   :  { %8435 = vmatprep.subr.bf16.mxu1 %v10643_v0 }
  0xfe   :  { %8437 = vmatpush3.bf16.msra.mxu1 %v8412_v7 }
  0xff   :  { %8438 = vmatprep.subr.bf16.mxu1 %v10643_v0 }
 0x102   :  { %8440 = vmatpush3.bf16.msra.mxu1 %v8415_v17 }
 0x103   :  { %8441 = vmatprep.subr.bf16.mxu1 %v10643_v0 }
 0x106   :  { %8443 = vmatpush3.bf16.msra.mxu1 %v8418_v23  ;;  %v9271_v23 = vld [vmem:[#allocation13] ss:$8 sps:$4 sm:$0xff]  }
 0x107   :  { %8444 = vmatprep.subr.bf16.mxu1 %v10643_v0 }
 0x10a   :  { %8446 = vmatpush3.bf16.msra.mxu1 %v8421_v28  ;;  %v9277_v28 = vld [vmem:[#allocation13 + $0x20] ss:$8 sps:$4 sm:$0xff]  }
 0x10b   :  { %8447 = vmatprep.subr.bf16.mxu1 %v10643_v0 }
 0x10e   :  { %8449 = vmatpush3.bf16.msra.mxu1 %v8424_v33  ;;  %v9288_v33 = vld [vmem:[#allocation13 + $0x54] ss:$8 sps:$4 sm:$0xff]  }
 0x10f   :  { %8450 = vmatprep.subr.bf16.mxu1 %v10643_v0 }
 0x112   :  { %8452 = vmatpush3.bf16.msra.mxu1 %v8427_v38  ;;  %v9304_v38 = vld [vmem:[#allocation13 + $0x114] ss:$8 sps:$4 sm:$0xff]  }
 0x113   :  { %8453 = vmatprep.subr.bf16.mxu1 %v10643_v0  ;;  %917 = vmatprep.subr.bf16.mxu0 %v9304_v38 }
 0x114   :  { %918 = vmatpush1.bf16.msra.mxu0 %v9306_v40 }
 0x115   :  { %919 = vmatprep.subr.bf16.mxu0 %v9310_v42 }
 0x116   :  { %8455 = vmatpush3.bf16.msra.mxu1 %v8430_v41  ;;  %v9294_v41 = vld [vmem:[#allocation13 + $0x74] ss:$8 sps:$4 sm:$0xff]  }
 0x117   :  { %862 = vmatprep.subr.bf16.mxu1 %v9273_v45  ;;  %v9297_v45 = vld [vmem:[#allocation13 + $0x84] ss:$8 sps:$4 sm:$0xff]  }
 0x118   :  { %920 = vmatpush1.bf16.msra.mxu0 %v9312_v44 }
 0x119   :  { %921 = vmatprep.subr.bf16.mxu0 %v9316_v46 }
 0x11c   :  { %922 = vmatpush1.bf16.msra.mxu0 %v9318_v48 }
 0x1cc   :  { %v312_v52 = vpop.f32.mrb[0].mxu1 }
 0x1cd   :  { %v323_v53 = vrot.slane %v312_v52, %v10948_v51  ;;  %v8372_v55 = vpop.f32.mrb[1].mxu1  ;;  %v9322_v52 = vld [vmem:[#allocation13 + $0x144] ss:$8 sps:$4 sm:$0xff]  }
 0x1ce   :  { %v9324_v55 = vld [vmem:[#allocation13 + $0x140] ss:$8 sps:$4 sm:$0xff]   ;;  %923 = vmatprep.subr.bf16.mxu0 %v9322_v52 }
 0x1cf   :  { %v324_v56 = vcombine.high %v323_v53, %v323_v53  ;;  %v331_v57 = vrot.slane %v323_v53, %v10948_v51  ;;  %v9301_v53 = vld [vmem:[#allocation13 + $0x90] ss:$8 sps:$4 sm:$0xff]   ;;  %924 = vmatpush1.bf16.msra.mxu0 %v9324_v55 }
 0x1d1   :  { %v338_v58 = vrot.slane %v324_v56, %v10948_v51  ;;  %v342_v59 = vrot.slane %v331_v57, %v10952_v54  ;;  %v9309_v56 = vld [vmem:[#allocation13 + $0xa4] ss:$8 sps:$4 sm:$0xff]   ;;  %v9328_v57 = vld [vmem:[#allocation13 + $0x154] ss:$8 sps:$4 sm:$0xff]  }
 0x1d2   :  { %925 = vmatprep.subr.bf16.mxu0 %v9328_v57 }
 0x1d3   :  { %v346_v60 = vrot.slane %v338_v58, %v10952_v54  ;;  %v10958_v62 = vsub.f32 %v10307_v61, %v342_v59  ;;  %v10960_v0 = vsub.f32 %v10308_v63, %v342_v59  ;;  %v9307_v58 = vld [vmem:[#allocation13 + $0xa0] ss:$8 sps:$4 sm:$0xff]   ;;  %v9330_v59 = vld [vmem:[#allocation13 + $0x150] ss:$8 sps:$4 sm:$0xff]   ;;  %v9334_v61 = vld [vmem:[#allocation13 + $0x164] ss:$8 sps:$4 sm:$0xff]  }
 0x1d4   :  { %v9313_v63 = vld [vmem:[#allocation13 + $0xb0] ss:$8 sps:$4 sm:$0xff]   ;;  %926 = vmatpush1.bf16.msra.mxu0 %v9330_v59 }
 0x1d5   :  { %v10962_v2 = vsub.f32 %v10309_v1, %v346_v60  ;;  %v10964_v4 = vsub.f32 %v10310_v3, %v346_v60  ;;  %v353_v5 = vmul.f32 %v10958_v62, %v10958_v62  ;;  %v354_v6 = vmul.f32 %v10960_v0, %v10960_v0  ;;  %v9315_v60 = vld [vmem:[#allocation13 + $0xb4] ss:$8 sps:$4 sm:$0xff]   ;;  %v9336_v1 = vld [vmem:[#allocation13 + $0x160] ss:$8 sps:$4 sm:$0xff]   ;;  %v9321_v3 = vld [vmem:[#allocation13 + $0xc4] ss:$8 sps:$4 sm:$0xff]   ;;  %927 = vmatprep.subr.bf16.mxu0 %v9334_v61 }
 0x1d7   :  { %v355_v7 = vmul.f32 %v10962_v2, %v10962_v2  ;;  %v356_v8 = vmul.f32 %v10964_v4, %v10964_v4  ;;  %v357_v9 = vadd.f32 %v354_v6, %v353_v5  ;;  %v9340_v5 = vld [vmem:[#allocation13 + $0x174] ss:$8 sps:$4 sm:$0xff]   ;;  %v9319_v6 = vld [vmem:[#allocation13 + $0xc0] ss:$8 sps:$4 sm:$0xff]  }
 0x1d8   :  { %928 = vmatpush1.bf16.msra.mxu0 %v9336_v1 }
 0x1d9   :  { %v358_v10 = vrot.slane %v357_v9, 4  ;;  %v364_v11 = vadd.f32 %v356_v8, %v355_v7  ;;  %v9327_v7 = vld [vmem:[#allocation13 + $0xd4] ss:$8 sps:$4 sm:$0xff]   ;;  %929 = vmatprep.subr.bf16.mxu0 %v9340_v5  ;;  %v9325_v8 = vld [vmem:[#allocation13 + $0xd0] ss:$8 sps:$4 sm:$0xff]  }
 0x1db   :  { %v359_v12 = vadd.f32 %v358_v10, %v357_v9  ;;  %v365_v13 = vrot.slane %v364_v11, 4  ;;  %v9333_v9 = vld [vmem:[#allocation13 + $0xe4] ss:$8 sps:$4 sm:$0xff]   ;;  %v9331_v10 = vld [vmem:[#allocation13 + $0xe0] ss:$8 sps:$4 sm:$0xff]  }
 0x1dd   :  { %v360_v14 = vrot.slane %v359_v12, 2  ;;  %v366_v15 = vadd.f32 %v365_v13, %v364_v11  ;;  %v9339_v11 = vld [vmem:[#allocation13 + $0xf4] ss:$8 sps:$4 sm:$0xff]   ;;  %v9342_v13 = vld [vmem:[#allocation13 + $0x170] ss:$8 sps:$4 sm:$0xff]  }
 0x1de   :  { %930 = vmatpush1.bf16.msra.mxu0 %v9342_v13  ;;  %v1047_v13 = vld [vmem:[#allocation8 + $0x28] sm:$0xff] }
 0x1df   :  { %v361_v16 = vadd.f32 %v360_v14, %v359_v12  ;;  %v367_v17 = vrot.slane %v366_v15, 2  ;;  %v9337_v12 = vld [vmem:[#allocation13 + $0xf0] ss:$8 sps:$4 sm:$0xff]   ;;  %v12453_v14 = vmov 0  }
 0x1e0   :  { %947 = vmatprep.mubr.bf16.mxu0 %v12453_v14 }
 0x1e1   :  { %v362_v18 = vrot.slane %v361_v16, 1  ;;  %v368_v19 = vadd.f32 %v367_v17, %v366_v15  ;;  %v1043_v15 = vld [vmem:[#allocation8 + $0x8] sm:$0xff] }
 0x1e3   :  { %v369_v20 = vrot.slane %v368_v19, 1  ;;  %v363_v21 = vadd.f32 %v362_v18, %v361_v16  ;;  %v1045_v16 = vld [vmem:[#allocation8 + $0x18] sm:$0xff] }
 0x1e4   :  { %v10976_v17 = vpack.c.bf16 %v1045_v16, %v1043_v15  ;;  %v1049_v15 = vld [vmem:[#allocation8 + $0x38] sm:$0xff]  ;;  %v12559_v16 = vmov 0 }
 0x1e5   :  { %v370_v22 = vadd.f32 %v369_v20, %v368_v19  ;;  %v12560_v16 = vsel %vm11000_vm6, 4294967295, %v12559_v16 }
 0x1e6   :  { %12555 = vst [vmem:[#allocation34_spill] sm:$0xff] %v10976_v17  ;;  %12561 = vst [vmem:[#allocation36_spill] sm:$0xff] %v12560_v16 }
 0x1e7   :  { %v373_v25 = vsel %vm243_vm1, %v370_v22, %v363_v21 }
 0x1e8   :  { %8406 = vmatmul.mubr.f32.vlgmr.msra.gmra.mrb[2].mxu1 %v373_v25 }
 0x1e9   :  { %863 = vmatpush1.bf16.msra.mxu1 %v9271_v23 }
 0x1ea   :  { %864 = vmatprep.subr.bf16.mxu1 %v9276_v24 }
 0x1ed   :  { %865 = vmatpush1.bf16.msra.mxu1 %v9274_v26 }
 0x1ee   :  { %866 = vmatprep.subr.bf16.mxu1 %v9279_v27 }
 0x1f1   :  { %867 = vmatpush1.bf16.msra.mxu1 %v9277_v28  ;;  %v208_v28 = vld [vmem:[#allocation10] sm:$0x3] }
 0x1f2   :  { %868 = vmatprep.subr.bf16.mxu1 %v9282_v29  ;;  %v10985_v29 = vsub.s32 1, %v10945_v50 }
 0x1f4   :  { %12556 = vst [vmem:[#allocation35_spill] sm:$0xff] %v10985_v29 }
 0x1f5   :  { %869 = vmatpush1.bf16.msra.mxu1 %v9280_v30  ;;  %v489_v30 = vrot.slane %v208_v28, %v10952_v54 }
 0x1f6   :  { %870 = vmatprep.subr.bf16.mxu1 %v9285_v31 }
 0x1f9   :  { %871 = vmatpush1.bf16.msra.mxu1 %v9283_v32 }
 0x1fa   :  { %872 = vmatprep.subr.bf16.mxu1 %v9288_v33 }
 0x1fd   :  { %873 = vmatpush1.bf16.msra.mxu1 %v9286_v34  ;;  %v497_v34 = vrot.slane %v208_v28, %v10985_v29 }
 0x1fe   :  { %874 = vmatprep.subr.bf16.mxu1 %v9291_v35 }
 0x201   :  { %875 = vmatpush1.bf16.msra.mxu1 %v9289_v39 }
 0x202   :  { %876 = vmatprep.subr.bf16.mxu1 %v9294_v41 }
 0x205   :  { %877 = vmatpush1.bf16.msra.mxu1 %v9292_v43 }
 0x206   :  { %878 = vmatprep.subr.bf16.mxu1 %v9297_v45 }
 0x209   :  { %879 = vmatpush1.bf16.msra.mxu1 %v9295_v47 }
 0x20a   :  { %880 = vmatprep.subr.bf16.mxu1 %v9303_v49 }
 0x20d   :  { %881 = vmatpush1.bf16.msra.mxu1 %v9301_v53 }
 0x20e   :  { %882 = vmatprep.subr.bf16.mxu1 %v9309_v56 }
 0x211   :  { %883 = vmatpush1.bf16.msra.mxu1 %v9307_v58 }
 0x212   :  { %884 = vmatprep.subr.bf16.mxu1 %v9315_v60 }
 0x215   :  { %885 = vmatpush1.bf16.msra.mxu1 %v9313_v63 }
 0x216   :  { %886 = vmatprep.subr.bf16.mxu1 %v9321_v3 }
 0x219   :  { %887 = vmatpush1.bf16.msra.mxu1 %v9319_v6 }
 0x21a   :  { %888 = vmatprep.subr.bf16.mxu1 %v9327_v7  ;;  %v1042_v7 = vld [vmem:[#allocation8] sm:$0xff] }
 0x21d   :  { %889 = vmatpush1.bf16.msra.mxu1 %v9325_v8  ;;  %v1044_v8 = vld [vmem:[#allocation8 + $0x10] sm:$0xff] }
 0x21e   :  { %890 = vmatprep.subr.bf16.mxu1 %v9333_v9 }
 0x221   :  { %891 = vmatpush1.bf16.msra.mxu1 %v9331_v10 }
 0x222   :  { %892 = vmatprep.subr.bf16.mxu1 %v9339_v11 }
 0x225   :  { %893 = vmatpush1.bf16.msra.mxu1 %v9337_v12 }
 0x226   :  { %8457 = vmatprep.subr.bf16.mxu1 %v10976_v17 }
 0x2bb   :  { %v441_v18 = vpop.f32.mrb[2].mxu1 }
 0x2bc   :  { %v452_v19 = vrot.slane %v441_v18, %v10948_v51  ;;  %v8407_v20 = vpop.f32.mrb[3].mxu1 }
 0x2bd   :  { %v12562_v20 = vmov 0 }
 0x2be   :  { %v453_v21 = vcombine.high %v452_v19, %v452_v19  ;;  %v460_v22 = vrot.slane %v452_v19, %v10948_v51  ;;  %v12563_v20 = vsel %vm11007_vm7, 4294967295, %v12562_v20 }
 0x2bf   :  { %12564 = vst [vmem:[#allocation37_spill] sm:$0xff] %v12563_v20 }
 0x2c0   :  { %v467_v23 = vrot.slane %v453_v21, %v10948_v51  ;;  %v471_v24 = vrot.slane %v460_v22, %v10952_v54  ;;  %v11011_v21 = vpack.c.bf16 %v1044_v8, %v1042_v7  ;;  %v1073_v7 = vld [vmem:[#allocation8 + $0xf8] sm:$0xff] }
 0x2c2   :  { %v475_v25 = vrot.slane %v467_v23, %v10952_v54  ;;  %v478_v26 = vadd.f32 1e-05, %v471_v24 }
 0x2c4   :  { %v479_v27 = vadd.f32 1e-05, %v475_v25  ;;  %10087 = vrsqrt.f32 %v478_v26  ;;  %v11013_v25 = vpack.c.bf16 %v1049_v15, %v1047_v13  ;;  %v1075_v13 = vld [vmem:[#allocation8 + $0x108] sm:$0xff]  ;;  %v1077_v15 = vld [vmem:[#allocation8 + $0x118] sm:$0xff] }
 0x2c6   :  { %10089 = vrsqrt.f32 %v479_v27 }
 0x2ce   :  { %v10088_v31 = vpop.eup %10087 }
 0x2cf   :  { %v482_v32 = vmul.f32 %v10088_v31, %v10958_v62  ;;  %v483_v33 = vmul.f32 %v10088_v31, %v10960_v0  ;;  %v1046_v31 = vld [vmem:[#allocation8 + $0x20] sm:$0xff] }
 0x2d0   :  { %v10090_v35 = vpop.eup %10089 }
 0x2d1   :  { %v490_v36 = vmul.f32 %v489_v30, %v482_v32  ;;  %v491_v37 = vmul.f32 %v489_v30, %v483_v33  ;;  %v484_v38 = vmul.f32 %v10090_v35, %v10962_v2  ;;  %v485_v39 = vmul.f32 %v10090_v35, %v10964_v4  ;;  %v1048_v32 = vld [vmem:[#allocation8 + $0x30] sm:$0xff]  ;;  %v1051_v33 = vld [vmem:[#allocation8 + $0x48] sm:$0xff] }
 0x2d2   :  { %v11021_v35 = vpack.c.bf16 %v1048_v32, %v1046_v31  ;;  %v1083_v32 = vld [vmem:[#allocation8 + $0x148] sm:$0xff] }
 0x2d3   :  { %v498_v40 = vadd.f32 %v497_v34, %v490_v36  ;;  %v499_v41 = vadd.f32 %v497_v34, %v491_v37  ;;  %v492_v42 = vmul.f32 %v489_v30, %v484_v38  ;;  %v493_v43 = vmul.f32 %v489_v30, %v485_v39  ;;  %v1050_v39 = vld [vmem:[#allocation8 + $0x40] sm:$0xff] }
 0x2d5   :  { %v7562_v44 = vmul.f32 -1.442695, %v498_v40  ;;  %v7563_v45 = vmul.f32 -1.442695, %v499_v41  ;;  %v500_v46 = vadd.f32 %v497_v34, %v492_v42  ;;  %v501_v47 = vadd.f32 %v497_v34, %v493_v43  ;;  %v1053_v34 = vld [vmem:[#allocation8 + $0x58] sm:$0xff] }
 0x2d6   :  { %v11026_v38 = vpack.c.bf16 %v1053_v34, %v1051_v33  ;;  %v1057_v42 = vld [vmem:[#allocation8 + $0x78] sm:$0xff] }
 0x2d7   :  { %10091 = vpow2.f32 %v7562_v44  ;;  %v7564_v62 = vmul.f32 -1.442695, %v500_v46  ;;  %v7565_v0 = vmul.f32 -1.442695, %v501_v47  ;;  %v1085_v33 = vld [vmem:[#allocation8 + $0x158] sm:$0xff] }
 0x2d8   :  { %10093 = vpow2.f32 %v7563_v45  ;;  %v11079_v34 = vpack.c.bf16 %v1085_v33, %v1083_v32  ;;  %v11118_v32 = vld [vmem:[#allocation11 + $0x8] sm:$0x1f]  ;;  %v206_v33 = vld [vmem:[#allocation5] sm:$0x77] }
 0x2d9   :  { %10095 = vpow2.f32 %v7564_v62  ;;  %v1056_v62 = vld [vmem:[#allocation8 + $0x70] sm:$0xff]  ;;  %12572 = vst [vmem:[#allocation45_spill] sm:$0xff] %v11118_v32 }
 0x2da   :  { %10097 = vpow2.f32 %v7565_v0  ;;  %v1059_v0 = vld [vmem:[#allocation8 + $0x88] sm:$0xff] }
 0x2e1   :  { %v10092_v48 = vpop.eup %10091 }
 0x2e2   :  { %v10094_v49 = vpop.eup %10093  ;;  %v514_v52 = vadd.f32 1.0, %v10092_v48  ;;  %v1061_v48 = vld [vmem:[#allocation8 + $0x98] sm:$0xff] }
 0x2e3   :  { %v10096_v2 = vpop.eup %10095  ;;  %v515_v53 = vadd.f32 1.0, %v10094_v49 }
 0x2e4   :  { %v10098_v4 = vpop.eup %10097  ;;  %10099 = vrcp.f32 %v514_v52  ;;  %v516_v55 = vadd.f32 1.0, %v10096_v2  ;;  %v11042_v52 = vpack.c.bf16 %v1061_v48, %v1059_v0  ;;  %v1058_v2 = vld [vmem:[#allocation8 + $0x80] sm:$0xff]  ;;  %v1093_v0 = vld [vmem:[#allocation8 + $0x198] sm:$0xff] }
 0x2e5   :  { %10101 = vrcp.f32 %v515_v53  ;;  %v517_v56 = vadd.f32 1.0, %v10098_v4  ;;  %v1060_v53 = vld [vmem:[#allocation8 + $0x90] sm:$0xff]  ;;  %v1063_v4 = vld [vmem:[#allocation8 + $0xa8] sm:$0xff] }
 0x2e6   :  { %10103 = vrcp.f32 %v516_v55  ;;  %v1065_v55 = vld [vmem:[#allocation8 + $0xb8] sm:$0xff] }
 0x2e7   :  { %10105 = vrcp.f32 %v517_v56  ;;  %v11045_v56 = vpack.c.bf16 %v1060_v53, %v1058_v2  ;;  %v1090_v2 = vld [vmem:[#allocation8 + $0x180] sm:$0xff]  ;;  %v1092_v53 = vld [vmem:[#allocation8 + $0x190] sm:$0xff] }
 0x2ee   :  { %v10100_v57 = vpop.eup %10099 }
 0x2ef   :  { %v10102_v58 = vpop.eup %10101  ;;  %v526_v59 = vmul.f32 %v10100_v57, %v498_v40  ;;  %v1052_v40 = vld [vmem:[#allocation8 + $0x50] sm:$0xff]  ;;  %v11048_v57 = vpack.c.bf16 %v1065_v55, %v1063_v4  ;;  %v11093_v4 = vpack.c.bf16 %v1092_v53, %v1090_v2  ;;  %v1095_v55 = vld [vmem:[#allocation8 + $0x1a8] sm:$0xff] }
 0x2f0   :  { %v10104_v60 = vpop.eup %10103  ;;  %v527_v61 = vmul.f32 %v10102_v58, %v499_v41  ;;  %v1055_v41 = vld [vmem:[#allocation8 + $0x68] sm:$0xff]  ;;  %v11029_v45 = vpack.c.bf16 %v1052_v40, %v1050_v39  ;;  %v1062_v58 = vld [vmem:[#allocation8 + $0xa0] sm:$0xff] }
 0x2f1   :  { %v10106_v1 = vpop.eup %10105  ;;  %v583_v3 = vrot.slane %v526_v59, 7  ;;  %v596_v5 = vrot.slane %v526_v59, 1  ;;  %v528_v6 = vmul.f32 %v10104_v60, %v500_v46  ;;  %v11032_v46 = vpack.c.bf16 %v1057_v42, %v1055_v41  ;;  %v1067_v60 = vld [vmem:[#allocation8 + $0xc8] sm:$0xff]  ;;  %v1089_v41 = vld [vmem:[#allocation8 + $0x178] sm:$0xff] }
 0x2f2   :  { %v584_v9 = vrot.slane %v527_v61, 7  ;;  %v609_v10 = vpack.c.bf16 %v527_v61, %v526_v59  ;;  %v597_v11 = vrot.slane %v527_v61, 1  ;;  %v529_v12 = vmul.f32 %v10106_v1, %v501_v47  ;;  %v1054_v47 = vld [vmem:[#allocation8 + $0x60] sm:$0xff]  ;;  %v1064_v59 = vld [vmem:[#allocation8 + $0xb0] sm:$0xff]  ;;  %v1069_v61 = vld [vmem:[#allocation8 + $0xd8] sm:$0xff] }
 0x2f3   :  { %v586_v24 = vrot.slane %v528_v6, 7  ;;  %v599_v28 = vrot.slane %v528_v6, 1  ;;  %v11039_v49 = vpack.c.bf16 %v1056_v62, %v1054_v47  ;;  %v11051_v63 = vpack.c.bf16 %v1064_v59, %v1062_v58  ;;  %v1087_v40 = vld [vmem:[#allocation8 + $0x168] sm:$0xff]  ;;  %v1097_v58 = vld [vmem:[#allocation8 + $0x1b8] sm:$0xff] }
 0x2f4   :  { %894 = vmatprep.mubr.bf16.mxu1 %v609_v10  ;;  %v585_v18 = vsel %vm582_vm2, %v583_v3, %v584_v9  ;;  %v598_v19 = vsel %vm595_vm4, %v596_v5, %v597_v11  ;;  %v612_v26 = vpack.c.bf16 %v529_v12, %v528_v6  ;;  %v587_v27 = vrot.slane %v529_v12, 7  ;;  %v1068_v5 = vld [vmem:[#allocation8 + $0xd0] sm:$0xff]  ;;  %v1071_v6 = vld [vmem:[#allocation8 + $0xe8] sm:$0xff]  ;;  %v1070_v10 = vld [vmem:[#allocation8 + $0xe0] sm:$0xff] }
 0x2f5   :  { %v7616_v22 = vpack.c.bf16 %v585_v18, %v583_v3  ;;  %v7623_v23 = vpack.c.bf16 %v597_v11, %v598_v19  ;;  %v600_v30 = vrot.slane %v529_v12, 1  ;;  %v11054_v1 = vpack.c.bf16 %v1069_v61, %v1067_v60  ;;  %v1066_v3 = vld [vmem:[#allocation8 + $0xc0] sm:$0xff]  ;;  %v1072_v11 = vld [vmem:[#allocation8 + $0xf0] sm:$0xff]  ;;  %v1091_v62 = vld [vmem:[#allocation8 + $0x188] sm:$0xff] }
 0x2f6   :  { %v588_v36 = vsel %vm582_vm2, %v586_v24, %v587_v27  ;;  %v11057_v8 = vpack.c.bf16 %v1068_v5, %v1066_v3  ;;  %v11060_v9 = vpack.c.bf16 %v1073_v7, %v1071_v6  ;;  %v11063_v12 = vpack.c.bf16 %v1072_v11, %v1070_v10  ;;  %v1074_v18 = vld [vmem:[#allocation8 + $0x100] sm:$0xff]  ;;  %v1076_v19 = vld [vmem:[#allocation8 + $0x110] sm:$0xff]  ;;  %v1099_v5 = vld [vmem:[#allocation8 + $0x1c8] sm:$0xff] }
 0x2f7   :  { %7617 = vmatmul.mubr.msk.bf16.vlgmr.msra.gmra.mrb[4].mxu1 %vm11000_vm6, %v7616_v22  ;;  %7624 = vmatmul.mubr.msk.bf16.vlgmr.msra.gmra.mrb[0].mxu0 %vm11007_vm7, %v7623_v23  ;;  %v601_v37 = vsel %vm595_vm4, %v599_v28, %v600_v30  ;;  %v7620_v43 = vpack.c.bf16 %v588_v36, %v586_v24  ;;  %v11067_v22 = vpack.c.bf16 %v1077_v15, %v1075_v13  ;;  %v1079_v24 = vld [vmem:[#allocation8 + $0x128] sm:$0xff]  ;;  %v1078_v28 = vld [vmem:[#allocation8 + $0x120] sm:$0xff]  ;;  %v1096_v61 = vld [vmem:[#allocation8 + $0x1b0] sm:$0xff] }
 0x2f8   :  { %904 = vmatprep.mubr.bf16.mxu1 %v612_v26  ;;  %957 = vmatprep.mubr.bf16.mxu0 %v12453_v14  ;;  %v7626_v44 = vpack.c.bf16 %v600_v30, %v601_v37  ;;  %v11069_v23 = vpack.c.bf16 %v1076_v19, %v1074_v18  ;;  %v1081_v26 = vld [vmem:[#allocation8 + $0x138] sm:$0xff]  ;;  %v1080_v30 = vld [vmem:[#allocation8 + $0x130] sm:$0xff]  ;;  %v1082_v36 = vld [vmem:[#allocation8 + $0x140] sm:$0xff]  ;;  %v11085_v42 = vpack.c.bf16 %v1089_v41, %v1087_v40 }
 0x2f9   :  { %8459 = vmatpush1.bf16.msra.mxu1 %v11011_v21  ;;  %v11073_v27 = vpack.c.bf16 %v1081_v26, %v1079_v24  ;;  %v11075_v31 = vpack.c.bf16 %v1080_v30, %v1078_v28  ;;  %v1084_v37 = vld [vmem:[#allocation8 + $0x150] sm:$0xff]  ;;  %v11091_v48 = vpack.c.bf16 %v1093_v0, %v1091_v62  ;;  %v11097_v59 = vpack.c.bf16 %v1097_v58, %v1095_v55  ;;  %v1094_v60 = vld [vmem:[#allocation8 + $0x1a0] sm:$0xff]  ;;  %v1101_v6 = vld [vmem:[#allocation8 + $0x1d8] sm:$0xff] }
 0x2fa   :  { %8461 = vmatprep.subr.bf16.mxu1 %v11013_v25  ;;  %v11081_v39 = vpack.c.bf16 %v1084_v37, %v1082_v36  ;;  %v11099_v3 = vpack.c.bf16 %v1096_v61, %v1094_v60  ;;  %v11103_v7 = vpack.c.bf16 %v1101_v6, %v1099_v5  ;;  %v1098_v10 = vld [vmem:[#allocation8 + $0x1c0] sm:$0xff]  ;;  %v1100_v11 = vld [vmem:[#allocation8 + $0x1d0] sm:$0xff]  ;;  %v1103_v15 = vld [vmem:[#allocation8 + $0x1e8] sm:$0xff]  ;;  %v11121_v36 = vsub.s32 4, %v10945_v50 }
 0x2fb   :  { %12565 = vst [vmem:[#allocation38_spill] sm:$0xff] %v11097_v59  ;;  %v11105_v13 = vpack.c.bf16 %v1100_v11, %v1098_v10  ;;  %v1105_v18 = vld [vmem:[#allocation8 + $0x1f8] sm:$0xff]  ;;  %v1102_v19 = vld [vmem:[#allocation8 + $0x1e0] sm:$0xff]  ;;  %v1104_v26 = vld [vmem:[#allocation8 + $0x1f0] sm:$0xff]  ;;  %v621_v40 = vrot.slane %v11118_v32, %v10952_v54  ;;  %v973_v41 = vrot.slane %v206_v33, %v10952_v54 }
 0x2fc   :  { %12566 = vst [vmem:[#allocation39_spill] sm:$0xff] %v11099_v3  ;;  %12567 = vst [vmem:[#allocation40_spill] sm:$0xff] %v11103_v7  ;;  %v11108_v24 = vpack.c.bf16 %v1105_v18, %v1103_v15  ;;  %v11111_v28 = vpack.c.bf16 %v1104_v26, %v1102_v19  ;;  %v11116_v30 = vld [vmem:[#allocation11] sm:$0x1f]  ;;  %v977_v62 = vrot.slane %v206_v33, %v11121_v36  ;;  %v207_v26 = vld [vmem:[#allocation5 + $0x8] sm:$0x77] }
 0x2fd   :  { %8463 = vmatpush1.bf16.msra.mxu1 %v11021_v35  ;;  %12568 = vst [vmem:[#allocation41_spill] sm:$0xff] %v11105_v13  ;;  %12571 = vst [vmem:[#allocation44_spill] sm:$0xff] %v11116_v30  ;;  %v617_v37 = vrot.slane %v11116_v30, %v10952_v54  ;;  %v993_v5 = vrot.slane %v973_v41, %v10952_v54 }
 0x2fe   :  { %8465 = vmatprep.subr.bf16.mxu1 %v11026_v38  ;;  %12569 = vst [vmem:[#allocation42_spill] sm:$0xff] %v11108_v24  ;;  %12570 = vst [vmem:[#allocation43_spill] sm:$0xff] %v11111_v28  ;;  %v997_v18 = vrot.slane %v977_v62, %v10952_v54 }
 0x2ff   :  { %7621 = vmatmul.mubr.msk.bf16.gmra.mrb[8].mxu1 %vm11000_vm6, %v7620_v43  ;;  %7627 = vmatmul.mubr.msk.bf16.gmra.mrb[4].mxu0 %vm11007_vm7, %v7626_v44  ;;  %v1086_v43 = vld [vmem:[#allocation8 + $0x160] sm:$0xff]  ;;  %v1088_v44 = vld [vmem:[#allocation8 + $0x170] sm:$0xff]  ;;  %12573 = vst [vmem:[#allocation46_spill] sm:$0xff] %v11121_v36 }
 0x300   :  { %v11087_v47 = vpack.c.bf16 %v1088_v44, %v1086_v43 }
 0x301   :  { %8467 = vmatpush1.bf16.msra.mxu1 %v11029_v45 }
 0x302   :  { %8469 = vmatprep.subr.bf16.mxu1 %v11032_v46 }
 0x305   :  { %8471 = vmatpush1.bf16.msra.mxu1 %v11039_v49 }
 0x306   :  { %8473 = vmatprep.subr.bf16.mxu1 %v11042_v52 }
 0x309   :  { %8475 = vmatpush1.bf16.msra.mxu1 %v11045_v56 }
 0x30a   :  { %8477 = vmatprep.subr.bf16.mxu1 %v11048_v57 }
 0x30d   :  { %8479 = vmatpush1.bf16.msra.mxu1 %v11051_v63 }
 0x30e   :  { %8481 = vmatprep.subr.bf16.mxu1 %v11054_v1 }
 0x311   :  { %8483 = vmatpush1.bf16.msra.mxu1 %v11057_v8 }
 0x312   :  { %8485 = vmatprep.subr.bf16.mxu1 %v11060_v9 }
 0x315   :  { %8487 = vmatpush1.bf16.msra.mxu1 %v11063_v12 }
 0x316   :  { %8489 = vmatprep.subr.bf16.mxu1 %v11067_v22 }
 0x319   :  { %8491 = vmatpush1.bf16.msra.mxu1 %v11069_v23 }
 0x31a   :  { %8493 = vmatprep.subr.bf16.mxu1 %v11073_v27 }
 0x31d   :  { %8495 = vmatpush1.bf16.msra.mxu1 %v11075_v31 }
 0x31e   :  { %8497 = vmatprep.subr.bf16.mxu1 %v11079_v34 }
 0x321   :  { %8499 = vmatpush1.bf16.msra.mxu1 %v11081_v39 }
 0x322   :  { %8501 = vmatprep.subr.bf16.mxu1 %v11085_v42 }
 0x325   :  { %8503 = vmatpush1.bf16.msra.mxu1 %v11087_v47 }
 0x326   :  { %8505 = vmatprep.subr.bf16.mxu1 %v11091_v48 }
 0x329   :  { %8507 = vmatpush1.bf16.msra.mxu1 %v11093_v4 }
 0x32a   :  { %8509 = vmatprep.subr.bf16.mxu1 %v11097_v59 }
 0x32d   :  { %8511 = vmatpush1.bf16.msra.mxu1 %v11099_v3 }
 0x32e   :  { %8513 = vmatprep.subr.bf16.mxu1 %v11103_v7 }
 0x331   :  { %8515 = vmatpush1.bf16.msra.mxu1 %v11105_v13 }
 0x332   :  { %8517 = vmatprep.subr.bf16.mxu1 %v11108_v24 }
 0x335   :  { %8519 = vmatpush1.bf16.msra.mxu1 %v11111_v28 }
 0x336   :  { %8521 = vmatprep.subr.bf16.mxu1 %v10976_v17 }
 0x3ca   :  { %v896_v43 = vpop.f32.mrb[4].mxu1  ;;  %v949_v44 = vpop.f32.mrb[0].mxu0 }
 0x3cb   :  { %v897_v0 = vadd.f32 %v896_v43, %v617_v37  ;;  %v898_v2 = vpop.f32.mrb[5].mxu1  ;;  %v951_v53 = vpop.f32.mrb[1].mxu0 }
 0x3cc   :  { %v899_v55 = vadd.f32 %v898_v2, %v621_v40  ;;  %v900_v58 = vpop.f32.mrb[6].mxu1  ;;  %v953_v60 = vpop.f32.mrb[2].mxu0  ;;  %v981_v2 = vrot.slane %v207_v26, %v10952_v54 }
 0x3cd   :  { %v950_v61 = vadd.f32 %v949_v44, %v897_v0  ;;  %v901_v6 = vadd.f32 %v900_v58, %v617_v37  ;;  %v902_v10 = vpop.f32.mrb[7].mxu1  ;;  %v955_v11 = vpop.f32.mrb[3].mxu0 }
 0x3ce   :  { %v952_v15 = vadd.f32 %v951_v53, %v899_v55  ;;  %v903_v19 = vadd.f32 %v902_v10, %v621_v40  ;;  %v985_v53 = vrot.slane %v207_v26, %v11121_v36 }
 0x3cf   :  { %v954_v14 = vadd.f32 %v953_v60, %v901_v6  ;;  %v11131_v33 = vadd.f32 %v993_v5, %v950_v61 }
 0x3d0   :  { %v956_v20 = vadd.f32 %v955_v11, %v903_v19  ;;  %v11136_v16 = vadd.f32 %v997_v18, %v952_v15  ;;  %v1005_v32 = vrot.slane %v985_v53, %v10952_v54 }
 0x3d1   :  { %12574 = vst [vmem:[#allocation47_spill] sm:$0xff] %v11131_v33  ;;  %v11133_v43 = vadd.f32 %v993_v5, %v954_v14 }
 0x3d2   :  { %12576 = vst [vmem:[#allocation49_spill] sm:$0xff] %v11136_v16  ;;  %v11138_v44 = vadd.f32 %v997_v18, %v956_v20  ;;  %v906_v41 = vpop.f32.mrb[8].mxu1  ;;  %v959_v0 = vpop.f32.mrb[4].mxu0  ;;  %v1001_v20 = vrot.slane %v981_v2, %v10952_v54 }
 0x3d3   :  { %12575 = vst [vmem:[#allocation48_spill] sm:$0xff] %v11133_v43  ;;  %v1014_v62 = vadd.f32 %v11133_v43, %v11131_v33  ;;  %v907_v55 = vadd.f32 %v906_v41, %v617_v37  ;;  %v908_v58 = vpop.f32.mrb[9].mxu1  ;;  %v961_v60 = vpop.f32.mrb[5].mxu0 }
 0x3d4   :  { %12577 = vst [vmem:[#allocation50_spill] sm:$0xff] %v11138_v44  ;;  %v1021_v14 = vadd.f32 %v11138_v44, %v11136_v16  ;;  %v909_v61 = vadd.f32 %v908_v58, %v621_v40  ;;  %v910_v5 = vpop.f32.mrb[10].mxu1  ;;  %v963_v6 = vpop.f32.mrb[6].mxu0 }
 0x3d5   :  { %v1015_v10 = vrot.slane %v1014_v62, 4  ;;  %v960_v11 = vadd.f32 %v959_v0, %v907_v55  ;;  %v911_v15 = vadd.f32 %v910_v5, %v617_v37  ;;  %v912_v18 = vpop.f32.mrb[11].mxu1  ;;  %v965_v19 = vpop.f32.mrb[7].mxu0 }
 0x3d6   :  { %v1022_v26 = vrot.slane %v1021_v14, 4  ;;  %v962_v36 = vadd.f32 %v961_v60, %v909_v61  ;;  %v913_v41 = vadd.f32 %v912_v18, %v621_v40 }
 0x3d7   :  { %v964_v30 = vadd.f32 %v963_v6, %v911_v15  ;;  %v1016_v33 = vadd.f32 %v1015_v10, %v1014_v62  ;;  %v11147_v44 = vadd.f32 %v1001_v20, %v960_v11 }
 0x3d8   :  { %v1023_v50 = vadd.f32 %v1022_v26, %v1021_v14  ;;  %v966_v43 = vadd.f32 %v965_v19, %v913_v41  ;;  %v11151_v16 = vadd.f32 %v1005_v32, %v962_v36 }
 0x3d9   :  { %v11149_v58 = vadd.f32 %v1001_v20, %v964_v30  ;;  %v1017_v40 = vrot.slane %v1016_v33, 2 }
 0x3da   :  { %v11153_v0 = vadd.f32 %v1005_v32, %v966_v43  ;;  %v1024_v2 = vrot.slane %v1023_v50, 2 }
 0x3db   :  { %v1028_v37 = vadd.f32 %v11149_v58, %v11147_v44  ;;  %v1018_v5 = vadd.f32 %v1017_v40, %v1016_v33  ;;  %v9345_v33 = vld [vmem:[#allocation14 + $0x4] ss:$8 sps:$4 sm:$0xff]  }
 0x3dc   :  { %v1035_v53 = vadd.f32 %v11153_v0, %v11151_v16  ;;  %v1025_v61 = vadd.f32 %v1024_v2, %v1023_v50  ;;  %v9343_v50 = vld [vmem:[#allocation14] ss:$8 sps:$4 sm:$0xff]   ;;  %2154 = vmatprep.subr.bf16.mxu0 %v9345_v33 }
 0x3dd   :  { %v1029_v55 = vrot.slane %v1028_v37, 4  ;;  %v1019_v43 = vrot.slane %v1018_v5, 1  ;;  %2155 = vmatpush1.bf16.msra.mxu0 %v9343_v50 }
 0x3de   :  { %v1036_v60 = vrot.slane %v1035_v53, 4  ;;  %v1026_v10 = vrot.slane %v1025_v61, 1 }
 0x3df   :  { %v1030_v14 = vadd.f32 %v1029_v55, %v1028_v37  ;;  %v1020_v26 = vadd.f32 %v1019_v43, %v1018_v5 }
 0x3e0   :  { %v1037_v62 = vadd.f32 %v1036_v60, %v1035_v53  ;;  %v1027_v18 = vadd.f32 %v1026_v10, %v1025_v61 }
 0x3e1   :  { %v1031_v30 = vrot.slane %v1030_v14, 2 }
 0x3e2   :  { %v1038_v6 = vrot.slane %v1037_v62, 2 }
 0x3e3   :  { %v1032_v36 = vadd.f32 %v1031_v30, %v1030_v14 }
 0x3e4   :  { %v1039_v32 = vadd.f32 %v1038_v6, %v1037_v62 }
 0x3e5   :  { %v1033_v11 = vrot.slane %v1032_v36, 1 }
 0x3e6   :  { %v1040_v20 = vrot.slane %v1039_v32, 1 }
 0x3e7   :  { %v1034_v15 = vadd.f32 %v1033_v11, %v1032_v36  ;;  %v12578_v36 = vld [vmem:[#allocation47_spill] sm:$0xff]  ;;  %v12581_v11 = vld [vmem:[#allocation48_spill] sm:$0xff] }
 0x3e8   :  { %v1041_v19 = vadd.f32 %v1040_v20, %v1039_v32  ;;  %v12579_v32 = vld [vmem:[#allocation49_spill] sm:$0xff] }
 0x3e9   :  { %v1110_v37 = vsel %vm243_vm1, %v1034_v15, %v1020_v26  ;;  %v12583_v15 = vld [vmem:[#allocation50_spill] sm:$0xff] }
 0x3ea   :  { %v1111_v41 = vsel %vm243_vm1, %v1041_v19, %v1027_v18 }
 0x3eb   :  { %1178 = vmatprep.mubr.f32.mxu1 %v1111_v41 }
 0x3ec   :  { %1179 = vmatmul.mubr.f32.vlgmr.msra.gmra.mrb[12].mxu1 %v1110_v37 }
 0x3ed   :  { %8523 = vmatpush1.bf16.msra.mxu1 %v11011_v21 }
 0x3ee   :  { %8525 = vmatprep.subr.bf16.mxu1 %v11013_v25 }
 0x3f1   :  { %8527 = vmatpush1.bf16.msra.mxu1 %v11021_v35 }
 0x3f2   :  { %8529 = vmatprep.subr.bf16.mxu1 %v11026_v38 }
 0x3f5   :  { %8531 = vmatpush1.bf16.msra.mxu1 %v11029_v45 }
 0x3f6   :  { %8533 = vmatprep.subr.bf16.mxu1 %v11032_v46 }
 0x3f9   :  { %8535 = vmatpush1.bf16.msra.mxu1 %v11039_v49 }
 0x3fa   :  { %8537 = vmatprep.subr.bf16.mxu1 %v11042_v52 }
 0x3fd   :  { %8539 = vmatpush1.bf16.msra.mxu1 %v11045_v56 }
 0x3fe   :  { %8541 = vmatprep.subr.bf16.mxu1 %v11048_v57 }
 0x401   :  { %8543 = vmatpush1.bf16.msra.mxu1 %v11051_v63 }
 0x402   :  { %8545 = vmatprep.subr.bf16.mxu1 %v11054_v1 }
 0x405   :  { %8547 = vmatpush1.bf16.msra.mxu1 %v11057_v8 }
 0x406   :  { %8549 = vmatprep.subr.bf16.mxu1 %v11060_v9 }
 0x409   :  { %8551 = vmatpush1.bf16.msra.mxu1 %v11063_v12 }
 0x40a   :  { %8553 = vmatprep.subr.bf16.mxu1 %v11067_v22 }
 0x40d   :  { %8555 = vmatpush1.bf16.msra.mxu1 %v11069_v23 }
 0x40e   :  { %8557 = vmatprep.subr.bf16.mxu1 %v11073_v27 }
 0x411   :  { %8559 = vmatpush1.bf16.msra.mxu1 %v11075_v31 }
 0x412   :  { %8561 = vmatprep.subr.bf16.mxu1 %v11079_v34 }
 0x415   :  { %8563 = vmatpush1.bf16.msra.mxu1 %v11081_v39 }
 0x416   :  { %8565 = vmatprep.subr.bf16.mxu1 %v11085_v42 }
 0x419   :  { %8567 = vmatpush1.bf16.msra.mxu1 %v11087_v47 }
 0x41a   :  { %8569 = vmatprep.subr.bf16.mxu1 %v11091_v48 }
 0x41d   :  { %8571 = vmatpush1.bf16.msra.mxu1 %v11093_v4 }
 0x41e   :  { %8573 = vmatprep.subr.bf16.mxu1 %v11097_v59 }
 0x421   :  { %8575 = vmatpush1.bf16.msra.mxu1 %v11099_v3 }
 0x422   :  { %8577 = vmatprep.subr.bf16.mxu1 %v11103_v7 }
 0x425   :  { %8579 = vmatpush1.bf16.msra.mxu1 %v11105_v13 }
 0x426   :  { %8581 = vmatprep.subr.bf16.mxu1 %v11108_v24 }
 0x429   :  { %8583 = vmatpush1.bf16.msra.mxu1 %v11111_v28 }
 0x42a   :  { %8585 = vmatprep.subr.bf16.mxu1 %v10976_v17 }
 0x4bf   :  { %v1180_v2 = vpop.f32.mrb[12].mxu1 }
 0x4c0   :  { %v1182_v53 = vpop.f32.mrb[13].mxu1 }
 0x4c1   :  { %v1187_v40 = vcombine.low %v1180_v2, %v1182_v53 }
 0x4c3   :  { %v1194_v55 = vrot.slane %v1187_v40, %v10948_v51 }
 0x4c5   :  { %v1195_v60 = vcombine.high %v1194_v55, %v1194_v55  ;;  %v1202_v14 = vrot.slane %v1194_v55, %v10948_v51 }
 0x4c7   :  { %v1209_v62 = vrot.slane %v1195_v60, %v10948_v51  ;;  %v1213_v61 = vrot.slane %v1202_v14, %v10952_v54  ;;  %v1217_v5 = vrot.slane %v1202_v14, %v10985_v29 }
 0x4c9   :  { %v1221_v30 = vrot.slane %v1209_v62, %v10952_v54  ;;  %v1225_v6 = vrot.slane %v1209_v62, %v10985_v29  ;;  %v11201_v10 = vsub.f32 %v12578_v36, %v1213_v61  ;;  %v11204_v43 = vsub.f32 %v12579_v32, %v1217_v5 }
 0x4ca   :  { %v11207_v20 = vsub.f32 %v12581_v11, %v1213_v61  ;;  %v11210_v18 = vsub.f32 %v12583_v15, %v1217_v5 }
 0x4cb   :  { %12580 = vst [vmem:[#allocation47_spill] sm:$0xff] %v11204_v43  ;;  %v11213_v19 = vsub.f32 %v11147_v44, %v1221_v30  ;;  %v11216_v26 = vsub.f32 %v11151_v16, %v1225_v6  ;;  %v11219_v41 = vsub.f32 %v11149_v58, %v1221_v30  ;;  %v11222_v37 = vsub.f32 %v11153_v0, %v1225_v6 }
 0x4cc   :  { %12582 = vst [vmem:[#allocation49_spill] sm:$0xff] %v11207_v20  ;;  %12584 = vst [vmem:[#allocation48_spill] sm:$0xff] %v11210_v18  ;;  %v1238_v50 = vmul.f32 %v11201_v10, %v11201_v10  ;;  %v1239_v33 = vmul.f32 %v11204_v43, %v11204_v43  ;;  %v1240_v2 = vmul.f32 %v11207_v20, %v11207_v20 }
 0x4cd   :  { %12585 = vst [vmem:[#allocation50_spill] sm:$0xff] %v11213_v19  ;;  %12586 = vst [vmem:[#allocation51_spill] sm:$0xff] %v11216_v26  ;;  %v1241_v44 = vmul.f32 %v11210_v18, %v11210_v18  ;;  %v1242_v16 = vmul.f32 %v11213_v19, %v11213_v19  ;;  %v1243_v58 = vmul.f32 %v11216_v26, %v11216_v26 }
 0x4ce   :  { %12587 = vst [vmem:[#allocation52_spill] sm:$0xff] %v11219_v41  ;;  %12588 = vst [vmem:[#allocation53_spill] sm:$0xff] %v11222_v37  ;;  %v1244_v0 = vmul.f32 %v11219_v41, %v11219_v41  ;;  %v1245_v53 = vmul.f32 %v11222_v37, %v11222_v37  ;;  %v1246_v40 = vadd.f32 %v1240_v2, %v1238_v50 }
 0x4cf   :  { %v1253_v55 = vadd.f32 %v1241_v44, %v1239_v33 }
 0x4d0   :  { %v1267_v60 = vadd.f32 %v1245_v53, %v1243_v58  ;;  %v1260_v14 = vadd.f32 %v1244_v0, %v1242_v16  ;;  %v1247_v61 = vrot.slane %v1246_v40, 4 }
 0x4d1   :  { %v1254_v62 = vrot.slane %v1253_v55, 4 }
 0x4d2   :  { %v1268_v5 = vrot.slane %v1267_v60, 4  ;;  %v1261_v30 = vrot.slane %v1260_v14, 4  ;;  %v1248_v36 = vadd.f32 %v1247_v61, %v1246_v40  ;;  %v9363_v61 = vld [vmem:[#allocation14 + $0x64] ss:$8 sps:$4 sm:$0xff]  }
 0x4d3   :  { %v1255_v6 = vadd.f32 %v1254_v62, %v1253_v55  ;;  %v9358_v62 = vld [vmem:[#allocation14 + $0x50] ss:$8 sps:$4 sm:$0xff]  }
 0x4d4   :  { %v1269_v32 = vadd.f32 %v1268_v5, %v1267_v60  ;;  %v1262_v11 = vadd.f32 %v1261_v30, %v1260_v14  ;;  %v1249_v26 = vrot.slane %v1248_v36, 2  ;;  %v9355_v60 = vld [vmem:[#allocation14 + $0x40] ss:$8 sps:$4 sm:$0xff]   ;;  %v9360_v14 = vld [vmem:[#allocation14 + $0x54] ss:$8 sps:$4 sm:$0xff]  }
 0x4d5   :  { %v1256_v15 = vrot.slane %v1255_v6, 2  ;;  %v9361_v5 = vld [vmem:[#allocation14 + $0x60] ss:$8 sps:$4 sm:$0xff]   ;;  %v9366_v30 = vld [vmem:[#allocation14 + $0x74] ss:$8 sps:$4 sm:$0xff]  }
 0x4d6   :  { %v1270_v19 = vrot.slane %v1269_v32, 2  ;;  %v1263_v18 = vrot.slane %v1262_v11, 2  ;;  %v1250_v43 = vadd.f32 %v1249_v26, %v1248_v36  ;;  %v9354_v26 = vld [vmem:[#allocation14 + $0x34] ss:$8 sps:$4 sm:$0xff]   ;;  %v9369_v36 = vld [vmem:[#allocation14 + $0x84] ss:$8 sps:$4 sm:$0xff]  }
 0x4d7   :  { %v1257_v41 = vadd.f32 %v1256_v15, %v1255_v6  ;;  %v9364_v6 = vld [vmem:[#allocation14 + $0x70] ss:$8 sps:$4 sm:$0xff]  }
 0x4d8   :  { %v1271_v20 = vadd.f32 %v1270_v19, %v1269_v32  ;;  %v1264_v37 = vadd.f32 %v1263_v18, %v1262_v11  ;;  %v1251_v33 = vrot.slane %v1250_v43, 1  ;;  %v9351_v18 = vld [vmem:[#allocation14 + $0x24] ss:$8 sps:$4 sm:$0xff]   ;;  %v9349_v19 = vld [vmem:[#allocation14 + $0x20] ss:$8 sps:$4 sm:$0xff]  }
 0x4d9   :  { %v1258_v50 = vrot.slane %v1257_v41, 1  ;;  %v9367_v32 = vld [vmem:[#allocation14 + $0x80] ss:$8 sps:$4 sm:$0xff]   ;;  %v9372_v11 = vld [vmem:[#allocation14 + $0x94] ss:$8 sps:$4 sm:$0xff]  }
 0x4da   :  { %v1272_v2 = vrot.slane %v1271_v20, 1  ;;  %v1265_v44 = vrot.slane %v1264_v37, 1  ;;  %v1252_v0 = vadd.f32 %v1251_v33, %v1250_v43  ;;  %v9348_v43 = vld [vmem:[#allocation14 + $0x14] ss:$8 sps:$4 sm:$0xff]   ;;  %v9370_v15 = vld [vmem:[#allocation14 + $0x90] ss:$8 sps:$4 sm:$0xff]  }
 0x4db   :  { %v1259_v16 = vadd.f32 %v1258_v50, %v1257_v41  ;;  %2156 = vmatprep.subr.bf16.mxu0 %v9348_v43  ;;  %v9352_v41 = vld [vmem:[#allocation14 + $0x30] ss:$8 sps:$4 sm:$0xff]   ;;  %v9375_v50 = vld [vmem:[#allocation14 + $0xa4] ss:$8 sps:$4 sm:$0xff]   ;;  %v9373_v33 = vld [vmem:[#allocation14 + $0xa0] ss:$8 sps:$4 sm:$0xff]  }
 0x4dc   :  { %v1273_v58 = vadd.f32 %v1272_v2, %v1271_v20  ;;  %v1266_v53 = vadd.f32 %v1265_v44, %v1264_v37  ;;  %v9346_v20 = vld [vmem:[#allocation14 + $0x10] ss:$8 sps:$4 sm:$0xff]   ;;  %v9357_v37 = vld [vmem:[#allocation14 + $0x44] ss:$8 sps:$4 sm:$0xff]   ;;  %v9378_v2 = vld [vmem:[#allocation14 + $0xb4] ss:$8 sps:$4 sm:$0xff]  }
 0x4dd   :  { %2157 = vmatpush1.bf16.msra.mxu0 %v9346_v20  ;;  %v9376_v44 = vld [vmem:[#allocation14 + $0xb0] ss:$8 sps:$4 sm:$0xff]   ;;  %v9390_v20 = vld [vmem:[#allocation14 + $0xf4] ss:$8 sps:$4 sm:$0xff]  }
 0x4de   :  { %v1279_v40 = vsel %vm243_vm1, %v1273_v58, %v1259_v16  ;;  %v1278_v55 = vsel %vm243_vm1, %v1266_v53, %v1252_v0  ;;  %2158 = vmatprep.subr.bf16.mxu0 %v9351_v18  ;;  %v9381_v16 = vld [vmem:[#allocation14 + $0xc4] ss:$8 sps:$4 sm:$0xff]   ;;  %v9379_v58 = vld [vmem:[#allocation14 + $0xc0] ss:$8 sps:$4 sm:$0xff]   ;;  %v9384_v0 = vld [vmem:[#allocation14 + $0xd4] ss:$8 sps:$4 sm:$0xff]  }
 0x4df   :  { %1346 = vmatprep.mubr.f32.mxu1 %v1279_v40  ;;  %v9382_v53 = vld [vmem:[#allocation14 + $0xd0] ss:$8 sps:$4 sm:$0xff]   ;;  %v9387_v40 = vld [vmem:[#allocation14 + $0xe4] ss:$8 sps:$4 sm:$0xff]  }
 0x4e0   :  { %1347 = vmatmul.mubr.f32.vlgmr.msra.gmra.mrb[14].mxu1 %v1278_v55  ;;  %v9385_v55 = vld [vmem:[#allocation14 + $0xe0] ss:$8 sps:$4 sm:$0xff]   ;;  %v9388_v43 = vld [vmem:[#allocation14 + $0xf0] ss:$8 sps:$4 sm:$0xff]   ;;  %v9393_v18 = vld [vmem:[#allocation14 + $0x104] ss:$8 sps:$4 sm:$0xff]  }
 0x4e1   :  { %8587 = vmatpush1.bf16.msra.mxu1 %v11011_v21  ;;  %2159 = vmatpush1.bf16.msra.mxu0 %v9349_v19 }
 0x4e2   :  { %8589 = vmatprep.subr.bf16.mxu1 %v11013_v25  ;;  %2160 = vmatprep.subr.bf16.mxu0 %v9354_v26 }
 0x4e5   :  { %8591 = vmatpush1.bf16.msra.mxu1 %v11021_v35  ;;  %2161 = vmatpush1.bf16.msra.mxu0 %v9352_v41 }
 0x4e6   :  { %8593 = vmatprep.subr.bf16.mxu1 %v11026_v38  ;;  %2162 = vmatprep.subr.bf16.mxu0 %v9357_v37 }
 0x4e9   :  { %8595 = vmatpush1.bf16.msra.mxu1 %v11029_v45  ;;  %2163 = vmatpush1.bf16.msra.mxu0 %v9355_v60 }
 0x4ea   :  { %8597 = vmatprep.subr.bf16.mxu1 %v11032_v46  ;;  %2164 = vmatprep.subr.bf16.mxu0 %v9360_v14 }
 0x4ed   :  { %8599 = vmatpush1.bf16.msra.mxu1 %v11039_v49  ;;  %2165 = vmatpush1.bf16.msra.mxu0 %v9358_v62 }
 0x4ee   :  { %8601 = vmatprep.subr.bf16.mxu1 %v11042_v52  ;;  %2166 = vmatprep.subr.bf16.mxu0 %v9363_v61 }
 0x4f1   :  { %8603 = vmatpush1.bf16.msra.mxu1 %v11045_v56  ;;  %2167 = vmatpush1.bf16.msra.mxu0 %v9361_v5 }
 0x4f2   :  { %8605 = vmatprep.subr.bf16.mxu1 %v11048_v57  ;;  %2168 = vmatprep.subr.bf16.mxu0 %v9366_v30 }
 0x4f5   :  { %8607 = vmatpush1.bf16.msra.mxu1 %v11051_v63  ;;  %2169 = vmatpush1.bf16.msra.mxu0 %v9364_v6 }
 0x4f6   :  { %8609 = vmatprep.subr.bf16.mxu1 %v11054_v1  ;;  %2170 = vmatprep.subr.bf16.mxu0 %v9369_v36 }
 0x4f9   :  { %8611 = vmatpush1.bf16.msra.mxu1 %v11057_v8  ;;  %2171 = vmatpush1.bf16.msra.mxu0 %v9367_v32 }
 0x4fa   :  { %8613 = vmatprep.subr.bf16.mxu1 %v11060_v9  ;;  %2172 = vmatprep.subr.bf16.mxu0 %v9372_v11 }
 0x4fd   :  { %8615 = vmatpush1.bf16.msra.mxu1 %v11063_v12  ;;  %2173 = vmatpush1.bf16.msra.mxu0 %v9370_v15 }
 0x4fe   :  { %8617 = vmatprep.subr.bf16.mxu1 %v11067_v22  ;;  %2174 = vmatprep.subr.bf16.mxu0 %v9375_v50  ;;  %v12589_v50 = vld [vmem:[#allocation31_spill] sm:$0xff] }
 0x501   :  { %8619 = vmatpush1.bf16.msra.mxu1 %v11069_v23  ;;  %2175 = vmatpush1.bf16.msra.mxu0 %v9373_v33  ;;  %v11282_v33 = vsub.s32 2, %v12589_v50 }
 0x502   :  { %8621 = vmatprep.subr.bf16.mxu1 %v11073_v27  ;;  %2176 = vmatprep.subr.bf16.mxu0 %v9378_v2  ;;  %v12591_v2 = vld [vmem:[#allocation44_spill] sm:$0xff] }
 0x503   :  { %12590 = vst [vmem:[#allocation54_spill] sm:$0xff] %v11282_v33 }
 0x505   :  { %8623 = vmatpush1.bf16.msra.mxu1 %v11075_v31  ;;  %2177 = vmatpush1.bf16.msra.mxu0 %v9376_v44  ;;  %v1417_v44 = vrot.slane %v12591_v2, %v10985_v29 }
 0x506   :  { %8625 = vmatprep.subr.bf16.mxu1 %v11079_v34  ;;  %2178 = vmatprep.subr.bf16.mxu0 %v9381_v16 }
 0x509   :  { %8627 = vmatpush1.bf16.msra.mxu1 %v11081_v39  ;;  %2179 = vmatpush1.bf16.msra.mxu0 %v9379_v58  ;;  %v12592_v58 = vld [vmem:[#allocation45_spill] sm:$0xff] }
 0x50a   :  { %8629 = vmatprep.subr.bf16.mxu1 %v11085_v42  ;;  %2180 = vmatprep.subr.bf16.mxu0 %v9384_v0  ;;  %v1421_v0 = vrot.slane %v12592_v58, %v10985_v29 }
 0x50d   :  { %8631 = vmatpush1.bf16.msra.mxu1 %v11087_v47  ;;  %2181 = vmatpush1.bf16.msra.mxu0 %v9382_v53 }
 0x50e   :  { %8633 = vmatprep.subr.bf16.mxu1 %v11091_v48  ;;  %2182 = vmatprep.subr.bf16.mxu0 %v9387_v40  ;;  %v1433_v40 = vrot.slane %v12591_v2, %v11282_v33  ;;  %v12599_v2 = vld [vmem:[#allocation51_spill] sm:$0xff] }
 0x511   :  { %8635 = vmatpush1.bf16.msra.mxu1 %v11093_v4  ;;  %2183 = vmatpush1.bf16.msra.mxu0 %v9385_v55 }
 0x512   :  { %8637 = vmatprep.subr.bf16.mxu1 %v11097_v59  ;;  %2184 = vmatprep.subr.bf16.mxu0 %v9390_v20 }
 0x515   :  { %8639 = vmatpush1.bf16.msra.mxu1 %v11099_v3  ;;  %2185 = vmatpush1.bf16.msra.mxu0 %v9388_v43  ;;  %v12593_v43 = vld [vmem:[#allocation49_spill] sm:$0xff] }
 0x516   :  { %8641 = vmatprep.subr.bf16.mxu1 %v11103_v7  ;;  %2207 = vmatprep.subr.bf16.mxu0 %v9393_v18 }
 0x519   :  { %8643 = vmatpush1.bf16.msra.mxu1 %v11105_v13 }
 0x51a   :  { %8645 = vmatprep.subr.bf16.mxu1 %v11108_v24 }
 0x51d   :  { %8647 = vmatpush1.bf16.msra.mxu1 %v11111_v28 }
 0x51e   :  { %8649 = vmatprep.subr.bf16.mxu1 %v10976_v17 }
 0x5b3   :  { %v1348_v19 = vpop.f32.mrb[14].mxu1 }
 0x5b4   :  { %v1350_v26 = vpop.f32.mrb[15].mxu1 }
 0x5b5   :  { %v1355_v41 = vcombine.low %v1348_v19, %v1350_v26  ;;  %v1437_v19 = vrot.slane %v12592_v58, %v11282_v33  ;;  %v12594_v26 = vld [vmem:[#allocation47_spill] sm:$0xff] }
 0x5b7   :  { %v1362_v37 = vrot.slane %v1355_v41, %v10948_v51 }
 0x5b9   :  { %v1363_v60 = vcombine.high %v1362_v37, %v1362_v37  ;;  %v1370_v14 = vrot.slane %v1362_v37, %v10948_v51  ;;  %v12595_v37 = vld [vmem:[#allocation48_spill] sm:$0xff] }
 0x5bb   :  { %v1377_v62 = vrot.slane %v1363_v60, %v10948_v51  ;;  %v1381_v61 = vrot.slane %v1370_v14, %v10952_v54  ;;  %v1385_v5 = vrot.slane %v1370_v14, %v10985_v29 }
 0x5bd   :  { %v1389_v30 = vrot.slane %v1377_v62, %v10952_v54  ;;  %v1393_v6 = vrot.slane %v1377_v62, %v10985_v29  ;;  %v1398_v36 = vadd.f32 1e-05, %v1381_v61  ;;  %v1399_v32 = vadd.f32 1e-05, %v1385_v5  ;;  %v12596_v62 = vld [vmem:[#allocation52_spill] sm:$0xff] }
 0x5bf   :  { %v1400_v11 = vadd.f32 1e-05, %v1389_v30  ;;  %v1401_v15 = vadd.f32 1e-05, %v1393_v6  ;;  %10107 = vrsqrt.f32 %v1398_v36  ;;  %v12597_v6 = vld [vmem:[#allocation50_spill] sm:$0xff] }
 0x5c0   :  { %10109 = vrsqrt.f32 %v1399_v32  ;;  %v12598_v32 = vld [vmem:[#allocation53_spill] sm:$0xff] }
 0x5c1   :  { %10111 = vrsqrt.f32 %v1400_v11 }
 0x5c2   :  { %10113 = vrsqrt.f32 %v1401_v15 }
 0x5c9   :  { %v10108_v16 = vpop.eup %10107 }
 0x5ca   :  { %v10110_v53 = vpop.eup %10109  ;;  %v1406_v55 = vmul.f32 %v10108_v16, %v11201_v10  ;;  %v1408_v20 = vmul.f32 %v10108_v16, %v12593_v43 }
 0x5cb   :  { %v10112_v18 = vpop.eup %10111  ;;  %v1407_v41 = vmul.f32 %v10110_v53, %v12594_v26  ;;  %v1409_v60 = vmul.f32 %v10110_v53, %v12595_v37 }
 0x5cc   :  { %v10114_v14 = vpop.eup %10113  ;;  %v1412_v61 = vmul.f32 %v10112_v18, %v12596_v62  ;;  %v1422_v5 = vmul.f32 %v1417_v44, %v1406_v55  ;;  %v1424_v30 = vmul.f32 %v1417_v44, %v1408_v20  ;;  %v1410_v36 = vmul.f32 %v10112_v18, %v12597_v6 }
 0x5cd   :  { %v1413_v11 = vmul.f32 %v10114_v14, %v12598_v32  ;;  %v1425_v10 = vmul.f32 %v1421_v0, %v1409_v60  ;;  %v1423_v15 = vmul.f32 %v1421_v0, %v1407_v41  ;;  %v1411_v16 = vmul.f32 %v10114_v14, %v12599_v2 }
 0x5ce   :  { %v1438_v43 = vadd.f32 %v1433_v40, %v1422_v5  ;;  %v1440_v29 = vadd.f32 %v1433_v40, %v1424_v30  ;;  %v1426_v58 = vmul.f32 %v1417_v44, %v1410_v36  ;;  %v1428_v33 = vmul.f32 %v1417_v44, %v1412_v61 }
 0x5cf   :  { %v1439_v26 = vadd.f32 %v1437_v19, %v1423_v15  ;;  %v1441_v54 = vadd.f32 %v1437_v19, %v1425_v10  ;;  %v1427_v53 = vmul.f32 %v1421_v0, %v1411_v16  ;;  %v1429_v37 = vmul.f32 %v1421_v0, %v1413_v11 }
 0x5d0   :  { %v7628_v51 = vmul.f32 -1.442695, %v1438_v43  ;;  %v7630_v62 = vmul.f32 -1.442695, %v1440_v29  ;;  %v11300_v55 = vadd.f32 %v1433_v40, %v1426_v58  ;;  %v11302_v20 = vadd.f32 %v1433_v40, %v1428_v33 }
 0x5d1   :  { %v7629_v18 = vmul.f32 -1.442695, %v1439_v26  ;;  %v7631_v6 = vmul.f32 -1.442695, %v1441_v54  ;;  %v1443_v60 = vadd.f32 %v1437_v19, %v1427_v53  ;;  %v1445_v41 = vadd.f32 %v1437_v19, %v1429_v37 }
 0x5d2   :  { %10115 = vpow2.f32 %v7628_v51  ;;  %v7632_v44 = vmul.f32 -1.442695, %v11300_v55  ;;  %v7634_v0 = vmul.f32 -1.442695, %v11302_v20 }
 0x5d3   :  { %10117 = vpow2.f32 %v7630_v62  ;;  %v7633_v14 = vmul.f32 -1.442695, %v1443_v60  ;;  %v7635_v5 = vmul.f32 -1.442695, %v1445_v41 }
 0x5d4   :  { %10119 = vpow2.f32 %v7629_v18 }
 0x5d5   :  { %10121 = vpow2.f32 %v7631_v6 }
 0x5d6   :  { %10123 = vpow2.f32 %v7633_v14 }
 0x5d7   :  { %10125 = vpow2.f32 %v7635_v5 }
 0x5d8   :  { %10127 = vpow2.f32 %v7632_v44 }
 0x5d9   :  { %10129 = vpow2.f32 %v7634_v0 }
 0x5dc   :  { %v10116_v33 = vpop.eup %10115 }
 0x5dd   :  { %v10118_v40 = vpop.eup %10117  ;;  %v1470_v61 = vadd.f32 1.0, %v10116_v33 }
 0x5de   :  { %v10120_v30 = vpop.eup %10119  ;;  %v1472_v36 = vadd.f32 1.0, %v10118_v40 }
 0x5df   :  { %v10122_v19 = vpop.eup %10121  ;;  %10131 = vrcp.f32 %v1470_v61  ;;  %v1471_v51 = vadd.f32 1.0, %v10120_v30 }
 0x5e0   :  { %v10124_v32 = vpop.eup %10123  ;;  %10133 = vrcp.f32 %v1472_v36  ;;  %v1473_v11 = vadd.f32 1.0, %v10122_v19 }
 0x5e1   :  { %v10126_v10 = vpop.eup %10125  ;;  %10135 = vrcp.f32 %v1471_v51  ;;  %v1475_v15 = vadd.f32 1.0, %v10124_v32 }
 0x5e2   :  { %v10128_v2 = vpop.eup %10127  ;;  %10137 = vrcp.f32 %v1473_v11  ;;  %v1477_v16 = vadd.f32 1.0, %v10126_v10 }
 0x5e3   :  { %v10130_v58 = vpop.eup %10129  ;;  %10139 = vrcp.f32 %v1475_v15  ;;  %v1474_v53 = vadd.f32 1.0, %v10128_v2 }
 0x5e4   :  { %10141 = vrcp.f32 %v1477_v16  ;;  %v1476_v37 = vadd.f32 1.0, %v10130_v58 }
 0x5e5   :  { %10143 = vrcp.f32 %v1474_v53 }
 0x5e6   :  { %10145 = vrcp.f32 %v1476_v37 }
 0x5e9   :  { %v10132_v62 = vpop.eup %10131 }
 0x5ea   :  { %v10134_v18 = vpop.eup %10133  ;;  %v11306_v6 = vmul.f32 %v10132_v62, %v1438_v43 }
 0x5eb   :  { %v10136_v14 = vpop.eup %10135  ;;  %v11308_v5 = vmul.f32 %v10134_v18, %v1440_v29 }
 0x5ec   :  { %v10138_v44 = vpop.eup %10137  ;;  %v1495_v0 = vmul.f32 %v10136_v14, %v1439_v26  ;;  %v1606_v33 = vrot.slane %v11306_v6, 7  ;;  %v1630_v19 = vrot.slane %v11306_v6, 1 }
 0x5ed   :  { %v10140_v40 = vpop.eup %10139  ;;  %v1497_v61 = vmul.f32 %v10138_v44, %v1441_v54  ;;  %v1608_v30 = vrot.slane %v11308_v5, 7  ;;  %v1656_v36 = vpack.c.bf16 %v11308_v5, %v11306_v6  ;;  %v1631_v29 = vrot.slane %v11308_v5, 1  ;;  %v9391_v44 = vld [vmem:[#allocation14 + $0x100] ss:$8 sps:$4 sm:$0xff]   ;;  %v9448_v5 = vld [vmem:[#allocation14 + $0x230] ss:$8 sps:$4 sm:$0xff]  }
 0x5ee   :  { %v10142_v51 = vpop.eup %10141  ;;  %v1607_v32 = vrot.slane %v1495_v0, 7  ;;  %v11315_v43 = vmul.f32 %v10140_v40, %v1443_v60  ;;  %v1633_v11 = vrot.slane %v1495_v0, 1 }
 0x5ef   :  { %v10144_v10 = vpop.eup %10143  ;;  %v1610_v26 = vrot.slane %v1497_v61, 7  ;;  %v1609_v15 = vsel %vm582_vm2, %v1606_v33, %v1608_v30  ;;  %v11319_v2 = vmul.f32 %v10142_v51, %v1445_v41  ;;  %v1634_v37 = vrot.slane %v1497_v61, 1  ;;  %v9396_v51 = vld [vmem:[#allocation14 + $0x114] ss:$8 sps:$4 sm:$0xff]  }
 0x5f0   :  { %v10146_v54 = vpop.eup %10145  ;;  %v7738_v16 = vpack.c.bf16 %v1609_v15, %v1606_v33  ;;  %v1613_v58 = vrot.slane %v11315_v43, 7  ;;  %v11323_v53 = vmul.f32 %v10144_v10, %v11300_v55  ;;  %v1632_v55 = vsel %vm595_vm4, %v1630_v19, %v1631_v29 }
 0x5f1   :  { %v1611_v60 = vsel %vm582_vm2, %v1607_v32, %v1610_v26  ;;  %v1616_v62 = vrot.slane %v11319_v2, 7  ;;  %v11328_v18 = vmul.f32 %v10146_v54, %v11302_v20  ;;  %v1635_v40 = vsel %vm595_vm4, %v1633_v11, %v1634_v37  ;;  %v9402_v20 = vld [vmem:[#allocation14 + $0x134] ss:$8 sps:$4 sm:$0xff]  }
 0x5f2   :  { %v7734_v41 = vpack.c.bf16 %v1611_v60, %v1607_v32  ;;  %v1612_v33 = vrot.slane %v11323_v53, 7  ;;  %v11339_v26 = vpack.c.bf16 %v1634_v37, %v1635_v40  ;;  %v11343_v54 = vpack.c.bf16 %v1631_v29, %v1632_v55  ;;  %v9394_v37 = vld [vmem:[#allocation14 + $0x110] ss:$8 sps:$4 sm:$0xff]   ;;  %v9399_v29 = vld [vmem:[#allocation14 + $0x124] ss:$8 sps:$4 sm:$0xff]  }
 0x5f3   :  { %v1617_v30 = vsel %vm582_vm2, %v1613_v58, %v1616_v62  ;;  %v1614_v10 = vrot.slane %v11328_v18, 7  ;;  %v1639_v11 = vrot.slane %v11315_v43, 1  ;;  %v1640_v19 = vrot.slane %v11319_v2, 1 }
 0x5f4   :  { %7735 = vmatprep.mubr.msk.bf16.mxu0 %vm11000_vm6, %v7734_v41  ;;  %v7742_v32 = vpack.c.bf16 %v1617_v30, %v1613_v58  ;;  %v1636_v60 = vrot.slane %v11323_v53, 1  ;;  %v1637_v62 = vrot.slane %v11328_v18, 1  ;;  %v9397_v30 = vld [vmem:[#allocation14 + $0x120] ss:$8 sps:$4 sm:$0xff]   ;;  %v1657_v14 = vpack.c.bf16 %v1497_v61, %v1495_v0  ;;  %v9414_v0 = vld [vmem:[#allocation14 + $0x174] ss:$8 sps:$4 sm:$0xff]  }
 0x5f5   :  { %7739 = vmatmul.mubr.msk.bf16.vlgmr.msra.gmra.mrb[8].mxu0 %vm11000_vm6, %v7738_v16  ;;  %v1641_v58 = vsel %vm595_vm4, %v1639_v11, %v1640_v19  ;;  %v1615_v55 = vsel %vm582_vm2, %v1612_v33, %v1614_v10  ;;  %v9403_v11 = vld [vmem:[#allocation14 + $0x140] ss:$8 sps:$4 sm:$0xff]   ;;  %v9408_v10 = vld [vmem:[#allocation14 + $0x154] ss:$8 sps:$4 sm:$0xff]   ;;  %v9412_v61 = vld [vmem:[#allocation14 + $0x170] ss:$8 sps:$4 sm:$0xff]  }
 0x5f6   :  { %2208 = vmatpush1.bf16.msra.mxu0 %v9391_v44  ;;  %7743 = vmatprep.mubr.msk.bf16.mxu0 %vm11000_vm6, %v7742_v32  ;;  %v11354_v41 = vpack.c.bf16 %v1640_v19, %v1641_v58  ;;  %v1638_v40 = vsel %vm595_vm4, %v1636_v60, %v1637_v62  ;;  %v7746_v44 = vpack.c.bf16 %v1615_v55, %v1612_v33  ;;  %v9405_v32 = vld [vmem:[#allocation14 + $0x144] ss:$8 sps:$4 sm:$0xff]   ;;  %v9406_v19 = vld [vmem:[#allocation14 + $0x150] ss:$8 sps:$4 sm:$0xff]   ;;  %v9409_v33 = vld [vmem:[#allocation14 + $0x160] ss:$8 sps:$4 sm:$0xff]  }
 0x5f7   :  { %2209 = vmatprep.subr.bf16.mxu0 %v9396_v51  ;;  %v11358_v16 = vpack.c.bf16 %v1637_v62, %v1638_v40  ;;  %v9400_v51 = vld [vmem:[#allocation14 + $0x130] ss:$8 sps:$4 sm:$0xff]   ;;  %v9411_v60 = vld [vmem:[#allocation14 + $0x164] ss:$8 sps:$4 sm:$0xff]   ;;  %v9426_v40 = vld [vmem:[#allocation14 + $0x1b4] ss:$8 sps:$4 sm:$0xff]  }
 0x5f8   :  { %v9417_v62 = vld [vmem:[#allocation14 + $0x184] ss:$8 sps:$4 sm:$0xff]   ;;  %v9424_v55 = vld [vmem:[#allocation14 + $0x1b0] ss:$8 sps:$4 sm:$0xff]  }
 0x5f9   :  { %v9423_v58 = vld [vmem:[#allocation14 + $0x1a4] ss:$8 sps:$4 sm:$0xff]  }
 0x5fa   :  { %2210 = vmatpush1.bf16.msra.mxu0 %v9394_v37  ;;  %v9418_v37 = vld [vmem:[#allocation14 + $0x190] ss:$8 sps:$4 sm:$0xff]  }
 0x5fb   :  { %2211 = vmatprep.subr.bf16.mxu0 %v9399_v29  ;;  %v9421_v29 = vld [vmem:[#allocation14 + $0x1a0] ss:$8 sps:$4 sm:$0xff]  }
 0x5fd   :  { %7747 = vmatmul.mubr.msk.bf16.gmra.mrb[12].mxu0 %vm11000_vm6, %v7746_v44  ;;  %v9427_v44 = vld [vmem:[#allocation14 + $0x1c0] ss:$8 sps:$4 sm:$0xff]  }
 0x5fe   :  { %2212 = vmatpush1.bf16.msra.mxu0 %v9397_v30  ;;  %2239 = vmatprep.mubr.bf16.mxu0 %v1657_v14  ;;  %v9415_v14 = vld [vmem:[#allocation14 + $0x180] ss:$8 sps:$4 sm:$0xff]   ;;  %v9429_v30 = vld [vmem:[#allocation14 + $0x1c4] ss:$8 sps:$4 sm:$0xff]  }
 0x5ff   :  { %2213 = vmatprep.subr.bf16.mxu0 %v9402_v20  ;;  %v9420_v20 = vld [vmem:[#allocation14 + $0x194] ss:$8 sps:$4 sm:$0xff]  }
 0x602   :  { %2214 = vmatpush1.bf16.msra.mxu0 %v9400_v51  ;;  %v9432_v51 = vld [vmem:[#allocation14 + $0x1d4] ss:$8 sps:$4 sm:$0xff]  }
 0x603   :  { %2215 = vmatprep.subr.bf16.mxu0 %v9405_v32  ;;  %v9430_v32 = vld [vmem:[#allocation14 + $0x1d0] ss:$8 sps:$4 sm:$0xff]  }
 0x606   :  { %2216 = vmatpush1.bf16.msra.mxu0 %v9403_v11  ;;  %v9435_v11 = vld [vmem:[#allocation14 + $0x1e4] ss:$8 sps:$4 sm:$0xff]  }
 0x607   :  { %2217 = vmatprep.subr.bf16.mxu0 %v9408_v10  ;;  %v9433_v10 = vld [vmem:[#allocation14 + $0x1e0] ss:$8 sps:$4 sm:$0xff]  }
 0x60a   :  { %2218 = vmatpush1.bf16.msra.mxu0 %v9406_v19  ;;  %v9438_v19 = vld [vmem:[#allocation14 + $0x1f4] ss:$8 sps:$4 sm:$0xff]  }
 0x60b   :  { %2219 = vmatprep.subr.bf16.mxu0 %v9411_v60  ;;  %v9436_v60 = vld [vmem:[#allocation14 + $0x1f0] ss:$8 sps:$4 sm:$0xff]  }
 0x60e   :  { %2220 = vmatpush1.bf16.msra.mxu0 %v9409_v33  ;;  %v9441_v33 = vld [vmem:[#allocation14 + $0x204] ss:$8 sps:$4 sm:$0xff]  }
 0x60f   :  { %2221 = vmatprep.subr.bf16.mxu0 %v9414_v0  ;;  %v9439_v0 = vld [vmem:[#allocation14 + $0x200] ss:$8 sps:$4 sm:$0xff]  }
 0x612   :  { %2222 = vmatpush1.bf16.msra.mxu0 %v9412_v61  ;;  %v9444_v61 = vld [vmem:[#allocation14 + $0x214] ss:$8 sps:$4 sm:$0xff]  }
 0x613   :  { %2223 = vmatprep.subr.bf16.mxu0 %v9417_v62  ;;  %v12601_v62 = vpack.c.bf16 %v11319_v2, %v11315_v43  ;;  %v9451_v43 = vld [vmem:[#allocation14 + $0x240] ss:$8 sps:$4 sm:$0xff]   ;;  %v9456_v2 = vld [vmem:[#allocation14 + $0x254] ss:$8 sps:$4 sm:$0xff]  }
 0x616   :  { %2224 = vmatpush1.bf16.msra.mxu0 %v9415_v14  ;;  %v9442_v14 = vld [vmem:[#allocation14 + $0x210] ss:$8 sps:$4 sm:$0xff]  }
 0x617   :  { %2225 = vmatprep.subr.bf16.mxu0 %v9420_v20  ;;  %v9447_v20 = vld [vmem:[#allocation14 + $0x224] ss:$8 sps:$4 sm:$0xff]  }
 0x61a   :  { %2226 = vmatpush1.bf16.msra.mxu0 %v9418_v37  ;;  %v9445_v37 = vld [vmem:[#allocation14 + $0x220] ss:$8 sps:$4 sm:$0xff]  }
 0x61b   :  { %2227 = vmatprep.subr.bf16.mxu0 %v9423_v58  ;;  %v9450_v58 = vld [vmem:[#allocation14 + $0x234] ss:$8 sps:$4 sm:$0xff]  }
 0x61e   :  { %2228 = vmatpush1.bf16.msra.mxu0 %v9421_v29  ;;  %v12602_v29 = vpack.c.bf16 %v11328_v18, %v11323_v53  ;;  %v9462_v53 = vld [vmem:[#allocation14 + $0x274] ss:$8 sps:$4 sm:$0xff]   ;;  %v9460_v18 = vld [vmem:[#allocation14 + $0x270] ss:$8 sps:$4 sm:$0xff]  }
 0x61f   :  { %2229 = vmatprep.subr.bf16.mxu0 %v9426_v40  ;;  %v9454_v40 = vld [vmem:[#allocation14 + $0x250] ss:$8 sps:$4 sm:$0xff]  }
 0x622   :  { %2230 = vmatpush1.bf16.msra.mxu0 %v9424_v55  ;;  %v9459_v55 = vld [vmem:[#allocation14 + $0x264] ss:$8 sps:$4 sm:$0xff]  }
 0x623   :  { %2231 = vmatprep.subr.bf16.mxu0 %v9429_v30  ;;  %v9457_v30 = vld [vmem:[#allocation14 + $0x260] ss:$8 sps:$4 sm:$0xff]  }
 0x626   :  { %2232 = vmatpush1.bf16.msra.mxu0 %v9427_v44  ;;  %v9465_v44 = vld [vmem:[#allocation14 + $0x284] ss:$8 sps:$4 sm:$0xff]  }
 0x627   :  { %2233 = vmatprep.subr.bf16.mxu0 %v9432_v51  ;;  %v9468_v51 = vld [vmem:[#allocation14 + $0x294] ss:$8 sps:$4 sm:$0xff]  }
 0x62a   :  { %2234 = vmatpush1.bf16.msra.mxu0 %v9430_v32  ;;  %v9466_v32 = vld [vmem:[#allocation14 + $0x290] ss:$8 sps:$4 sm:$0xff]  }
 0x62b   :  { %2235 = vmatprep.subr.bf16.mxu0 %v9435_v11  ;;  %v9471_v11 = vld [vmem:[#allocation14 + $0x2a4] ss:$8 sps:$4 sm:$0xff]  }
 0x62e   :  { %2236 = vmatpush1.bf16.msra.mxu0 %v9433_v10  ;;  %v9469_v10 = vld [vmem:[#allocation14 + $0x2a0] ss:$8 sps:$4 sm:$0xff]  }
 0x62f   :  { %2237 = vmatprep.subr.bf16.mxu0 %v9438_v19  ;;  %v9474_v19 = vld [vmem:[#allocation14 + $0x2b4] ss:$8 sps:$4 sm:$0xff]  }
 0x632   :  { %2238 = vmatpush1.bf16.msra.mxu0 %v9436_v60  ;;  %v9472_v60 = vld [vmem:[#allocation14 + $0x2b0] ss:$8 sps:$4 sm:$0xff]  }
 0x633   :  { %2260 = vmatprep.subr.bf16.mxu0 %v9441_v33  ;;  %v9477_v33 = vld [vmem:[#allocation14 + $0x2c4] ss:$8 sps:$4 sm:$0xff]  }
 0x635   :  { %2240 = vmatmul.mubr.bf16.vlgmr.msra.gmra.mrb[8].mxu0 %v1656_v36  ;;  %v9453_v36 = vld [vmem:[#allocation14 + $0x244] ss:$8 sps:$4 sm:$0xff]  }
 0x636   :  { %2249 = vmatprep.mubr.bf16.mxu0 %v12601_v62  ;;  %2261 = vmatpush1.bf16.msra.mxu0 %v9439_v0  ;;  %v9475_v0 = vld [vmem:[#allocation14 + $0x2c0] ss:$8 sps:$4 sm:$0xff]   ;;  %v9478_v62 = vld [vmem:[#allocation14 + $0x2d0] ss:$8 sps:$4 sm:$0xff]  }
 0x637   :  { %2262 = vmatprep.subr.bf16.mxu0 %v9444_v61  ;;  %v9480_v61 = vld [vmem:[#allocation14 + $0x2d4] ss:$8 sps:$4 sm:$0xff]  }
 0x63a   :  { %2263 = vmatpush1.bf16.msra.mxu0 %v9442_v14  ;;  %v9483_v14 = vld [vmem:[#allocation14 + $0x2e4] ss:$8 sps:$4 sm:$0xff]  }
 0x63b   :  { %2264 = vmatprep.subr.bf16.mxu0 %v9447_v20  ;;  %v9481_v20 = vld [vmem:[#allocation14 + $0x2e0] ss:$8 sps:$4 sm:$0xff]  }
 0x63d   :  { %2250 = vmatmul.mubr.bf16.gmra.mrb[12].mxu0 %v12602_v29  ;;  %v9489_v29 = vld [vmem:[#allocation16 + $0x4] ss:$8 sps:$4 sm:$0xff]  }
 0x63e   :  { %2265 = vmatpush1.bf16.msra.mxu0 %v9445_v37  ;;  %7750 = vmatprep.mubr.msk.bf16.mxu0 %vm11007_vm7, %v11339_v26  ;;  %v9463_v26 = vld [vmem:[#allocation14 + $0x280] ss:$8 sps:$4 sm:$0xff]   ;;  %v9486_v37 = vld [vmem:[#allocation14 + $0x2f4] ss:$8 sps:$4 sm:$0xff]  }
 0x63f   :  { %2266 = vmatprep.subr.bf16.mxu0 %v9450_v58  ;;  %v9484_v58 = vld [vmem:[#allocation14 + $0x2f0] ss:$8 sps:$4 sm:$0xff]  }
 0x642   :  { %2267 = vmatpush1.bf16.msra.mxu0 %v9448_v5  ;;  %v9487_v5 = vld [vmem:[#allocation16] ss:$8 sps:$4 sm:$0xff]  }
 0x643   :  { %2268 = vmatprep.subr.bf16.mxu0 %v9453_v36  ;;  %v9492_v36 = vld [vmem:[#allocation16 + $0x14] ss:$8 sps:$4 sm:$0xff]  }
 0x646   :  { %2269 = vmatpush1.bf16.msra.mxu0 %v9451_v43  ;;  %v9490_v43 = vld [vmem:[#allocation16 + $0x10] ss:$8 sps:$4 sm:$0xff]  }
 0x647   :  { %2270 = vmatprep.subr.bf16.mxu0 %v9456_v2  ;;  %v9495_v2 = vld [vmem:[#allocation16 + $0x24] ss:$8 sps:$4 sm:$0xff]  }
 0x64a   :  { %2271 = vmatpush1.bf16.msra.mxu0 %v9454_v40  ;;  %v9493_v40 = vld [vmem:[#allocation16 + $0x20] ss:$8 sps:$4 sm:$0xff]  }
 0x64b   :  { %2272 = vmatprep.subr.bf16.mxu0 %v9459_v55  ;;  %v9498_v55 = vld [vmem:[#allocation16 + $0x34] ss:$8 sps:$4 sm:$0xff]  }
 0x64e   :  { %2273 = vmatpush1.bf16.msra.mxu0 %v9457_v30  ;;  %v9496_v30 = vld [vmem:[#allocation16 + $0x30] ss:$8 sps:$4 sm:$0xff]  }
 0x64f   :  { %2274 = vmatprep.subr.bf16.mxu0 %v9462_v53  ;;  %v12604_v53 = vmov 0  }
 0x652   :  { %2275 = vmatpush1.bf16.msra.mxu0 %v9460_v18  ;;  %v9504_v18 = vld [vmem:[#allocation16 + $0x54] ss:$8 sps:$4 sm:$0xff]  }
 0x653   :  { %2276 = vmatprep.subr.bf16.mxu0 %v9465_v44  ;;  %v9502_v44 = vld [vmem:[#allocation16 + $0x50] ss:$8 sps:$4 sm:$0xff]  }
 0x656   :  { %2277 = vmatpush1.bf16.msra.mxu0 %v9463_v26  ;;  %v9507_v26 = vld [vmem:[#allocation16 + $0x64] ss:$8 sps:$4 sm:$0xff]  }
 0x657   :  { %2278 = vmatprep.subr.bf16.mxu0 %v9468_v51  ;;  %v9505_v51 = vld [vmem:[#allocation16 + $0x60] ss:$8 sps:$4 sm:$0xff]  }
 0x65a   :  { %2279 = vmatpush1.bf16.msra.mxu0 %v9466_v32  ;;  %v9510_v32 = vld [vmem:[#allocation16 + $0x74] ss:$8 sps:$4 sm:$0xff]  }
 0x65b   :  { %2280 = vmatprep.subr.bf16.mxu0 %v9471_v11  ;;  %v10311_v11 = vld [vmem:[#allocation2] sm:$0xff] }
 0x65e   :  { %2281 = vmatpush1.bf16.msra.mxu0 %v9469_v10  ;;  %v10312_v10 = vld [vmem:[#allocation2 + $0x8] sm:$0xff] }
 0x65f   :  { %2282 = vmatprep.subr.bf16.mxu0 %v9474_v19  ;;  %v2313_v19 = vpack.c.bf16 %v10312_v10, %v10311_v11 }
 0x662   :  { %2283 = vmatpush1.bf16.msra.mxu0 %v9472_v60  ;;  %v10313_v60 = vld [vmem:[#allocation2 + $0x10] sm:$0xff] }
 0x663   :  { %2284 = vmatprep.subr.bf16.mxu0 %v9477_v33  ;;  %v10314_v33 = vld [vmem:[#allocation2 + $0x18] sm:$0xff] }
 0x666   :  { %2285 = vmatpush1.bf16.msra.mxu0 %v9475_v0  ;;  %v2314_v0 = vpack.c.bf16 %v10314_v33, %v10313_v60 }
 0x667   :  { %2286 = vmatprep.subr.bf16.mxu0 %v9480_v61  ;;  %v11419_v61 = vsub.s32 3, %v12589_v50 }
 0x669   :  { %12605 = vst [vmem:[#allocation44_spill] sm:$0xff] %v11419_v61 }
 0x66a   :  { %2287 = vmatpush1.bf16.msra.mxu0 %v9478_v62  ;;  %v10315_v62 = vld [vmem:[#allocation11] sm:$0x1f] }
 0x66b   :  { %2288 = vmatprep.subr.bf16.mxu0 %v9483_v14  ;;  %v1669_v14 = vrot.slane %v10315_v62, %v11419_v61 }
 0x66e   :  { %2289 = vmatpush1.bf16.msra.mxu0 %v9481_v20  ;;  %v12606_v20 = vld [vmem:[#allocation46_spill] sm:$0xff] }
 0x66f   :  { %2290 = vmatprep.subr.bf16.mxu0 %v9486_v37  ;;  %v2334_v37 = vrot.slane %v10315_v62, %v12606_v20 }
 0x672   :  { %2291 = vmatpush1.bf16.msra.mxu0 %v9484_v58  ;;  %v10316_v58 = vld [vmem:[#allocation11 + $0x8] sm:$0x1f] }
 0x673   :  { %2419 = vmatprep.subr.bf16.mxu0 %v9489_v29  ;;  %v1673_v29 = vrot.slane %v10316_v58, %v11419_v61 }
 0x675   :  { %7753 = vmatmul.mubr.msk.bf16.vlgmr.msra.gmra.mrb[8].mxu0 %vm11007_vm7, %v11343_v54  ;;  %v9501_v54 = vld [vmem:[#allocation16 + $0x44] ss:$8 sps:$4 sm:$0xff]  }
 0x676   :  { %7756 = vmatprep.mubr.msk.bf16.mxu0 %vm11007_vm7, %v11354_v41  ;;  %2420 = vmatpush1.bf16.msra.mxu0 %v9487_v5  ;;  %v9499_v41 = vld [vmem:[#allocation16 + $0x40] ss:$8 sps:$4 sm:$0xff]   ;;  %v2338_v5 = vrot.slane %v10316_v58, %v12606_v20 }
 0x677   :  { %2421 = vmatprep.subr.bf16.mxu0 %v9492_v36  ;;  %v9112_v36 = vadd.f32 %v2334_v37, %v1669_v14 }
 0x67a   :  { %2422 = vmatpush1.bf16.msra.mxu0 %v9490_v43 }
 0x67b   :  { %2423 = vmatprep.subr.bf16.mxu0 %v9495_v2  ;;  %v9114_v2 = vadd.f32 %v2338_v5, %v1673_v29 }
 0x67d   :  { %7759 = vmatmul.mubr.msk.bf16.gmra.mrb[12].mxu0 %vm11007_vm7, %v11358_v16  ;;  %v9508_v16 = vld [vmem:[#allocation16 + $0x70] ss:$8 sps:$4 sm:$0xff]  }
 0x67e   :  { %2424 = vmatpush1.bf16.msra.mxu0 %v9493_v40  ;;  %2451 = vmatprep.mubr.bf16.mxu0 %v12604_v53 }
 0x67f   :  { %2425 = vmatprep.subr.bf16.mxu0 %v9498_v55 }
 0x682   :  { %2426 = vmatpush1.bf16.msra.mxu0 %v9496_v30 }
 0x683   :  { %2427 = vmatprep.subr.bf16.mxu0 %v9501_v54 }
 0x686   :  { %2428 = vmatpush1.bf16.msra.mxu0 %v9499_v41 }
 0x687   :  { %2429 = vmatprep.subr.bf16.mxu0 %v9504_v18 }
 0x68a   :  { %2430 = vmatpush1.bf16.msra.mxu0 %v9502_v44 }
 0x68b   :  { %2431 = vmatprep.subr.bf16.mxu0 %v9507_v26 }
 0x68e   :  { %2432 = vmatpush1.bf16.msra.mxu0 %v9505_v51 }
 0x68f   :  { %2433 = vmatprep.subr.bf16.mxu0 %v9510_v32 }
 0x692   :  { %2434 = vmatpush1.bf16.msra.mxu0 %v9508_v16 }
 0x693   :  { %8713 = vmatprep.subr.bf16.mxu0 %v10976_v17 }
 0x695   :  { %2452 = vmatmul.mubr.bf16.vlgmr.msra.gmra.mrb[8].mxu0 %v2313_v19 }
 0x696   :  { %2461 = vmatprep.mubr.bf16.mxu0 %v12604_v53  ;;  %8715 = vmatpush1.bf16.msra.mxu0 %v11011_v21 }
 0x697   :  { %8717 = vmatprep.subr.bf16.mxu0 %v11013_v25 }
 0x69a   :  { %8719 = vmatpush1.bf16.msra.mxu0 %v11021_v35 }
 0x69b   :  { %8721 = vmatprep.subr.bf16.mxu0 %v11026_v38 }
 0x69d   :  { %2462 = vmatmul.mubr.bf16.gmra.mrb[12].mxu0 %v2314_v0 }
 0x69e   :  { %8723 = vmatpush1.bf16.msra.mxu0 %v11029_v45 }
 0x69f   :  { %8725 = vmatprep.subr.bf16.mxu0 %v11032_v46 }
 0x6a2   :  { %8727 = vmatpush1.bf16.msra.mxu0 %v11039_v49 }
 0x6a3   :  { %8729 = vmatprep.subr.bf16.mxu0 %v11042_v52 }
 0x6a6   :  { %8731 = vmatpush1.bf16.msra.mxu0 %v11045_v56 }
 0x6a7   :  { %8733 = vmatprep.subr.bf16.mxu0 %v11048_v57 }
 0x6aa   :  { %8735 = vmatpush1.bf16.msra.mxu0 %v11051_v63 }
 0x6ab   :  { %8737 = vmatprep.subr.bf16.mxu0 %v11054_v1 }
 0x6ae   :  { %8739 = vmatpush1.bf16.msra.mxu0 %v11057_v8 }
 0x6af   :  { %8741 = vmatprep.subr.bf16.mxu0 %v11060_v9 }
 0x6b2   :  { %8743 = vmatpush1.bf16.msra.mxu0 %v11063_v12 }
 0x6b3   :  { %8745 = vmatprep.subr.bf16.mxu0 %v11067_v22 }
 0x6b6   :  { %8747 = vmatpush1.bf16.msra.mxu0 %v11069_v23 }
 0x6b7   :  { %8749 = vmatprep.subr.bf16.mxu0 %v11073_v27 }
 0x6ba   :  { %8751 = vmatpush1.bf16.msra.mxu0 %v11075_v31 }
 0x6bb   :  { %8753 = vmatprep.subr.bf16.mxu0 %v11079_v34 }
 0x6be   :  { %8755 = vmatpush1.bf16.msra.mxu0 %v11081_v39 }
 0x6bf   :  { %8757 = vmatprep.subr.bf16.mxu0 %v11085_v42 }
 0x6c2   :  { %8759 = vmatpush1.bf16.msra.mxu0 %v11087_v47 }
 0x6c3   :  { %8761 = vmatprep.subr.bf16.mxu0 %v11091_v48 }
 0x6c6   :  { %8763 = vmatpush1.bf16.msra.mxu0 %v11093_v4 }
 0x6c7   :  { %8765 = vmatprep.subr.bf16.mxu0 %v11097_v59 }
 0x6ca   :  { %8767 = vmatpush1.bf16.msra.mxu0 %v11099_v3 }
 0x6cb   :  { %8769 = vmatprep.subr.bf16.mxu0 %v11103_v7 }
 0x6ce   :  { %8771 = vmatpush1.bf16.msra.mxu0 %v11105_v13 }
 0x6cf   :  { %8773 = vmatprep.subr.bf16.mxu0 %v11108_v24 }
 0x6d2   :  { %8775 = vmatpush1.bf16.msra.mxu0 %v11111_v28 }
 0x6d3   :  { %8777 = vmatprep.subr.bf16.mxu0 %v10976_v17 }
 0x768   :  { %v2453_v43 = vpop.f32.mrb[8].mxu0 }
 0x769   :  { %v2455_v40 = vpop.f32.mrb[9].mxu0  ;;  %v11425_v30 = vadd.f32 %v9112_v36, %v2453_v43 }
 0x76a   :  { %v2457_v55 = vpop.f32.mrb[10].mxu0  ;;  %v11429_v41 = vadd.f32 %v9114_v2, %v2455_v40 }
 0x76b   :  { %12607 = vst [vmem:[#allocation45_spill] sm:$0xff] %v11425_v30  ;;  %v11427_v53 = vadd.f32 %v9112_v36, %v2457_v55  ;;  %v2459_v54 = vpop.f32.mrb[11].mxu0 }
 0x76c   :  { %12609 = vst [vmem:[#allocation47_spill] sm:$0xff] %v11429_v41  ;;  %v11431_v18 = vadd.f32 %v9114_v2, %v2459_v54 }
 0x76d   :  { %12608 = vst [vmem:[#allocation49_spill] sm:$0xff] %v11427_v53  ;;  %v2482_v44 = vadd.f32 %v11427_v53, %v11425_v30 }
 0x76e   :  { %12610 = vst [vmem:[#allocation48_spill] sm:$0xff] %v11431_v18  ;;  %v2489_v26 = vadd.f32 %v11431_v18, %v11429_v41 }
 0x76f   :  { %v2483_v51 = vrot.slane %v2482_v44, 4 }
 0x770   :  { %v2490_v32 = vrot.slane %v2489_v26, 4  ;;  %v2463_v16 = vpop.f32.mrb[12].mxu0 }
 0x771   :  { %v2465_v11 = vpop.f32.mrb[13].mxu0  ;;  %v2484_v60 = vadd.f32 %v2483_v51, %v2482_v44  ;;  %v11437_v33 = vadd.f32 %v9112_v36, %v2463_v16 }
 0x772   :  { %v2491_v10 = vadd.f32 %v2490_v32, %v2489_v26  ;;  %v2467_v19 = vpop.f32.mrb[14].mxu0  ;;  %v11441_v14 = vadd.f32 %v9114_v2, %v2465_v11 }
 0x773   :  { %12611 = vst [vmem:[#allocation52_spill] sm:$0xff] %v11437_v33  ;;  %v11439_v0 = vadd.f32 %v9112_v36, %v2467_v19  ;;  %v2469_v62 = vpop.f32.mrb[15].mxu0  ;;  %v2485_v43 = vrot.slane %v2484_v60, 2 }
 0x774   :  { %12613 = vst [vmem:[#allocation53_spill] sm:$0xff] %v11441_v14  ;;  %v11443_v37 = vadd.f32 %v9114_v2, %v2469_v62  ;;  %v2492_v29 = vrot.slane %v2491_v10, 2 }
 0x775   :  { %12612 = vst [vmem:[#allocation50_spill] sm:$0xff] %v11439_v0  ;;  %v2496_v58 = vadd.f32 %v11439_v0, %v11437_v33  ;;  %v2486_v36 = vadd.f32 %v2485_v43, %v2484_v60 }
 0x776   :  { %12614 = vst [vmem:[#allocation51_spill] sm:$0xff] %v11443_v37  ;;  %v2503_v5 = vadd.f32 %v11443_v37, %v11441_v14  ;;  %v2493_v26 = vadd.f32 %v2492_v29, %v2491_v10 }
 0x777   :  { %v2497_v40 = vrot.slane %v2496_v58, 4  ;;  %v2487_v19 = vrot.slane %v2486_v36, 1 }
 0x778   :  { %v2504_v55 = vrot.slane %v2503_v5, 4  ;;  %v2494_v11 = vrot.slane %v2493_v26, 1 }
 0x779   :  { %v2498_v54 = vadd.f32 %v2497_v40, %v2496_v58  ;;  %v2488_v6 = vadd.f32 %v2487_v19, %v2486_v36  ;;  %v12617_v40 = vld [vmem:[#allocation35_spill] sm:$0xff] }
 0x77a   :  { %v2505_v44 = vadd.f32 %v2504_v55, %v2503_v5  ;;  %v2495_v50 = vadd.f32 %v2494_v11, %v2493_v26  ;;  %v12616_v5 = vld [vmem:[#allocation33_spill] sm:$0xff] }
 0x77b   :  { %v2499_v51 = vrot.slane %v2498_v54, 2 }
 0x77c   :  { %v2506_v32 = vrot.slane %v2505_v44, 2 }
 0x77d   :  { %v2500_v16 = vadd.f32 %v2499_v51, %v2498_v54 }
 0x77e   :  { %v2507_v2 = vadd.f32 %v2506_v32, %v2505_v44 }
 0x77f   :  { %v2501_v62 = vrot.slane %v2500_v16, 1 }
 0x780   :  { %v2508_v20 = vrot.slane %v2507_v2, 1 }
 0x781   :  { %v2502_v61 = vadd.f32 %v2501_v62, %v2500_v16 }
 0x782   :  { %v2509_v17 = vadd.f32 %v2508_v20, %v2507_v2 }
 0x783   :  { %v2514_v58 = vsel %vm243_vm1, %v2502_v61, %v2488_v6  ;;  %v12615_v61 = vld [vmem:[#allocation32_spill] sm:$0xff] }
 0x784   :  { %v2515_v15 = vsel %vm243_vm1, %v2509_v17, %v2495_v50  ;;  %v9513_v17 = vld [vmem:[#allocation19 + $0x4] ss:$8 sps:$4 sm:$0xff]  }
 0x785   :  { %2582 = vmatprep.mubr.f32.mxu1 %v2515_v15 }
 0x786   :  { %2583 = vmatmul.mubr.f32.vlgmr.msra.gmra.mrb[16].mxu1 %v2514_v58 }
 0x787   :  { %8651 = vmatpush1.bf16.msra.mxu1 %v11011_v21 }
 0x788   :  { %8653 = vmatprep.subr.bf16.mxu1 %v11013_v25 }
 0x78b   :  { %8655 = vmatpush1.bf16.msra.mxu1 %v11021_v35 }
 0x78c   :  { %8657 = vmatprep.subr.bf16.mxu1 %v11026_v38 }
 0x78f   :  { %8659 = vmatpush1.bf16.msra.mxu1 %v11029_v45 }
 0x790   :  { %8661 = vmatprep.subr.bf16.mxu1 %v11032_v46 }
 0x793   :  { %8663 = vmatpush1.bf16.msra.mxu1 %v11039_v49 }
 0x794   :  { %8665 = vmatprep.subr.bf16.mxu1 %v11042_v52 }
 0x797   :  { %8667 = vmatpush1.bf16.msra.mxu1 %v11045_v56 }
 0x798   :  { %8669 = vmatprep.subr.bf16.mxu1 %v11048_v57 }
 0x79b   :  { %8671 = vmatpush1.bf16.msra.mxu1 %v11051_v63 }
 0x79c   :  { %8673 = vmatprep.subr.bf16.mxu1 %v11054_v1 }
 0x79f   :  { %8675 = vmatpush1.bf16.msra.mxu1 %v11057_v8 }
 0x7a0   :  { %8677 = vmatprep.subr.bf16.mxu1 %v11060_v9 }
 0x7a3   :  { %8679 = vmatpush1.bf16.msra.mxu1 %v11063_v12 }
 0x7a4   :  { %8681 = vmatprep.subr.bf16.mxu1 %v11067_v22 }
 0x7a7   :  { %8683 = vmatpush1.bf16.msra.mxu1 %v11069_v23 }
 0x7a8   :  { %8685 = vmatprep.subr.bf16.mxu1 %v11073_v27 }
 0x7ab   :  { %8687 = vmatpush1.bf16.msra.mxu1 %v11075_v31 }
 0x7ac   :  { %8689 = vmatprep.subr.bf16.mxu1 %v11079_v34 }
 0x7af   :  { %8691 = vmatpush1.bf16.msra.mxu1 %v11081_v39 }
 0x7b0   :  { %8693 = vmatprep.subr.bf16.mxu1 %v11085_v42 }
 0x7b3   :  { %8695 = vmatpush1.bf16.msra.mxu1 %v11087_v47 }
 0x7b4   :  { %8697 = vmatprep.subr.bf16.mxu1 %v11091_v48 }
 0x7b7   :  { %8699 = vmatpush1.bf16.msra.mxu1 %v11093_v4 }
 0x7b8   :  { %8701 = vmatprep.subr.bf16.mxu1 %v11097_v59 }
 0x7bb   :  { %8703 = vmatpush1.bf16.msra.mxu1 %v11099_v3 }
 0x7bc   :  { %8705 = vmatprep.subr.bf16.mxu1 %v11103_v7 }
 0x7bf   :  { %8707 = vmatpush1.bf16.msra.mxu1 %v11105_v13 }
 0x7c0   :  { %8709 = vmatprep.subr.bf16.mxu1 %v11108_v24 }
 0x7c3   :  { %8711 = vmatpush1.bf16.msra.mxu1 %v11111_v28 }
 0x7c4   :  { %3558 = vmatprep.subr.bf16.mxu1 %v9513_v17 }
 0x859   :  { %v2584_v50 = vpop.f32.mrb[16].mxu1 }
 0x85a   :  { %v2586_v15 = vpop.f32.mrb[17].mxu1 }
 0x85b   :  { %v2591_v6 = vcombine.low %v2584_v50, %v2586_v15 }
 0x85d   :  { %v2598_v20 = vrot.slane %v2591_v6, %v12615_v61 }
 0x85f   :  { %v2599_v10 = vcombine.high %v2598_v20, %v2598_v20  ;;  %v2606_v60 = vrot.slane %v2598_v20, %v12615_v61 }
 0x861   :  { %v2613_v29 = vrot.slane %v2599_v10, %v12615_v61  ;;  %v2617_v43 = vrot.slane %v2606_v60, %v12616_v5  ;;  %v2621_v55 = vrot.slane %v2606_v60, %v12617_v40 }
 0x863   :  { %v2625_v54 = vrot.slane %v2613_v29, %v12616_v5  ;;  %v2629_v44 = vrot.slane %v2613_v29, %v12617_v40  ;;  %v11490_v26 = vsub.f32 %v11425_v30, %v2617_v43  ;;  %v11493_v36 = vsub.f32 %v11429_v41, %v2621_v55 }
 0x864   :  { %v11496_v51 = vsub.f32 %v11427_v53, %v2617_v43  ;;  %v11499_v32 = vsub.f32 %v11431_v18, %v2621_v55 }
 0x865   :  { %v11502_v16 = vsub.f32 %v11437_v33, %v2625_v54  ;;  %v11505_v11 = vsub.f32 %v11441_v14, %v2629_v44  ;;  %v11508_v2 = vsub.f32 %v11439_v0, %v2625_v54  ;;  %v11511_v19 = vsub.f32 %v11443_v37, %v2629_v44 }
 0x866   :  { %v2642_v62 = vmul.f32 %v11490_v26, %v11490_v26  ;;  %v2643_v58 = vmul.f32 %v11493_v36, %v11493_v36  ;;  %v2644_v17 = vmul.f32 %v11496_v51, %v11496_v51  ;;  %v2645_v50 = vmul.f32 %v11499_v32, %v11499_v32 }
 0x867   :  { %v2646_v15 = vmul.f32 %v11502_v16, %v11502_v16  ;;  %v2647_v6 = vmul.f32 %v11505_v11, %v11505_v11  ;;  %v2648_v20 = vmul.f32 %v11508_v2, %v11508_v2  ;;  %v2649_v10 = vmul.f32 %v11511_v19, %v11511_v19 }
 0x868   :  { %v2650_v60 = vadd.f32 %v2644_v17, %v2642_v62  ;;  %v2657_v29 = vadd.f32 %v2645_v50, %v2643_v58 }
 0x869   :  { %v2671_v43 = vadd.f32 %v2649_v10, %v2647_v6  ;;  %v2664_v55 = vadd.f32 %v2648_v20, %v2646_v15 }
 0x86a   :  { %v2658_v54 = vrot.slane %v2657_v29, 4  ;;  %v2651_v44 = vrot.slane %v2650_v60, 4 }
 0x86b   :  { %v2672_v37 = vrot.slane %v2671_v43, 4  ;;  %v2665_v14 = vrot.slane %v2664_v55, 4 }
 0x86c   :  { %v2659_v0 = vadd.f32 %v2658_v54, %v2657_v29  ;;  %v2652_v33 = vadd.f32 %v2651_v44, %v2650_v60  ;;  %v9511_v29 = vld [vmem:[#allocation19] ss:$8 sps:$4 sm:$0xff]   ;;  %v9534_v60 = vld [vmem:[#allocation19 + $0x74] ss:$8 sps:$4 sm:$0xff]  }
 0x86d   :  { %v2673_v18 = vadd.f32 %v2672_v37, %v2671_v43  ;;  %v2666_v41 = vadd.f32 %v2665_v14, %v2664_v55  ;;  %v9532_v43 = vld [vmem:[#allocation19 + $0x70] ss:$8 sps:$4 sm:$0xff]   ;;  %v9537_v55 = vld [vmem:[#allocation19 + $0x84] ss:$8 sps:$4 sm:$0xff]   ;;  %v9535_v54 = vld [vmem:[#allocation19 + $0x80] ss:$8 sps:$4 sm:$0xff]  }
 0x86e   :  { %v2660_v53 = vrot.slane %v2659_v0, 2  ;;  %v2653_v30 = vrot.slane %v2652_v33, 2  ;;  %v9540_v44 = vld [vmem:[#allocation19 + $0x94] ss:$8 sps:$4 sm:$0xff]  }
 0x86f   :  { %v2674_v28 = vrot.slane %v2673_v18, 2  ;;  %v2667_v24 = vrot.slane %v2666_v41, 2 }
 0x870   :  { %v2661_v13 = vadd.f32 %v2660_v53, %v2659_v0  ;;  %v2654_v7 = vadd.f32 %v2653_v30, %v2652_v33  ;;  %v9516_v53 = vld [vmem:[#allocation19 + $0x14] ss:$8 sps:$4 sm:$0xff]   ;;  %v9514_v30 = vld [vmem:[#allocation19 + $0x10] ss:$8 sps:$4 sm:$0xff]   ;;  %v9531_v33 = vld [vmem:[#allocation19 + $0x64] ss:$8 sps:$4 sm:$0xff]  }
 0x871   :  { %v2675_v3 = vadd.f32 %v2674_v28, %v2673_v18  ;;  %v2668_v59 = vadd.f32 %v2667_v24, %v2666_v41  ;;  %v9519_v24 = vld [vmem:[#allocation19 + $0x24] ss:$8 sps:$4 sm:$0xff]   ;;  %v9517_v28 = vld [vmem:[#allocation19 + $0x20] ss:$8 sps:$4 sm:$0xff]   ;;  %v9528_v41 = vld [vmem:[#allocation19 + $0x54] ss:$8 sps:$4 sm:$0xff]  }
 0x872   :  { %v2662_v62 = vrot.slane %v2661_v13, 1  ;;  %v2655_v58 = vrot.slane %v2654_v7, 1  ;;  %v9526_v18 = vld [vmem:[#allocation19 + $0x50] ss:$8 sps:$4 sm:$0xff]   ;;  %v9529_v0 = vld [vmem:[#allocation19 + $0x60] ss:$8 sps:$4 sm:$0xff]  }
 0x873   :  { %v2676_v17 = vrot.slane %v2675_v3, 1  ;;  %v2669_v50 = vrot.slane %v2668_v59, 1 }
 0x874   :  { %v2663_v15 = vadd.f32 %v2662_v62, %v2661_v13  ;;  %v2656_v20 = vadd.f32 %v2655_v58, %v2654_v7  ;;  %v9522_v13 = vld [vmem:[#allocation19 + $0x34] ss:$8 sps:$4 sm:$0xff]   ;;  %v9523_v7 = vld [vmem:[#allocation19 + $0x40] ss:$8 sps:$4 sm:$0xff]   ;;  %v9538_v62 = vld [vmem:[#allocation19 + $0x90] ss:$8 sps:$4 sm:$0xff]  }
 0x875   :  { %v2677_v6 = vadd.f32 %v2676_v17, %v2675_v3  ;;  %v2670_v10 = vadd.f32 %v2669_v50, %v2668_v59  ;;  %v9520_v3 = vld [vmem:[#allocation19 + $0x30] ss:$8 sps:$4 sm:$0xff]   ;;  %v9525_v59 = vld [vmem:[#allocation19 + $0x44] ss:$8 sps:$4 sm:$0xff]   ;;  %v9541_v17 = vld [vmem:[#allocation19 + $0xa0] ss:$8 sps:$4 sm:$0xff]  }
 0x876   :  { %v9543_v58 = vld [vmem:[#allocation19 + $0xa4] ss:$8 sps:$4 sm:$0xff]   ;;  %v9546_v50 = vld [vmem:[#allocation19 + $0xb4] ss:$8 sps:$4 sm:$0xff]  }
 0x877   :  { %v2683_v37 = vsel %vm243_vm1, %v2677_v6, %v2663_v15  ;;  %v2682_v14 = vsel %vm243_vm1, %v2670_v10, %v2656_v20  ;;  %v9544_v15 = vld [vmem:[#allocation19 + $0xb0] ss:$8 sps:$4 sm:$0xff]   ;;  %v9549_v6 = vld [vmem:[#allocation19 + $0xc4] ss:$8 sps:$4 sm:$0xff]   ;;  %v9547_v20 = vld [vmem:[#allocation19 + $0xc0] ss:$8 sps:$4 sm:$0xff]  }
 0x878   :  { %2750 = vmatprep.mubr.f32.mxu1 %v2683_v37  ;;  %v9552_v10 = vld [vmem:[#allocation19 + $0xd4] ss:$8 sps:$4 sm:$0xff]   ;;  %v9555_v37 = vld [vmem:[#allocation19 + $0xe4] ss:$8 sps:$4 sm:$0xff]  }
 0x879   :  { %2751 = vmatmul.mubr.f32.vlgmr.msra.gmra.mrb[18].mxu1 %v2682_v14  ;;  %v9553_v14 = vld [vmem:[#allocation19 + $0xe0] ss:$8 sps:$4 sm:$0xff]  }
 0x87a   :  { %3559 = vmatpush1.bf16.msra.mxu1 %v9511_v29  ;;  %v9550_v29 = vld [vmem:[#allocation19 + $0xd0] ss:$8 sps:$4 sm:$0xff]  }
 0x87b   :  { %3560 = vmatprep.subr.bf16.mxu1 %v9516_v53  ;;  %v9558_v53 = vld [vmem:[#allocation19 + $0xf4] ss:$8 sps:$4 sm:$0xff]  }
 0x87e   :  { %3561 = vmatpush1.bf16.msra.mxu1 %v9514_v30  ;;  %v9556_v30 = vld [vmem:[#allocation19 + $0xf0] ss:$8 sps:$4 sm:$0xff]  }
 0x87f   :  { %3562 = vmatprep.subr.bf16.mxu1 %v9519_v24  ;;  %v9561_v24 = vld [vmem:[#allocation19 + $0x104] ss:$8 sps:$4 sm:$0xff]  }
 0x882   :  { %3563 = vmatpush1.bf16.msra.mxu1 %v9517_v28 }
 0x883   :  { %3564 = vmatprep.subr.bf16.mxu1 %v9522_v13 }
 0x886   :  { %3565 = vmatpush1.bf16.msra.mxu1 %v9520_v3 }
 0x887   :  { %3566 = vmatprep.subr.bf16.mxu1 %v9525_v59 }
 0x88a   :  { %3567 = vmatpush1.bf16.msra.mxu1 %v9523_v7 }
 0x88b   :  { %3568 = vmatprep.subr.bf16.mxu1 %v9528_v41 }
 0x88e   :  { %3569 = vmatpush1.bf16.msra.mxu1 %v9526_v18 }
 0x88f   :  { %3570 = vmatprep.subr.bf16.mxu1 %v9531_v33 }
 0x892   :  { %3571 = vmatpush1.bf16.msra.mxu1 %v9529_v0 }
 0x893   :  { %3572 = vmatprep.subr.bf16.mxu1 %v9534_v60 }
 0x896   :  { %3573 = vmatpush1.bf16.msra.mxu1 %v9532_v43 }
 0x897   :  { %3574 = vmatprep.subr.bf16.mxu1 %v9537_v55 }
 0x89a   :  { %3575 = vmatpush1.bf16.msra.mxu1 %v9535_v54 }
 0x89b   :  { %3576 = vmatprep.subr.bf16.mxu1 %v9540_v44 }
 0x89e   :  { %3577 = vmatpush1.bf16.msra.mxu1 %v9538_v62 }
 0x89f   :  { %3578 = vmatprep.subr.bf16.mxu1 %v9543_v58  ;;  %v11538_v58 = vld [vmem:[#allocation17] sm:$0x3f] }
 0x8a2   :  { %3579 = vmatpush1.bf16.msra.mxu1 %v9541_v17  ;;  %v11540_v17 = vld [vmem:[#allocation17 + $0x8] sm:$0x3f] }
 0x8a3   :  { %3580 = vmatprep.subr.bf16.mxu1 %v9546_v50  ;;  %v2821_v50 = vrot.slane %v11538_v58, %v12616_v5 }
 0x8a6   :  { %3581 = vmatpush1.bf16.msra.mxu1 %v9544_v15 }
 0x8a7   :  { %3582 = vmatprep.subr.bf16.mxu1 %v9549_v6  ;;  %v2825_v6 = vrot.slane %v11540_v17, %v12616_v5 }
 0x8aa   :  { %3583 = vmatpush1.bf16.msra.mxu1 %v9547_v20 }
 0x8ab   :  { %3584 = vmatprep.subr.bf16.mxu1 %v9552_v10 }
 0x8ae   :  { %3585 = vmatpush1.bf16.msra.mxu1 %v9550_v29 }
 0x8af   :  { %3586 = vmatprep.subr.bf16.mxu1 %v9555_v37  ;;  %v2837_v37 = vrot.slane %v11538_v58, %v12617_v40 }
 0x8b2   :  { %3587 = vmatpush1.bf16.msra.mxu1 %v9553_v14 }
 0x8b3   :  { %3588 = vmatprep.subr.bf16.mxu1 %v9558_v53 }
 0x8b6   :  { %3589 = vmatpush1.bf16.msra.mxu1 %v9556_v30 }
 0x8b7   :  { %3611 = vmatprep.subr.bf16.mxu1 %v9561_v24  ;;  %v2841_v24 = vrot.slane %v11540_v17, %v12617_v40 }
 0x94c   :  { %v2752_v28 = vpop.f32.mrb[18].mxu1 }
 0x94d   :  { %v2754_v13 = vpop.f32.mrb[19].mxu1 }
 0x94e   :  { %v2759_v3 = vcombine.low %v2752_v28, %v2754_v13 }
 0x950   :  { %v2766_v59 = vrot.slane %v2759_v3, %v12615_v61 }
 0x952   :  { %v2767_v7 = vcombine.high %v2766_v59, %v2766_v59  ;;  %v2774_v41 = vrot.slane %v2766_v59, %v12615_v61 }
 0x954   :  { %v2781_v18 = vrot.slane %v2767_v7, %v12615_v61  ;;  %v2785_v33 = vrot.slane %v2774_v41, %v12616_v5  ;;  %v2789_v0 = vrot.slane %v2774_v41, %v12617_v40 }
 0x956   :  { %v2793_v60 = vrot.slane %v2781_v18, %v12616_v5  ;;  %v2797_v43 = vrot.slane %v2781_v18, %v12617_v40  ;;  %v2802_v55 = vadd.f32 1e-05, %v2785_v33  ;;  %v2803_v54 = vadd.f32 1e-05, %v2789_v0 }
 0x958   :  { %v2804_v44 = vadd.f32 1e-05, %v2793_v60  ;;  %v2805_v62 = vadd.f32 1e-05, %v2797_v43  ;;  %10147 = vrsqrt.f32 %v2802_v55 }
 0x959   :  { %10149 = vrsqrt.f32 %v2803_v54 }
 0x95a   :  { %10151 = vrsqrt.f32 %v2804_v44 }
 0x95b   :  { %10153 = vrsqrt.f32 %v2805_v62 }
 0x962   :  { %v10148_v15 = vpop.eup %10147 }
 0x963   :  { %v10150_v20 = vpop.eup %10149  ;;  %v2810_v10 = vmul.f32 %v10148_v15, %v11490_v26  ;;  %v2812_v29 = vmul.f32 %v10148_v15, %v11496_v51 }
 0x964   :  { %v10152_v14 = vpop.eup %10151  ;;  %v2811_v53 = vmul.f32 %v10150_v20, %v11493_v36  ;;  %v2813_v30 = vmul.f32 %v10150_v20, %v11499_v32 }
 0x965   :  { %v10154_v28 = vpop.eup %10153  ;;  %v2816_v13 = vmul.f32 %v10152_v14, %v11508_v2  ;;  %v2826_v3 = vmul.f32 %v2821_v50, %v2810_v10  ;;  %v2828_v59 = vmul.f32 %v2821_v50, %v2812_v29  ;;  %v2814_v26 = vmul.f32 %v10152_v14, %v11502_v16 }
 0x966   :  { %v2817_v51 = vmul.f32 %v10154_v28, %v11511_v19  ;;  %v2829_v7 = vmul.f32 %v2825_v6, %v2813_v30  ;;  %v2827_v41 = vmul.f32 %v2825_v6, %v2811_v53  ;;  %v2815_v18 = vmul.f32 %v10154_v28, %v11505_v11 }
 0x967   :  { %v2844_v33 = vadd.f32 %v2837_v37, %v2828_v59  ;;  %v2842_v36 = vadd.f32 %v2837_v37, %v2826_v3  ;;  %v2830_v0 = vmul.f32 %v2821_v50, %v2814_v26  ;;  %v2832_v32 = vmul.f32 %v2821_v50, %v2816_v13 }
 0x968   :  { %v2843_v60 = vadd.f32 %v2841_v24, %v2827_v41  ;;  %v2845_v43 = vadd.f32 %v2841_v24, %v2829_v7  ;;  %v2831_v55 = vmul.f32 %v2825_v6, %v2815_v18  ;;  %v2833_v54 = vmul.f32 %v2825_v6, %v2817_v51 }
 0x969   :  { %v7778_v44 = vmul.f32 -1.442695, %v2844_v33  ;;  %v7776_v2 = vmul.f32 -1.442695, %v2842_v36  ;;  %v11558_v62 = vadd.f32 %v2837_v37, %v2830_v0  ;;  %v11560_v15 = vadd.f32 %v2837_v37, %v2832_v32 }
 0x96a   :  { %v7777_v16 = vmul.f32 -1.442695, %v2843_v60  ;;  %v7779_v19 = vmul.f32 -1.442695, %v2845_v43  ;;  %v2847_v20 = vadd.f32 %v2841_v24, %v2831_v55  ;;  %v2849_v10 = vadd.f32 %v2841_v24, %v2833_v54 }
 0x96b   :  { %10155 = vpow2.f32 %v7778_v44  ;;  %v7780_v50 = vmul.f32 -1.442695, %v11558_v62  ;;  %v7782_v6 = vmul.f32 -1.442695, %v11560_v15 }
 0x96c   :  { %10157 = vpow2.f32 %v7777_v16  ;;  %v7781_v11 = vmul.f32 -1.442695, %v2847_v20  ;;  %v7783_v29 = vmul.f32 -1.442695, %v2849_v10 }
 0x96d   :  { %10159 = vpow2.f32 %v7779_v19 }
 0x96e   :  { %10161 = vpow2.f32 %v7776_v2 }
 0x96f   :  { %10163 = vpow2.f32 %v7781_v11 }
 0x970   :  { %10165 = vpow2.f32 %v7783_v29 }
 0x971   :  { %10167 = vpow2.f32 %v7780_v50 }
 0x972   :  { %10169 = vpow2.f32 %v7782_v6 }
 0x975   :  { %v10156_v37 = vpop.eup %10155 }
 0x976   :  { %v10158_v14 = vpop.eup %10157  ;;  %v2876_v53 = vadd.f32 1.0, %v10156_v37 }
 0x977   :  { %v10160_v30 = vpop.eup %10159  ;;  %v2875_v28 = vadd.f32 1.0, %v10158_v14 }
 0x978   :  { %v10162_v24 = vpop.eup %10161  ;;  %10171 = vrcp.f32 %v2876_v53  ;;  %v2877_v13 = vadd.f32 1.0, %v10160_v30 }
 0x979   :  { %v10164_v3 = vpop.eup %10163  ;;  %10173 = vrcp.f32 %v2875_v28  ;;  %v2874_v59 = vadd.f32 1.0, %v10162_v24 }
 0x97a   :  { %v10166_v26 = vpop.eup %10165  ;;  %10175 = vrcp.f32 %v2877_v13  ;;  %v2879_v51 = vadd.f32 1.0, %v10164_v3 }
 0x97b   :  { %v10168_v7 = vpop.eup %10167  ;;  %10177 = vrcp.f32 %v2874_v59  ;;  %v2881_v41 = vadd.f32 1.0, %v10166_v26 }
 0x97c   :  { %v10170_v18 = vpop.eup %10169  ;;  %10179 = vrcp.f32 %v2879_v51  ;;  %v2878_v0 = vadd.f32 1.0, %v10168_v7 }
 0x97d   :  { %10181 = vrcp.f32 %v2881_v41  ;;  %v2880_v32 = vadd.f32 1.0, %v10170_v18  ;;  %v9559_v18 = vld [vmem:[#allocation19 + $0x100] ss:$8 sps:$4 sm:$0xff]  }
 0x97e   :  { %10183 = vrcp.f32 %v2878_v0 }
 0x97f   :  { %10185 = vrcp.f32 %v2880_v32 }
 0x982   :  { %v10172_v55 = vpop.eup %10171 }
 0x983   :  { %v10174_v54 = vpop.eup %10173  ;;  %v11564_v44 = vmul.f32 %v10172_v55, %v2844_v33 }
 0x984   :  { %v10176_v2 = vpop.eup %10175  ;;  %v11566_v16 = vmul.f32 %v10174_v54, %v2843_v60  ;;  %v9564_v54 = vld [vmem:[#allocation19 + $0x114] ss:$8 sps:$4 sm:$0xff]  }
 0x985   :  { %v10178_v19 = vpop.eup %10177  ;;  %v2901_v11 = vmul.f32 %v10176_v2, %v2845_v43  ;;  %v3012_v37 = vrot.slane %v11564_v44, 7  ;;  %v3035_v24 = vrot.slane %v11564_v44, 1 }
 0x986   :  { %v10180_v29 = vpop.eup %10179  ;;  %v3011_v50 = vrot.slane %v11566_v16, 7  ;;  %v11569_v6 = vmul.f32 %v10178_v19, %v2842_v36  ;;  %v3037_v14 = vrot.slane %v11566_v16, 1 }
 0x987   :  { %v10182_v53 = vpop.eup %10181  ;;  %v3014_v30 = vrot.slane %v2901_v11, 7  ;;  %v11573_v28 = vmul.f32 %v10180_v29, %v2847_v20  ;;  %v3038_v33 = vrot.slane %v2901_v11, 1 }
 0x988   :  { %v10184_v60 = vpop.eup %10183  ;;  %v3010_v13 = vrot.slane %v11569_v6, 7  ;;  %v11577_v43 = vmul.f32 %v10182_v53, %v2849_v10  ;;  %v3060_v36 = vpack.c.bf16 %v11564_v44, %v11569_v6  ;;  %v3034_v3 = vrot.slane %v11569_v6, 1  ;;  %v9616_v6 = vld [vmem:[#allocation19 + $0x230] ss:$8 sps:$4 sm:$0xff]  }
 0x989   :  { %v10186_v59 = vpop.eup %10185  ;;  %v3015_v26 = vsel %vm582_vm2, %v3011_v50, %v3014_v30  ;;  %v3017_v51 = vrot.slane %v11573_v28, 7  ;;  %v11585_v20 = vmul.f32 %v10184_v60, %v11558_v62  ;;  %v3039_v7 = vsel %vm595_vm4, %v3037_v14, %v3038_v33 }
 0x98a   :  { %v7882_v41 = vpack.c.bf16 %v3015_v26, %v3011_v50  ;;  %v3013_v10 = vsel %vm582_vm2, %v3010_v13, %v3012_v37  ;;  %v3020_v0 = vrot.slane %v11577_v43, 7  ;;  %v11591_v32 = vmul.f32 %v10186_v59, %v11560_v15 }
 0x98b   :  { %v7886_v55 = vpack.c.bf16 %v3013_v10, %v3010_v13  ;;  %v3016_v2 = vrot.slane %v11585_v20, 7  ;;  %v3067_v19 = vpack.c.bf16 %v11577_v43, %v11573_v28  ;;  %v11596_v62 = vpack.c.bf16 %v3038_v33, %v3039_v7  ;;  %v9562_v13 = vld [vmem:[#allocation19 + $0x110] ss:$8 sps:$4 sm:$0xff]  }
 0x98c   :  { %7883 = vmatprep.mubr.msk.bf16.mxu1 %vm11000_vm6, %v7882_v41  ;;  %v3021_v50 = vsel %vm582_vm2, %v3017_v51, %v3020_v0  ;;  %v3018_v37 = vrot.slane %v11591_v32, 7  ;;  %v3066_v15 = vpack.c.bf16 %v11591_v32, %v11585_v20  ;;  %v3036_v14 = vsel %vm595_vm4, %v3034_v3, %v3035_v24  ;;  %v9567_v3 = vld [vmem:[#allocation19 + $0x124] ss:$8 sps:$4 sm:$0xff]  }
 0x98d   :  { %7887 = vmatmul.mubr.msk.bf16.vlgmr.msra.gmra.mrb[20].mxu1 %vm11000_vm6, %v7886_v55  ;;  %v7890_v53 = vpack.c.bf16 %v3021_v50, %v3017_v51  ;;  %v11607_v30 = vpack.c.bf16 %v3035_v24, %v3036_v14  ;;  %v3043_v33 = vrot.slane %v11573_v28, 1  ;;  %v3044_v60 = vrot.slane %v11577_v43, 1  ;;  %v9570_v55 = vld [vmem:[#allocation19 + $0x134] ss:$8 sps:$4 sm:$0xff]   ;;  %v9571_v14 = vld [vmem:[#allocation19 + $0x140] ss:$8 sps:$4 sm:$0xff]  }
 0x98e   :  { %3612 = vmatpush1.bf16.msra.mxu1 %v9559_v18  ;;  %v3040_v59 = vrot.slane %v11585_v20, 1  ;;  %v3041_v26 = vrot.slane %v11591_v32, 1  ;;  %v3019_v24 = vsel %vm582_vm2, %v3016_v2, %v3018_v37  ;;  %v9565_v18 = vld [vmem:[#allocation19 + $0x120] ss:$8 sps:$4 sm:$0xff]   ;;  %v3061_v50 = vpack.c.bf16 %v2901_v11, %v11566_v16  ;;  %v9573_v37 = vld [vmem:[#allocation19 + $0x144] ss:$8 sps:$4 sm:$0xff]  }
 0x98f   :  { %7891 = vmatprep.mubr.msk.bf16.mxu1 %vm11000_vm6, %v7890_v53  ;;  %3613 = vmatprep.subr.bf16.mxu1 %v9564_v54  ;;  %v3045_v7 = vsel %vm595_vm4, %v3043_v33, %v3044_v60  ;;  %v7894_v0 = vpack.c.bf16 %v3019_v24, %v3016_v2  ;;  %v9568_v54 = vld [vmem:[#allocation19 + $0x130] ss:$8 sps:$4 sm:$0xff]   ;;  %v9576_v53 = vld [vmem:[#allocation19 + $0x154] ss:$8 sps:$4 sm:$0xff]   ;;  %v9577_v2 = vld [vmem:[#allocation19 + $0x160] ss:$8 sps:$4 sm:$0xff]  }
 0x990   :  { %v11617_v51 = vpack.c.bf16 %v3044_v60, %v3045_v7  ;;  %v3042_v41 = vsel %vm595_vm4, %v3040_v59, %v3041_v26  ;;  %v9574_v33 = vld [vmem:[#allocation19 + $0x150] ss:$8 sps:$4 sm:$0xff]   ;;  %v9579_v60 = vld [vmem:[#allocation19 + $0x164] ss:$8 sps:$4 sm:$0xff]   ;;  %v9582_v16 = vld [vmem:[#allocation19 + $0x174] ss:$8 sps:$4 sm:$0xff]  }
 0x991   :  { %v11620_v10 = vpack.c.bf16 %v3041_v26, %v3042_v41  ;;  %v9580_v11 = vld [vmem:[#allocation19 + $0x170] ss:$8 sps:$4 sm:$0xff]   ;;  %v9583_v59 = vld [vmem:[#allocation19 + $0x180] ss:$8 sps:$4 sm:$0xff]   ;;  %v9588_v26 = vld [vmem:[#allocation19 + $0x194] ss:$8 sps:$4 sm:$0xff]  }
 0x992   :  { %3614 = vmatpush1.bf16.msra.mxu1 %v9562_v13  ;;  %v9585_v13 = vld [vmem:[#allocation19 + $0x184] ss:$8 sps:$4 sm:$0xff]   ;;  %v9589_v24 = vld [vmem:[#allocation19 + $0x1a0] ss:$8 sps:$4 sm:$0xff]   ;;  %v9594_v41 = vld [vmem:[#allocation19 + $0x1b4] ss:$8 sps:$4 sm:$0xff]  }
 0x993   :  { %3615 = vmatprep.subr.bf16.mxu1 %v9567_v3  ;;  %v9586_v3 = vld [vmem:[#allocation19 + $0x190] ss:$8 sps:$4 sm:$0xff]   ;;  %v9591_v7 = vld [vmem:[#allocation19 + $0x1a4] ss:$8 sps:$4 sm:$0xff]   ;;  %v9619_v43 = vld [vmem:[#allocation19 + $0x240] ss:$8 sps:$4 sm:$0xff]  }
 0x994   :  { %v9621_v28 = vld [vmem:[#allocation19 + $0x244] ss:$8 sps:$4 sm:$0xff]   ;;  %v9630_v20 = vld [vmem:[#allocation19 + $0x274] ss:$8 sps:$4 sm:$0xff]   ;;  %v9628_v32 = vld [vmem:[#allocation19 + $0x270] ss:$8 sps:$4 sm:$0xff]  }
 0x995   :  { %7895 = vmatmul.mubr.msk.bf16.gmra.mrb[24].mxu1 %vm11000_vm6, %v7894_v0  ;;  %v9597_v0 = vld [vmem:[#allocation19 + $0x1c4] ss:$8 sps:$4 sm:$0xff]  }
 0x996   :  { %3616 = vmatpush1.bf16.msra.mxu1 %v9565_v18  ;;  %3643 = vmatprep.mubr.bf16.mxu1 %v3061_v50  ;;  %v9592_v18 = vld [vmem:[#allocation19 + $0x1b0] ss:$8 sps:$4 sm:$0xff]   ;;  %v9600_v50 = vld [vmem:[#allocation19 + $0x1d4] ss:$8 sps:$4 sm:$0xff]  }
 0x997   :  { %3617 = vmatprep.subr.bf16.mxu1 %v9570_v55  ;;  %v9595_v55 = vld [vmem:[#allocation19 + $0x1c0] ss:$8 sps:$4 sm:$0xff]  }
 0x99a   :  { %3618 = vmatpush1.bf16.msra.mxu1 %v9568_v54  ;;  %v9598_v54 = vld [vmem:[#allocation19 + $0x1d0] ss:$8 sps:$4 sm:$0xff]  }
 0x99b   :  { %3619 = vmatprep.subr.bf16.mxu1 %v9573_v37  ;;  %v9603_v37 = vld [vmem:[#allocation19 + $0x1e4] ss:$8 sps:$4 sm:$0xff]  }
 0x99e   :  { %3620 = vmatpush1.bf16.msra.mxu1 %v9571_v14  ;;  %v9601_v14 = vld [vmem:[#allocation19 + $0x1e0] ss:$8 sps:$4 sm:$0xff]  }
 0x99f   :  { %3621 = vmatprep.subr.bf16.mxu1 %v9576_v53  ;;  %v9606_v53 = vld [vmem:[#allocation19 + $0x1f4] ss:$8 sps:$4 sm:$0xff]  }
 0x9a2   :  { %3622 = vmatpush1.bf16.msra.mxu1 %v9574_v33  ;;  %v9604_v33 = vld [vmem:[#allocation19 + $0x1f0] ss:$8 sps:$4 sm:$0xff]  }
 0x9a3   :  { %3623 = vmatprep.subr.bf16.mxu1 %v9579_v60  ;;  %v9609_v60 = vld [vmem:[#allocation19 + $0x204] ss:$8 sps:$4 sm:$0xff]  }
 0x9a6   :  { %3624 = vmatpush1.bf16.msra.mxu1 %v9577_v2  ;;  %v9607_v2 = vld [vmem:[#allocation19 + $0x200] ss:$8 sps:$4 sm:$0xff]  }
 0x9a7   :  { %3625 = vmatprep.subr.bf16.mxu1 %v9582_v16  ;;  %v9612_v16 = vld [vmem:[#allocation19 + $0x214] ss:$8 sps:$4 sm:$0xff]  }
 0x9aa   :  { %3626 = vmatpush1.bf16.msra.mxu1 %v9580_v11  ;;  %v9610_v11 = vld [vmem:[#allocation19 + $0x210] ss:$8 sps:$4 sm:$0xff]  }
 0x9ab   :  { %3627 = vmatprep.subr.bf16.mxu1 %v9585_v13  ;;  %v9615_v13 = vld [vmem:[#allocation19 + $0x224] ss:$8 sps:$4 sm:$0xff]  }
 0x9ae   :  { %3628 = vmatpush1.bf16.msra.mxu1 %v9583_v59  ;;  %v9613_v59 = vld [vmem:[#allocation19 + $0x220] ss:$8 sps:$4 sm:$0xff]  }
 0x9af   :  { %3629 = vmatprep.subr.bf16.mxu1 %v9588_v26  ;;  %v9618_v26 = vld [vmem:[#allocation19 + $0x234] ss:$8 sps:$4 sm:$0xff]  }
 0x9b2   :  { %3630 = vmatpush1.bf16.msra.mxu1 %v9586_v3  ;;  %v9627_v3 = vld [vmem:[#allocation19 + $0x264] ss:$8 sps:$4 sm:$0xff]  }
 0x9b3   :  { %3631 = vmatprep.subr.bf16.mxu1 %v9591_v7  ;;  %v9625_v7 = vld [vmem:[#allocation19 + $0x260] ss:$8 sps:$4 sm:$0xff]  }
 0x9b6   :  { %3632 = vmatpush1.bf16.msra.mxu1 %v9589_v24  ;;  %v9636_v24 = vld [vmem:[#allocation19 + $0x294] ss:$8 sps:$4 sm:$0xff]  }
 0x9b7   :  { %3633 = vmatprep.subr.bf16.mxu1 %v9594_v41  ;;  %v9634_v41 = vld [vmem:[#allocation19 + $0x290] ss:$8 sps:$4 sm:$0xff]  }
 0x9ba   :  { %3634 = vmatpush1.bf16.msra.mxu1 %v9592_v18  ;;  %v9639_v18 = vld [vmem:[#allocation19 + $0x2a4] ss:$8 sps:$4 sm:$0xff]  }
 0x9bb   :  { %3635 = vmatprep.subr.bf16.mxu1 %v9597_v0  ;;  %v9637_v0 = vld [vmem:[#allocation19 + $0x2a0] ss:$8 sps:$4 sm:$0xff]  }
 0x9be   :  { %3636 = vmatpush1.bf16.msra.mxu1 %v9595_v55  ;;  %v9642_v55 = vld [vmem:[#allocation19 + $0x2b4] ss:$8 sps:$4 sm:$0xff]  }
 0x9bf   :  { %3637 = vmatprep.subr.bf16.mxu1 %v9600_v50  ;;  %v9640_v50 = vld [vmem:[#allocation19 + $0x2b0] ss:$8 sps:$4 sm:$0xff]  }
 0x9c2   :  { %3638 = vmatpush1.bf16.msra.mxu1 %v9598_v54  ;;  %v9645_v54 = vld [vmem:[#allocation19 + $0x2c4] ss:$8 sps:$4 sm:$0xff]  }
 0x9c3   :  { %3639 = vmatprep.subr.bf16.mxu1 %v9603_v37  ;;  %v9643_v37 = vld [vmem:[#allocation19 + $0x2c0] ss:$8 sps:$4 sm:$0xff]  }
 0x9c6   :  { %3640 = vmatpush1.bf16.msra.mxu1 %v9601_v14  ;;  %v9648_v14 = vld [vmem:[#allocation19 + $0x2d4] ss:$8 sps:$4 sm:$0xff]  }
 0x9c7   :  { %3641 = vmatprep.subr.bf16.mxu1 %v9606_v53  ;;  %v9646_v53 = vld [vmem:[#allocation19 + $0x2d0] ss:$8 sps:$4 sm:$0xff]  }
 0x9ca   :  { %3642 = vmatpush1.bf16.msra.mxu1 %v9604_v33  ;;  %v9651_v33 = vld [vmem:[#allocation19 + $0x2e4] ss:$8 sps:$4 sm:$0xff]  }
 0x9cb   :  { %3664 = vmatprep.subr.bf16.mxu1 %v9609_v60  ;;  %v9649_v60 = vld [vmem:[#allocation19 + $0x2e0] ss:$8 sps:$4 sm:$0xff]  }
 0x9cd   :  { %3644 = vmatmul.mubr.bf16.vlgmr.msra.gmra.mrb[20].mxu1 %v3060_v36  ;;  %v9624_v36 = vld [vmem:[#allocation19 + $0x254] ss:$8 sps:$4 sm:$0xff]  }
 0x9ce   :  { %3653 = vmatprep.mubr.bf16.mxu1 %v3067_v19  ;;  %3665 = vmatpush1.bf16.msra.mxu1 %v9607_v2  ;;  %v9622_v19 = vld [vmem:[#allocation19 + $0x250] ss:$8 sps:$4 sm:$0xff]   ;;  %v9654_v2 = vld [vmem:[#allocation19 + $0x2f4] ss:$8 sps:$4 sm:$0xff]  }
 0x9cf   :  { %3666 = vmatprep.subr.bf16.mxu1 %v9612_v16  ;;  %v9652_v16 = vld [vmem:[#allocation19 + $0x2f0] ss:$8 sps:$4 sm:$0xff]  }
 0x9d2   :  { %3667 = vmatpush1.bf16.msra.mxu1 %v9610_v11  ;;  %v12620_v11 = vld [vmem:[#allocation34_spill] sm:$0xff] }
 0x9d3   :  { %3668 = vmatprep.subr.bf16.mxu1 %v9615_v13  ;;  %v12624_v13 = vld [vmem:[#allocation41_spill] sm:$0xff] }
 0x9d5   :  { %3654 = vmatmul.mubr.bf16.gmra.mrb[24].mxu1 %v3066_v15  ;;  %v9633_v15 = vld [vmem:[#allocation19 + $0x284] ss:$8 sps:$4 sm:$0xff]  }
 0x9d6   :  { %3669 = vmatpush1.bf16.msra.mxu1 %v9613_v59  ;;  %7898 = vmatprep.mubr.msk.bf16.mxu1 %vm11007_vm7, %v11596_v62  ;;  %v9631_v62 = vld [vmem:[#allocation19 + $0x280] ss:$8 sps:$4 sm:$0xff]   ;;  %v12625_v59 = vld [vmem:[#allocation42_spill] sm:$0xff] }
 0x9d7   :  { %3670 = vmatprep.subr.bf16.mxu1 %v9618_v26  ;;  %v12626_v26 = vld [vmem:[#allocation43_spill] sm:$0xff] }
 0x9da   :  { %3671 = vmatpush1.bf16.msra.mxu1 %v9616_v6  ;;  %v12627_v6 = vld [vmem:[#allocation31_spill] sm:$0xff] }
 0x9db   :  { %3672 = vmatprep.subr.bf16.mxu1 %v9621_v28  ;;  %v11680_v28 = vsub.s32 5, %v12627_v6 }
 0x9dd   :  { %12628 = vst [vmem:[#allocation32_spill] sm:$0xff] %v11680_v28 }
 0x9de   :  { %3673 = vmatpush1.bf16.msra.mxu1 %v9619_v43  ;;  %v12629_v43 = vld [vmem:[#allocation54_spill] sm:$0xff] }
 0x9df   :  { %3674 = vmatprep.subr.bf16.mxu1 %v9624_v36  ;;  %v3073_v36 = vrot.slane %v11538_v58, %v12629_v43 }
 0x9e2   :  { %3675 = vmatpush1.bf16.msra.mxu1 %v9622_v19  ;;  %v10317_v19 = vld [vmem:[#allocation5] sm:$0x77] }
 0x9e3   :  { %3676 = vmatprep.subr.bf16.mxu1 %v9627_v3  ;;  %v3720_v3 = vrot.slane %v10317_v19, %v12617_v40 }
 0x9e6   :  { %3677 = vmatpush1.bf16.msra.mxu1 %v9625_v7  ;;  %v3077_v7 = vrot.slane %v11540_v17, %v12629_v43 }
 0x9e7   :  { %3678 = vmatprep.subr.bf16.mxu1 %v9630_v20  ;;  %v3724_v20 = vrot.slane %v10317_v19, %v11680_v28 }
 0x9ea   :  { %3679 = vmatpush1.bf16.msra.mxu1 %v9628_v32 }
 0x9eb   :  { %3680 = vmatprep.subr.bf16.mxu1 %v9633_v15 }
 0x9ee   :  { %3681 = vmatpush1.bf16.msra.mxu1 %v9631_v62  ;;  %v3740_v62 = vrot.slane %v3720_v3, %v12617_v40 }
 0x9ef   :  { %3682 = vmatprep.subr.bf16.mxu1 %v9636_v24 }
 0x9f2   :  { %3683 = vmatpush1.bf16.msra.mxu1 %v9634_v41 }
 0x9f3   :  { %3684 = vmatprep.subr.bf16.mxu1 %v9639_v18  ;;  %v3744_v18 = vrot.slane %v3724_v20, %v12617_v40 }
 0x9f6   :  { %3685 = vmatpush1.bf16.msra.mxu1 %v9637_v0 }
 0x9f7   :  { %3686 = vmatprep.subr.bf16.mxu1 %v9642_v55 }
 0x9fa   :  { %3687 = vmatpush1.bf16.msra.mxu1 %v9640_v50 }
 0x9fb   :  { %3688 = vmatprep.subr.bf16.mxu1 %v9645_v54 }
 0x9fe   :  { %3689 = vmatpush1.bf16.msra.mxu1 %v9643_v37 }
 0x9ff   :  { %3690 = vmatprep.subr.bf16.mxu1 %v9648_v14  ;;  %v10318_v14 = vld [vmem:[#allocation5 + $0x8] sm:$0x77] }
 0xa00   :  { %v3728_v17 = vrot.slane %v10318_v14, %v12617_v40 }
 0xa02   :  { %3691 = vmatpush1.bf16.msra.mxu1 %v9646_v53 }
 0xa03   :  { %3692 = vmatprep.subr.bf16.mxu1 %v9651_v33 }
 0xa06   :  { %3693 = vmatpush1.bf16.msra.mxu1 %v9649_v60  ;;  %v3732_v60 = vrot.slane %v10318_v14, %v11680_v28 }
 0xa07   :  { %3694 = vmatprep.subr.bf16.mxu1 %v9654_v2 }
 0xa0a   :  { %3695 = vmatpush1.bf16.msra.mxu1 %v9652_v16 }
 0xa0b   :  { %8841 = vmatprep.subr.bf16.mxu1 %v12620_v11 }
 0xa0d   :  { %7901 = vmatmul.mubr.msk.bf16.vlgmr.msra.gmra.mrb[20].mxu1 %vm11007_vm7, %v11607_v30  ;;  %v12621_v30 = vld [vmem:[#allocation38_spill] sm:$0xff] }
 0xa0e   :  { %7904 = vmatprep.mubr.msk.bf16.mxu1 %vm11007_vm7, %v11617_v51  ;;  %8843 = vmatpush1.bf16.msra.mxu1 %v11011_v21  ;;  %v12622_v51 = vld [vmem:[#allocation39_spill] sm:$0xff] }
 0xa0f   :  { %8845 = vmatprep.subr.bf16.mxu1 %v11013_v25 }
 0xa12   :  { %8847 = vmatpush1.bf16.msra.mxu1 %v11021_v35 }
 0xa13   :  { %8849 = vmatprep.subr.bf16.mxu1 %v11026_v38 }
 0xa15   :  { %7907 = vmatmul.mubr.msk.bf16.gmra.mrb[24].mxu1 %vm11007_vm7, %v11620_v10  ;;  %v12623_v10 = vld [vmem:[#allocation40_spill] sm:$0xff] }
 0xa16   :  { %8851 = vmatpush1.bf16.msra.mxu1 %v11029_v45 }
 0xa17   :  { %8853 = vmatprep.subr.bf16.mxu1 %v11032_v46 }
 0xa1a   :  { %8855 = vmatpush1.bf16.msra.mxu1 %v11039_v49 }
 0xa1b   :  { %8857 = vmatprep.subr.bf16.mxu1 %v11042_v52 }
 0xa1e   :  { %8859 = vmatpush1.bf16.msra.mxu1 %v11045_v56 }
 0xa1f   :  { %8861 = vmatprep.subr.bf16.mxu1 %v11048_v57 }
 0xa22   :  { %8863 = vmatpush1.bf16.msra.mxu1 %v11051_v63 }
 0xa23   :  { %8865 = vmatprep.subr.bf16.mxu1 %v11054_v1 }
 0xa26   :  { %8867 = vmatpush1.bf16.msra.mxu1 %v11057_v8 }
 0xa27   :  { %8869 = vmatprep.subr.bf16.mxu1 %v11060_v9 }
 0xa2a   :  { %8871 = vmatpush1.bf16.msra.mxu1 %v11063_v12 }
 0xa2b   :  { %8873 = vmatprep.subr.bf16.mxu1 %v11067_v22 }
 0xa2e   :  { %8875 = vmatpush1.bf16.msra.mxu1 %v11069_v23 }
 0xa2f   :  { %8877 = vmatprep.subr.bf16.mxu1 %v11073_v27 }
 0xa32   :  { %8879 = vmatpush1.bf16.msra.mxu1 %v11075_v31 }
 0xa33   :  { %8881 = vmatprep.subr.bf16.mxu1 %v11079_v34 }
 0xa36   :  { %8883 = vmatpush1.bf16.msra.mxu1 %v11081_v39 }
 0xa37   :  { %8885 = vmatprep.subr.bf16.mxu1 %v11085_v42 }
 0xa3a   :  { %8887 = vmatpush1.bf16.msra.mxu1 %v11087_v47 }
 0xa3b   :  { %8889 = vmatprep.subr.bf16.mxu1 %v11091_v48 }
 0xa3e   :  { %8891 = vmatpush1.bf16.msra.mxu1 %v11093_v4 }
 0xa3f   :  { %8893 = vmatprep.subr.bf16.mxu1 %v12621_v30 }
 0xa42   :  { %8895 = vmatpush1.bf16.msra.mxu1 %v12622_v51 }
 0xa43   :  { %8897 = vmatprep.subr.bf16.mxu1 %v12623_v10 }
 0xa46   :  { %8899 = vmatpush1.bf16.msra.mxu1 %v12624_v13 }
 0xa47   :  { %8901 = vmatprep.subr.bf16.mxu1 %v12625_v59 }
 0xa4a   :  { %8903 = vmatpush1.bf16.msra.mxu1 %v12626_v26 }
 0xa4b   :  { %8905 = vmatprep.subr.bf16.mxu1 %v12620_v11 }
 0xae0   :  { %v3698_v32 = vpop.f32.mrb[20].mxu1 }
 0xae1   :  { %v9128_v15 = vadd.f32 %v3698_v32, %v3073_v36  ;;  %v3700_v24 = vpop.f32.mrb[21].mxu1  ;;  %v3748_v32 = vrot.slane %v3728_v17, %v12617_v40 }
 0xae2   :  { %v9129_v41 = vadd.f32 %v3700_v24, %v3077_v7  ;;  %v3702_v0 = vpop.f32.mrb[22].mxu1 }
 0xae3   :  { %v9130_v55 = vadd.f32 %v3702_v0, %v3073_v36  ;;  %v3704_v50 = vpop.f32.mrb[23].mxu1  ;;  %v11690_v54 = vadd.f32 %v9128_v15, %v3740_v62 }
 0xae4   :  { %v9131_v58 = vadd.f32 %v3704_v50, %v3077_v7  ;;  %v11695_v53 = vadd.f32 %v9129_v41, %v3744_v18  ;;  %v3752_v41 = vrot.slane %v3732_v60, %v12617_v40 }
 0xae5   :  { %v11692_v37 = vadd.f32 %v9130_v55, %v3740_v62 }
 0xae6   :  { %v11697_v33 = vadd.f32 %v9131_v58, %v3744_v18 }
 0xae7   :  { %v3761_v2 = vadd.f32 %v11692_v37, %v11690_v54 }
 0xae8   :  { %v3768_v16 = vadd.f32 %v11697_v33, %v11695_v53  ;;  %v3708_v19 = vpop.f32.mrb[24].mxu1 }
 0xae9   :  { %v3762_v3 = vrot.slane %v3761_v2, 4  ;;  %v9132_v20 = vadd.f32 %v3708_v19, %v3073_v36  ;;  %v3710_v15 = vpop.f32.mrb[25].mxu1 }
 0xaea   :  { %v3769_v62 = vrot.slane %v3768_v16, 4  ;;  %v9133_v24 = vadd.f32 %v3710_v15, %v3077_v7  ;;  %v3712_v18 = vpop.f32.mrb[26].mxu1 }
 0xaeb   :  { %v9134_v0 = vadd.f32 %v3712_v18, %v3073_v36  ;;  %v3714_v55 = vpop.f32.mrb[27].mxu1  ;;  %v3763_v14 = vadd.f32 %v3762_v3, %v3761_v2  ;;  %v11706_v43 = vadd.f32 %v9132_v20, %v3748_v32 }
 0xaec   :  { %v3770_v50 = vadd.f32 %v3769_v62, %v3768_v16  ;;  %v9135_v58 = vadd.f32 %v3714_v55, %v3077_v7  ;;  %v11710_v28 = vadd.f32 %v9133_v24, %v3752_v41 }
 0xaed   :  { %12630 = vst [vmem:[#allocation33_spill] sm:$0xff] %v11706_v43  ;;  %v11708_v6 = vadd.f32 %v9134_v0, %v3748_v32  ;;  %v3764_v36 = vrot.slane %v3763_v14, 2 }
 0xaee   :  { %v11712_v19 = vadd.f32 %v9135_v58, %v3752_v41  ;;  %v3771_v15 = vrot.slane %v3770_v50, 2 }
 0xaef   :  { %12631 = vst [vmem:[#allocation35_spill] sm:$0xff] %v11708_v6  ;;  %v3775_v17 = vadd.f32 %v11708_v6, %v11706_v43  ;;  %v3765_v20 = vadd.f32 %v3764_v36, %v3763_v14 }
 0xaf0   :  { %12632 = vst [vmem:[#allocation55_spill] sm:$0xff] %v11712_v19  ;;  %v3782_v60 = vadd.f32 %v11712_v19, %v11710_v28  ;;  %v3772_v3 = vadd.f32 %v3771_v15, %v3770_v50 }
 0xaf1   :  { %v3776_v18 = vrot.slane %v3775_v17, 4  ;;  %v3766_v55 = vrot.slane %v3765_v20, 1 }
 0xaf2   :  { %v3783_v16 = vrot.slane %v3782_v60, 4  ;;  %v3773_v0 = vrot.slane %v3772_v3, 1 }
 0xaf3   :  { %v3777_v7 = vadd.f32 %v3776_v18, %v3775_v17  ;;  %v3767_v43 = vadd.f32 %v3766_v55, %v3765_v20 }
 0xaf4   :  { %v3784_v2 = vadd.f32 %v3783_v16, %v3782_v60  ;;  %v3774_v29 = vadd.f32 %v3773_v0, %v3772_v3  ;;  %v12633_v20 = vld [vmem:[#allocation33_spill] sm:$0xff] }
 0xaf5   :  { %v3778_v32 = vrot.slane %v3777_v7, 2 }
 0xaf6   :  { %v3785_v62 = vrot.slane %v3784_v2, 2 }
 0xaf7   :  { %v3779_v24 = vadd.f32 %v3778_v32, %v3777_v7 }
 0xaf8   :  { %v3786_v41 = vadd.f32 %v3785_v62, %v3784_v2 }
 0xaf9   :  { %v3780_v58 = vrot.slane %v3779_v24, 1 }
 0xafa   :  { %v3787_v11 = vrot.slane %v3786_v41, 1 }
 0xafb   :  { %v3781_v44 = vadd.f32 %v3780_v58, %v3779_v24  ;;  %v12634_v24 = vld [vmem:[#allocation35_spill] sm:$0xff] }
 0xafc   :  { %v3788_v6 = vadd.f32 %v3787_v11, %v3786_v41 }
 0xafd   :  { %v3793_v17 = vsel %vm243_vm1, %v3781_v44, %v3767_v43 }
 0xafe   :  { %v3794_v19 = vsel %vm243_vm1, %v3788_v6, %v3774_v29  ;;  %v9657_v29 = vld [vmem:[#allocation20 + $0x4] ss:$8 sps:$4 sm:$0xff]  }
 0xaff   :  { %3861 = vmatprep.mubr.f32.mxu0 %v3794_v19 }
 0xb00   :  { %3862 = vmatmul.mubr.f32.vlgmr.msra.gmra.mrb[16].mxu0 %v3793_v17 }
 0xb01   :  { %8779 = vmatpush1.bf16.msra.mxu0 %v11011_v21 }
 0xb02   :  { %8781 = vmatprep.subr.bf16.mxu0 %v11013_v25 }
 0xb05   :  { %8783 = vmatpush1.bf16.msra.mxu0 %v11021_v35 }
 0xb06   :  { %8785 = vmatprep.subr.bf16.mxu0 %v11026_v38 }
 0xb09   :  { %8787 = vmatpush1.bf16.msra.mxu0 %v11029_v45 }
 0xb0a   :  { %8789 = vmatprep.subr.bf16.mxu0 %v11032_v46 }
 0xb0d   :  { %8791 = vmatpush1.bf16.msra.mxu0 %v11039_v49 }
 0xb0e   :  { %8793 = vmatprep.subr.bf16.mxu0 %v11042_v52 }
 0xb11   :  { %8795 = vmatpush1.bf16.msra.mxu0 %v11045_v56 }
 0xb12   :  { %8797 = vmatprep.subr.bf16.mxu0 %v11048_v57 }
 0xb15   :  { %8799 = vmatpush1.bf16.msra.mxu0 %v11051_v63 }
 0xb16   :  { %8801 = vmatprep.subr.bf16.mxu0 %v11054_v1 }
 0xb19   :  { %8803 = vmatpush1.bf16.msra.mxu0 %v11057_v8 }
 0xb1a   :  { %8805 = vmatprep.subr.bf16.mxu0 %v11060_v9 }
 0xb1d   :  { %8807 = vmatpush1.bf16.msra.mxu0 %v11063_v12 }
 0xb1e   :  { %8809 = vmatprep.subr.bf16.mxu0 %v11067_v22 }
 0xb21   :  { %8811 = vmatpush1.bf16.msra.mxu0 %v11069_v23 }
 0xb22   :  { %8813 = vmatprep.subr.bf16.mxu0 %v11073_v27 }
 0xb25   :  { %8815 = vmatpush1.bf16.msra.mxu0 %v11075_v31 }
 0xb26   :  { %8817 = vmatprep.subr.bf16.mxu0 %v11079_v34 }
 0xb29   :  { %8819 = vmatpush1.bf16.msra.mxu0 %v11081_v39 }
 0xb2a   :  { %8821 = vmatprep.subr.bf16.mxu0 %v11085_v42 }
 0xb2d   :  { %8823 = vmatpush1.bf16.msra.mxu0 %v11087_v47 }
 0xb2e   :  { %8825 = vmatprep.subr.bf16.mxu0 %v11091_v48 }
 0xb31   :  { %8827 = vmatpush1.bf16.msra.mxu0 %v11093_v4 }
 0xb32   :  { %8829 = vmatprep.subr.bf16.mxu0 %v12621_v30 }
 0xb35   :  { %8831 = vmatpush1.bf16.msra.mxu0 %v12622_v51 }
 0xb36   :  { %8833 = vmatprep.subr.bf16.mxu0 %v12623_v10 }
 0xb39   :  { %8835 = vmatpush1.bf16.msra.mxu0 %v12624_v13 }
 0xb3a   :  { %8837 = vmatprep.subr.bf16.mxu0 %v12625_v59 }
 0xb3d   :  { %8839 = vmatpush1.bf16.msra.mxu0 %v12626_v26 }
 0xb3e   :  { %4837 = vmatprep.subr.bf16.mxu0 %v9657_v29 }
 0xbd3   :  { %v3863_v44 = vpop.f32.mrb[16].mxu0 }
 0xbd4   :  { %v3865_v11 = vpop.f32.mrb[17].mxu0 }
 0xbd5   :  { %v3870_v6 = vcombine.low %v3863_v44, %v3865_v11 }
 0xbd7   :  { %v3877_v43 = vrot.slane %v3870_v6, %v12615_v61 }
 0xbd9   :  { %v3878_v50 = vcombine.high %v3877_v43, %v3877_v43  ;;  %v3885_v14 = vrot.slane %v3877_v43, %v12615_v61 }
 0xbdb   :  { %v3892_v19 = vrot.slane %v3878_v50, %v12615_v61  ;;  %v3896_v15 = vrot.slane %v3885_v14, %v12616_v5  ;;  %v3900_v60 = vrot.slane %v3885_v14, %v12617_v40 }
 0xbdd   :  { %v3904_v36 = vrot.slane %v3892_v19, %v12616_v5  ;;  %v3908_v18 = vrot.slane %v3892_v19, %v12617_v40  ;;  %v11759_v16 = vsub.f32 %v11690_v54, %v3896_v15  ;;  %v11762_v7 = vsub.f32 %v11695_v53, %v3900_v60  ;;  %v12635_v54 = vld [vmem:[#allocation55_spill] sm:$0xff] }
 0xbde   :  { %v11765_v2 = vsub.f32 %v11692_v37, %v3896_v15  ;;  %v11768_v3 = vsub.f32 %v11697_v33, %v3900_v60 }
 0xbdf   :  { %v11771_v32 = vsub.f32 %v12633_v20, %v3904_v36  ;;  %v11774_v62 = vsub.f32 %v11710_v28, %v3908_v18  ;;  %v11777_v0 = vsub.f32 %v12634_v24, %v3904_v36  ;;  %v11780_v41 = vsub.f32 %v12635_v54, %v3908_v18 }
 0xbe0   :  { %v3921_v53 = vmul.f32 %v11759_v16, %v11759_v16  ;;  %v3922_v37 = vmul.f32 %v11762_v7, %v11762_v7  ;;  %v3923_v33 = vmul.f32 %v11765_v2, %v11765_v2  ;;  %v3924_v55 = vmul.f32 %v11768_v3, %v11768_v3 }
 0xbe1   :  { %v3925_v28 = vmul.f32 %v11771_v32, %v11771_v32  ;;  %v3926_v58 = vmul.f32 %v11774_v62, %v11774_v62  ;;  %v3927_v17 = vmul.f32 %v11777_v0, %v11777_v0  ;;  %v3928_v29 = vmul.f32 %v11780_v41, %v11780_v41 }
 0xbe2   :  { %v3929_v44 = vadd.f32 %v3923_v33, %v3921_v53  ;;  %v3936_v11 = vadd.f32 %v3924_v55, %v3922_v37 }
 0xbe3   :  { %v3950_v6 = vadd.f32 %v3928_v29, %v3926_v58  ;;  %v3943_v43 = vadd.f32 %v3927_v17, %v3925_v28 }
 0xbe4   :  { %v3937_v50 = vrot.slane %v3936_v11, 4  ;;  %v3930_v14 = vrot.slane %v3929_v44, 4 }
 0xbe5   :  { %v3951_v19 = vrot.slane %v3950_v6, 4  ;;  %v3944_v15 = vrot.slane %v3943_v43, 4 }
 0xbe6   :  { %v3938_v60 = vadd.f32 %v3937_v50, %v3936_v11  ;;  %v3931_v36 = vadd.f32 %v3930_v14, %v3929_v44  ;;  %v9655_v11 = vld [vmem:[#allocation20] ss:$8 sps:$4 sm:$0xff]   ;;  %v9658_v50 = vld [vmem:[#allocation20 + $0x10] ss:$8 sps:$4 sm:$0xff]   ;;  %v9672_v14 = vld [vmem:[#allocation20 + $0x54] ss:$8 sps:$4 sm:$0xff]  }
 0xbe7   :  { %v3952_v18 = vadd.f32 %v3951_v19, %v3950_v6  ;;  %v3945_v20 = vadd.f32 %v3944_v15, %v3943_v43  ;;  %v9660_v43 = vld [vmem:[#allocation20 + $0x14] ss:$8 sps:$4 sm:$0xff]   ;;  %v9670_v19 = vld [vmem:[#allocation20 + $0x50] ss:$8 sps:$4 sm:$0xff]   ;;  %v9675_v15 = vld [vmem:[#allocation20 + $0x64] ss:$8 sps:$4 sm:$0xff]  }
 0xbe8   :  { %v3939_v24 = vrot.slane %v3938_v60, 2  ;;  %v3932_v54 = vrot.slane %v3931_v36, 2 }
 0xbe9   :  { %v3953_v26 = vrot.slane %v3952_v18, 2  ;;  %v3946_v59 = vrot.slane %v3945_v20, 2 }
 0xbea   :  { %v3940_v13 = vadd.f32 %v3939_v24, %v3938_v60  ;;  %v3933_v10 = vadd.f32 %v3932_v54, %v3931_v36  ;;  %v9673_v60 = vld [vmem:[#allocation20 + $0x60] ss:$8 sps:$4 sm:$0xff]   ;;  %v9678_v36 = vld [vmem:[#allocation20 + $0x74] ss:$8 sps:$4 sm:$0xff]  }
 0xbeb   :  { %v3954_v51 = vadd.f32 %v3953_v26, %v3952_v18  ;;  %v3947_v30 = vadd.f32 %v3946_v59, %v3945_v20  ;;  %v9663_v59 = vld [vmem:[#allocation20 + $0x24] ss:$8 sps:$4 sm:$0xff]   ;;  %v9661_v26 = vld [vmem:[#allocation20 + $0x20] ss:$8 sps:$4 sm:$0xff]   ;;  %v9676_v18 = vld [vmem:[#allocation20 + $0x70] ss:$8 sps:$4 sm:$0xff]  }
 0xbec   :  { %v3941_v53 = vrot.slane %v3940_v13, 1  ;;  %v3934_v37 = vrot.slane %v3933_v10, 1  ;;  %v9681_v20 = vld [vmem:[#allocation20 + $0x84] ss:$8 sps:$4 sm:$0xff]   ;;  %v9679_v24 = vld [vmem:[#allocation20 + $0x80] ss:$8 sps:$4 sm:$0xff]  }
 0xbed   :  { %v3955_v33 = vrot.slane %v3954_v51, 1  ;;  %v3948_v55 = vrot.slane %v3947_v30, 1  ;;  %v9684_v54 = vld [vmem:[#allocation20 + $0x94] ss:$8 sps:$4 sm:$0xff]  }
 0xbee   :  { %v3942_v28 = vadd.f32 %v3941_v53, %v3940_v13  ;;  %v3935_v17 = vadd.f32 %v3934_v37, %v3933_v10  ;;  %v9666_v13 = vld [vmem:[#allocation20 + $0x34] ss:$8 sps:$4 sm:$0xff]   ;;  %v9667_v10 = vld [vmem:[#allocation20 + $0x40] ss:$8 sps:$4 sm:$0xff]   ;;  %v9682_v53 = vld [vmem:[#allocation20 + $0x90] ss:$8 sps:$4 sm:$0xff]  }
 0xbef   :  { %v3956_v58 = vadd.f32 %v3955_v33, %v3954_v51  ;;  %v3949_v29 = vadd.f32 %v3948_v55, %v3947_v30  ;;  %v9664_v51 = vld [vmem:[#allocation20 + $0x30] ss:$8 sps:$4 sm:$0xff]   ;;  %v9669_v30 = vld [vmem:[#allocation20 + $0x44] ss:$8 sps:$4 sm:$0xff]   ;;  %v9685_v33 = vld [vmem:[#allocation20 + $0xa0] ss:$8 sps:$4 sm:$0xff]  }
 0xbf0   :  { %v9687_v37 = vld [vmem:[#allocation20 + $0xa4] ss:$8 sps:$4 sm:$0xff]   ;;  %v9688_v55 = vld [vmem:[#allocation20 + $0xb0] ss:$8 sps:$4 sm:$0xff]  }
 0xbf1   :  { %v3962_v44 = vsel %vm243_vm1, %v3956_v58, %v3942_v28  ;;  %v3961_v6 = vsel %vm243_vm1, %v3949_v29, %v3935_v17  ;;  %v9690_v28 = vld [vmem:[#allocation20 + $0xb4] ss:$8 sps:$4 sm:$0xff]   ;;  %v9693_v58 = vld [vmem:[#allocation20 + $0xc4] ss:$8 sps:$4 sm:$0xff]   ;;  %v9691_v17 = vld [vmem:[#allocation20 + $0xc0] ss:$8 sps:$4 sm:$0xff]  }
 0xbf2   :  { %4029 = vmatprep.mubr.f32.mxu0 %v3962_v44  ;;  %v9696_v29 = vld [vmem:[#allocation20 + $0xd4] ss:$8 sps:$4 sm:$0xff]   ;;  %v9699_v44 = vld [vmem:[#allocation20 + $0xe4] ss:$8 sps:$4 sm:$0xff]  }
 0xbf3   :  { %4030 = vmatmul.mubr.f32.vlgmr.msra.gmra.mrb[18].mxu0 %v3961_v6  ;;  %v9697_v6 = vld [vmem:[#allocation20 + $0xe0] ss:$8 sps:$4 sm:$0xff]  }
 0xbf4   :  { %4838 = vmatpush1.bf16.msra.mxu0 %v9655_v11  ;;  %v9694_v11 = vld [vmem:[#allocation20 + $0xd0] ss:$8 sps:$4 sm:$0xff]  }
 0xbf5   :  { %4839 = vmatprep.subr.bf16.mxu0 %v9660_v43  ;;  %v9702_v43 = vld [vmem:[#allocation20 + $0xf4] ss:$8 sps:$4 sm:$0xff]  }
 0xbf8   :  { %4840 = vmatpush1.bf16.msra.mxu0 %v9658_v50  ;;  %v9700_v50 = vld [vmem:[#allocation20 + $0xf0] ss:$8 sps:$4 sm:$0xff]  }
 0xbf9   :  { %4841 = vmatprep.subr.bf16.mxu0 %v9663_v59  ;;  %v9705_v59 = vld [vmem:[#allocation20 + $0x104] ss:$8 sps:$4 sm:$0xff]  }
 0xbfc   :  { %4842 = vmatpush1.bf16.msra.mxu0 %v9661_v26 }
 0xbfd   :  { %4843 = vmatprep.subr.bf16.mxu0 %v9666_v13 }
 0xc00   :  { %4844 = vmatpush1.bf16.msra.mxu0 %v9664_v51 }
 0xc01   :  { %4845 = vmatprep.subr.bf16.mxu0 %v9669_v30 }
 0xc04   :  { %4846 = vmatpush1.bf16.msra.mxu0 %v9667_v10 }
 0xc05   :  { %4847 = vmatprep.subr.bf16.mxu0 %v9672_v14 }
 0xc08   :  { %4848 = vmatpush1.bf16.msra.mxu0 %v9670_v19 }
 0xc09   :  { %4849 = vmatprep.subr.bf16.mxu0 %v9675_v15 }
 0xc0c   :  { %4850 = vmatpush1.bf16.msra.mxu0 %v9673_v60 }
 0xc0d   :  { %4851 = vmatprep.subr.bf16.mxu0 %v9678_v36 }
 0xc10   :  { %4852 = vmatpush1.bf16.msra.mxu0 %v9676_v18 }
 0xc11   :  { %4853 = vmatprep.subr.bf16.mxu0 %v9681_v20 }
 0xc14   :  { %4854 = vmatpush1.bf16.msra.mxu0 %v9679_v24 }
 0xc15   :  { %4855 = vmatprep.subr.bf16.mxu0 %v9684_v54 }
 0xc18   :  { %4856 = vmatpush1.bf16.msra.mxu0 %v9682_v53 }
 0xc19   :  { %4857 = vmatprep.subr.bf16.mxu0 %v9687_v37  ;;  %v11807_v37 = vld [vmem:[#allocation17] sm:$0x3f] }
 0xc1c   :  { %4858 = vmatpush1.bf16.msra.mxu0 %v9685_v33  ;;  %v12636_v33 = vld [vmem:[#allocation44_spill] sm:$0xff] }
 0xc1d   :  { %4859 = vmatprep.subr.bf16.mxu0 %v9690_v28 }
 0xc20   :  { %4860 = vmatpush1.bf16.msra.mxu0 %v9688_v55  ;;  %v4100_v55 = vrot.slane %v11807_v37, %v12636_v33 }
 0xc21   :  { %4861 = vmatprep.subr.bf16.mxu0 %v9693_v58  ;;  %v11811_v58 = vld [vmem:[#allocation17 + $0x8] sm:$0x3f] }
 0xc24   :  { %4862 = vmatpush1.bf16.msra.mxu0 %v9691_v17  ;;  %v4104_v17 = vrot.slane %v11811_v58, %v12636_v33 }
 0xc25   :  { %4863 = vmatprep.subr.bf16.mxu0 %v9696_v29 }
 0xc28   :  { %4864 = vmatpush1.bf16.msra.mxu0 %v9694_v11 }
 0xc29   :  { %4865 = vmatprep.subr.bf16.mxu0 %v9699_v44 }
 0xc2c   :  { %4866 = vmatpush1.bf16.msra.mxu0 %v9697_v6  ;;  %v12637_v6 = vld [vmem:[#allocation46_spill] sm:$0xff] }
 0xc2d   :  { %4867 = vmatprep.subr.bf16.mxu0 %v9702_v43  ;;  %v4116_v43 = vrot.slane %v11807_v37, %v12637_v6 }
 0xc30   :  { %4868 = vmatpush1.bf16.msra.mxu0 %v9700_v50 }
 0xc31   :  { %4890 = vmatprep.subr.bf16.mxu0 %v9705_v59 }
 0xcc6   :  { %v4031_v26 = vpop.f32.mrb[18].mxu0 }
 0xcc7   :  { %v4033_v13 = vpop.f32.mrb[19].mxu0 }
 0xcc8   :  { %v4038_v51 = vcombine.low %v4031_v26, %v4033_v13  ;;  %v4120_v13 = vrot.slane %v11811_v58, %v12637_v6  ;;  %v12663_v6 = vld [vmem:[#allocation51_spill] sm:$0xff] }
 0xcca   :  { %v4045_v30 = vrot.slane %v4038_v51, %v12615_v61 }
 0xccc   :  { %v4046_v10 = vcombine.high %v4045_v30, %v4045_v30  ;;  %v4053_v14 = vrot.slane %v4045_v30, %v12615_v61 }
 0xcce   :  { %v4060_v19 = vrot.slane %v4046_v10, %v12615_v61  ;;  %v4064_v15 = vrot.slane %v4053_v14, %v12616_v5  ;;  %v4068_v60 = vrot.slane %v4053_v14, %v12617_v40 }
 0xcd0   :  { %v4072_v36 = vrot.slane %v4060_v19, %v12616_v5  ;;  %v4076_v18 = vrot.slane %v4060_v19, %v12617_v40  ;;  %v4081_v20 = vadd.f32 1e-05, %v4064_v15  ;;  %v4082_v24 = vadd.f32 1e-05, %v4068_v60 }
 0xcd2   :  { %v4083_v54 = vadd.f32 1e-05, %v4072_v36  ;;  %v4084_v53 = vadd.f32 1e-05, %v4076_v18  ;;  %10187 = vrsqrt.f32 %v4081_v20 }
 0xcd3   :  { %10189 = vrsqrt.f32 %v4082_v24 }
 0xcd4   :  { %10191 = vrsqrt.f32 %v4083_v54 }
 0xcd5   :  { %10193 = vrsqrt.f32 %v4084_v53 }
 0xcdc   :  { %v10188_v28 = vpop.eup %10187 }
 0xcdd   :  { %v10190_v29 = vpop.eup %10189  ;;  %v4089_v11 = vmul.f32 %v10188_v28, %v11759_v16  ;;  %v4091_v44 = vmul.f32 %v10188_v28, %v11765_v2 }
 0xcde   :  { %v10192_v50 = vpop.eup %10191  ;;  %v4090_v59 = vmul.f32 %v10190_v29, %v11762_v7  ;;  %v4092_v26 = vmul.f32 %v10190_v29, %v11768_v3 }
 0xcdf   :  { %v10194_v51 = vpop.eup %10193  ;;  %v4095_v30 = vmul.f32 %v10192_v50, %v11777_v0  ;;  %v4105_v10 = vmul.f32 %v4100_v55, %v4089_v11  ;;  %v4107_v14 = vmul.f32 %v4100_v55, %v4091_v44  ;;  %v4093_v16 = vmul.f32 %v10192_v50, %v11771_v32 }
 0xce0   :  { %v4096_v2 = vmul.f32 %v10194_v51, %v11780_v41  ;;  %v4108_v19 = vmul.f32 %v4104_v17, %v4092_v26  ;;  %v4106_v15 = vmul.f32 %v4104_v17, %v4090_v59  ;;  %v4094_v60 = vmul.f32 %v10194_v51, %v11774_v62 }
 0xce1   :  { %v4123_v36 = vadd.f32 %v4116_v43, %v4107_v14  ;;  %v4121_v7 = vadd.f32 %v4116_v43, %v4105_v10  ;;  %v4109_v18 = vmul.f32 %v4100_v55, %v4093_v16  ;;  %v4111_v3 = vmul.f32 %v4100_v55, %v4095_v30 }
 0xce2   :  { %v4122_v20 = vadd.f32 %v4120_v13, %v4106_v15  ;;  %v4124_v24 = vadd.f32 %v4120_v13, %v4108_v19  ;;  %v4110_v54 = vmul.f32 %v4104_v17, %v4094_v60  ;;  %v4112_v53 = vmul.f32 %v4104_v17, %v4096_v2 }
 0xce3   :  { %v7910_v28 = vmul.f32 -1.442695, %v4123_v36  ;;  %v7908_v0 = vmul.f32 -1.442695, %v4121_v7  ;;  %v11827_v29 = vadd.f32 %v4116_v43, %v4109_v18  ;;  %v11829_v11 = vadd.f32 %v4116_v43, %v4111_v3 }
 0xce4   :  { %v7909_v32 = vmul.f32 -1.442695, %v4122_v20  ;;  %v7911_v41 = vmul.f32 -1.442695, %v4124_v24  ;;  %v4126_v44 = vadd.f32 %v4120_v13, %v4110_v54  ;;  %v4128_v50 = vadd.f32 %v4120_v13, %v4112_v53 }
 0xce5   :  { %10195 = vpow2.f32 %v7910_v28  ;;  %v7912_v55 = vmul.f32 -1.442695, %v11827_v29  ;;  %v7914_v17 = vmul.f32 -1.442695, %v11829_v11 }
 0xce6   :  { %10197 = vpow2.f32 %v7909_v32  ;;  %v7913_v62 = vmul.f32 -1.442695, %v4126_v44  ;;  %v7915_v59 = vmul.f32 -1.442695, %v4128_v50 }
 0xce7   :  { %10199 = vpow2.f32 %v7911_v41 }
 0xce8   :  { %10201 = vpow2.f32 %v7908_v0 }
 0xce9   :  { %10203 = vpow2.f32 %v7913_v62 }
 0xcea   :  { %10205 = vpow2.f32 %v7915_v59 }
 0xceb   :  { %10207 = vpow2.f32 %v7912_v55 }
 0xcec   :  { %10209 = vpow2.f32 %v7914_v17 }
 0xcef   :  { %v10196_v43 = vpop.eup %10195 }
 0xcf0   :  { %v10198_v26 = vpop.eup %10197  ;;  %v4155_v51 = vadd.f32 1.0, %v10196_v43 }
 0xcf1   :  { %v10200_v30 = vpop.eup %10199  ;;  %v4154_v10 = vadd.f32 1.0, %v10198_v26 }
 0xcf2   :  { %v10202_v13 = vpop.eup %10201  ;;  %10211 = vrcp.f32 %v4155_v51  ;;  %v4156_v14 = vadd.f32 1.0, %v10200_v30 }
 0xcf3   :  { %v10204_v16 = vpop.eup %10203  ;;  %10213 = vrcp.f32 %v4154_v10  ;;  %v4153_v2 = vadd.f32 1.0, %v10202_v13 }
 0xcf4   :  { %v10206_v19 = vpop.eup %10205  ;;  %10215 = vrcp.f32 %v4156_v14  ;;  %v4158_v15 = vadd.f32 1.0, %v10204_v16 }
 0xcf5   :  { %v10208_v60 = vpop.eup %10207  ;;  %10217 = vrcp.f32 %v4153_v2  ;;  %v4160_v18 = vadd.f32 1.0, %v10206_v19 }
 0xcf6   :  { %v10210_v3 = vpop.eup %10209  ;;  %10219 = vrcp.f32 %v4158_v15  ;;  %v4157_v54 = vadd.f32 1.0, %v10208_v60 }
 0xcf7   :  { %10221 = vrcp.f32 %v4160_v18  ;;  %v4159_v53 = vadd.f32 1.0, %v10210_v3 }
 0xcf8   :  { %10223 = vrcp.f32 %v4157_v54 }
 0xcf9   :  { %10225 = vrcp.f32 %v4159_v53  ;;  %v9703_v53 = vld [vmem:[#allocation20 + $0x100] ss:$8 sps:$4 sm:$0xff]  }
 0xcfc   :  { %v10212_v28 = vpop.eup %10211 }
 0xcfd   :  { %v10214_v0 = vpop.eup %10213  ;;  %v11833_v32 = vmul.f32 %v10212_v28, %v4123_v36 }
 0xcfe   :  { %v10216_v41 = vpop.eup %10215  ;;  %v11835_v62 = vmul.f32 %v10214_v0, %v4122_v20 }
 0xcff   :  { %v10218_v59 = vpop.eup %10217  ;;  %v4180_v55 = vmul.f32 %v10216_v41, %v4124_v24  ;;  %v4291_v51 = vrot.slane %v11833_v32, 7  ;;  %v4314_v16 = vrot.slane %v11833_v32, 1 }
 0xd00   :  { %v10220_v17 = vpop.eup %10219  ;;  %v4290_v43 = vrot.slane %v11835_v62, 7  ;;  %v11838_v26 = vmul.f32 %v10218_v59, %v4121_v7  ;;  %v4316_v30 = vrot.slane %v11835_v62, 1  ;;  %v9708_v59 = vld [vmem:[#allocation20 + $0x114] ss:$8 sps:$4 sm:$0xff]  }
 0xd01   :  { %v10222_v10 = vpop.eup %10221  ;;  %v4293_v13 = vrot.slane %v4180_v55, 7  ;;  %v11842_v14 = vmul.f32 %v10220_v17, %v4126_v44  ;;  %v4317_v36 = vrot.slane %v4180_v55, 1 }
 0xd02   :  { %v10224_v20 = vpop.eup %10223  ;;  %v4289_v2 = vrot.slane %v11838_v26, 7  ;;  %v11846_v24 = vmul.f32 %v10222_v10, %v4128_v50  ;;  %v4339_v7 = vpack.c.bf16 %v11833_v32, %v11838_v26  ;;  %v4313_v19 = vrot.slane %v11838_v26, 1  ;;  %v9760_v26 = vld [vmem:[#allocation20 + $0x230] ss:$8 sps:$4 sm:$0xff]  }
 0xd03   :  { %v10226_v15 = vpop.eup %10225  ;;  %v4294_v60 = vsel %vm582_vm2, %v4290_v43, %v4293_v13  ;;  %v4296_v18 = vrot.slane %v11842_v14, 7  ;;  %v11854_v44 = vmul.f32 %v10224_v20, %v11827_v29  ;;  %v4318_v3 = vsel %vm595_vm4, %v4316_v30, %v4317_v36 }
 0xd04   :  { %v8014_v54 = vpack.c.bf16 %v4294_v60, %v4290_v43  ;;  %v4292_v50 = vsel %vm582_vm2, %v4289_v2, %v4291_v51  ;;  %v4299_v28 = vrot.slane %v11846_v24, 7  ;;  %v11860_v0 = vmul.f32 %v10226_v15, %v11829_v11  ;;  %v9706_v60 = vld [vmem:[#allocation20 + $0x110] ss:$8 sps:$4 sm:$0xff]  }
 0xd05   :  { %v8018_v41 = vpack.c.bf16 %v4292_v50, %v4289_v2  ;;  %v4295_v17 = vrot.slane %v11854_v44, 7  ;;  %v4346_v10 = vpack.c.bf16 %v11846_v24, %v11842_v14  ;;  %v11865_v29 = vpack.c.bf16 %v4317_v36, %v4318_v3 }
 0xd06   :  { %8015 = vmatprep.mubr.msk.bf16.mxu0 %vm11000_vm6, %v8014_v54  ;;  %v4300_v43 = vsel %vm582_vm2, %v4296_v18, %v4299_v28  ;;  %v4297_v51 = vrot.slane %v11860_v0, 7  ;;  %v4315_v30 = vsel %vm595_vm4, %v4313_v19, %v4314_v16  ;;  %v4322_v36 = vrot.slane %v11842_v14, 1  ;;  %v9711_v19 = vld [vmem:[#allocation20 + $0x124] ss:$8 sps:$4 sm:$0xff]  }
 0xd07   :  { %8019 = vmatmul.mubr.msk.bf16.vlgmr.msra.gmra.mrb[20].mxu0 %vm11000_vm6, %v8018_v41  ;;  %v8022_v20 = vpack.c.bf16 %v4300_v43, %v4296_v18  ;;  %v11876_v2 = vpack.c.bf16 %v4314_v16, %v4315_v30  ;;  %v4323_v15 = vrot.slane %v11846_v24, 1  ;;  %v4319_v3 = vrot.slane %v11854_v44, 1  ;;  %v9714_v30 = vld [vmem:[#allocation20 + $0x134] ss:$8 sps:$4 sm:$0xff]   ;;  %v9765_v14 = vld [vmem:[#allocation20 + $0x244] ss:$8 sps:$4 sm:$0xff]  }
 0xd08   :  { %4891 = vmatpush1.bf16.msra.mxu0 %v9703_v53  ;;  %v4320_v54 = vrot.slane %v11860_v0, 1  ;;  %v4298_v16 = vsel %vm582_vm2, %v4295_v17, %v4297_v51  ;;  %v9709_v53 = vld [vmem:[#allocation20 + $0x120] ss:$8 sps:$4 sm:$0xff]   ;;  %v4340_v11 = vpack.c.bf16 %v4180_v55, %v11835_v62  ;;  %v9717_v51 = vld [vmem:[#allocation20 + $0x144] ss:$8 sps:$4 sm:$0xff]  }
 0xd09   :  { %8023 = vmatprep.mubr.msk.bf16.mxu0 %vm11000_vm6, %v8022_v20  ;;  %4892 = vmatprep.subr.bf16.mxu0 %v9708_v59  ;;  %v4324_v50 = vsel %vm595_vm4, %v4322_v36, %v4323_v15  ;;  %v8026_v43 = vpack.c.bf16 %v4298_v16, %v4295_v17  ;;  %v9712_v59 = vld [vmem:[#allocation20 + $0x130] ss:$8 sps:$4 sm:$0xff]   ;;  %v9715_v20 = vld [vmem:[#allocation20 + $0x140] ss:$8 sps:$4 sm:$0xff]   ;;  %v9720_v36 = vld [vmem:[#allocation20 + $0x154] ss:$8 sps:$4 sm:$0xff]  }
 0xd0a   :  { %v11886_v18 = vpack.c.bf16 %v4323_v15, %v4324_v50  ;;  %v4321_v28 = vsel %vm595_vm4, %v4319_v3, %v4320_v54  ;;  %v9718_v15 = vld [vmem:[#allocation20 + $0x150] ss:$8 sps:$4 sm:$0xff]   ;;  %v9721_v17 = vld [vmem:[#allocation20 + $0x160] ss:$8 sps:$4 sm:$0xff]   ;;  %v9726_v62 = vld [vmem:[#allocation20 + $0x174] ss:$8 sps:$4 sm:$0xff]  }
 0xd0b   :  { %v11889_v41 = vpack.c.bf16 %v4320_v54, %v4321_v28  ;;  %v9724_v55 = vld [vmem:[#allocation20 + $0x170] ss:$8 sps:$4 sm:$0xff]   ;;  %v9729_v3 = vld [vmem:[#allocation20 + $0x184] ss:$8 sps:$4 sm:$0xff]   ;;  %v9732_v54 = vld [vmem:[#allocation20 + $0x194] ss:$8 sps:$4 sm:$0xff]  }
 0xd0c   :  { %4893 = vmatpush1.bf16.msra.mxu0 %v9706_v60  ;;  %v9723_v60 = vld [vmem:[#allocation20 + $0x164] ss:$8 sps:$4 sm:$0xff]   ;;  %v9733_v16 = vld [vmem:[#allocation20 + $0x1a0] ss:$8 sps:$4 sm:$0xff]   ;;  %v9738_v28 = vld [vmem:[#allocation20 + $0x1b4] ss:$8 sps:$4 sm:$0xff]  }
 0xd0d   :  { %4894 = vmatprep.subr.bf16.mxu0 %v9711_v19  ;;  %v9730_v19 = vld [vmem:[#allocation20 + $0x190] ss:$8 sps:$4 sm:$0xff]   ;;  %v9735_v50 = vld [vmem:[#allocation20 + $0x1a4] ss:$8 sps:$4 sm:$0xff]   ;;  %v9763_v24 = vld [vmem:[#allocation20 + $0x240] ss:$8 sps:$4 sm:$0xff]  }
 0xd0f   :  { %8027 = vmatmul.mubr.msk.bf16.gmra.mrb[24].mxu0 %vm11000_vm6, %v8026_v43  ;;  %v9741_v43 = vld [vmem:[#allocation20 + $0x1c4] ss:$8 sps:$4 sm:$0xff]  }
 0xd10   :  { %4895 = vmatpush1.bf16.msra.mxu0 %v9709_v53  ;;  %4922 = vmatprep.mubr.bf16.mxu0 %v4340_v11  ;;  %v9727_v11 = vld [vmem:[#allocation20 + $0x180] ss:$8 sps:$4 sm:$0xff]   ;;  %v9736_v53 = vld [vmem:[#allocation20 + $0x1b0] ss:$8 sps:$4 sm:$0xff]  }
 0xd11   :  { %4896 = vmatprep.subr.bf16.mxu0 %v9714_v30  ;;  %v9739_v30 = vld [vmem:[#allocation20 + $0x1c0] ss:$8 sps:$4 sm:$0xff]  }
 0xd14   :  { %4897 = vmatpush1.bf16.msra.mxu0 %v9712_v59  ;;  %v9744_v59 = vld [vmem:[#allocation20 + $0x1d4] ss:$8 sps:$4 sm:$0xff]  }
 0xd15   :  { %4898 = vmatprep.subr.bf16.mxu0 %v9717_v51  ;;  %v9742_v51 = vld [vmem:[#allocation20 + $0x1d0] ss:$8 sps:$4 sm:$0xff]  }
 0xd18   :  { %4899 = vmatpush1.bf16.msra.mxu0 %v9715_v20  ;;  %v9747_v20 = vld [vmem:[#allocation20 + $0x1e4] ss:$8 sps:$4 sm:$0xff]  }
 0xd19   :  { %4900 = vmatprep.subr.bf16.mxu0 %v9720_v36  ;;  %v9745_v36 = vld [vmem:[#allocation20 + $0x1e0] ss:$8 sps:$4 sm:$0xff]  }
 0xd1c   :  { %4901 = vmatpush1.bf16.msra.mxu0 %v9718_v15  ;;  %v9750_v15 = vld [vmem:[#allocation20 + $0x1f4] ss:$8 sps:$4 sm:$0xff]  }
 0xd1d   :  { %4902 = vmatprep.subr.bf16.mxu0 %v9723_v60  ;;  %v9748_v60 = vld [vmem:[#allocation20 + $0x1f0] ss:$8 sps:$4 sm:$0xff]  }
 0xd20   :  { %4903 = vmatpush1.bf16.msra.mxu0 %v9721_v17  ;;  %v9753_v17 = vld [vmem:[#allocation20 + $0x204] ss:$8 sps:$4 sm:$0xff]  }
 0xd21   :  { %4904 = vmatprep.subr.bf16.mxu0 %v9726_v62  ;;  %v9751_v62 = vld [vmem:[#allocation20 + $0x200] ss:$8 sps:$4 sm:$0xff]  }
 0xd24   :  { %4905 = vmatpush1.bf16.msra.mxu0 %v9724_v55  ;;  %v9756_v55 = vld [vmem:[#allocation20 + $0x214] ss:$8 sps:$4 sm:$0xff]  }
 0xd25   :  { %4906 = vmatprep.subr.bf16.mxu0 %v9729_v3  ;;  %v9754_v3 = vld [vmem:[#allocation20 + $0x210] ss:$8 sps:$4 sm:$0xff]  }
 0xd28   :  { %4907 = vmatpush1.bf16.msra.mxu0 %v9727_v11  ;;  %v9759_v11 = vld [vmem:[#allocation20 + $0x224] ss:$8 sps:$4 sm:$0xff]  }
 0xd29   :  { %4908 = vmatprep.subr.bf16.mxu0 %v9732_v54  ;;  %v9757_v54 = vld [vmem:[#allocation20 + $0x220] ss:$8 sps:$4 sm:$0xff]  }
 0xd2c   :  { %4909 = vmatpush1.bf16.msra.mxu0 %v9730_v19  ;;  %v9762_v19 = vld [vmem:[#allocation20 + $0x234] ss:$8 sps:$4 sm:$0xff]  }
 0xd2d   :  { %4910 = vmatprep.subr.bf16.mxu0 %v9735_v50  ;;  %v12639_v50 = vpack.c.bf16 %v11860_v0, %v11854_v44  ;;  %v9774_v44 = vld [vmem:[#allocation20 + $0x274] ss:$8 sps:$4 sm:$0xff]   ;;  %v9772_v0 = vld [vmem:[#allocation20 + $0x270] ss:$8 sps:$4 sm:$0xff]  }
 0xd30   :  { %4911 = vmatpush1.bf16.msra.mxu0 %v9733_v16  ;;  %v9771_v16 = vld [vmem:[#allocation20 + $0x264] ss:$8 sps:$4 sm:$0xff]  }
 0xd31   :  { %4912 = vmatprep.subr.bf16.mxu0 %v9738_v28  ;;  %v9769_v28 = vld [vmem:[#allocation20 + $0x260] ss:$8 sps:$4 sm:$0xff]  }
 0xd34   :  { %4913 = vmatpush1.bf16.msra.mxu0 %v9736_v53  ;;  %v9777_v53 = vld [vmem:[#allocation20 + $0x284] ss:$8 sps:$4 sm:$0xff]  }
 0xd35   :  { %4914 = vmatprep.subr.bf16.mxu0 %v9741_v43  ;;  %v9780_v43 = vld [vmem:[#allocation20 + $0x294] ss:$8 sps:$4 sm:$0xff]  }
 0xd38   :  { %4915 = vmatpush1.bf16.msra.mxu0 %v9739_v30  ;;  %v9778_v30 = vld [vmem:[#allocation20 + $0x290] ss:$8 sps:$4 sm:$0xff]  }
 0xd39   :  { %4916 = vmatprep.subr.bf16.mxu0 %v9744_v59  ;;  %v9783_v59 = vld [vmem:[#allocation20 + $0x2a4] ss:$8 sps:$4 sm:$0xff]  }
 0xd3c   :  { %4917 = vmatpush1.bf16.msra.mxu0 %v9742_v51  ;;  %v9781_v51 = vld [vmem:[#allocation20 + $0x2a0] ss:$8 sps:$4 sm:$0xff]  }
 0xd3d   :  { %4918 = vmatprep.subr.bf16.mxu0 %v9747_v20  ;;  %v9786_v20 = vld [vmem:[#allocation20 + $0x2b4] ss:$8 sps:$4 sm:$0xff]  }
 0xd40   :  { %4919 = vmatpush1.bf16.msra.mxu0 %v9745_v36  ;;  %v9784_v36 = vld [vmem:[#allocation20 + $0x2b0] ss:$8 sps:$4 sm:$0xff]  }
 0xd41   :  { %4920 = vmatprep.subr.bf16.mxu0 %v9750_v15  ;;  %v9789_v15 = vld [vmem:[#allocation20 + $0x2c4] ss:$8 sps:$4 sm:$0xff]  }
 0xd44   :  { %4921 = vmatpush1.bf16.msra.mxu0 %v9748_v60  ;;  %v9787_v60 = vld [vmem:[#allocation20 + $0x2c0] ss:$8 sps:$4 sm:$0xff]  }
 0xd45   :  { %4943 = vmatprep.subr.bf16.mxu0 %v9753_v17  ;;  %v9792_v17 = vld [vmem:[#allocation20 + $0x2d4] ss:$8 sps:$4 sm:$0xff]  }
 0xd47   :  { %4923 = vmatmul.mubr.bf16.vlgmr.msra.gmra.mrb[20].mxu0 %v4339_v7  ;;  %v9768_v7 = vld [vmem:[#allocation20 + $0x254] ss:$8 sps:$4 sm:$0xff]  }
 0xd48   :  { %4932 = vmatprep.mubr.bf16.mxu0 %v4346_v10  ;;  %4944 = vmatpush1.bf16.msra.mxu0 %v9751_v62  ;;  %v9766_v10 = vld [vmem:[#allocation20 + $0x250] ss:$8 sps:$4 sm:$0xff]  }
 0xd49   :  { %4945 = vmatprep.subr.bf16.mxu0 %v9756_v55  ;;  %v9790_v62 = vld [vmem:[#allocation20 + $0x2d0] ss:$8 sps:$4 sm:$0xff]   ;;  %v9795_v55 = vld [vmem:[#allocation20 + $0x2e4] ss:$8 sps:$4 sm:$0xff]  }
 0xd4c   :  { %4946 = vmatpush1.bf16.msra.mxu0 %v9754_v3  ;;  %v9793_v3 = vld [vmem:[#allocation20 + $0x2e0] ss:$8 sps:$4 sm:$0xff]  }
 0xd4d   :  { %4947 = vmatprep.subr.bf16.mxu0 %v9759_v11  ;;  %v9798_v11 = vld [vmem:[#allocation20 + $0x2f4] ss:$8 sps:$4 sm:$0xff]  }
 0xd4f   :  { %4933 = vmatmul.mubr.bf16.gmra.mrb[24].mxu0 %v12639_v50  ;;  %v12645_v50 = vld [vmem:[#allocation41_spill] sm:$0xff] }
 0xd50   :  { %4948 = vmatpush1.bf16.msra.mxu0 %v9757_v54  ;;  %8030 = vmatprep.mubr.msk.bf16.mxu0 %vm11007_vm7, %v11865_v29  ;;  %v9775_v29 = vld [vmem:[#allocation20 + $0x280] ss:$8 sps:$4 sm:$0xff]   ;;  %v9796_v54 = vld [vmem:[#allocation20 + $0x2f0] ss:$8 sps:$4 sm:$0xff]  }
 0xd51   :  { %4949 = vmatprep.subr.bf16.mxu0 %v9762_v19  ;;  %v12641_v19 = vld [vmem:[#allocation34_spill] sm:$0xff] }
 0xd54   :  { %4950 = vmatpush1.bf16.msra.mxu0 %v9760_v26  ;;  %v12646_v26 = vld [vmem:[#allocation42_spill] sm:$0xff] }
 0xd55   :  { %4951 = vmatprep.subr.bf16.mxu0 %v9765_v14  ;;  %v12647_v14 = vld [vmem:[#allocation43_spill] sm:$0xff] }
 0xd58   :  { %4952 = vmatpush1.bf16.msra.mxu0 %v9763_v24  ;;  %v12648_v24 = vld [vmem:[#allocation32_spill] sm:$0xff] }
 0xd59   :  { %4953 = vmatprep.subr.bf16.mxu0 %v9768_v7  ;;  %v4352_v7 = vrot.slane %v11807_v37, %v12648_v24  ;;  %v12655_v37 = vld [vmem:[#allocation48_spill] sm:$0xff] }
 0xd5c   :  { %4954 = vmatpush1.bf16.msra.mxu0 %v9766_v10  ;;  %v4356_v10 = vrot.slane %v11811_v58, %v12648_v24 }
 0xd5d   :  { %4955 = vmatprep.subr.bf16.mxu0 %v9771_v16 }
 0xd60   :  { %4956 = vmatpush1.bf16.msra.mxu0 %v9769_v28 }
 0xd61   :  { %4957 = vmatprep.subr.bf16.mxu0 %v9774_v44 }
 0xd64   :  { %4958 = vmatpush1.bf16.msra.mxu0 %v9772_v0 }
 0xd65   :  { %4959 = vmatprep.subr.bf16.mxu0 %v9777_v53 }
 0xd68   :  { %4960 = vmatpush1.bf16.msra.mxu0 %v9775_v29 }
 0xd69   :  { %4961 = vmatprep.subr.bf16.mxu0 %v9780_v43 }
 0xd6c   :  { %4962 = vmatpush1.bf16.msra.mxu0 %v9778_v30 }
 0xd6d   :  { %4963 = vmatprep.subr.bf16.mxu0 %v9783_v59  ;;  %v12649_v59 = vld [vmem:[#allocation45_spill] sm:$0xff] }
 0xd70   :  { %4964 = vmatpush1.bf16.msra.mxu0 %v9781_v51 }
 0xd71   :  { %4965 = vmatprep.subr.bf16.mxu0 %v9786_v20  ;;  %v12651_v20 = vld [vmem:[#allocation49_spill] sm:$0xff] }
 0xd74   :  { %4966 = vmatpush1.bf16.msra.mxu0 %v9784_v36 }
 0xd75   :  { %4967 = vmatprep.subr.bf16.mxu0 %v9789_v15  ;;  %v12653_v15 = vld [vmem:[#allocation47_spill] sm:$0xff] }
 0xd78   :  { %4968 = vmatpush1.bf16.msra.mxu0 %v9787_v60 }
 0xd79   :  { %4969 = vmatprep.subr.bf16.mxu0 %v9792_v17 }
 0xd7c   :  { %4970 = vmatpush1.bf16.msra.mxu0 %v9790_v62 }
 0xd7d   :  { %4971 = vmatprep.subr.bf16.mxu0 %v9795_v55 }
 0xd80   :  { %4972 = vmatpush1.bf16.msra.mxu0 %v9793_v3 }
 0xd81   :  { %4973 = vmatprep.subr.bf16.mxu0 %v9798_v11 }
 0xd84   :  { %4974 = vmatpush1.bf16.msra.mxu0 %v9796_v54 }
 0xd85   :  { %8969 = vmatprep.subr.bf16.mxu0 %v12641_v19 }
 0xd87   :  { %8033 = vmatmul.mubr.msk.bf16.vlgmr.msra.gmra.mrb[20].mxu0 %vm11007_vm7, %v11876_v2  ;;  %v12642_v2 = vld [vmem:[#allocation38_spill] sm:$0xff] }
 0xd88   :  { %8036 = vmatprep.mubr.msk.bf16.mxu0 %vm11007_vm7, %v11886_v18  ;;  %8971 = vmatpush1.bf16.msra.mxu0 %v11011_v21  ;;  %v12643_v18 = vld [vmem:[#allocation39_spill] sm:$0xff] }
 0xd89   :  { %8973 = vmatprep.subr.bf16.mxu0 %v11013_v25 }
 0xd8c   :  { %8975 = vmatpush1.bf16.msra.mxu0 %v11021_v35 }
 0xd8d   :  { %8977 = vmatprep.subr.bf16.mxu0 %v11026_v38 }
 0xd8f   :  { %8039 = vmatmul.mubr.msk.bf16.gmra.mrb[24].mxu0 %vm11007_vm7, %v11889_v41  ;;  %v12644_v41 = vld [vmem:[#allocation40_spill] sm:$0xff] }
 0xd90   :  { %8979 = vmatpush1.bf16.msra.mxu0 %v11029_v45 }
 0xd91   :  { %8981 = vmatprep.subr.bf16.mxu0 %v11032_v46 }
 0xd94   :  { %8983 = vmatpush1.bf16.msra.mxu0 %v11039_v49 }
 0xd95   :  { %8985 = vmatprep.subr.bf16.mxu0 %v11042_v52 }
 0xd98   :  { %8987 = vmatpush1.bf16.msra.mxu0 %v11045_v56 }
 0xd99   :  { %8989 = vmatprep.subr.bf16.mxu0 %v11048_v57 }
 0xd9c   :  { %8991 = vmatpush1.bf16.msra.mxu0 %v11051_v63 }
 0xd9d   :  { %8993 = vmatprep.subr.bf16.mxu0 %v11054_v1 }
 0xda0   :  { %8995 = vmatpush1.bf16.msra.mxu0 %v11057_v8 }
 0xda1   :  { %8997 = vmatprep.subr.bf16.mxu0 %v11060_v9 }
 0xda4   :  { %8999 = vmatpush1.bf16.msra.mxu0 %v11063_v12 }
 0xda5   :  { %9001 = vmatprep.subr.bf16.mxu0 %v11067_v22 }
 0xda8   :  { %9003 = vmatpush1.bf16.msra.mxu0 %v11069_v23 }
 0xda9   :  { %9005 = vmatprep.subr.bf16.mxu0 %v11073_v27 }
 0xdac   :  { %9007 = vmatpush1.bf16.msra.mxu0 %v11075_v31 }
 0xdad   :  { %9009 = vmatprep.subr.bf16.mxu0 %v11079_v34 }
 0xdb0   :  { %9011 = vmatpush1.bf16.msra.mxu0 %v11081_v39 }
 0xdb1   :  { %9013 = vmatprep.subr.bf16.mxu0 %v11085_v42 }
 0xdb4   :  { %9015 = vmatpush1.bf16.msra.mxu0 %v11087_v47 }
 0xdb5   :  { %9017 = vmatprep.subr.bf16.mxu0 %v11091_v48 }
 0xdb8   :  { %9019 = vmatpush1.bf16.msra.mxu0 %v11093_v4 }
 0xdb9   :  { %9021 = vmatprep.subr.bf16.mxu0 %v12642_v2 }
 0xdbc   :  { %9023 = vmatpush1.bf16.msra.mxu0 %v12643_v18 }
 0xdbd   :  { %9025 = vmatprep.subr.bf16.mxu0 %v12644_v41 }
 0xdc0   :  { %9027 = vmatpush1.bf16.msra.mxu0 %v12645_v50 }
 0xdc1   :  { %9029 = vmatprep.subr.bf16.mxu0 %v12646_v26 }
 0xdc4   :  { %9031 = vmatpush1.bf16.msra.mxu0 %v12647_v14 }
 0xdc5   :  { %9033 = vmatprep.subr.bf16.mxu0 %v12641_v19 }
 0xe5a   :  { %v4977_v16 = vpop.f32.mrb[20].mxu0 }
 0xe5b   :  { %v9136_v28 = vadd.f32 %v4977_v16, %v4352_v7  ;;  %v4979_v44 = vpop.f32.mrb[21].mxu0 }
 0xe5c   :  { %v9137_v0 = vadd.f32 %v4979_v44, %v4356_v10  ;;  %v4981_v53 = vpop.f32.mrb[22].mxu0 }
 0xe5d   :  { %v9138_v29 = vadd.f32 %v4981_v53, %v4352_v7  ;;  %v4983_v43 = vpop.f32.mrb[23].mxu0  ;;  %v11953_v51 = vadd.f32 %v9136_v28, %v12649_v59 }
 0xe5e   :  { %v9139_v30 = vadd.f32 %v4983_v43, %v4356_v10  ;;  %v11959_v60 = vadd.f32 %v9137_v0, %v12653_v15 }
 0xe5f   :  { %12650 = vst [vmem:[#allocation33_spill] sm:$0xff] %v11953_v51  ;;  %v11956_v36 = vadd.f32 %v9138_v29, %v12651_v20  ;;  %v12659_v20 = vld [vmem:[#allocation50_spill] sm:$0xff] }
 0xe60   :  { %12654 = vst [vmem:[#allocation55_spill] sm:$0xff] %v11959_v60  ;;  %v11962_v17 = vadd.f32 %v9139_v30, %v12655_v37  ;;  %v12657_v30 = vld [vmem:[#allocation52_spill] sm:$0xff]  ;;  %v12661_v37 = vld [vmem:[#allocation53_spill] sm:$0xff] }
 0xe61   :  { %12652 = vst [vmem:[#allocation35_spill] sm:$0xff] %v11956_v36  ;;  %v5007_v58 = vadd.f32 %v11956_v36, %v11953_v51 }
 0xe62   :  { %12656 = vst [vmem:[#allocation34_spill] sm:$0xff] %v11962_v17  ;;  %v5014_v62 = vadd.f32 %v11962_v17, %v11959_v60  ;;  %v4987_v55 = vpop.f32.mrb[24].mxu0 }
 0xe63   :  { %v5008_v3 = vrot.slane %v5007_v58, 4  ;;  %v9140_v11 = vadd.f32 %v4987_v55, %v4352_v7  ;;  %v4989_v54 = vpop.f32.mrb[25].mxu0 }
 0xe64   :  { %v5015_v19 = vrot.slane %v5014_v62, 4  ;;  %v9141_v16 = vadd.f32 %v4989_v54, %v4356_v10  ;;  %v4991_v28 = vpop.f32.mrb[26].mxu0 }
 0xe65   :  { %v9142_v44 = vadd.f32 %v4991_v28, %v4352_v7  ;;  %v4993_v53 = vpop.f32.mrb[27].mxu0  ;;  %v5009_v43 = vadd.f32 %v5008_v3, %v5007_v58  ;;  %v11969_v59 = vadd.f32 %v9140_v11, %v12657_v30 }
 0xe66   :  { %v5016_v0 = vadd.f32 %v5015_v19, %v5014_v62  ;;  %v9143_v29 = vadd.f32 %v4993_v53, %v4356_v10  ;;  %v11975_v24 = vadd.f32 %v9141_v16, %v12661_v37 }
 0xe67   :  { %12658 = vst [vmem:[#allocation45_spill] sm:$0xff] %v11969_v59  ;;  %v11972_v15 = vadd.f32 %v9142_v44, %v12659_v20  ;;  %v5010_v58 = vrot.slane %v5009_v43, 2 }
 0xe68   :  { %12662 = vst [vmem:[#allocation47_spill] sm:$0xff] %v11975_v24  ;;  %v11978_v55 = vadd.f32 %v9143_v29, %v12663_v6  ;;  %v5017_v10 = vrot.slane %v5016_v0, 2 }
 0xe69   :  { %12660 = vst [vmem:[#allocation49_spill] sm:$0xff] %v11972_v15  ;;  %v5021_v54 = vadd.f32 %v11972_v15, %v11969_v59  ;;  %v5011_v44 = vadd.f32 %v5010_v58, %v5009_v43 }
 0xe6a   :  { %12664 = vst [vmem:[#allocation48_spill] sm:$0xff] %v11978_v55  ;;  %v5028_v7 = vadd.f32 %v11978_v55, %v11975_v24  ;;  %v5018_v28 = vadd.f32 %v5017_v10, %v5016_v0 }
 0xe6b   :  { %v5022_v62 = vrot.slane %v5021_v54, 4  ;;  %v5012_v29 = vrot.slane %v5011_v44, 1 }
 0xe6c   :  { %v5029_v3 = vrot.slane %v5028_v7, 4  ;;  %v5019_v20 = vrot.slane %v5018_v28, 1 }
 0xe6d   :  { %v5023_v11 = vadd.f32 %v5022_v62, %v5021_v54  ;;  %v5013_v55 = vadd.f32 %v5012_v29, %v5011_v44 }
 0xe6e   :  { %v5030_v19 = vadd.f32 %v5029_v3, %v5028_v7  ;;  %v5020_v13 = vadd.f32 %v5019_v20, %v5018_v28 }
 0xe6f   :  { %v5024_v53 = vrot.slane %v5023_v11, 2 }
 0xe70   :  { %v5031_v16 = vrot.slane %v5030_v19, 2 }
 0xe71   :  { %v5025_v30 = vadd.f32 %v5024_v53, %v5023_v11  ;;  %v12665_v53 = vld [vmem:[#allocation47_spill] sm:$0xff] }
 0xe72   :  { %v5032_v6 = vadd.f32 %v5031_v16, %v5030_v19 }
 0xe73   :  { %v5026_v37 = vrot.slane %v5025_v30, 1 }
 0xe74   :  { %v5033_v33 = vrot.slane %v5032_v6, 1 }
 0xe75   :  { %v5027_v32 = vadd.f32 %v5026_v37, %v5025_v30  ;;  %v12666_v30 = vld [vmem:[#allocation49_spill] sm:$0xff] }
 0xe76   :  { %v5034_v15 = vadd.f32 %v5033_v33, %v5032_v6  ;;  %v9801_v33 = vld [vmem:[#allocation19 + $0x304] ss:$8 sps:$4 sm:$0xff]  }
 0xe77   :  { %v5039_v54 = vsel %vm243_vm1, %v5027_v32, %v5013_v55  ;;  %v12667_v6 = vld [vmem:[#allocation48_spill] sm:$0xff] }
 0xe78   :  { %v5040_v24 = vsel %vm243_vm1, %v5034_v15, %v5020_v13 }
 0xe79   :  { %5107 = vmatprep.mubr.f32.mxu1 %v5040_v24 }
 0xe7a   :  { %5108 = vmatmul.mubr.f32.vlgmr.msra.gmra.mrb[28].mxu1 %v5039_v54 }
 0xe7b   :  { %8907 = vmatpush1.bf16.msra.mxu1 %v11011_v21 }
 0xe7c   :  { %8909 = vmatprep.subr.bf16.mxu1 %v11013_v25 }
 0xe7f   :  { %8911 = vmatpush1.bf16.msra.mxu1 %v11021_v35 }
 0xe80   :  { %8913 = vmatprep.subr.bf16.mxu1 %v11026_v38 }
 0xe83   :  { %8915 = vmatpush1.bf16.msra.mxu1 %v11029_v45 }
 0xe84   :  { %8917 = vmatprep.subr.bf16.mxu1 %v11032_v46 }
 0xe87   :  { %8919 = vmatpush1.bf16.msra.mxu1 %v11039_v49 }
 0xe88   :  { %8921 = vmatprep.subr.bf16.mxu1 %v11042_v52 }
 0xe8b   :  { %8923 = vmatpush1.bf16.msra.mxu1 %v11045_v56 }
 0xe8c   :  { %8925 = vmatprep.subr.bf16.mxu1 %v11048_v57 }
 0xe8f   :  { %8927 = vmatpush1.bf16.msra.mxu1 %v11051_v63 }
 0xe90   :  { %8929 = vmatprep.subr.bf16.mxu1 %v11054_v1 }
 0xe93   :  { %8931 = vmatpush1.bf16.msra.mxu1 %v11057_v8 }
 0xe94   :  { %8933 = vmatprep.subr.bf16.mxu1 %v11060_v9 }
 0xe97   :  { %8935 = vmatpush1.bf16.msra.mxu1 %v11063_v12 }
 0xe98   :  { %8937 = vmatprep.subr.bf16.mxu1 %v11067_v22 }
 0xe9b   :  { %8939 = vmatpush1.bf16.msra.mxu1 %v11069_v23 }
 0xe9c   :  { %8941 = vmatprep.subr.bf16.mxu1 %v11073_v27 }
 0xe9f   :  { %8943 = vmatpush1.bf16.msra.mxu1 %v11075_v31 }
 0xea0   :  { %8945 = vmatprep.subr.bf16.mxu1 %v11079_v34 }
 0xea3   :  { %8947 = vmatpush1.bf16.msra.mxu1 %v11081_v39 }
 0xea4   :  { %8949 = vmatprep.subr.bf16.mxu1 %v11085_v42 }
 0xea7   :  { %8951 = vmatpush1.bf16.msra.mxu1 %v11087_v47 }
 0xea8   :  { %8953 = vmatprep.subr.bf16.mxu1 %v11091_v48 }
 0xeab   :  { %8955 = vmatpush1.bf16.msra.mxu1 %v11093_v4 }
 0xeac   :  { %8957 = vmatprep.subr.bf16.mxu1 %v12642_v2 }
 0xeaf   :  { %8959 = vmatpush1.bf16.msra.mxu1 %v12643_v18 }
 0xeb0   :  { %8961 = vmatprep.subr.bf16.mxu1 %v12644_v41 }
 0xeb3   :  { %8963 = vmatpush1.bf16.msra.mxu1 %v12645_v50 }
 0xeb4   :  { %8965 = vmatprep.subr.bf16.mxu1 %v12646_v26 }
 0xeb7   :  { %8967 = vmatpush1.bf16.msra.mxu1 %v12647_v14 }
 0xeb8   :  { %6084 = vmatprep.subr.bf16.mxu1 %v9801_v33 }
 0xf4d   :  { %v5109_v13 = vpop.f32.mrb[28].mxu1 }
 0xf4e   :  { %v5111_v32 = vpop.f32.mrb[29].mxu1 }
 0xf4f   :  { %v5116_v24 = vcombine.low %v5109_v13, %v5111_v32 }
 0xf51   :  { %v5123_v0 = vrot.slane %v5116_v24, %v12615_v61 }
 0xf53   :  { %v5124_v43 = vcombine.high %v5123_v0, %v5123_v0  ;;  %v5131_v15 = vrot.slane %v5123_v0, %v12615_v61 }
 0xf55   :  { %v5138_v55 = vrot.slane %v5124_v43, %v12615_v61  ;;  %v5142_v7 = vrot.slane %v5131_v15, %v12616_v5  ;;  %v5146_v10 = vrot.slane %v5131_v15, %v12617_v40 }
 0xf57   :  { %v5150_v58 = vrot.slane %v5138_v55, %v12616_v5  ;;  %v5154_v62 = vrot.slane %v5138_v55, %v12617_v40  ;;  %v12025_v3 = vsub.f32 %v11953_v51, %v5142_v7  ;;  %v12028_v11 = vsub.f32 %v11959_v60, %v5146_v10 }
 0xf58   :  { %v12031_v19 = vsub.f32 %v11956_v36, %v5142_v7  ;;  %v12034_v28 = vsub.f32 %v11962_v17, %v5146_v10 }
 0xf59   :  { %v12037_v44 = vsub.f32 %v11969_v59, %v5150_v58  ;;  %v12040_v16 = vsub.f32 %v12665_v53, %v5154_v62  ;;  %v12043_v20 = vsub.f32 %v12666_v30, %v5150_v58  ;;  %v12046_v29 = vsub.f32 %v12667_v6, %v5154_v62 }
 0xf5a   :  { %v5167_v37 = vmul.f32 %v12025_v3, %v12025_v3  ;;  %v5168_v54 = vmul.f32 %v12028_v11, %v12028_v11  ;;  %v5169_v33 = vmul.f32 %v12031_v19, %v12031_v19  ;;  %v5170_v13 = vmul.f32 %v12034_v28, %v12034_v28 }
 0xf5b   :  { %v5171_v32 = vmul.f32 %v12037_v44, %v12037_v44  ;;  %v5172_v24 = vmul.f32 %v12040_v16, %v12040_v16  ;;  %v5173_v0 = vmul.f32 %v12043_v20, %v12043_v20  ;;  %v5174_v43 = vmul.f32 %v12046_v29, %v12046_v29 }
 0xf5c   :  { %v5175_v15 = vadd.f32 %v5169_v33, %v5167_v37  ;;  %v5182_v55 = vadd.f32 %v5170_v13, %v5168_v54 }
 0xf5d   :  { %v5196_v7 = vadd.f32 %v5174_v43, %v5172_v24  ;;  %v5189_v10 = vadd.f32 %v5173_v0, %v5171_v32 }
 0xf5e   :  { %v5183_v58 = vrot.slane %v5182_v55, 4  ;;  %v5176_v62 = vrot.slane %v5175_v15, 4 }
 0xf5f   :  { %v5197_v6 = vrot.slane %v5196_v7, 4  ;;  %v5190_v30 = vrot.slane %v5189_v10, 4 }
 0xf60   :  { %v5184_v53 = vadd.f32 %v5183_v58, %v5182_v55  ;;  %v5177_v59 = vadd.f32 %v5176_v62, %v5175_v15  ;;  %v9799_v55 = vld [vmem:[#allocation19 + $0x300] ss:$8 sps:$4 sm:$0xff]   ;;  %v9822_v15 = vld [vmem:[#allocation19 + $0x374] ss:$8 sps:$4 sm:$0xff]  }
 0xf61   :  { %v5198_v17 = vadd.f32 %v5197_v6, %v5196_v7  ;;  %v5191_v36 = vadd.f32 %v5190_v30, %v5189_v10  ;;  %v9820_v7 = vld [vmem:[#allocation19 + $0x370] ss:$8 sps:$4 sm:$0xff]   ;;  %v9825_v10 = vld [vmem:[#allocation19 + $0x384] ss:$8 sps:$4 sm:$0xff]   ;;  %v9823_v58 = vld [vmem:[#allocation19 + $0x380] ss:$8 sps:$4 sm:$0xff]  }
 0xf62   :  { %v5185_v60 = vrot.slane %v5184_v53, 2  ;;  %v5178_v51 = vrot.slane %v5177_v59, 2  ;;  %v9828_v62 = vld [vmem:[#allocation19 + $0x394] ss:$8 sps:$4 sm:$0xff]  }
 0xf63   :  { %v5199_v14 = vrot.slane %v5198_v17, 2  ;;  %v5192_v26 = vrot.slane %v5191_v36, 2 }
 0xf64   :  { %v5186_v50 = vadd.f32 %v5185_v60, %v5184_v53  ;;  %v5179_v41 = vadd.f32 %v5178_v51, %v5177_v59  ;;  %v9804_v60 = vld [vmem:[#allocation19 + $0x314] ss:$8 sps:$4 sm:$0xff]   ;;  %v9802_v51 = vld [vmem:[#allocation19 + $0x310] ss:$8 sps:$4 sm:$0xff]   ;;  %v9819_v59 = vld [vmem:[#allocation19 + $0x364] ss:$8 sps:$4 sm:$0xff]  }
 0xf65   :  { %v5200_v18 = vadd.f32 %v5199_v14, %v5198_v17  ;;  %v5193_v2 = vadd.f32 %v5192_v26, %v5191_v36  ;;  %v9807_v26 = vld [vmem:[#allocation19 + $0x324] ss:$8 sps:$4 sm:$0xff]   ;;  %v9805_v14 = vld [vmem:[#allocation19 + $0x320] ss:$8 sps:$4 sm:$0xff]   ;;  %v9816_v36 = vld [vmem:[#allocation19 + $0x354] ss:$8 sps:$4 sm:$0xff]  }
 0xf66   :  { %v5187_v37 = vrot.slane %v5186_v50, 1  ;;  %v5180_v54 = vrot.slane %v5179_v41, 1  ;;  %v9814_v17 = vld [vmem:[#allocation19 + $0x350] ss:$8 sps:$4 sm:$0xff]   ;;  %v9817_v53 = vld [vmem:[#allocation19 + $0x360] ss:$8 sps:$4 sm:$0xff]  }
 0xf67   :  { %v5201_v33 = vrot.slane %v5200_v18, 1  ;;  %v5194_v13 = vrot.slane %v5193_v2, 1 }
 0xf68   :  { %v5188_v32 = vadd.f32 %v5187_v37, %v5186_v50  ;;  %v5181_v0 = vadd.f32 %v5180_v54, %v5179_v41  ;;  %v9810_v50 = vld [vmem:[#allocation19 + $0x334] ss:$8 sps:$4 sm:$0xff]   ;;  %v9811_v41 = vld [vmem:[#allocation19 + $0x340] ss:$8 sps:$4 sm:$0xff]   ;;  %v9826_v37 = vld [vmem:[#allocation19 + $0x390] ss:$8 sps:$4 sm:$0xff]  }
 0xf69   :  { %v5202_v24 = vadd.f32 %v5201_v33, %v5200_v18  ;;  %v5195_v43 = vadd.f32 %v5194_v13, %v5193_v2  ;;  %v9808_v18 = vld [vmem:[#allocation19 + $0x330] ss:$8 sps:$4 sm:$0xff]   ;;  %v9813_v2 = vld [vmem:[#allocation19 + $0x344] ss:$8 sps:$4 sm:$0xff]   ;;  %v9829_v33 = vld [vmem:[#allocation19 + $0x3a0] ss:$8 sps:$4 sm:$0xff]  }
 0xf6a   :  { %v9831_v54 = vld [vmem:[#allocation19 + $0x3a4] ss:$8 sps:$4 sm:$0xff]   ;;  %v9832_v13 = vld [vmem:[#allocation19 + $0x3b0] ss:$8 sps:$4 sm:$0xff]  }
 0xf6b   :  { %v5208_v6 = vsel %vm243_vm1, %v5202_v24, %v5188_v32  ;;  %v5207_v30 = vsel %vm243_vm1, %v5195_v43, %v5181_v0  ;;  %v9834_v32 = vld [vmem:[#allocation19 + $0x3b4] ss:$8 sps:$4 sm:$0xff]   ;;  %v9837_v24 = vld [vmem:[#allocation19 + $0x3c4] ss:$8 sps:$4 sm:$0xff]   ;;  %v9835_v0 = vld [vmem:[#allocation19 + $0x3c0] ss:$8 sps:$4 sm:$0xff]  }
 0xf6c   :  { %5275 = vmatprep.mubr.f32.mxu1 %v5208_v6  ;;  %v9840_v43 = vld [vmem:[#allocation19 + $0x3d4] ss:$8 sps:$4 sm:$0xff]   ;;  %v9843_v6 = vld [vmem:[#allocation19 + $0x3e4] ss:$8 sps:$4 sm:$0xff]  }
 0xf6d   :  { %5276 = vmatmul.mubr.f32.vlgmr.msra.gmra.mrb[30].mxu1 %v5207_v30  ;;  %v9841_v30 = vld [vmem:[#allocation19 + $0x3e0] ss:$8 sps:$4 sm:$0xff]  }
 0xf6e   :  { %6085 = vmatpush1.bf16.msra.mxu1 %v9799_v55  ;;  %v9838_v55 = vld [vmem:[#allocation19 + $0x3d0] ss:$8 sps:$4 sm:$0xff]  }
 0xf6f   :  { %6086 = vmatprep.subr.bf16.mxu1 %v9804_v60  ;;  %v9846_v60 = vld [vmem:[#allocation19 + $0x3f4] ss:$8 sps:$4 sm:$0xff]  }
 0xf72   :  { %6087 = vmatpush1.bf16.msra.mxu1 %v9802_v51  ;;  %v9844_v51 = vld [vmem:[#allocation19 + $0x3f0] ss:$8 sps:$4 sm:$0xff]  }
 0xf73   :  { %6088 = vmatprep.subr.bf16.mxu1 %v9807_v26  ;;  %v9849_v26 = vld [vmem:[#allocation19 + $0x404] ss:$8 sps:$4 sm:$0xff]  }
 0xf76   :  { %6089 = vmatpush1.bf16.msra.mxu1 %v9805_v14 }
 0xf77   :  { %6090 = vmatprep.subr.bf16.mxu1 %v9810_v50 }
 0xf7a   :  { %6091 = vmatpush1.bf16.msra.mxu1 %v9808_v18 }
 0xf7b   :  { %6092 = vmatprep.subr.bf16.mxu1 %v9813_v2 }
 0xf7e   :  { %6093 = vmatpush1.bf16.msra.mxu1 %v9811_v41 }
 0xf7f   :  { %6094 = vmatprep.subr.bf16.mxu1 %v9816_v36 }
 0xf82   :  { %6095 = vmatpush1.bf16.msra.mxu1 %v9814_v17 }
 0xf83   :  { %6096 = vmatprep.subr.bf16.mxu1 %v9819_v59 }
 0xf86   :  { %6097 = vmatpush1.bf16.msra.mxu1 %v9817_v53 }
 0xf87   :  { %6098 = vmatprep.subr.bf16.mxu1 %v9822_v15 }
 0xf8a   :  { %6099 = vmatpush1.bf16.msra.mxu1 %v9820_v7 }
 0xf8b   :  { %6100 = vmatprep.subr.bf16.mxu1 %v9825_v10 }
 0xf8e   :  { %6101 = vmatpush1.bf16.msra.mxu1 %v9823_v58 }
 0xf8f   :  { %6102 = vmatprep.subr.bf16.mxu1 %v9828_v62 }
 0xf92   :  { %6103 = vmatpush1.bf16.msra.mxu1 %v9826_v37 }
 0xf93   :  { %6104 = vmatprep.subr.bf16.mxu1 %v9831_v54  ;;  %v12073_v54 = vld [vmem:[#allocation17 + $0x10] sm:$0x3f] }
 0xf96   :  { %6105 = vmatpush1.bf16.msra.mxu1 %v9829_v33  ;;  %v12075_v33 = vld [vmem:[#allocation17 + $0x18] sm:$0x3f] }
 0xf97   :  { %6106 = vmatprep.subr.bf16.mxu1 %v9834_v32 }
 0xf9a   :  { %6107 = vmatpush1.bf16.msra.mxu1 %v9832_v13  ;;  %v5346_v13 = vrot.slane %v12073_v54, %v12616_v5 }
 0xf9b   :  { %6108 = vmatprep.subr.bf16.mxu1 %v9837_v24  ;;  %v5350_v24 = vrot.slane %v12075_v33, %v12616_v5 }
 0xf9e   :  { %6109 = vmatpush1.bf16.msra.mxu1 %v9835_v0 }
 0xf9f   :  { %6110 = vmatprep.subr.bf16.mxu1 %v9840_v43 }
 0xfa2   :  { %6111 = vmatpush1.bf16.msra.mxu1 %v9838_v55 }
 0xfa3   :  { %6112 = vmatprep.subr.bf16.mxu1 %v9843_v6  ;;  %v5362_v6 = vrot.slane %v12073_v54, %v12617_v40 }
 0xfa6   :  { %6113 = vmatpush1.bf16.msra.mxu1 %v9841_v30 }
 0xfa7   :  { %6114 = vmatprep.subr.bf16.mxu1 %v9846_v60 }
 0xfaa   :  { %6115 = vmatpush1.bf16.msra.mxu1 %v9844_v51 }
 0xfab   :  { %6137 = vmatprep.subr.bf16.mxu1 %v9849_v26  ;;  %v5366_v26 = vrot.slane %v12075_v33, %v12617_v40 }
0x1040   :  { %v5277_v14 = vpop.f32.mrb[30].mxu1 }
0x1041   :  { %v5279_v50 = vpop.f32.mrb[31].mxu1 }
0x1042   :  { %v5284_v18 = vcombine.low %v5277_v14, %v5279_v50 }
0x1044   :  { %v5291_v2 = vrot.slane %v5284_v18, %v12615_v61 }
0x1046   :  { %v5292_v41 = vcombine.high %v5291_v2, %v5291_v2  ;;  %v5299_v36 = vrot.slane %v5291_v2, %v12615_v61 }
0x1048   :  { %v5306_v17 = vrot.slane %v5292_v41, %v12615_v61  ;;  %v5310_v59 = vrot.slane %v5299_v36, %v12616_v5  ;;  %v5314_v53 = vrot.slane %v5299_v36, %v12617_v40 }
0x104a   :  { %v5318_v15 = vrot.slane %v5306_v17, %v12616_v5  ;;  %v5322_v7 = vrot.slane %v5306_v17, %v12617_v40  ;;  %v5327_v10 = vadd.f32 1e-05, %v5310_v59  ;;  %v5328_v58 = vadd.f32 1e-05, %v5314_v53 }
0x104c   :  { %v5329_v62 = vadd.f32 1e-05, %v5318_v15  ;;  %v5330_v37 = vadd.f32 1e-05, %v5322_v7  ;;  %10227 = vrsqrt.f32 %v5327_v10 }
0x104d   :  { %10229 = vrsqrt.f32 %v5328_v58 }
0x104e   :  { %10231 = vrsqrt.f32 %v5329_v62 }
0x104f   :  { %10233 = vrsqrt.f32 %v5330_v37 }
0x1056   :  { %v10228_v32 = vpop.eup %10227 }
0x1057   :  { %v10230_v0 = vpop.eup %10229  ;;  %v5335_v43 = vmul.f32 %v10228_v32, %v12025_v3  ;;  %v5337_v55 = vmul.f32 %v10228_v32, %v12031_v19 }
0x1058   :  { %v10232_v30 = vpop.eup %10231  ;;  %v5336_v60 = vmul.f32 %v10230_v0, %v12028_v11  ;;  %v5338_v51 = vmul.f32 %v10230_v0, %v12034_v28 }
0x1059   :  { %v10234_v14 = vpop.eup %10233  ;;  %v5341_v50 = vmul.f32 %v10232_v30, %v12043_v20  ;;  %v5351_v18 = vmul.f32 %v5346_v13, %v5335_v43  ;;  %v5353_v2 = vmul.f32 %v5346_v13, %v5337_v55  ;;  %v5339_v3 = vmul.f32 %v10232_v30, %v12037_v44 }
0x105a   :  { %v5342_v19 = vmul.f32 %v10234_v14, %v12046_v29  ;;  %v5354_v41 = vmul.f32 %v5350_v24, %v5338_v51  ;;  %v5352_v36 = vmul.f32 %v5350_v24, %v5336_v60  ;;  %v5340_v17 = vmul.f32 %v10234_v14, %v12040_v16 }
0x105b   :  { %v5369_v59 = vadd.f32 %v5362_v6, %v5353_v2  ;;  %v5367_v11 = vadd.f32 %v5362_v6, %v5351_v18  ;;  %v5355_v53 = vmul.f32 %v5346_v13, %v5339_v3  ;;  %v5357_v28 = vmul.f32 %v5346_v13, %v5341_v50 }
0x105c   :  { %v5368_v15 = vadd.f32 %v5366_v26, %v5352_v36  ;;  %v5370_v7 = vadd.f32 %v5366_v26, %v5354_v41  ;;  %v5356_v10 = vmul.f32 %v5350_v24, %v5340_v17  ;;  %v5358_v58 = vmul.f32 %v5350_v24, %v5342_v19 }
0x105d   :  { %v8042_v62 = vmul.f32 -1.442695, %v5369_v59  ;;  %v8040_v20 = vmul.f32 -1.442695, %v5367_v11  ;;  %v12093_v37 = vadd.f32 %v5362_v6, %v5355_v53  ;;  %v12095_v32 = vadd.f32 %v5362_v6, %v5357_v28 }
0x105e   :  { %v8041_v44 = vmul.f32 -1.442695, %v5368_v15  ;;  %v8043_v29 = vmul.f32 -1.442695, %v5370_v7  ;;  %v5372_v0 = vadd.f32 %v5366_v26, %v5356_v10  ;;  %v5374_v43 = vadd.f32 %v5366_v26, %v5358_v58 }
0x105f   :  { %10235 = vpow2.f32 %v8042_v62  ;;  %v8044_v13 = vmul.f32 -1.442695, %v12093_v37  ;;  %v8046_v24 = vmul.f32 -1.442695, %v12095_v32 }
0x1060   :  { %10237 = vpow2.f32 %v8041_v44  ;;  %v8045_v16 = vmul.f32 -1.442695, %v5372_v0  ;;  %v8047_v55 = vmul.f32 -1.442695, %v5374_v43 }
0x1061   :  { %10239 = vpow2.f32 %v8043_v29 }
0x1062   :  { %10241 = vpow2.f32 %v8040_v20 }
0x1063   :  { %10243 = vpow2.f32 %v8045_v16 }
0x1064   :  { %10245 = vpow2.f32 %v8047_v55 }
0x1065   :  { %10247 = vpow2.f32 %v8044_v13 }
0x1066   :  { %10249 = vpow2.f32 %v8046_v24 }
0x1069   :  { %v10236_v6 = vpop.eup %10235 }
0x106a   :  { %v10238_v30 = vpop.eup %10237  ;;  %v5401_v60 = vadd.f32 1.0, %v10236_v6 }
0x106b   :  { %v10240_v51 = vpop.eup %10239  ;;  %v5400_v14 = vadd.f32 1.0, %v10238_v30 }
0x106c   :  { %v10242_v26 = vpop.eup %10241  ;;  %10251 = vrcp.f32 %v5401_v60  ;;  %v5402_v50 = vadd.f32 1.0, %v10240_v51 }
0x106d   :  { %v10244_v18 = vpop.eup %10243  ;;  %10253 = vrcp.f32 %v5400_v14  ;;  %v5399_v2 = vadd.f32 1.0, %v10242_v26 }
0x106e   :  { %v10246_v3 = vpop.eup %10245  ;;  %10255 = vrcp.f32 %v5402_v50  ;;  %v5404_v19 = vadd.f32 1.0, %v10244_v18 }
0x106f   :  { %v10248_v41 = vpop.eup %10247  ;;  %10257 = vrcp.f32 %v5399_v2  ;;  %v5406_v36 = vadd.f32 1.0, %v10246_v3 }
0x1070   :  { %v10250_v17 = vpop.eup %10249  ;;  %10259 = vrcp.f32 %v5404_v19  ;;  %v5403_v53 = vadd.f32 1.0, %v10248_v41 }
0x1071   :  { %10261 = vrcp.f32 %v5406_v36  ;;  %v5405_v28 = vadd.f32 1.0, %v10250_v17  ;;  %v9847_v17 = vld [vmem:[#allocation19 + $0x400] ss:$8 sps:$4 sm:$0xff]  }
0x1072   :  { %10263 = vrcp.f32 %v5403_v53 }
0x1073   :  { %10265 = vrcp.f32 %v5405_v28 }
0x1076   :  { %v10252_v10 = vpop.eup %10251 }
0x1077   :  { %v10254_v58 = vpop.eup %10253  ;;  %v12099_v62 = vmul.f32 %v10252_v10, %v5369_v59 }
0x1078   :  { %v10256_v20 = vpop.eup %10255  ;;  %v12101_v44 = vmul.f32 %v10254_v58, %v5368_v15  ;;  %v9852_v58 = vld [vmem:[#allocation19 + $0x414] ss:$8 sps:$4 sm:$0xff]  }
0x1079   :  { %v10258_v29 = vpop.eup %10257  ;;  %v5426_v16 = vmul.f32 %v10256_v20, %v5370_v7  ;;  %v5538_v6 = vrot.slane %v12099_v62, 7  ;;  %v5561_v26 = vrot.slane %v12099_v62, 1 }
0x107a   :  { %v10260_v55 = vpop.eup %10259  ;;  %v5537_v13 = vrot.slane %v12101_v44, 7  ;;  %v12104_v24 = vmul.f32 %v10258_v29, %v5367_v11  ;;  %v5563_v30 = vrot.slane %v12101_v44, 1 }
0x107b   :  { %v10262_v60 = vpop.eup %10261  ;;  %v5540_v51 = vrot.slane %v5426_v16, 7  ;;  %v12108_v14 = vmul.f32 %v10260_v55, %v5372_v0  ;;  %v5564_v59 = vrot.slane %v5426_v16, 1  ;;  %v10012_v55 = vld [vmem:[#allocation20 + $0x470] ss:$8 sps:$4 sm:$0xff]  }
0x107c   :  { %v10264_v15 = vpop.eup %10263  ;;  %v5536_v50 = vrot.slane %v12104_v24, 7  ;;  %v12112_v7 = vmul.f32 %v10262_v60, %v5374_v43  ;;  %v5586_v11 = vpack.c.bf16 %v12099_v62, %v12104_v24  ;;  %v5560_v18 = vrot.slane %v12104_v24, 1  ;;  %v9904_v24 = vld [vmem:[#allocation19 + $0x530] ss:$8 sps:$4 sm:$0xff]  }
0x107d   :  { %v10266_v2 = vpop.eup %10265  ;;  %v5541_v3 = vsel %vm582_vm2, %v5537_v13, %v5540_v51  ;;  %v5543_v19 = vrot.slane %v12108_v14, 7  ;;  %v12120_v0 = vmul.f32 %v10264_v15, %v12093_v37  ;;  %v5565_v41 = vsel %vm595_vm4, %v5563_v30, %v5564_v59 }
0x107e   :  { %v8146_v36 = vpack.c.bf16 %v5541_v3, %v5537_v13  ;;  %v5539_v43 = vsel %vm582_vm2, %v5536_v50, %v5538_v6  ;;  %v5546_v53 = vrot.slane %v12112_v7, 7  ;;  %v12126_v28 = vmul.f32 %v10266_v2, %v12095_v32 }
0x107f   :  { %v8150_v10 = vpack.c.bf16 %v5539_v43, %v5536_v50  ;;  %v5542_v20 = vrot.slane %v12120_v0, 7  ;;  %v5593_v29 = vpack.c.bf16 %v12112_v7, %v12108_v14  ;;  %v12131_v37 = vpack.c.bf16 %v5564_v59, %v5565_v41  ;;  %v9850_v50 = vld [vmem:[#allocation19 + $0x410] ss:$8 sps:$4 sm:$0xff]  }
0x1080   :  { %8147 = vmatprep.mubr.msk.bf16.mxu1 %vm11000_vm6, %v8146_v36  ;;  %v5547_v13 = vsel %vm582_vm2, %v5543_v19, %v5546_v53  ;;  %v5544_v6 = vrot.slane %v12126_v28, 7  ;;  %v5592_v32 = vpack.c.bf16 %v12126_v28, %v12120_v0  ;;  %v5562_v30 = vsel %vm595_vm4, %v5560_v18, %v5561_v26  ;;  %v9855_v18 = vld [vmem:[#allocation19 + $0x424] ss:$8 sps:$4 sm:$0xff]  }
0x1081   :  { %8151 = vmatmul.mubr.msk.bf16.vlgmr.msra.gmra.mrb[32].mxu1 %vm11000_vm6, %v8150_v10  ;;  %v8154_v60 = vpack.c.bf16 %v5547_v13, %v5543_v19  ;;  %v12142_v51 = vpack.c.bf16 %v5561_v26, %v5562_v30  ;;  %v5569_v59 = vrot.slane %v12108_v14, 1  ;;  %v5570_v15 = vrot.slane %v12112_v7, 1  ;;  %v9858_v10 = vld [vmem:[#allocation19 + $0x434] ss:$8 sps:$4 sm:$0xff]   ;;  %v9859_v30 = vld [vmem:[#allocation19 + $0x440] ss:$8 sps:$4 sm:$0xff]  }
0x1082   :  { %6138 = vmatpush1.bf16.msra.mxu1 %v9847_v17  ;;  %v5566_v2 = vrot.slane %v12120_v0, 1  ;;  %v5567_v3 = vrot.slane %v12126_v28, 1  ;;  %v5545_v26 = vsel %vm582_vm2, %v5542_v20, %v5544_v6  ;;  %v9853_v17 = vld [vmem:[#allocation19 + $0x420] ss:$8 sps:$4 sm:$0xff]   ;;  %v5587_v13 = vpack.c.bf16 %v5426_v16, %v12101_v44  ;;  %v9861_v6 = vld [vmem:[#allocation19 + $0x444] ss:$8 sps:$4 sm:$0xff]  }
0x1083   :  { %8155 = vmatprep.mubr.msk.bf16.mxu1 %vm11000_vm6, %v8154_v60  ;;  %6139 = vmatprep.subr.bf16.mxu1 %v9852_v58  ;;  %v5571_v41 = vsel %vm595_vm4, %v5569_v59, %v5570_v15  ;;  %v8158_v53 = vpack.c.bf16 %v5545_v26, %v5542_v20  ;;  %v9856_v58 = vld [vmem:[#allocation19 + $0x430] ss:$8 sps:$4 sm:$0xff]   ;;  %v9864_v60 = vld [vmem:[#allocation19 + $0x454] ss:$8 sps:$4 sm:$0xff]   ;;  %v9865_v20 = vld [vmem:[#allocation19 + $0x460] ss:$8 sps:$4 sm:$0xff]  }
0x1084   :  { %v12152_v19 = vpack.c.bf16 %v5570_v15, %v5571_v41  ;;  %v5568_v36 = vsel %vm595_vm4, %v5566_v2, %v5567_v3  ;;  %v9862_v59 = vld [vmem:[#allocation19 + $0x450] ss:$8 sps:$4 sm:$0xff]   ;;  %v9867_v15 = vld [vmem:[#allocation19 + $0x464] ss:$8 sps:$4 sm:$0xff]   ;;  %v9870_v44 = vld [vmem:[#allocation19 + $0x474] ss:$8 sps:$4 sm:$0xff]  }
0x1085   :  { %v12155_v43 = vpack.c.bf16 %v5567_v3, %v5568_v36  ;;  %v9868_v16 = vld [vmem:[#allocation19 + $0x470] ss:$8 sps:$4 sm:$0xff]   ;;  %v9871_v2 = vld [vmem:[#allocation19 + $0x480] ss:$8 sps:$4 sm:$0xff]   ;;  %v9876_v3 = vld [vmem:[#allocation19 + $0x494] ss:$8 sps:$4 sm:$0xff]  }
0x1086   :  { %6140 = vmatpush1.bf16.msra.mxu1 %v9850_v50  ;;  %v9873_v50 = vld [vmem:[#allocation19 + $0x484] ss:$8 sps:$4 sm:$0xff]   ;;  %v9877_v26 = vld [vmem:[#allocation19 + $0x4a0] ss:$8 sps:$4 sm:$0xff]   ;;  %v9882_v36 = vld [vmem:[#allocation19 + $0x4b4] ss:$8 sps:$4 sm:$0xff]  }
0x1087   :  { %6141 = vmatprep.subr.bf16.mxu1 %v9855_v18  ;;  %v9874_v18 = vld [vmem:[#allocation19 + $0x490] ss:$8 sps:$4 sm:$0xff]   ;;  %v9879_v41 = vld [vmem:[#allocation19 + $0x4a4] ss:$8 sps:$4 sm:$0xff]   ;;  %v9907_v7 = vld [vmem:[#allocation19 + $0x540] ss:$8 sps:$4 sm:$0xff]  }
0x1088   :  { %v9909_v14 = vld [vmem:[#allocation19 + $0x544] ss:$8 sps:$4 sm:$0xff]   ;;  %v9918_v0 = vld [vmem:[#allocation19 + $0x574] ss:$8 sps:$4 sm:$0xff]   ;;  %v9916_v28 = vld [vmem:[#allocation19 + $0x570] ss:$8 sps:$4 sm:$0xff]  }
0x1089   :  { %8159 = vmatmul.mubr.msk.bf16.gmra.mrb[36].mxu1 %vm11000_vm6, %v8158_v53  ;;  %v9885_v53 = vld [vmem:[#allocation19 + $0x4c4] ss:$8 sps:$4 sm:$0xff]  }
0x108a   :  { %6142 = vmatpush1.bf16.msra.mxu1 %v9853_v17  ;;  %6169 = vmatprep.mubr.bf16.mxu1 %v5587_v13  ;;  %v9880_v17 = vld [vmem:[#allocation19 + $0x4b0] ss:$8 sps:$4 sm:$0xff]   ;;  %v9888_v13 = vld [vmem:[#allocation19 + $0x4d4] ss:$8 sps:$4 sm:$0xff]  }
0x108b   :  { %6143 = vmatprep.subr.bf16.mxu1 %v9858_v10  ;;  %v9883_v10 = vld [vmem:[#allocation19 + $0x4c0] ss:$8 sps:$4 sm:$0xff]  }
0x108e   :  { %6144 = vmatpush1.bf16.msra.mxu1 %v9856_v58  ;;  %v9886_v58 = vld [vmem:[#allocation19 + $0x4d0] ss:$8 sps:$4 sm:$0xff]  }
0x108f   :  { %6145 = vmatprep.subr.bf16.mxu1 %v9861_v6  ;;  %v9891_v6 = vld [vmem:[#allocation19 + $0x4e4] ss:$8 sps:$4 sm:$0xff]  }
0x1092   :  { %6146 = vmatpush1.bf16.msra.mxu1 %v9859_v30  ;;  %v9889_v30 = vld [vmem:[#allocation19 + $0x4e0] ss:$8 sps:$4 sm:$0xff]  }
0x1093   :  { %6147 = vmatprep.subr.bf16.mxu1 %v9864_v60  ;;  %v9894_v60 = vld [vmem:[#allocation19 + $0x4f4] ss:$8 sps:$4 sm:$0xff]  }
0x1096   :  { %6148 = vmatpush1.bf16.msra.mxu1 %v9862_v59  ;;  %v9892_v59 = vld [vmem:[#allocation19 + $0x4f0] ss:$8 sps:$4 sm:$0xff]  }
0x1097   :  { %6149 = vmatprep.subr.bf16.mxu1 %v9867_v15  ;;  %v9897_v15 = vld [vmem:[#allocation19 + $0x504] ss:$8 sps:$4 sm:$0xff]  }
0x109a   :  { %6150 = vmatpush1.bf16.msra.mxu1 %v9865_v20  ;;  %v9895_v20 = vld [vmem:[#allocation19 + $0x500] ss:$8 sps:$4 sm:$0xff]  }
0x109b   :  { %6151 = vmatprep.subr.bf16.mxu1 %v9870_v44  ;;  %v9900_v44 = vld [vmem:[#allocation19 + $0x514] ss:$8 sps:$4 sm:$0xff]  }
0x109e   :  { %6152 = vmatpush1.bf16.msra.mxu1 %v9868_v16  ;;  %v9898_v16 = vld [vmem:[#allocation19 + $0x510] ss:$8 sps:$4 sm:$0xff]  }
0x109f   :  { %6153 = vmatprep.subr.bf16.mxu1 %v9873_v50  ;;  %v9903_v50 = vld [vmem:[#allocation19 + $0x524] ss:$8 sps:$4 sm:$0xff]  }
0x10a2   :  { %6154 = vmatpush1.bf16.msra.mxu1 %v9871_v2  ;;  %v9901_v2 = vld [vmem:[#allocation19 + $0x520] ss:$8 sps:$4 sm:$0xff]  }
0x10a3   :  { %6155 = vmatprep.subr.bf16.mxu1 %v9876_v3  ;;  %v9906_v3 = vld [vmem:[#allocation19 + $0x534] ss:$8 sps:$4 sm:$0xff]  }
0x10a6   :  { %6156 = vmatpush1.bf16.msra.mxu1 %v9874_v18  ;;  %v9915_v18 = vld [vmem:[#allocation19 + $0x564] ss:$8 sps:$4 sm:$0xff]  }
0x10a7   :  { %6157 = vmatprep.subr.bf16.mxu1 %v9879_v41  ;;  %v9913_v41 = vld [vmem:[#allocation19 + $0x560] ss:$8 sps:$4 sm:$0xff]  }
0x10aa   :  { %6158 = vmatpush1.bf16.msra.mxu1 %v9877_v26  ;;  %v9924_v26 = vld [vmem:[#allocation19 + $0x594] ss:$8 sps:$4 sm:$0xff]  }
0x10ab   :  { %6159 = vmatprep.subr.bf16.mxu1 %v9882_v36  ;;  %v9922_v36 = vld [vmem:[#allocation19 + $0x590] ss:$8 sps:$4 sm:$0xff]  }
0x10ae   :  { %6160 = vmatpush1.bf16.msra.mxu1 %v9880_v17  ;;  %v9927_v17 = vld [vmem:[#allocation19 + $0x5a4] ss:$8 sps:$4 sm:$0xff]  }
0x10af   :  { %6161 = vmatprep.subr.bf16.mxu1 %v9885_v53  ;;  %v9925_v53 = vld [vmem:[#allocation19 + $0x5a0] ss:$8 sps:$4 sm:$0xff]  }
0x10b2   :  { %6162 = vmatpush1.bf16.msra.mxu1 %v9883_v10  ;;  %v9930_v10 = vld [vmem:[#allocation19 + $0x5b4] ss:$8 sps:$4 sm:$0xff]  }
0x10b3   :  { %6163 = vmatprep.subr.bf16.mxu1 %v9888_v13  ;;  %v9928_v13 = vld [vmem:[#allocation19 + $0x5b0] ss:$8 sps:$4 sm:$0xff]  }
0x10b6   :  { %6164 = vmatpush1.bf16.msra.mxu1 %v9886_v58  ;;  %v9933_v58 = vld [vmem:[#allocation19 + $0x5c4] ss:$8 sps:$4 sm:$0xff]  }
0x10b7   :  { %6165 = vmatprep.subr.bf16.mxu1 %v9891_v6  ;;  %v9931_v6 = vld [vmem:[#allocation19 + $0x5c0] ss:$8 sps:$4 sm:$0xff]  }
0x10ba   :  { %6166 = vmatpush1.bf16.msra.mxu1 %v9889_v30  ;;  %v9936_v30 = vld [vmem:[#allocation19 + $0x5d4] ss:$8 sps:$4 sm:$0xff]  }
0x10bb   :  { %6167 = vmatprep.subr.bf16.mxu1 %v9894_v60  ;;  %v9934_v60 = vld [vmem:[#allocation19 + $0x5d0] ss:$8 sps:$4 sm:$0xff]  }
0x10be   :  { %6168 = vmatpush1.bf16.msra.mxu1 %v9892_v59  ;;  %v9939_v59 = vld [vmem:[#allocation19 + $0x5e4] ss:$8 sps:$4 sm:$0xff]  }
0x10bf   :  { %6190 = vmatprep.subr.bf16.mxu1 %v9897_v15  ;;  %v9937_v15 = vld [vmem:[#allocation19 + $0x5e0] ss:$8 sps:$4 sm:$0xff]  }
0x10c1   :  { %6170 = vmatmul.mubr.bf16.vlgmr.msra.gmra.mrb[32].mxu1 %v5586_v11  ;;  %v9912_v11 = vld [vmem:[#allocation19 + $0x554] ss:$8 sps:$4 sm:$0xff]  }
0x10c2   :  { %6179 = vmatprep.mubr.bf16.mxu1 %v5593_v29  ;;  %6191 = vmatpush1.bf16.msra.mxu1 %v9895_v20  ;;  %v9910_v29 = vld [vmem:[#allocation19 + $0x550] ss:$8 sps:$4 sm:$0xff]   ;;  %v9942_v20 = vld [vmem:[#allocation19 + $0x5f4] ss:$8 sps:$4 sm:$0xff]  }
0x10c3   :  { %6192 = vmatprep.subr.bf16.mxu1 %v9900_v44  ;;  %v9940_v44 = vld [vmem:[#allocation19 + $0x5f0] ss:$8 sps:$4 sm:$0xff]  }
0x10c6   :  { %6193 = vmatpush1.bf16.msra.mxu1 %v9898_v16  ;;  %v12670_v16 = vld [vmem:[#allocation31_spill] sm:$0xff] }
0x10c7   :  { %6194 = vmatprep.subr.bf16.mxu1 %v9903_v50  ;;  %v6249_v50 = vsub.s32 6, %v12670_v16 }
0x10c9   :  { %6180 = vmatmul.mubr.bf16.gmra.mrb[36].mxu1 %v5592_v32  ;;  %v9921_v32 = vld [vmem:[#allocation19 + $0x584] ss:$8 sps:$4 sm:$0xff]  }
0x10ca   :  { %6195 = vmatpush1.bf16.msra.mxu1 %v9901_v2  ;;  %8162 = vmatprep.mubr.msk.bf16.mxu1 %vm11007_vm7, %v12131_v37  ;;  %v9919_v37 = vld [vmem:[#allocation19 + $0x580] ss:$8 sps:$4 sm:$0xff]   ;;  %v12671_v2 = vld [vmem:[#allocation54_spill] sm:$0xff] }
0x10cb   :  { %6196 = vmatprep.subr.bf16.mxu1 %v9906_v3  ;;  %v5599_v3 = vrot.slane %v12073_v54, %v12671_v2 }
0x10ce   :  { %6197 = vmatpush1.bf16.msra.mxu1 %v9904_v24  ;;  %v10321_v24 = vld [vmem:[#allocation5] sm:$0x77] }
0x10cf   :  { %6198 = vmatprep.subr.bf16.mxu1 %v9909_v14  ;;  %v6246_v14 = vrot.slane %v10321_v24, %v12671_v2 }
0x10d2   :  { %6199 = vmatpush1.bf16.msra.mxu1 %v9907_v7  ;;  %v5603_v7 = vrot.slane %v12075_v33, %v12671_v2 }
0x10d3   :  { %6200 = vmatprep.subr.bf16.mxu1 %v9912_v11 }
0x10d6   :  { %6201 = vmatpush1.bf16.msra.mxu1 %v9910_v29 }
0x10d7   :  { %6202 = vmatprep.subr.bf16.mxu1 %v9915_v18 }
0x10da   :  { %6203 = vmatpush1.bf16.msra.mxu1 %v9913_v41 }
0x10db   :  { %6204 = vmatprep.subr.bf16.mxu1 %v9918_v0 }
0x10de   :  { %6205 = vmatpush1.bf16.msra.mxu1 %v9916_v28 }
0x10df   :  { %6206 = vmatprep.subr.bf16.mxu1 %v9921_v32 }
0x10e2   :  { %6207 = vmatpush1.bf16.msra.mxu1 %v9919_v37 }
0x10e3   :  { %6208 = vmatprep.subr.bf16.mxu1 %v9924_v26 }
0x10e6   :  { %6209 = vmatpush1.bf16.msra.mxu1 %v9922_v36 }
0x10e7   :  { %6210 = vmatprep.subr.bf16.mxu1 %v9927_v17  ;;  %v10322_v17 = vld [vmem:[#allocation5 + $0x8] sm:$0x77] }
0x10ea   :  { %6211 = vmatpush1.bf16.msra.mxu1 %v9925_v53  ;;  %v6254_v53 = vrot.slane %v10322_v17, %v12671_v2 }
0x10eb   :  { %6212 = vmatprep.subr.bf16.mxu1 %v9930_v10 }
0x10ee   :  { %6213 = vmatpush1.bf16.msra.mxu1 %v9928_v13 }
0x10ef   :  { %6214 = vmatprep.subr.bf16.mxu1 %v9933_v58  ;;  %v6258_v58 = vrot.slane %v10322_v17, %v6249_v50 }
0x10f2   :  { %6215 = vmatpush1.bf16.msra.mxu1 %v9931_v6 }
0x10f3   :  { %6216 = vmatprep.subr.bf16.mxu1 %v9936_v30 }
0x10f6   :  { %6217 = vmatpush1.bf16.msra.mxu1 %v9934_v60 }
0x10f7   :  { %6218 = vmatprep.subr.bf16.mxu1 %v9939_v59 }
0x10fa   :  { %6219 = vmatpush1.bf16.msra.mxu1 %v9937_v15 }
0x10fb   :  { %6220 = vmatprep.subr.bf16.mxu1 %v9942_v20  ;;  %v6274_v20 = vrot.slane %v6254_v53, %v12671_v2 }
0x10fe   :  { %6221 = vmatpush1.bf16.msra.mxu1 %v9940_v44 }
0x1101   :  { %8165 = vmatmul.mubr.msk.bf16.vlgmr.msra.gmra.mrb[32].mxu1 %vm11007_vm7, %v12142_v51  ;;  %v6250_v51 = vrot.slane %v10321_v24, %v6249_v50 }
0x1102   :  { %8168 = vmatprep.mubr.msk.bf16.mxu1 %vm11007_vm7, %v12152_v19  ;;  %v6266_v19 = vrot.slane %v6246_v14, %v12671_v2  ;;  %v6278_v14 = vrot.slane %v6258_v58, %v12671_v2 }
0x1109   :  { %8171 = vmatmul.mubr.msk.bf16.gmra.mrb[36].mxu1 %vm11007_vm7, %v12155_v43  ;;  %v6270_v43 = vrot.slane %v6250_v51, %v12671_v2 }
0x11d4   :  { %v6224_v11 = vpop.f32.mrb[32].mxu1 }
0x11d5   :  { %v9144_v29 = vadd.f32 %v6224_v11, %v5599_v3  ;;  %v6226_v18 = vpop.f32.mrb[33].mxu1 }
0x11d6   :  { %v9145_v41 = vadd.f32 %v6226_v18, %v5603_v7  ;;  %v6228_v0 = vpop.f32.mrb[34].mxu1 }
0x11d7   :  { %v9146_v28 = vadd.f32 %v6228_v0, %v5599_v3  ;;  %v6230_v32 = vpop.f32.mrb[35].mxu1  ;;  %v12189_v26 = vadd.f32 %v9144_v29, %v6266_v19 }
0x11d8   :  { %v9147_v37 = vadd.f32 %v6230_v32, %v5603_v7  ;;  %v12194_v10 = vadd.f32 %v9145_v41, %v6270_v43 }
0x11d9   :  { %v12191_v36 = vadd.f32 %v9146_v28, %v6266_v19 }
0x11da   :  { %v12196_v13 = vadd.f32 %v9147_v37, %v6270_v43 }
0x11db   :  { %v6287_v6 = vadd.f32 %v12191_v36, %v12189_v26 }
0x11dc   :  { %v6294_v30 = vadd.f32 %v12196_v13, %v12194_v10  ;;  %v6234_v60 = vpop.f32.mrb[36].mxu1 }
0x11dd   :  { %v6288_v59 = vrot.slane %v6287_v6, 4  ;;  %v9148_v15 = vadd.f32 %v6234_v60, %v5599_v3  ;;  %v6236_v44 = vpop.f32.mrb[37].mxu1 }
0x11de   :  { %v6295_v16 = vrot.slane %v6294_v30, 4  ;;  %v9149_v24 = vadd.f32 %v6236_v44, %v5603_v7  ;;  %v6238_v51 = vpop.f32.mrb[38].mxu1 }
0x11df   :  { %v9150_v11 = vadd.f32 %v6238_v51, %v5599_v3  ;;  %v6240_v29 = vpop.f32.mrb[39].mxu1  ;;  %v6289_v18 = vadd.f32 %v6288_v59, %v6287_v6  ;;  %v12204_v41 = vadd.f32 %v9148_v15, %v6274_v20 }
0x11e0   :  { %v6296_v50 = vadd.f32 %v6295_v16, %v6294_v30  ;;  %v9151_v19 = vadd.f32 %v6240_v29, %v5603_v7  ;;  %v12208_v0 = vadd.f32 %v9149_v24, %v6278_v14 }
0x11e1   :  { %v12206_v43 = vadd.f32 %v9150_v11, %v6274_v20  ;;  %v6290_v3 = vrot.slane %v6289_v18, 2 }
0x11e2   :  { %v12210_v28 = vadd.f32 %v9151_v19, %v6278_v14  ;;  %v6297_v37 = vrot.slane %v6296_v50, 2 }
0x11e3   :  { %v6301_v32 = vadd.f32 %v12206_v43, %v12204_v41  ;;  %v6291_v30 = vadd.f32 %v6290_v3, %v6289_v18 }
0x11e4   :  { %v6308_v2 = vadd.f32 %v12210_v28, %v12208_v0  ;;  %v6298_v6 = vadd.f32 %v6297_v37, %v6296_v50 }
0x11e5   :  { %v6302_v17 = vrot.slane %v6301_v32, 4  ;;  %v6292_v16 = vrot.slane %v6291_v30, 1 }
0x11e6   :  { %v6309_v53 = vrot.slane %v6308_v2, 4  ;;  %v6299_v20 = vrot.slane %v6298_v6, 1 }
0x11e7   :  { %v6303_v7 = vadd.f32 %v6302_v17, %v6301_v32  ;;  %v6293_v19 = vadd.f32 %v6292_v16, %v6291_v30 }
0x11e8   :  { %v6310_v58 = vadd.f32 %v6309_v53, %v6308_v2  ;;  %v6300_v11 = vadd.f32 %v6299_v20, %v6298_v6 }
0x11e9   :  { %v6304_v60 = vrot.slane %v6303_v7, 2 }
0x11ea   :  { %v6311_v59 = vrot.slane %v6310_v58, 2 }
0x11eb   :  { %v6305_v15 = vadd.f32 %v6304_v60, %v6303_v7 }
0x11ec   :  { %v6312_v44 = vadd.f32 %v6311_v59, %v6310_v58 }
0x11ed   :  { %v6306_v24 = vrot.slane %v6305_v15, 1 }
0x11ee   :  { %v6313_v14 = vrot.slane %v6312_v44, 1 }
0x11ef   :  { %v6307_v51 = vadd.f32 %v6306_v24, %v6305_v15 }
0x11f0   :  { %v6314_v29 = vadd.f32 %v6313_v14, %v6312_v44 }
0x11f1   :  { %v6319_v32 = vsel %vm243_vm1, %v6307_v51, %v6293_v19 }
0x11f2   :  { %v6320_v62 = vsel %vm243_vm1, %v6314_v29, %v6300_v11 }
0x11f3   :  { %6387 = vmatprep.mubr.f32.mxu0 %v6320_v62 }
0x11f4   :  { %6388 = vmatmul.mubr.f32.vlgmr.msra.gmra.mrb[28].mxu0 %v6319_v32 }
0x11f5   :  { %9035 = vmatpush1.bf16.msra.mxu0 %v11011_v21  ;;  %v12672_v21 = vld [vmem:[#allocation38_spill] sm:$0xff] }
0x11f6   :  { %9037 = vmatprep.subr.bf16.mxu0 %v11013_v25  ;;  %v12673_v25 = vld [vmem:[#allocation39_spill] sm:$0xff] }
0x11f9   :  { %9039 = vmatpush1.bf16.msra.mxu0 %v11021_v35  ;;  %v12674_v35 = vld [vmem:[#allocation40_spill] sm:$0xff] }
0x11fa   :  { %9041 = vmatprep.subr.bf16.mxu0 %v11026_v38  ;;  %v12675_v38 = vld [vmem:[#allocation41_spill] sm:$0xff] }
0x11fd   :  { %9043 = vmatpush1.bf16.msra.mxu0 %v11029_v45  ;;  %v12676_v45 = vld [vmem:[#allocation42_spill] sm:$0xff] }
0x11fe   :  { %9045 = vmatprep.subr.bf16.mxu0 %v11032_v46  ;;  %v12677_v46 = vld [vmem:[#allocation43_spill] sm:$0xff] }
0x1201   :  { %9047 = vmatpush1.bf16.msra.mxu0 %v11039_v49  ;;  %v9945_v49 = vld [vmem:[#allocation20 + $0x304] ss:$8 sps:$4 sm:$0xff]  }
0x1202   :  { %9049 = vmatprep.subr.bf16.mxu0 %v11042_v52 }
0x1205   :  { %9051 = vmatpush1.bf16.msra.mxu0 %v11045_v56 }
0x1206   :  { %9053 = vmatprep.subr.bf16.mxu0 %v11048_v57 }
0x1209   :  { %9055 = vmatpush1.bf16.msra.mxu0 %v11051_v63 }
0x120a   :  { %9057 = vmatprep.subr.bf16.mxu0 %v11054_v1 }
0x120d   :  { %9059 = vmatpush1.bf16.msra.mxu0 %v11057_v8 }
0x120e   :  { %9061 = vmatprep.subr.bf16.mxu0 %v11060_v9 }
0x1211   :  { %9063 = vmatpush1.bf16.msra.mxu0 %v11063_v12 }
0x1212   :  { %9065 = vmatprep.subr.bf16.mxu0 %v11067_v22 }
0x1215   :  { %9067 = vmatpush1.bf16.msra.mxu0 %v11069_v23 }
0x1216   :  { %9069 = vmatprep.subr.bf16.mxu0 %v11073_v27 }
0x1219   :  { %9071 = vmatpush1.bf16.msra.mxu0 %v11075_v31 }
0x121a   :  { %9073 = vmatprep.subr.bf16.mxu0 %v11079_v34 }
0x121d   :  { %9075 = vmatpush1.bf16.msra.mxu0 %v11081_v39 }
0x121e   :  { %9077 = vmatprep.subr.bf16.mxu0 %v11085_v42 }
0x1221   :  { %9079 = vmatpush1.bf16.msra.mxu0 %v11087_v47 }
0x1222   :  { %9081 = vmatprep.subr.bf16.mxu0 %v11091_v48 }
0x1225   :  { %9083 = vmatpush1.bf16.msra.mxu0 %v11093_v4 }
0x1226   :  { %9085 = vmatprep.subr.bf16.mxu0 %v12672_v21 }
0x1229   :  { %9087 = vmatpush1.bf16.msra.mxu0 %v12673_v25 }
0x122a   :  { %9089 = vmatprep.subr.bf16.mxu0 %v12674_v35 }
0x122d   :  { %9091 = vmatpush1.bf16.msra.mxu0 %v12675_v38 }
0x122e   :  { %9093 = vmatprep.subr.bf16.mxu0 %v12676_v45  ;;  %v9943_v45 = vld [vmem:[#allocation20 + $0x300] ss:$8 sps:$4 sm:$0xff]  }
0x1231   :  { %9095 = vmatpush1.bf16.msra.mxu0 %v12677_v46 }
0x1232   :  { %7364 = vmatprep.subr.bf16.mxu0 %v9945_v49 }
0x12c7   :  { %v6389_v52 = vpop.f32.mrb[28].mxu0 }
0x12c8   :  { %v6391_v56 = vpop.f32.mrb[29].mxu0 }
0x12c9   :  { %v6396_v57 = vcombine.low %v6389_v52, %v6391_v56  ;;  %v9948_v52 = vld [vmem:[#allocation20 + $0x314] ss:$8 sps:$4 sm:$0xff]   ;;  %v9946_v56 = vld [vmem:[#allocation20 + $0x310] ss:$8 sps:$4 sm:$0xff]  }
0x12cb   :  { %v6403_v63 = vrot.slane %v6396_v57, %v12615_v61  ;;  %v9951_v57 = vld [vmem:[#allocation20 + $0x324] ss:$8 sps:$4 sm:$0xff]  }
0x12cd   :  { %v6404_v1 = vcombine.high %v6403_v63, %v6403_v63  ;;  %v6411_v8 = vrot.slane %v6403_v63, %v12615_v61  ;;  %v9949_v63 = vld [vmem:[#allocation20 + $0x320] ss:$8 sps:$4 sm:$0xff]  }
0x12cf   :  { %v6418_v9 = vrot.slane %v6404_v1, %v12615_v61  ;;  %v6422_v12 = vrot.slane %v6411_v8, %v12616_v5  ;;  %v6426_v22 = vrot.slane %v6411_v8, %v12617_v40  ;;  %v9954_v1 = vld [vmem:[#allocation20 + $0x334] ss:$8 sps:$4 sm:$0xff]   ;;  %v9952_v8 = vld [vmem:[#allocation20 + $0x330] ss:$8 sps:$4 sm:$0xff]  }
0x12d1   :  { %v6430_v23 = vrot.slane %v6418_v9, %v12616_v5  ;;  %v6434_v27 = vrot.slane %v6418_v9, %v12617_v40  ;;  %v12257_v31 = vsub.f32 %v12189_v26, %v6422_v12  ;;  %v12260_v34 = vsub.f32 %v12194_v10, %v6426_v22  ;;  %v9957_v9 = vld [vmem:[#allocation20 + $0x344] ss:$8 sps:$4 sm:$0xff]  }
0x12d2   :  { %v12263_v39 = vsub.f32 %v12191_v36, %v6422_v12  ;;  %v12266_v42 = vsub.f32 %v12196_v13, %v6426_v22  ;;  %v9955_v12 = vld [vmem:[#allocation20 + $0x340] ss:$8 sps:$4 sm:$0xff]   ;;  %v9960_v22 = vld [vmem:[#allocation20 + $0x354] ss:$8 sps:$4 sm:$0xff]  }
0x12d3   :  { %v12269_v47 = vsub.f32 %v12204_v41, %v6430_v23  ;;  %v12272_v48 = vsub.f32 %v12208_v0, %v6434_v27  ;;  %v12275_v4 = vsub.f32 %v12206_v43, %v6430_v23  ;;  %v12278_v62 = vsub.f32 %v12210_v28, %v6434_v27  ;;  %v9958_v23 = vld [vmem:[#allocation20 + $0x350] ss:$8 sps:$4 sm:$0xff]   ;;  %v9963_v27 = vld [vmem:[#allocation20 + $0x364] ss:$8 sps:$4 sm:$0xff]  }
0x12d4   :  { %v6447_v26 = vmul.f32 %v12257_v31, %v12257_v31  ;;  %v6448_v36 = vmul.f32 %v12260_v34, %v12260_v34  ;;  %v6449_v10 = vmul.f32 %v12263_v39, %v12263_v39  ;;  %v6450_v13 = vmul.f32 %v12266_v42, %v12266_v42 }
0x12d5   :  { %v6451_v50 = vmul.f32 %v12269_v47, %v12269_v47  ;;  %v6452_v18 = vmul.f32 %v12272_v48, %v12272_v48  ;;  %v6453_v41 = vmul.f32 %v12275_v4, %v12275_v4  ;;  %v6454_v43 = vmul.f32 %v12278_v62, %v12278_v62 }
0x12d6   :  { %v6455_v0 = vadd.f32 %v6449_v10, %v6447_v26  ;;  %v6462_v28 = vadd.f32 %v6450_v13, %v6448_v36  ;;  %v9961_v26 = vld [vmem:[#allocation20 + $0x360] ss:$8 sps:$4 sm:$0xff]   ;;  %v9966_v36 = vld [vmem:[#allocation20 + $0x374] ss:$8 sps:$4 sm:$0xff]   ;;  %v9964_v10 = vld [vmem:[#allocation20 + $0x370] ss:$8 sps:$4 sm:$0xff]  }
0x12d7   :  { %v6476_v37 = vadd.f32 %v6454_v43, %v6452_v18  ;;  %v6469_v2 = vadd.f32 %v6453_v41, %v6451_v50  ;;  %v9969_v13 = vld [vmem:[#allocation20 + $0x384] ss:$8 sps:$4 sm:$0xff]   ;;  %v9967_v50 = vld [vmem:[#allocation20 + $0x380] ss:$8 sps:$4 sm:$0xff]   ;;  %v9972_v18 = vld [vmem:[#allocation20 + $0x394] ss:$8 sps:$4 sm:$0xff]  }
0x12d8   :  { %v6463_v3 = vrot.slane %v6462_v28, 4  ;;  %v6456_v17 = vrot.slane %v6455_v0, 4  ;;  %v9970_v41 = vld [vmem:[#allocation20 + $0x390] ss:$8 sps:$4 sm:$0xff]   ;;  %v9975_v43 = vld [vmem:[#allocation20 + $0x3a4] ss:$8 sps:$4 sm:$0xff]  }
0x12d9   :  { %v6477_v53 = vrot.slane %v6476_v37, 4  ;;  %v6470_v7 = vrot.slane %v6469_v2, 4 }
0x12da   :  { %v6464_v58 = vadd.f32 %v6463_v3, %v6462_v28  ;;  %v6457_v6 = vadd.f32 %v6456_v17, %v6455_v0  ;;  %v9973_v0 = vld [vmem:[#allocation20 + $0x3a0] ss:$8 sps:$4 sm:$0xff]   ;;  %v9976_v28 = vld [vmem:[#allocation20 + $0x3b0] ss:$8 sps:$4 sm:$0xff]   ;;  %v9984_v17 = vld [vmem:[#allocation20 + $0x3d4] ss:$8 sps:$4 sm:$0xff]  }
0x12db   :  { %v6478_v30 = vadd.f32 %v6477_v53, %v6476_v37  ;;  %v6471_v60 = vadd.f32 %v6470_v7, %v6469_v2  ;;  %v9978_v37 = vld [vmem:[#allocation20 + $0x3b4] ss:$8 sps:$4 sm:$0xff]   ;;  %v9981_v2 = vld [vmem:[#allocation20 + $0x3c4] ss:$8 sps:$4 sm:$0xff]   ;;  %v9979_v3 = vld [vmem:[#allocation20 + $0x3c0] ss:$8 sps:$4 sm:$0xff]  }
0x12dc   :  { %v6465_v59 = vrot.slane %v6464_v58, 2  ;;  %v6458_v15 = vrot.slane %v6457_v6, 2  ;;  %v9982_v53 = vld [vmem:[#allocation20 + $0x3d0] ss:$8 sps:$4 sm:$0xff]   ;;  %v9987_v7 = vld [vmem:[#allocation20 + $0x3e4] ss:$8 sps:$4 sm:$0xff]  }
0x12dd   :  { %v6479_v20 = vrot.slane %v6478_v30, 2  ;;  %v6472_v44 = vrot.slane %v6471_v60, 2 }
0x12de   :  { %v6466_v16 = vadd.f32 %v6465_v59, %v6464_v58  ;;  %v6459_v24 = vadd.f32 %v6458_v15, %v6457_v6  ;;  %v9985_v58 = vld [vmem:[#allocation20 + $0x3e0] ss:$8 sps:$4 sm:$0xff]   ;;  %v9990_v6 = vld [vmem:[#allocation20 + $0x3f4] ss:$8 sps:$4 sm:$0xff]  }
0x12df   :  { %v6480_v14 = vadd.f32 %v6479_v20, %v6478_v30  ;;  %v6473_v51 = vadd.f32 %v6472_v44, %v6471_v60  ;;  %v9988_v30 = vld [vmem:[#allocation20 + $0x3f0] ss:$8 sps:$4 sm:$0xff]   ;;  %v9993_v60 = vld [vmem:[#allocation20 + $0x404] ss:$8 sps:$4 sm:$0xff]  }
0x12e0   :  { %v6467_v11 = vrot.slane %v6466_v16, 1  ;;  %v6460_v29 = vrot.slane %v6459_v24, 1 }
0x12e1   :  { %v6481_v19 = vrot.slane %v6480_v14, 1  ;;  %v6474_v32 = vrot.slane %v6473_v51, 1 }
0x12e2   :  { %v6468_v21 = vadd.f32 %v6467_v11, %v6466_v16  ;;  %v6461_v35 = vadd.f32 %v6460_v29, %v6459_v24 }
0x12e3   :  { %v6482_v25 = vadd.f32 %v6481_v19, %v6480_v14  ;;  %v6475_v38 = vadd.f32 %v6474_v32, %v6473_v51 }
0x12e5   :  { %v6488_v46 = vsel %vm243_vm1, %v6482_v25, %v6468_v21  ;;  %v6487_v49 = vsel %vm243_vm1, %v6475_v38, %v6461_v35  ;;  %v12678_v38 = vld [vmem:[#allocation44_spill] sm:$0xff] }
0x12e6   :  { %6555 = vmatprep.mubr.f32.mxu0 %v6488_v46  ;;  %v6630_v46 = vrot.slane %v12075_v33, %v12678_v38 }
0x12e7   :  { %6556 = vmatmul.mubr.f32.vlgmr.msra.gmra.mrb[30].mxu0 %v6487_v49 }
0x12e8   :  { %7365 = vmatpush1.bf16.msra.mxu0 %v9943_v45  ;;  %v6626_v45 = vrot.slane %v12073_v54, %v12678_v38  ;;  %v12317_v54 = vld [vmem:[#allocation17 + $0x18] sm:$0x3f] }
0x12e9   :  { %7366 = vmatprep.subr.bf16.mxu0 %v9948_v52  ;;  %v12311_v52 = vld [vmem:[#allocation17 + $0x10] sm:$0x3f] }
0x12ec   :  { %7367 = vmatpush1.bf16.msra.mxu0 %v9946_v56  ;;  %v12679_v56 = vld [vmem:[#allocation46_spill] sm:$0xff] }
0x12ed   :  { %7368 = vmatprep.subr.bf16.mxu0 %v9951_v57  ;;  %v6642_v57 = vrot.slane %v12311_v52, %v12679_v56  ;;  %v6646_v33 = vrot.slane %v12317_v54, %v12679_v56 }
0x12f0   :  { %7369 = vmatpush1.bf16.msra.mxu0 %v9949_v63 }
0x12f1   :  { %7370 = vmatprep.subr.bf16.mxu0 %v9954_v1 }
0x12f4   :  { %7371 = vmatpush1.bf16.msra.mxu0 %v9952_v8 }
0x12f5   :  { %7372 = vmatprep.subr.bf16.mxu0 %v9957_v9 }
0x12f8   :  { %7373 = vmatpush1.bf16.msra.mxu0 %v9955_v12 }
0x12f9   :  { %7374 = vmatprep.subr.bf16.mxu0 %v9960_v22 }
0x12fc   :  { %7375 = vmatpush1.bf16.msra.mxu0 %v9958_v23 }
0x12fd   :  { %7376 = vmatprep.subr.bf16.mxu0 %v9963_v27 }
0x1300   :  { %7377 = vmatpush1.bf16.msra.mxu0 %v9961_v26 }
0x1301   :  { %7378 = vmatprep.subr.bf16.mxu0 %v9966_v36 }
0x1304   :  { %7379 = vmatpush1.bf16.msra.mxu0 %v9964_v10 }
0x1305   :  { %7380 = vmatprep.subr.bf16.mxu0 %v9969_v13 }
0x1308   :  { %7381 = vmatpush1.bf16.msra.mxu0 %v9967_v50 }
0x1309   :  { %7382 = vmatprep.subr.bf16.mxu0 %v9972_v18 }
0x130c   :  { %7383 = vmatpush1.bf16.msra.mxu0 %v9970_v41 }
0x130d   :  { %7384 = vmatprep.subr.bf16.mxu0 %v9975_v43 }
0x1310   :  { %7385 = vmatpush1.bf16.msra.mxu0 %v9973_v0 }
0x1311   :  { %7386 = vmatprep.subr.bf16.mxu0 %v9978_v37 }
0x1314   :  { %7387 = vmatpush1.bf16.msra.mxu0 %v9976_v28 }
0x1315   :  { %7388 = vmatprep.subr.bf16.mxu0 %v9981_v2 }
0x1318   :  { %7389 = vmatpush1.bf16.msra.mxu0 %v9979_v3 }
0x1319   :  { %7390 = vmatprep.subr.bf16.mxu0 %v9984_v17 }
0x131c   :  { %7391 = vmatpush1.bf16.msra.mxu0 %v9982_v53 }
0x131d   :  { %7392 = vmatprep.subr.bf16.mxu0 %v9987_v7 }
0x1320   :  { %7393 = vmatpush1.bf16.msra.mxu0 %v9985_v58 }
0x1321   :  { %7394 = vmatprep.subr.bf16.mxu0 %v9990_v6 }
0x1324   :  { %7395 = vmatpush1.bf16.msra.mxu0 %v9988_v30 }
0x1325   :  { %7417 = vmatprep.subr.bf16.mxu0 %v9993_v60 }
0x13ba   :  { %v6557_v59 = vpop.f32.mrb[30].mxu0 }
0x13bb   :  { %v6559_v15 = vpop.f32.mrb[31].mxu0 }
0x13bc   :  { %v6564_v20 = vcombine.low %v6557_v59, %v6559_v15 }
0x13be   :  { %v6571_v44 = vrot.slane %v6564_v20, %v12615_v61 }
0x13c0   :  { %v6572_v16 = vcombine.high %v6571_v44, %v6571_v44  ;;  %v6579_v24 = vrot.slane %v6571_v44, %v12615_v61 }
0x13c2   :  { %v6586_v14 = vrot.slane %v6572_v16, %v12615_v61  ;;  %v6590_v51 = vrot.slane %v6579_v24, %v12616_v5  ;;  %v6594_v11 = vrot.slane %v6579_v24, %v12617_v40 }
0x13c4   :  { %v6598_v29 = vrot.slane %v6586_v14, %v12616_v5  ;;  %v6602_v19 = vrot.slane %v6586_v14, %v12617_v40  ;;  %v6607_v32 = vadd.f32 1e-05, %v6590_v51  ;;  %v6608_v21 = vadd.f32 1e-05, %v6594_v11 }
0x13c6   :  { %v6609_v25 = vadd.f32 1e-05, %v6598_v29  ;;  %v6610_v35 = vadd.f32 1e-05, %v6602_v19  ;;  %10267 = vrsqrt.f32 %v6607_v32 }
0x13c7   :  { %10269 = vrsqrt.f32 %v6608_v21 }
0x13c8   :  { %10271 = vrsqrt.f32 %v6609_v25 }
0x13c9   :  { %10273 = vrsqrt.f32 %v6610_v35 }
0x13d0   :  { %v10268_v61 = vpop.eup %10267 }
0x13d1   :  { %v10270_v49 = vpop.eup %10269  ;;  %v6615_v5 = vmul.f32 %v10268_v61, %v12257_v31  ;;  %v6617_v40 = vmul.f32 %v10268_v61, %v12263_v39 }
0x13d2   :  { %v10272_v63 = vpop.eup %10271  ;;  %v6616_v1 = vmul.f32 %v10270_v49, %v12260_v34  ;;  %v6618_v8 = vmul.f32 %v10270_v49, %v12266_v42 }
0x13d3   :  { %v10274_v9 = vpop.eup %10273  ;;  %v6621_v31 = vmul.f32 %v10272_v63, %v12275_v4  ;;  %v6631_v12 = vmul.f32 %v6626_v45, %v6615_v5  ;;  %v6633_v39 = vmul.f32 %v6626_v45, %v6617_v40  ;;  %v6619_v22 = vmul.f32 %v10272_v63, %v12269_v47 }
0x13d4   :  { %v6622_v23 = vmul.f32 %v10274_v9, %v12278_v62  ;;  %v6634_v27 = vmul.f32 %v6630_v46, %v6618_v8  ;;  %v6632_v26 = vmul.f32 %v6630_v46, %v6616_v1  ;;  %v6620_v34 = vmul.f32 %v10274_v9, %v12272_v48 }
0x13d5   :  { %v6649_v36 = vadd.f32 %v6642_v57, %v6633_v39  ;;  %v6647_v42 = vadd.f32 %v6642_v57, %v6631_v12  ;;  %v6635_v10 = vmul.f32 %v6626_v45, %v6619_v22  ;;  %v6637_v13 = vmul.f32 %v6626_v45, %v6621_v31 }
0x13d6   :  { %v6648_v50 = vadd.f32 %v6646_v33, %v6632_v26  ;;  %v6650_v18 = vadd.f32 %v6646_v33, %v6634_v27  ;;  %v6636_v41 = vmul.f32 %v6630_v46, %v6620_v34  ;;  %v6638_v43 = vmul.f32 %v6630_v46, %v6622_v23 }
0x13d7   :  { %v8174_v0 = vmul.f32 -1.442695, %v6649_v36  ;;  %v8172_v4 = vmul.f32 -1.442695, %v6647_v42  ;;  %v12325_v28 = vadd.f32 %v6642_v57, %v6635_v10  ;;  %v12327_v37 = vadd.f32 %v6642_v57, %v6637_v13  ;;  %v9991_v13 = vld [vmem:[#allocation20 + $0x400] ss:$8 sps:$4 sm:$0xff]  }
0x13d8   :  { %v8173_v47 = vmul.f32 -1.442695, %v6648_v50  ;;  %v8175_v62 = vmul.f32 -1.442695, %v6650_v18  ;;  %v6652_v2 = vadd.f32 %v6646_v33, %v6636_v41  ;;  %v6654_v3 = vadd.f32 %v6646_v33, %v6638_v43 }
0x13d9   :  { %10275 = vpow2.f32 %v8174_v0  ;;  %v8176_v53 = vmul.f32 -1.442695, %v12325_v28  ;;  %v8178_v7 = vmul.f32 -1.442695, %v12327_v37  ;;  %v9996_v0 = vld [vmem:[#allocation20 + $0x414] ss:$8 sps:$4 sm:$0xff]  }
0x13da   :  { %10277 = vpow2.f32 %v8173_v47  ;;  %v8177_v48 = vmul.f32 -1.442695, %v6652_v2  ;;  %v8179_v17 = vmul.f32 -1.442695, %v6654_v3 }
0x13db   :  { %10279 = vpow2.f32 %v8175_v62 }
0x13dc   :  { %10281 = vpow2.f32 %v8172_v4 }
0x13dd   :  { %10283 = vpow2.f32 %v8177_v48 }
0x13de   :  { %10285 = vpow2.f32 %v8179_v17 }
0x13df   :  { %10287 = vpow2.f32 %v8176_v53 }
0x13e0   :  { %10289 = vpow2.f32 %v8178_v7 }
0x13e3   :  { %v10276_v58 = vpop.eup %10275 }
0x13e4   :  { %v10278_v6 = vpop.eup %10277  ;;  %v6681_v30 = vadd.f32 1.0, %v10276_v58  ;;  %v9994_v58 = vld [vmem:[#allocation20 + $0x410] ss:$8 sps:$4 sm:$0xff]  }
0x13e5   :  { %v10280_v60 = vpop.eup %10279  ;;  %v6680_v59 = vadd.f32 1.0, %v10278_v6 }
0x13e6   :  { %v10282_v15 = vpop.eup %10281  ;;  %10291 = vrcp.f32 %v6681_v30  ;;  %v6682_v20 = vadd.f32 1.0, %v10280_v60  ;;  %v9999_v60 = vld [vmem:[#allocation20 + $0x424] ss:$8 sps:$4 sm:$0xff]  }
0x13e7   :  { %v10284_v44 = vpop.eup %10283  ;;  %10293 = vrcp.f32 %v6680_v59  ;;  %v6679_v16 = vadd.f32 1.0, %v10282_v15 }
0x13e8   :  { %v10286_v24 = vpop.eup %10285  ;;  %10295 = vrcp.f32 %v6682_v20  ;;  %v6684_v14 = vadd.f32 1.0, %v10284_v44 }
0x13e9   :  { %v10288_v51 = vpop.eup %10287  ;;  %10297 = vrcp.f32 %v6679_v16  ;;  %v6686_v11 = vadd.f32 1.0, %v10286_v24  ;;  %v9997_v24 = vld [vmem:[#allocation20 + $0x420] ss:$8 sps:$4 sm:$0xff]  }
0x13ea   :  { %v10290_v29 = vpop.eup %10289  ;;  %10299 = vrcp.f32 %v6684_v14  ;;  %v6683_v19 = vadd.f32 1.0, %v10288_v51  ;;  %v10002_v51 = vld [vmem:[#allocation20 + $0x434] ss:$8 sps:$4 sm:$0xff]  }
0x13eb   :  { %10301 = vrcp.f32 %v6686_v11  ;;  %v6685_v32 = vadd.f32 1.0, %v10290_v29  ;;  %v10000_v29 = vld [vmem:[#allocation20 + $0x430] ss:$8 sps:$4 sm:$0xff]  }
0x13ec   :  { %10303 = vrcp.f32 %v6683_v19  ;;  %v10005_v19 = vld [vmem:[#allocation20 + $0x444] ss:$8 sps:$4 sm:$0xff]  }
0x13ed   :  { %10305 = vrcp.f32 %v6685_v32  ;;  %v10003_v32 = vld [vmem:[#allocation20 + $0x440] ss:$8 sps:$4 sm:$0xff]  }
0x13f0   :  { %v10292_v21 = vpop.eup %10291 }
0x13f1   :  { %v10294_v25 = vpop.eup %10293  ;;  %v12331_v35 = vmul.f32 %v10292_v21, %v6649_v36  ;;  %v10008_v21 = vld [vmem:[#allocation20 + $0x454] ss:$8 sps:$4 sm:$0xff]  }
0x13f2   :  { %v10296_v38 = vpop.eup %10295  ;;  %v12333_v45 = vmul.f32 %v10294_v25, %v6648_v50  ;;  %v10006_v25 = vld [vmem:[#allocation20 + $0x450] ss:$8 sps:$4 sm:$0xff]  }
0x13f3   :  { %v10298_v61 = vpop.eup %10297  ;;  %v6706_v46 = vmul.f32 %v10296_v38, %v6650_v18  ;;  %v6818_v56 = vrot.slane %v12331_v35, 7  ;;  %v6841_v9 = vrot.slane %v12331_v35, 1  ;;  %v10011_v38 = vld [vmem:[#allocation20 + $0x464] ss:$8 sps:$4 sm:$0xff]  }
0x13f4   :  { %v10300_v49 = vpop.eup %10299  ;;  %v6817_v5 = vrot.slane %v12333_v45, 7  ;;  %v12336_v40 = vmul.f32 %v10298_v61, %v6647_v42  ;;  %v6843_v57 = vrot.slane %v12333_v45, 1  ;;  %v10009_v61 = vld [vmem:[#allocation20 + $0x460] ss:$8 sps:$4 sm:$0xff]  }
0x13f5   :  { %v10302_v63 = vpop.eup %10301  ;;  %v6820_v1 = vrot.slane %v6706_v46, 7  ;;  %v12340_v8 = vmul.f32 %v10300_v49, %v6652_v2  ;;  %v6844_v33 = vrot.slane %v6706_v46, 1  ;;  %v6867_v11 = vpack.c.bf16 %v6706_v46, %v12333_v45  ;;  %v10014_v45 = vld [vmem:[#allocation20 + $0x474] ss:$8 sps:$4 sm:$0xff]   ;;  %v10017_v46 = vld [vmem:[#allocation20 + $0x484] ss:$8 sps:$4 sm:$0xff]  }
0x13f6   :  { %v10304_v31 = vpop.eup %10303  ;;  %v6816_v12 = vrot.slane %v12336_v40, 7  ;;  %v12344_v39 = vmul.f32 %v10302_v63, %v6654_v3  ;;  %v6866_v22 = vpack.c.bf16 %v12331_v35, %v12336_v40  ;;  %v6840_v23 = vrot.slane %v12336_v40, 1  ;;  %v10015_v49 = vld [vmem:[#allocation20 + $0x480] ss:$8 sps:$4 sm:$0xff]   ;;  %v10048_v40 = vld [vmem:[#allocation20 + $0x530] ss:$8 sps:$4 sm:$0xff]  }
0x13f7   :  { %v10306_v27 = vpop.eup %10305  ;;  %v6821_v26 = vsel %vm582_vm2, %v6817_v5, %v6820_v1  ;;  %v6823_v34 = vrot.slane %v12340_v8, 7  ;;  %v12352_v36 = vmul.f32 %v10304_v31, %v12325_v28  ;;  %v6845_v42 = vsel %vm595_vm4, %v6843_v57, %v6844_v33  ;;  %v10023_v57 = vld [vmem:[#allocation20 + $0x4a4] ss:$8 sps:$4 sm:$0xff]   ;;  %v10021_v63 = vld [vmem:[#allocation20 + $0x4a0] ss:$8 sps:$4 sm:$0xff]  }
0x13f8   :  { %v8278_v10 = vpack.c.bf16 %v6821_v26, %v6817_v5  ;;  %v6819_v50 = vsel %vm582_vm2, %v6816_v12, %v6818_v56  ;;  %v6826_v18 = vrot.slane %v12344_v39, 7  ;;  %v12358_v41 = vmul.f32 %v10306_v27, %v12327_v37  ;;  %v10020_v5 = vld [vmem:[#allocation20 + $0x494] ss:$8 sps:$4 sm:$0xff]   ;;  %v10018_v56 = vld [vmem:[#allocation20 + $0x490] ss:$8 sps:$4 sm:$0xff]  }
0x13f9   :  { %v8282_v43 = vpack.c.bf16 %v6819_v50, %v6816_v12  ;;  %v6822_v4 = vrot.slane %v12352_v36, 7  ;;  %v6873_v47 = vpack.c.bf16 %v12344_v39, %v12340_v8  ;;  %v12363_v28 = vpack.c.bf16 %v6844_v33, %v6845_v42  ;;  %v10026_v1 = vld [vmem:[#allocation20 + $0x4b4] ss:$8 sps:$4 sm:$0xff]   ;;  %v10024_v33 = vld [vmem:[#allocation20 + $0x4b0] ss:$8 sps:$4 sm:$0xff]  }
0x13fa   :  { %8279 = vmatprep.mubr.msk.bf16.mxu0 %vm11000_vm6, %v8278_v10  ;;  %v6827_v62 = vsel %vm582_vm2, %v6823_v34, %v6826_v18  ;;  %v6824_v2 = vrot.slane %v12358_v41, 7  ;;  %v6872_v37 = vpack.c.bf16 %v12358_v41, %v12352_v36  ;;  %v6842_v3 = vsel %vm595_vm4, %v6840_v23, %v6841_v9  ;;  %v10027_v31 = vld [vmem:[#allocation20 + $0x4c0] ss:$8 sps:$4 sm:$0xff]   ;;  %v10032_v12 = vld [vmem:[#allocation20 + $0x4d4] ss:$8 sps:$4 sm:$0xff]  }
0x13fb   :  { %8283 = vmatmul.mubr.msk.bf16.vlgmr.msra.gmra.mrb[32].mxu0 %vm11000_vm6, %v8282_v43  ;;  %v8286_v48 = vpack.c.bf16 %v6827_v62, %v6823_v34  ;;  %v12374_v17 = vpack.c.bf16 %v6841_v9, %v6842_v3  ;;  %v6849_v53 = vrot.slane %v12340_v8, 1  ;;  %v6850_v7 = vrot.slane %v12344_v39, 1  ;;  %v10029_v9 = vld [vmem:[#allocation20 + $0x4c4] ss:$8 sps:$4 sm:$0xff]   ;;  %v10030_v23 = vld [vmem:[#allocation20 + $0x4d0] ss:$8 sps:$4 sm:$0xff]  }
0x13fc   :  { %7418 = vmatpush1.bf16.msra.mxu0 %v9991_v13  ;;  %v6846_v6 = vrot.slane %v12352_v36, 1  ;;  %v6847_v30 = vrot.slane %v12358_v41, 1  ;;  %v6825_v15 = vsel %vm582_vm2, %v6822_v4, %v6824_v2  ;;  %v10035_v27 = vld [vmem:[#allocation20 + $0x4e4] ss:$8 sps:$4 sm:$0xff]   ;;  %v10033_v26 = vld [vmem:[#allocation20 + $0x4e0] ss:$8 sps:$4 sm:$0xff]  }
0x13fd   :  { %8287 = vmatprep.mubr.msk.bf16.mxu0 %vm11000_vm6, %v8286_v48  ;;  %7419 = vmatprep.subr.bf16.mxu0 %v9996_v0  ;;  %v6851_v59 = vsel %vm595_vm4, %v6849_v53, %v6850_v7  ;;  %v8290_v14 = vpack.c.bf16 %v6825_v15, %v6822_v4  ;;  %v10038_v34 = vld [vmem:[#allocation20 + $0x4f4] ss:$8 sps:$4 sm:$0xff]   ;;  %v10036_v42 = vld [vmem:[#allocation20 + $0x4f0] ss:$8 sps:$4 sm:$0xff]   ;;  %v10041_v10 = vld [vmem:[#allocation20 + $0x504] ss:$8 sps:$4 sm:$0xff]  }
0x13fe   :  { %v12384_v20 = vpack.c.bf16 %v6850_v7, %v6851_v59  ;;  %v6848_v44 = vsel %vm595_vm4, %v6846_v6, %v6847_v30  ;;  %v10039_v13 = vld [vmem:[#allocation20 + $0x500] ss:$8 sps:$4 sm:$0xff]   ;;  %v10044_v50 = vld [vmem:[#allocation20 + $0x514] ss:$8 sps:$4 sm:$0xff]   ;;  %v10042_v18 = vld [vmem:[#allocation20 + $0x510] ss:$8 sps:$4 sm:$0xff]  }
0x13ff   :  { %v12387_v16 = vpack.c.bf16 %v6847_v30, %v6848_v44  ;;  %v10047_v43 = vld [vmem:[#allocation20 + $0x524] ss:$8 sps:$4 sm:$0xff]   ;;  %v10045_v0 = vld [vmem:[#allocation20 + $0x520] ss:$8 sps:$4 sm:$0xff]   ;;  %v10050_v4 = vld [vmem:[#allocation20 + $0x534] ss:$8 sps:$4 sm:$0xff]  }
0x1400   :  { %7420 = vmatpush1.bf16.msra.mxu0 %v9994_v58  ;;  %v10053_v8 = vld [vmem:[#allocation20 + $0x544] ss:$8 sps:$4 sm:$0xff]   ;;  %v10051_v39 = vld [vmem:[#allocation20 + $0x540] ss:$8 sps:$4 sm:$0xff]   ;;  %v10062_v36 = vld [vmem:[#allocation20 + $0x574] ss:$8 sps:$4 sm:$0xff]  }
0x1401   :  { %7421 = vmatprep.subr.bf16.mxu0 %v9999_v60  ;;  %v10059_v62 = vld [vmem:[#allocation20 + $0x564] ss:$8 sps:$4 sm:$0xff]   ;;  %v10057_v2 = vld [vmem:[#allocation20 + $0x560] ss:$8 sps:$4 sm:$0xff]   ;;  %v10060_v41 = vld [vmem:[#allocation20 + $0x570] ss:$8 sps:$4 sm:$0xff]  }
0x1402   :  { %v10068_v3 = vld [vmem:[#allocation20 + $0x594] ss:$8 sps:$4 sm:$0xff]   ;;  %v10066_v48 = vld [vmem:[#allocation20 + $0x590] ss:$8 sps:$4 sm:$0xff]   ;;  %v10071_v53 = vld [vmem:[#allocation20 + $0x5a4] ss:$8 sps:$4 sm:$0xff]  }
0x1403   :  { %8291 = vmatmul.mubr.msk.bf16.gmra.mrb[36].mxu0 %vm11000_vm6, %v8290_v14  ;;  %v10069_v7 = vld [vmem:[#allocation20 + $0x5a0] ss:$8 sps:$4 sm:$0xff]   ;;  %v10074_v58 = vld [vmem:[#allocation20 + $0x5b4] ss:$8 sps:$4 sm:$0xff]   ;;  %v10072_v6 = vld [vmem:[#allocation20 + $0x5b0] ss:$8 sps:$4 sm:$0xff]  }
0x1404   :  { %7422 = vmatpush1.bf16.msra.mxu0 %v9997_v24  ;;  %7449 = vmatprep.mubr.bf16.mxu0 %v6867_v11  ;;  %v10077_v30 = vld [vmem:[#allocation20 + $0x5c4] ss:$8 sps:$4 sm:$0xff]   ;;  %v10075_v60 = vld [vmem:[#allocation20 + $0x5c0] ss:$8 sps:$4 sm:$0xff]   ;;  %v10080_v59 = vld [vmem:[#allocation20 + $0x5d4] ss:$8 sps:$4 sm:$0xff]  }
0x1405   :  { %7423 = vmatprep.subr.bf16.mxu0 %v10002_v51  ;;  %v10078_v15 = vld [vmem:[#allocation20 + $0x5d0] ss:$8 sps:$4 sm:$0xff]   ;;  %v10083_v44 = vld [vmem:[#allocation20 + $0x5e4] ss:$8 sps:$4 sm:$0xff]   ;;  %v10081_v24 = vld [vmem:[#allocation20 + $0x5e0] ss:$8 sps:$4 sm:$0xff]  }
0x1406   :  { %v10086_v14 = vld [vmem:[#allocation20 + $0x5f4] ss:$8 sps:$4 sm:$0xff]   ;;  %v10084_v51 = vld [vmem:[#allocation20 + $0x5f0] ss:$8 sps:$4 sm:$0xff]   ;;  %v12681_v11 = vld [vmem:[#allocation32_spill] sm:$0xff] }
0x1408   :  { %7424 = vmatpush1.bf16.msra.mxu0 %v10000_v29  ;;  %v6879_v29 = vrot.slane %v12311_v52, %v12681_v11  ;;  %v12685_v52 = vld [vmem:[#allocation34_spill] sm:$0xff] }
0x1409   :  { %7425 = vmatprep.subr.bf16.mxu0 %v10005_v19  ;;  %v6883_v19 = vrot.slane %v12317_v54, %v12681_v11 }
0x140c   :  { %7426 = vmatpush1.bf16.msra.mxu0 %v10003_v32 }
0x140d   :  { %7427 = vmatprep.subr.bf16.mxu0 %v10008_v21 }
0x1410   :  { %7428 = vmatpush1.bf16.msra.mxu0 %v10006_v25 }
0x1411   :  { %7429 = vmatprep.subr.bf16.mxu0 %v10011_v38 }
0x1414   :  { %7430 = vmatpush1.bf16.msra.mxu0 %v10009_v61 }
0x1415   :  { %7431 = vmatprep.subr.bf16.mxu0 %v10014_v45 }
0x1418   :  { %7432 = vmatpush1.bf16.msra.mxu0 %v10012_v55 }
0x1419   :  { %7433 = vmatprep.subr.bf16.mxu0 %v10017_v46 }
0x141c   :  { %7434 = vmatpush1.bf16.msra.mxu0 %v10015_v49 }
0x141d   :  { %7435 = vmatprep.subr.bf16.mxu0 %v10020_v5 }
0x1420   :  { %7436 = vmatpush1.bf16.msra.mxu0 %v10018_v56 }
0x1421   :  { %7437 = vmatprep.subr.bf16.mxu0 %v10023_v57 }
0x1424   :  { %7438 = vmatpush1.bf16.msra.mxu0 %v10021_v63 }
0x1425   :  { %7439 = vmatprep.subr.bf16.mxu0 %v10026_v1 }
0x1428   :  { %7440 = vmatpush1.bf16.msra.mxu0 %v10024_v33 }
0x1429   :  { %7441 = vmatprep.subr.bf16.mxu0 %v10029_v9 }
0x142c   :  { %7442 = vmatpush1.bf16.msra.mxu0 %v10027_v31  ;;  %v12686_v31 = vld [vmem:[#allocation45_spill] sm:$0xff] }
0x142d   :  { %7443 = vmatprep.subr.bf16.mxu0 %v10032_v12 }
0x1430   :  { %7444 = vmatpush1.bf16.msra.mxu0 %v10030_v23 }
0x1431   :  { %7445 = vmatprep.subr.bf16.mxu0 %v10035_v27 }
0x1434   :  { %7446 = vmatpush1.bf16.msra.mxu0 %v10033_v26  ;;  %v12687_v26 = vld [vmem:[#allocation47_spill] sm:$0xff] }
0x1435   :  { %7447 = vmatprep.subr.bf16.mxu0 %v10038_v34 }
0x1438   :  { %7448 = vmatpush1.bf16.msra.mxu0 %v10036_v42 }
0x1439   :  { %7470 = vmatprep.subr.bf16.mxu0 %v10041_v10  ;;  %v12688_v10 = vld [vmem:[#allocation49_spill] sm:$0xff] }
0x143b   :  { %7450 = vmatmul.mubr.bf16.vlgmr.msra.gmra.mrb[32].mxu0 %v6866_v22  ;;  %v10056_v22 = vld [vmem:[#allocation20 + $0x554] ss:$8 sps:$4 sm:$0xff]  }
0x143c   :  { %7459 = vmatprep.mubr.bf16.mxu0 %v6873_v47  ;;  %7471 = vmatpush1.bf16.msra.mxu0 %v10039_v13  ;;  %v10054_v47 = vld [vmem:[#allocation20 + $0x550] ss:$8 sps:$4 sm:$0xff]  }
0x143d   :  { %7472 = vmatprep.subr.bf16.mxu0 %v10044_v50  ;;  %v12689_v50 = vld [vmem:[#allocation48_spill] sm:$0xff] }
0x1440   :  { %7473 = vmatpush1.bf16.msra.mxu0 %v10042_v18 }
0x1441   :  { %7474 = vmatprep.subr.bf16.mxu0 %v10047_v43 }
0x1443   :  { %7460 = vmatmul.mubr.bf16.gmra.mrb[36].mxu0 %v6872_v37  ;;  %v10065_v37 = vld [vmem:[#allocation20 + $0x584] ss:$8 sps:$4 sm:$0xff]  }
0x1444   :  { %7475 = vmatpush1.bf16.msra.mxu0 %v10045_v0  ;;  %8294 = vmatprep.mubr.msk.bf16.mxu0 %vm11007_vm7, %v12363_v28  ;;  %v10063_v28 = vld [vmem:[#allocation20 + $0x580] ss:$8 sps:$4 sm:$0xff]  }
0x1445   :  { %7476 = vmatprep.subr.bf16.mxu0 %v10050_v4 }
0x1448   :  { %7477 = vmatpush1.bf16.msra.mxu0 %v10048_v40 }
0x1449   :  { %7478 = vmatprep.subr.bf16.mxu0 %v10053_v8 }
0x144c   :  { %7479 = vmatpush1.bf16.msra.mxu0 %v10051_v39 }
0x144d   :  { %7480 = vmatprep.subr.bf16.mxu0 %v10056_v22 }
0x1450   :  { %7481 = vmatpush1.bf16.msra.mxu0 %v10054_v47 }
0x1451   :  { %7482 = vmatprep.subr.bf16.mxu0 %v10059_v62 }
0x1454   :  { %7483 = vmatpush1.bf16.msra.mxu0 %v10057_v2 }
0x1455   :  { %7484 = vmatprep.subr.bf16.mxu0 %v10062_v36 }
0x1458   :  { %7485 = vmatpush1.bf16.msra.mxu0 %v10060_v41 }
0x1459   :  { %7486 = vmatprep.subr.bf16.mxu0 %v10065_v37 }
0x145c   :  { %7487 = vmatpush1.bf16.msra.mxu0 %v10063_v28 }
0x145d   :  { %7488 = vmatprep.subr.bf16.mxu0 %v10068_v3 }
0x1460   :  { %7489 = vmatpush1.bf16.msra.mxu0 %v10066_v48 }
0x1461   :  { %7490 = vmatprep.subr.bf16.mxu0 %v10071_v53 }
0x1464   :  { %7491 = vmatpush1.bf16.msra.mxu0 %v10069_v7 }
0x1465   :  { %7492 = vmatprep.subr.bf16.mxu0 %v10074_v58 }
0x1468   :  { %7493 = vmatpush1.bf16.msra.mxu0 %v10072_v6 }
0x1469   :  { %7494 = vmatprep.subr.bf16.mxu0 %v10077_v30 }
0x146c   :  { %7495 = vmatpush1.bf16.msra.mxu0 %v10075_v60 }
0x146d   :  { %7496 = vmatprep.subr.bf16.mxu0 %v10080_v59 }
0x1470   :  { %7497 = vmatpush1.bf16.msra.mxu0 %v10078_v15 }
0x1471   :  { %7498 = vmatprep.subr.bf16.mxu0 %v10083_v44 }
0x1474   :  { %7499 = vmatpush1.bf16.msra.mxu0 %v10081_v24 }
0x1475   :  { %7500 = vmatprep.subr.bf16.mxu0 %v10086_v14 }
0x1478   :  { %7501 = vmatpush1.bf16.msra.mxu0 %v10084_v51 }
0x147b   :  { %8297 = vmatmul.mubr.msk.bf16.vlgmr.msra.gmra.mrb[32].mxu0 %vm11007_vm7, %v12374_v17  ;;  %v12682_v17 = vld [vmem:[#allocation33_spill] sm:$0xff] }
0x147c   :  { %8300 = vmatprep.mubr.msk.bf16.mxu0 %vm11007_vm7, %v12384_v20  ;;  %v12683_v20 = vld [vmem:[#allocation55_spill] sm:$0xff] }
0x1483   :  { %8303 = vmatmul.mubr.msk.bf16.gmra.mrb[36].mxu0 %vm11007_vm7, %v12387_v16  ;;  %v12684_v16 = vld [vmem:[#allocation35_spill] sm:$0xff] }
0x154e   :  { %v7504_v32 = vpop.f32.mrb[32].mxu0 }
0x154f   :  { %v9152_v21 = vadd.f32 %v7504_v32, %v6879_v29  ;;  %v7506_v25 = vpop.f32.mrb[33].mxu0 }
0x1550   :  { %v9153_v38 = vadd.f32 %v7506_v25, %v6883_v19  ;;  %v7508_v61 = vpop.f32.mrb[34].mxu0 }
0x1551   :  { %v7523_v45 = vadd.f32 %v9152_v21, %v12682_v17  ;;  %v9154_v55 = vadd.f32 %v7508_v61, %v6879_v29  ;;  %v7510_v46 = vpop.f32.mrb[35].mxu0 }
0x1552   :  { %v7524_v49 = vadd.f32 %v9153_v38, %v12683_v20  ;;  %v9155_v5 = vadd.f32 %v7510_v46, %v6883_v19 }
0x1553   :  { %7531 = vst [vmem:[#allocation22] sm:$0xff] %v7523_v45  ;;  %v7525_v56 = vadd.f32 %v9154_v55, %v12684_v16 }
0x1554   :  { %7532 = vst [vmem:[#allocation22 + $0x8] sm:$0xff] %v7524_v49  ;;  %v7526_v57 = vadd.f32 %v9155_v5, %v12685_v52 }
0x1555   :  { %7533 = vst [vmem:[#allocation22 + $0x10] sm:$0xff] %v7525_v56 }
0x1556   :  { %7534 = vst [vmem:[#allocation22 + $0x18] sm:$0xff] %v7526_v57  ;;  %v7514_v54 = vpop.f32.mrb[36].mxu0 }
0x1557   :  { %v9156_v63 = vadd.f32 %v7514_v54, %v6879_v29  ;;  %v7516_v1 = vpop.f32.mrb[37].mxu0 }
0x1558   :  { %v9157_v33 = vadd.f32 %v7516_v1, %v6883_v19  ;;  %v7518_v9 = vpop.f32.mrb[38].mxu0 }
0x1559   :  { %v7527_v12 = vadd.f32 %v9156_v63, %v12686_v31  ;;  %v9158_v23 = vadd.f32 %v7518_v9, %v6879_v29  ;;  %v7520_v27 = vpop.f32.mrb[39].mxu0 }
0x155a   :  { %v7528_v34 = vadd.f32 %v9157_v33, %v12687_v26  ;;  %v9159_v42 = vadd.f32 %v7520_v27, %v6883_v19 }
0x155b   :  { %7535 = vst [vmem:[#allocation22 + $0x20] sm:$0xff] %v7527_v12  ;;  %v7529_v13 = vadd.f32 %v9158_v23, %v12688_v10 }
0x155c   :  { %7536 = vst [vmem:[#allocation22 + $0x28] sm:$0xff] %v7528_v34  ;;  %v7530_v18 = vadd.f32 %v9159_v42, %v12689_v50 }
0x155d   :  { %7537 = vst [vmem:[#allocation22 + $0x30] sm:$0xff] %v7529_v13 }
0x155e   :  { %7538 = vst [vmem:[#allocation22 + $0x38] sm:$0xff] %v7530_v18 }
0x155f   :  { %10600 = shalt.err (!%p10597_p2)
}
0x1560   :  { %s10601_s18 = scalar_lea.hbm %s12452_s12, 1024 }
0x1561   :  { %p10602_p3 = scmp.ne.s32.totalorder %s12452_s12, %s10601_s18  ;;  %p10605_p4 = scmp.lt.u32.totalorder %s10601_s18, %s12452_s12 }
0x1563   :  { %p10607_p5 = pnand %p10605_p4, %p10602_p3 }
0x1565   :  { %10610 = shalt.err (!%p10607_p5)
}
0x1566   :  { %7550 = dma.vmem_to_hbm [thread:$0]  %s7545_s15, 1024, %s12452_s12, [#allocation4], %s10631_s1, %s10631_s1, %s10632_s22  }
0x1567   :  { %10625 = dma.done.wait [#allocation4], 1024  }
0x1568   :  { %10626 = vsyncadd [#allocation4], 4294966272 }
0x1569   :  { %7554 = vsyncpa [#allocation3], 1 }
0x156a   :  { %7555 = vsyncpa [#allocation6], 1 }
0x156b   :  { %7556 = vsyncpa [#allocation9], 1 }
0x156c   :  { %7557 = vsyncpa [#allocation12], 1 }
0x156d   :  { %7558 = vsyncpa [#allocation15], 1 }
0x156e   :  { %7559 = vsyncpa [#allocation18], 1 }
0x156f   :  { %7560 = vsyncpa [#allocation21], 1 }
0x1570   :  { %7561 = vsyncpa [#allocation4], 1 }

</bundles_post_ra>
